<compile_context>
chip_gen: v5e
topology: v5e:2x2
jax: 0.10.0
libtpu: 0.0.40
codegen_flags: <defaults>
</compile_context>

<pallas_src>
import jax
import jax.numpy as jnp
from jax import lax
from jax.experimental import pallas as pl
from jax.experimental.pallas import tpu as pltpu

EPS = 1e-5
LANE = 128


def _pick_row_tile(H, W, C, budget_bytes=3 << 20):
    """Largest divisor of H whose (TR*W, 9C) bf16 patch tile fits the budget.
    Capped below H (when H > 1) so the row-tile loop is actually exercised."""
    best = 1
    for tr in range(1, H + 1):
        if H % tr != 0:
            continue
        if tr >= H and H > 1:
            continue
        if tr * W * 9 * C * 2 <= budget_bytes:
            best = tr
    return best


def _make_kernel(H, W, C, TR):
    HP, WP = H + 2, W + 2
    NT = H // TR              # number of row tiles
    TM = TR * W               # matmul rows per tile
    inv_hw = 1.0 / float(H * W)

    def kernel(xp_ref, w1_ref, w2_ref, o_ref, hpad_ref, cbuf_ref):
        # xp_ref  : (1, HP, WP, C) bf16  reflect-pre-padded input block
        # w*_ref  : (9C, C)        bf16  im2col weight slab, rows = (dh, dw, ci)
        # o_ref   : (1, H, W, C)   f32
        # hpad_ref: (HP, WP, C)    bf16  reflect-padded intermediate (scratch)
        # cbuf_ref: (H*W, C)       f32   conv output scratch (reused by both convs)

        def xp_tap(r0, dh, dw):
            return xp_ref[pl.ds(0, 1), pl.ds(r0 + dh, TR),
                          pl.ds(dw, W), :].reshape(TM, C)

        def hp_tap(r0, dh, dw):
            return hpad_ref[pl.ds(r0 + dh, TR), pl.ds(dw, W), :].reshape(TM, C)

        def conv_pass(read_tap, w_ref):
            """Row-tiled 3x3 conv via im2col: writes (H*W, C) f32 into cbuf_ref
            and accumulates IN statistics on the fly. Returns (mean, inv_std)."""
            def body(t, carry):
                s, ss = carry
                r0 = pl.multiple_of(t * TR, TR)
                patches = jnp.concatenate(
                    [read_tap(r0, dh, dw) for dh in range(3) for dw in range(3)],
                    axis=-1)                                       # (TM, 9C) bf16
                acc = jnp.dot(patches, w_ref[...],
                              preferred_element_type=jnp.float32)  # 1 MXU dot
                cbuf_ref[pl.ds(pl.multiple_of(t * TM, TM), TM), :] = acc
                return (s + jnp.sum(acc, axis=0, keepdims=True),
                        ss + jnp.sum(acc * acc, axis=0, keepdims=True))

            zero = jnp.zeros((1, C), jnp.float32)
            s, ss = lax.fori_loop(0, NT, body, (zero, zero))
            mean = s * inv_hw
            # Single-pass (sum, sum-sq) variance, clamped >= 0; conv outputs are
            # O(1) here so cancellation stays well inside the bf16-MXU tolerance.
            var = jnp.maximum(ss * inv_hw - mean * mean, 0.0)
            return mean, lax.rsqrt(var + EPS)

        # ---- conv1 (bias dropped: cancels exactly in affine-free IN) --------
        mean1, inv1 = conv_pass(xp_tap, w1_ref)

        # ---- fused IN + ReLU + bf16 cast + reflect-pad store into hpad ------
        def norm1_body(t, carry):
            m0 = pl.multiple_of(t * TM, TM)
            a = cbuf_ref[pl.ds(m0, TM), :]
            y = jnp.maximum((a - mean1) * inv1, 0.0).astype(jnp.bfloat16)
            y3 = y.reshape(TR, W, C)
            # Build the left/right reflect columns here so the scratch store is
            # a full-width (unmasked) slab.
            slab = jnp.concatenate(
                [y3[:, 1:2, :], y3, y3[:, W - 2:W - 1, :]], axis=1)  # (TR, WP, C)
            r0 = pl.multiple_of(t * TR, TR)
            hpad_ref[pl.ds(r0 + 1, TR), :, :] = slab
            return carry
        lax.fori_loop(0, NT, norm1_body, 0)

        # Top / bottom reflect rows (corners come along for free: padded rows 2
        # and HP-3 already carry their left/right pad columns).
        hpad_ref[pl.ds(0, 1), :, :] = hpad_ref[pl.ds(2, 1), :, :]
        hpad_ref[pl.ds(HP - 1, 1), :, :] = hpad_ref[pl.ds(HP - 3, 1), :, :]
        # TODO(synk): use_dropout=False for this config; nn.Dropout(0.5) not emitted.

        # ---- conv2 + IN ------------------------------------------------------
        mean2, inv2 = conv_pass(hp_tap, w2_ref)

        # ---- fused IN + residual add + output store --------------------------
        def norm2_body(t, carry):
            m0 = pl.multiple_of(t * TM, TM)
            a = cbuf_ref[pl.ds(m0, TM), :]
            y = (a - mean2) * inv2
            r0 = pl.multiple_of(t * TR, TR)
            x_t = xp_ref[pl.ds(0, 1), pl.ds(r0 + 1, TR),
                         pl.ds(1, W), :].reshape(TM, C).astype(jnp.float32)
            o_ref[pl.ds(0, 1), pl.ds(r0, TR), :, :] = (
                (x_t + y).reshape(1, TR, W, C))
            return carry
        lax.fori_loop(0, NT, norm2_body, 0)

    return kernel


def resnet_block_nhwc(xp, w1s, w2s):
    """xp: (N, H+2, W+2, C) reflect-padded NHWC bf16; w*s: (9C, C) bf16 slabs."""
    N, HP, WP, C = xp.shape
    H, W = HP - 2, WP - 2
    TR = _pick_row_tile(H, W, C)
    TM = TR * W
    kernel = _make_kernel(H, W, C, TR)

    # VMEM budget for the tiled kernel (worst case: double-buffered weights).
    est = (2 * HP * WP * C * 2       # input blocks (x2 buffers, bf16)
           + 2 * H * W * C * 4       # output blocks (x2 buffers, f32)
           + 2 * 2 * 9 * C * C * 2   # two bf16 weight slabs (x2 buffers)
           + HP * WP * C * 2         # bf16 reflect-pad scratch
           + H * W * C * 4           # f32 conv-out scratch
           + TM * 9 * C * 2          # bf16 im2col patch tile
           + 6 * TM * C * 4)         # per-tile dot output / normalize temps
    try:
        vmem_cap = pltpu.get_tpu_info().vmem_capacity_bytes   # 64 MiB on v7x
    except Exception:
        vmem_cap = 64 * 1024 * 1024
    vmem_limit = min(int(vmem_cap * 0.9),
                     max(32 * 1024 * 1024, int(est * 1.5)))

    flops = 2 * 2 * 9 * H * W * C * C * N
    bytes_accessed = (xp.size * 2 + N * H * W * C * 4
                      + w1s.size * 2 + w2s.size * 2)
    cost = pl.CostEstimate(flops=flops, transcendentals=2 * N * C,
                           bytes_accessed=bytes_accessed)

    # TODO(synk): for batch-1 inference on v7x (2 TCs), add a second parallel
    # grid axis splitting H and combine IN statistics across the halves.
    def call(buffered_weights):
        if buffered_weights:
            w_spec = pl.BlockSpec((9 * C, C), lambda n: (0, 0),
                                  pipeline_mode=pl.Buffered(1))
        else:
            w_spec = pl.BlockSpec((9 * C, C), lambda n: (0, 0))
        return pl.pallas_call(
            kernel,
            out_shape=jax.ShapeDtypeStruct((N, H, W, C), jnp.float32),
            grid=(N,),
            in_specs=[
                pl.BlockSpec((1, HP, WP, C), lambda n: (n, 0, 0, 0)),
                w_spec,
                w_spec,
            ],
            out_specs=pl.BlockSpec((1, H, W, C), lambda n: (n, 0, 0, 0)),
            scratch_shapes=[pltpu.VMEM((HP, WP, C), jnp.bfloat16),
                            pltpu.VMEM((H * W, C), jnp.float32)],
            compiler_params=pltpu.CompilerParams(
                dimension_semantics=("parallel",),
                vmem_limit_bytes=vmem_limit),
            cost_estimate=cost,
        )(xp, w1s, w2s)

    try:
        # Constant weight index_map => single-buffer them (halves their VMEM).
        return call(buffered_weights=True)
    except Exception:
        return call(buffered_weights=False)


def resnet_block(x_nchw, w1_oikk, b1, w2_oikk, b2):
    """PyTorch conventions: NCHW input, (O, I, kH, kW) weights.

    b1/b2 are accepted for interface parity but intentionally unused: with
    InstanceNorm2d(affine=False) directly after each conv, a per-channel bias
    cancels exactly in (x - mean)."""
    del b1, b2
    N, C, H, W = x_nchw.shape
    Cp = -(-C // LANE) * LANE                       # lane-dense channel padding

    x = jnp.transpose(x_nchw, (0, 2, 3, 1))         # NCHW -> NHWC
    if Cp != C:
        x = jnp.pad(x, ((0, 0), (0, 0), (0, 0), (0, Cp - C)))
    # ReflectionPad2d(1) once in HBM; bf16 halves the per-step input DMA.
    # Zero-padded channels stay exactly zero through conv (zero weights),
    # IN ((0-0)*rsqrt(0+eps)=0) and the residual, and are sliced off at the end.
    xp = jnp.pad(x, ((0, 0), (1, 1), (1, 1), (0, 0)),
                 mode="reflect").astype(jnp.bfloat16)

    def prep_w(w_oikk):
        w = jnp.transpose(w_oikk, (2, 3, 1, 0))     # (kH, kW, I, O)
        if Cp != C:
            w = jnp.pad(w, ((0, 0), (0, 0), (0, Cp - C), (0, Cp - C)))
        return w.reshape(9 * Cp, Cp).astype(jnp.bfloat16)   # rows = (dh, dw, ci)

    y = resnet_block_nhwc(xp, prep_w(w1_oikk), prep_w(w2_oikk))
    y = y[..., :C]
    return jnp.transpose(y, (0, 3, 1, 2))           # NHWC -> NCHW


# ----------------------------- pure-JAX reference -----------------------------
def _ref_conv3x3_reflect(x_nchw, w_oikk, b):
    xp = jnp.pad(x_nchw, ((0, 0), (0, 0), (1, 1), (1, 1)), mode="reflect")
    return jax.lax.conv_general_dilated(
        xp, w_oikk, window_strides=(1, 1), padding="VALID",
        dimension_numbers=("NCHW", "OIHW", "NCHW")) + b[None, :, None, None]


def _ref_instance_norm(x_nchw):
    mean = jnp.mean(x_nchw, axis=(2, 3), keepdims=True)
    var = jnp.mean((x_nchw - mean) ** 2, axis=(2, 3), keepdims=True)
    return (x_nchw - mean) * jax.lax.rsqrt(var + EPS)


def _ref_resnet_block(x, w1, b1, w2, b2):
    h = _ref_conv3x3_reflect(x, w1, b1)
    h = _ref_instance_norm(h)
    h = jnp.maximum(h, 0.0)
    h = _ref_conv3x3_reflect(h, w2, b2)
    h = _ref_instance_norm(h)
    return x + h


if __name__ == "__main__":
    N, C, H, W = 2, 4, 16, 16
    key = jax.random.PRNGKey(0)
    kx, kw1, kb1, kw2, kb2 = jax.random.split(key, 5)

    x = jax.random.normal(kx, (N, C, H, W), dtype=jnp.float32)
    # Shapes from nn.Conv2d(dim, dim, kernel_size=3, bias=True)
    w1 = jax.random.normal(kw1, (C, C, 3, 3), dtype=jnp.float32) * 0.1
    b1 = jax.random.normal(kb1, (C,), dtype=jnp.float32) * 0.1
    w2 = jax.random.normal(kw2, (C, C, 3, 3), dtype=jnp.float32) * 0.1
    b2 = jax.random.normal(kb2, (C,), dtype=jnp.float32) * 0.1

    out = jax.block_until_ready(resnet_block(x, w1, b1, w2, b2))
    ref = jax.block_until_ready(_ref_resnet_block(x, w1, b1, w2, b2))

    assert out.shape == (N, C, H, W) and out.dtype == jnp.float32
    # bf16 MXU operands + bf16 residual read => looser tolerance than pure f32.
    err = float(jnp.max(jnp.abs(out - ref)))
    assert err < 1e-1, err
    print("KERNEL_OK")
</pallas_src>

<mosaic_0001>
module attributes {stable_mosaic.version = 11 : i64} {
  func.func @kernel(%arg0: i32, %arg1: memref<1x18x18x128xbf16, #tpu.memory_space<vmem>>, %arg2: memref<1152x128xbf16, #tpu.memory_space<vmem>>, %arg3: memref<1152x128xbf16, #tpu.memory_space<vmem>>, %arg4: memref<1x16x16x128xf32, #tpu.memory_space<vmem>>, %arg5: memref<18x18x128xbf16, #tpu.memory_space<vmem>>, %arg6: memref<256x128xf32, #tpu.memory_space<vmem>>) attributes {dimension_semantics = [#tpu.dimension_semantics<parallel>], iteration_bounds = array<i64: 2>, scalar_prefetch = 0 : i64, scratch_operands = 2 : i64, tpu.core_type = #tpu.core_type<tc>, window_params = [{transform_indices = @transform_0, window_bounds = array<i64: 1, 18, 18, 128>}, {pipeline_mode = #tpu.pipeline_mode<synchronous>, transform_indices = @transform_1, window_bounds = array<i64: 1152, 128>}, {pipeline_mode = #tpu.pipeline_mode<synchronous>, transform_indices = @transform_2, window_bounds = array<i64: 1152, 128>}, {transform_indices = @transform_3, window_bounds = array<i64: 1, 16, 16, 128>}]} {
    %cst = arith.constant 0.000000e+00 : f32
    %0 = vector.broadcast %cst : f32 to vector<1x128xf32>
    %c0_i32 = arith.constant 0 : i32
    %c2_i32 = arith.constant 2 : i32
    %1 = arith.addi %c0_i32, %c2_i32 : i32
    %c1_i32 = arith.constant 1 : i32
    %2:2 = scf.for %arg7 = %c0_i32 to %1 step %c1_i32 iter_args(%arg8 = %0, %arg9 = %0) -> (vector<1x128xf32>, vector<1x128xf32>)  : i32 {
      %c8_i32 = arith.constant 8 : i32
      %34 = arith.muli %arg7, %c8_i32 : i32
      %35 = tpu.assume_multiple %34, 8 : i32
      %c0_i32_30 = arith.constant 0 : i32
      %36 = arith.addi %35, %c0_i32_30 : i32
      %c0_31 = arith.constant 0 : index
      %37 = arith.index_cast %36 : i32 to index
      %c0_32 = arith.constant 0 : index
      %c0_33 = arith.constant 0 : index
      %38 = vector.load %arg1[%c0_31, %37, %c0_32, %c0_33] : memref<1x18x18x128xbf16, #tpu.memory_space<vmem>>, vector<1x8x16x128xbf16>
      %39 = vector.shape_cast %38 : vector<1x8x16x128xbf16> to vector<128x128xbf16>
      %c0_i32_34 = arith.constant 0 : i32
      %40 = arith.addi %35, %c0_i32_34 : i32
      %c0_35 = arith.constant 0 : index
      %41 = arith.index_cast %40 : i32 to index
      %c1 = arith.constant 1 : index
      %c0_36 = arith.constant 0 : index
      %42 = vector.load %arg1[%c0_35, %41, %c1, %c0_36] : memref<1x18x18x128xbf16, #tpu.memory_space<vmem>>, vector<1x8x16x128xbf16>
      %43 = vector.shape_cast %42 : vector<1x8x16x128xbf16> to vector<128x128xbf16>
      %c0_i32_37 = arith.constant 0 : i32
      %44 = arith.addi %35, %c0_i32_37 : i32
      %c0_38 = arith.constant 0 : index
      %45 = arith.index_cast %44 : i32 to index
      %c2_39 = arith.constant 2 : index
      %c0_40 = arith.constant 0 : index
      %46 = vector.load %arg1[%c0_38, %45, %c2_39, %c0_40] : memref<1x18x18x128xbf16, #tpu.memory_space<vmem>>, vector<1x8x16x128xbf16>
      %47 = vector.shape_cast %46 : vector<1x8x16x128xbf16> to vector<128x128xbf16>
      %c1_i32_41 = arith.constant 1 : i32
      %48 = arith.addi %35, %c1_i32_41 : i32
      %c0_42 = arith.constant 0 : index
      %49 = arith.index_cast %48 : i32 to index
      %c0_43 = arith.constant 0 : index
      %c0_44 = arith.constant 0 : index
      %50 = vector.load %arg1[%c0_42, %49, %c0_43, %c0_44] : memref<1x18x18x128xbf16, #tpu.memory_space<vmem>>, vector<1x8x16x128xbf16>
      %51 = vector.shape_cast %50 : vector<1x8x16x128xbf16> to vector<128x128xbf16>
      %c1_i32_45 = arith.constant 1 : i32
      %52 = arith.addi %35, %c1_i32_45 : i32
      %c0_46 = arith.constant 0 : index
      %53 = arith.index_cast %52 : i32 to index
      %c1_47 = arith.constant 1 : index
      %c0_48 = arith.constant 0 : index
      %54 = vector.load %arg1[%c0_46, %53, %c1_47, %c0_48] : memref<1x18x18x128xbf16, #tpu.memory_space<vmem>>, vector<1x8x16x128xbf16>
      %55 = vector.shape_cast %54 : vector<1x8x16x128xbf16> to vector<128x128xbf16>
      %c1_i32_49 = arith.constant 1 : i32
      %56 = arith.addi %35, %c1_i32_49 : i32
      %c0_50 = arith.constant 0 : index
      %57 = arith.index_cast %56 : i32 to index
      %c2_51 = arith.constant 2 : index
      %c0_52 = arith.constant 0 : index
      %58 = vector.load %arg1[%c0_50, %57, %c2_51, %c0_52] : memref<1x18x18x128xbf16, #tpu.memory_space<vmem>>, vector<1x8x16x128xbf16>
      %59 = vector.shape_cast %58 : vector<1x8x16x128xbf16> to vector<128x128xbf16>
      %c2_i32_53 = arith.constant 2 : i32
      %60 = arith.addi %35, %c2_i32_53 : i32
      %c0_54 = arith.constant 0 : index
      %61 = arith.index_cast %60 : i32 to index
      %c0_55 = arith.constant 0 : index
      %c0_56 = arith.constant 0 : index
      %62 = vector.load %arg1[%c0_54, %61, %c0_55, %c0_56] : memref<1x18x18x128xbf16, #tpu.memory_space<vmem>>, vector<1x8x16x128xbf16>
      %63 = vector.shape_cast %62 : vector<1x8x16x128xbf16> to vector<128x128xbf16>
      %c2_i32_57 = arith.constant 2 : i32
      %64 = arith.addi %35, %c2_i32_57 : i32
      %c0_58 = arith.constant 0 : index
      %65 = arith.index_cast %64 : i32 to index
      %c1_59 = arith.constant 1 : index
      %c0_60 = arith.constant 0 : index
      %66 = vector.load %arg1[%c0_58, %65, %c1_59, %c0_60] : memref<1x18x18x128xbf16, #tpu.memory_space<vmem>>, vector<1x8x16x128xbf16>
      %67 = vector.shape_cast %66 : vector<1x8x16x128xbf16> to vector<128x128xbf16>
      %c2_i32_61 = arith.constant 2 : i32
      %68 = arith.addi %35, %c2_i32_61 : i32
      %c0_62 = arith.constant 0 : index
      %69 = arith.index_cast %68 : i32 to index
      %c2_63 = arith.constant 2 : index
      %c0_64 = arith.constant 0 : index
      %70 = vector.load %arg1[%c0_62, %69, %c2_63, %c0_64] : memref<1x18x18x128xbf16, #tpu.memory_space<vmem>>, vector<1x8x16x128xbf16>
      %71 = vector.shape_cast %70 : vector<1x8x16x128xbf16> to vector<128x128xbf16>
      %72 = tpu.concatenate %39, %43, %47, %51, %55, %59, %63, %67, %71 in 1 : vector<128x128xbf16>, vector<128x128xbf16>, vector<128x128xbf16>, vector<128x128xbf16>, vector<128x128xbf16>, vector<128x128xbf16>, vector<128x128xbf16>, vector<128x128xbf16>, vector<128x128xbf16> -> vector<128x1152xbf16>
      %c0_65 = arith.constant 0 : index
      %c0_66 = arith.constant 0 : index
      %73 = vector.load %arg2[%c0_65, %c0_66] : memref<1152x128xbf16, #tpu.memory_space<vmem>>, vector<1152x128xbf16>
      %cst_67 = arith.constant dense<0.000000e+00> : vector<128x128xf32>
      %74 = tpu.matmul %72, %73, %cst_67 {dimension_numbers = #tpu.dot_dimension_numbers<[1], [0], [0], [1], [0, 0, 1, 1], [], []>} : vector<128x1152xbf16>, vector<1152x128xbf16>, vector<128x128xf32> -> vector<128x128xf32>
      %c128_i32 = arith.constant 128 : i32
      %75 = arith.muli %arg7, %c128_i32 : i32
      %76 = tpu.assume_multiple %75, 128 : i32
      %77 = arith.index_cast %76 : i32 to index
      %c0_68 = arith.constant 0 : index
      %78 = vector.load %arg6[%77, %c0_68] : memref<256x128xf32, #tpu.memory_space<vmem>>, vector<128x128xf32>
      tpu.vector_store %arg6[%77, %c0_68], %74 {strides = array<i32>} : memref<256x128xf32, #tpu.memory_space<vmem>>, vector<128x128xf32>,
      %cst_69 = arith.constant dense<0.000000e+00> : vector<128xf32>
      %79 = vector.multi_reduction <add>, %74, %cst_69 [0] : vector<128x128xf32> to vector<128xf32>
      %80 = vector.shape_cast %79 : vector<128xf32> to vector<1x128xf32>
      %81 = arith.addf %arg8, %80 : vector<1x128xf32>
      %82 = arith.mulf %74, %74 : vector<128x128xf32>
      %cst_70 = arith.constant dense<0.000000e+00> : vector<128xf32>
      %83 = vector.multi_reduction <add>, %82, %cst_70 [0] : vector<128x128xf32> to vector<128xf32>
      %84 = vector.shape_cast %83 : vector<128xf32> to vector<1x128xf32>
      %85 = arith.addf %arg9, %84 : vector<1x128xf32>
      scf.yield %81, %85 : vector<1x128xf32>, vector<1x128xf32>
    }
    %c2_i32_0 = arith.constant 2 : i32
    %cst_1 = arith.constant 3.906250e-03 : f32
    %3 = vector.broadcast %cst_1 : f32 to vector<1x128xf32>
    %4 = arith.mulf %2#0, %3 : vector<1x128xf32>
    %cst_2 = arith.constant 3.906250e-03 : f32
    %5 = vector.broadcast %cst_2 : f32 to vector<1x128xf32>
    %6 = arith.mulf %2#1, %5 : vector<1x128xf32>
    %7 = arith.mulf %4, %4 : vector<1x128xf32>
    %8 = arith.subf %6, %7 : vector<1x128xf32>
    %cst_3 = arith.constant 0.000000e+00 : f32
    %9 = vector.broadcast %cst_3 : f32 to vector<1x128xf32>
    %10 = arith.maximumf %8, %9 : vector<1x128xf32>
    %cst_4 = arith.constant 9.99999974E-6 : f32
    %11 = vector.broadcast %cst_4 : f32 to vector<1x128xf32>
    %12 = arith.addf %10, %11 : vector<1x128xf32>
    %13 = math.rsqrt %12 : vector<1x128xf32>
    %c0_i32_5 = arith.constant 0 : i32
    %c2_i32_6 = arith.constant 2 : i32
    %14 = arith.addi %c0_i32_5, %c2_i32_6 : i32
    %c1_i32_7 = arith.constant 1 : i32
    scf.for %arg7 = %c0_i32_5 to %14 step %c1_i32_7  : i32 {
      %c128_i32 = arith.constant 128 : i32
      %34 = arith.muli %arg7, %c128_i32 : i32
      %35 = tpu.assume_multiple %34, 128 : i32
      %36 = arith.index_cast %35 : i32 to index
      %c0_30 = arith.constant 0 : index
      %37 = vector.load %arg6[%36, %c0_30] : memref<256x128xf32, #tpu.memory_space<vmem>>, vector<128x128xf32>
      %38 = vector.broadcast %4 : vector<1x128xf32> to vector<128x128xf32>
      %39 = arith.subf %37, %38 : vector<128x128xf32>
      %40 = vector.broadcast %13 : vector<1x128xf32> to vector<128x128xf32>
      %41 = arith.mulf %39, %40 : vector<128x128xf32>
      %cst_31 = arith.constant 0.000000e+00 : f32
      %42 = vector.broadcast %cst_31 : f32 to vector<128x128xf32>
      %43 = arith.maximumf %41, %42 : vector<128x128xf32>
      %44 = arith.truncf %43 : vector<128x128xf32> to vector<128x128xbf16>
      %45 = vector.shape_cast %44 : vector<128x128xbf16> to vector<8x16x128xbf16>
      %46 = vector.extract_strided_slice %45 {offsets = [0, 1, 0], sizes = [8, 1, 128], strides = [1, 1, 1]} : vector<8x16x128xbf16> to vector<8x1x128xbf16>
      %47 = vector.extract_strided_slice %45 {offsets = [0, 14, 0], sizes = [8, 1, 128], strides = [1, 1, 1]} : vector<8x16x128xbf16> to vector<8x1x128xbf16>
      %48 = tpu.concatenate %46, %45, %47 in 1 : vector<8x1x128xbf16>, vector<8x16x128xbf16>, vector<8x1x128xbf16> -> vector<8x18x128xbf16>
      %c8_i32 = arith.constant 8 : i32
      %49 = arith.muli %arg7, %c8_i32 : i32
      %50 = tpu.assume_multiple %49, 8 : i32
      %c1_i32_32 = arith.constant 1 : i32
      %51 = arith.addi %50, %c1_i32_32 : i32
      %52 = arith.index_cast %51 : i32 to index
      %c0_33 = arith.constant 0 : index
      %c0_34 = arith.constant 0 : index
      %53 = vector.load %arg5[%52, %c0_33, %c0_34] : memref<18x18x128xbf16, #tpu.memory_space<vmem>>, vector<8x18x128xbf16>
      tpu.vector_store %arg5[%52, %c0_33, %c0_34], %48 {strides = array<i32>} : memref<18x18x128xbf16, #tpu.memory_space<vmem>>, vector<8x18x128xbf16>,
    }
    %c2_i32_8 = arith.constant 2 : i32
    %c2 = arith.constant 2 : index
    %c0 = arith.constant 0 : index
    %c0_9 = arith.constant 0 : index
    %15 = vector.load %arg5[%c2, %c0, %c0_9] : memref<18x18x128xbf16, #tpu.memory_space<vmem>>, vector<1x18x128xbf16>
    %c0_10 = arith.constant 0 : index
    %c0_11 = arith.constant 0 : index
    %c0_12 = arith.constant 0 : index
    %16 = vector.load %arg5[%c0_10, %c0_11, %c0_12] : memref<18x18x128xbf16, #tpu.memory_space<vmem>>, vector<1x18x128xbf16>
    tpu.vector_store %arg5[%c0_10, %c0_11, %c0_12], %15 {strides = array<i32>} : memref<18x18x128xbf16, #tpu.memory_space<vmem>>, vector<1x18x128xbf16>,
    %c15 = arith.constant 15 : index
    %c0_13 = arith.constant 0 : index
    %c0_14 = arith.constant 0 : index
    %17 = vector.load %arg5[%c15, %c0_13, %c0_14] : memref<18x18x128xbf16, #tpu.memory_space<vmem>>, vector<1x18x128xbf16>
    %c17 = arith.constant 17 : index
    %c0_15 = arith.constant 0 : index
    %c0_16 = arith.constant 0 : index
    %18 = vector.load %arg5[%c17, %c0_15, %c0_16] : memref<18x18x128xbf16, #tpu.memory_space<vmem>>, vector<1x18x128xbf16>
    tpu.vector_store %arg5[%c17, %c0_15, %c0_16], %17 {strides = array<i32>} : memref<18x18x128xbf16, #tpu.memory_space<vmem>>, vector<1x18x128xbf16>,
    %cst_17 = arith.constant 0.000000e+00 : f32
    %19 = vector.broadcast %cst_17 : f32 to vector<1x128xf32>
    %c0_i32_18 = arith.constant 0 : i32
    %c2_i32_19 = arith.constant 2 : i32
    %20 = arith.addi %c0_i32_18, %c2_i32_19 : i32
    %c1_i32_20 = arith.constant 1 : i32
    %21:2 = scf.for %arg7 = %c0_i32_18 to %20 step %c1_i32_20 iter_args(%arg8 = %19, %arg9 = %19) -> (vector<1x128xf32>, vector<1x128xf32>)  : i32 {
      %c8_i32 = arith.constant 8 : i32
      %34 = arith.muli %arg7, %c8_i32 : i32
      %35 = tpu.assume_multiple %34, 8 : i32
      %c0_i32_30 = arith.constant 0 : i32
      %36 = arith.addi %35, %c0_i32_30 : i32
      %37 = arith.index_cast %36 : i32 to index
      %c0_31 = arith.constant 0 : index
      %c0_32 = arith.constant 0 : index
      %38 = vector.load %arg5[%37, %c0_31, %c0_32] : memref<18x18x128xbf16, #tpu.memory_space<vmem>>, vector<8x16x128xbf16>
      %39 = vector.shape_cast %38 : vector<8x16x128xbf16> to vector<128x128xbf16>
      %c0_i32_33 = arith.constant 0 : i32
      %40 = arith.addi %35, %c0_i32_33 : i32
      %41 = arith.index_cast %40 : i32 to index
      %c1 = arith.constant 1 : index
      %c0_34 = arith.constant 0 : index
      %42 = vector.load %arg5[%41, %c1, %c0_34] : memref<18x18x128xbf16, #tpu.memory_space<vmem>>, vector<8x16x128xbf16>
      %43 = vector.shape_cast %42 : vector<8x16x128xbf16> to vector<128x128xbf16>
      %c0_i32_35 = arith.constant 0 : i32
      %44 = arith.addi %35, %c0_i32_35 : i32
      %45 = arith.index_cast %44 : i32 to index
      %c2_36 = arith.constant 2 : index
      %c0_37 = arith.constant 0 : index
      %46 = vector.load %arg5[%45, %c2_36, %c0_37] : memref<18x18x128xbf16, #tpu.memory_space<vmem>>, vector<8x16x128xbf16>
      %47 = vector.shape_cast %46 : vector<8x16x128xbf16> to vector<128x128xbf16>
      %c1_i32_38 = arith.constant 1 : i32
      %48 = arith.addi %35, %c1_i32_38 : i32
      %49 = arith.index_cast %48 : i32 to index
      %c0_39 = arith.constant 0 : index
      %c0_40 = arith.constant 0 : index
      %50 = vector.load %arg5[%49, %c0_39, %c0_40] : memref<18x18x128xbf16, #tpu.memory_space<vmem>>, vector<8x16x128xbf16>
      %51 = vector.shape_cast %50 : vector<8x16x128xbf16> to vector<128x128xbf16>
      %c1_i32_41 = arith.constant 1 : i32
      %52 = arith.addi %35, %c1_i32_41 : i32
      %53 = arith.index_cast %52 : i32 to index
      %c1_42 = arith.constant 1 : index
      %c0_43 = arith.constant 0 : index
      %54 = vector.load %arg5[%53, %c1_42, %c0_43] : memref<18x18x128xbf16, #tpu.memory_space<vmem>>, vector<8x16x128xbf16>
      %55 = vector.shape_cast %54 : vector<8x16x128xbf16> to vector<128x128xbf16>
      %c1_i32_44 = arith.constant 1 : i32
      %56 = arith.addi %35, %c1_i32_44 : i32
      %57 = arith.index_cast %56 : i32 to index
      %c2_45 = arith.constant 2 : index
      %c0_46 = arith.constant 0 : index
      %58 = vector.load %arg5[%57, %c2_45, %c0_46] : memref<18x18x128xbf16, #tpu.memory_space<vmem>>, vector<8x16x128xbf16>
      %59 = vector.shape_cast %58 : vector<8x16x128xbf16> to vector<128x128xbf16>
      %c2_i32_47 = arith.constant 2 : i32
      %60 = arith.addi %35, %c2_i32_47 : i32
      %61 = arith.index_cast %60 : i32 to index
      %c0_48 = arith.constant 0 : index
      %c0_49 = arith.constant 0 : index
      %62 = vector.load %arg5[%61, %c0_48, %c0_49] : memref<18x18x128xbf16, #tpu.memory_space<vmem>>, vector<8x16x128xbf16>
      %63 = vector.shape_cast %62 : vector<8x16x128xbf16> to vector<128x128xbf16>
      %c2_i32_50 = arith.constant 2 : i32
      %64 = arith.addi %35, %c2_i32_50 : i32
      %65 = arith.index_cast %64 : i32 to index
      %c1_51 = arith.constant 1 : index
      %c0_52 = arith.constant 0 : index
      %66 = vector.load %arg5[%65, %c1_51, %c0_52] : memref<18x18x128xbf16, #tpu.memory_space<vmem>>, vector<8x16x128xbf16>
      %67 = vector.shape_cast %66 : vector<8x16x128xbf16> to vector<128x128xbf16>
      %c2_i32_53 = arith.constant 2 : i32
      %68 = arith.addi %35, %c2_i32_53 : i32
      %69 = arith.index_cast %68 : i32 to index
      %c2_54 = arith.constant 2 : index
      %c0_55 = arith.constant 0 : index
      %70 = vector.load %arg5[%69, %c2_54, %c0_55] : memref<18x18x128xbf16, #tpu.memory_space<vmem>>, vector<8x16x128xbf16>
      %71 = vector.shape_cast %70 : vector<8x16x128xbf16> to vector<128x128xbf16>
      %72 = tpu.concatenate %39, %43, %47, %51, %55, %59, %63, %67, %71 in 1 : vector<128x128xbf16>, vector<128x128xbf16>, vector<128x128xbf16>, vector<128x128xbf16>, vector<128x128xbf16>, vector<128x128xbf16>, vector<128x128xbf16>, vector<128x128xbf16>, vector<128x128xbf16> -> vector<128x1152xbf16>
      %c0_56 = arith.constant 0 : index
      %c0_57 = arith.constant 0 : index
      %73 = vector.load %arg3[%c0_56, %c0_57] : memref<1152x128xbf16, #tpu.memory_space<vmem>>, vector<1152x128xbf16>
      %cst_58 = arith.constant dense<0.000000e+00> : vector<128x128xf32>
      %74 = tpu.matmul %72, %73, %cst_58 {dimension_numbers = #tpu.dot_dimension_numbers<[1], [0], [0], [1], [0, 0, 1, 1], [], []>} : vector<128x1152xbf16>, vector<1152x128xbf16>, vector<128x128xf32> -> vector<128x128xf32>
      %c128_i32 = arith.constant 128 : i32
      %75 = arith.muli %arg7, %c128_i32 : i32
      %76 = tpu.assume_multiple %75, 128 : i32
      %77 = arith.index_cast %76 : i32 to index
      %c0_59 = arith.constant 0 : index
      %78 = vector.load %arg6[%77, %c0_59] : memref<256x128xf32, #tpu.memory_space<vmem>>, vector<128x128xf32>
      tpu.vector_store %arg6[%77, %c0_59], %74 {strides = array<i32>} : memref<256x128xf32, #tpu.memory_space<vmem>>, vector<128x128xf32>,
      %cst_60 = arith.constant dense<0.000000e+00> : vector<128xf32>
      %79 = vector.multi_reduction <add>, %74, %cst_60 [0] : vector<128x128xf32> to vector<128xf32>
      %80 = vector.shape_cast %79 : vector<128xf32> to vector<1x128xf32>
      %81 = arith.addf %arg8, %80 : vector<1x128xf32>
      %82 = arith.mulf %74, %74 : vector<128x128xf32>
      %cst_61 = arith.constant dense<0.000000e+00> : vector<128xf32>
      %83 = vector.multi_reduction <add>, %82, %cst_61 [0] : vector<128x128xf32> to vector<128xf32>
      %84 = vector.shape_cast %83 : vector<128xf32> to vector<1x128xf32>
      %85 = arith.addf %arg9, %84 : vector<1x128xf32>
      scf.yield %81, %85 : vector<1x128xf32>, vector<1x128xf32>
    }
    %c2_i32_21 = arith.constant 2 : i32
    %cst_22 = arith.constant 3.906250e-03 : f32
    %22 = vector.broadcast %cst_22 : f32 to vector<1x128xf32>
    %23 = arith.mulf %21#0, %22 : vector<1x128xf32>
    %cst_23 = arith.constant 3.906250e-03 : f32
    %24 = vector.broadcast %cst_23 : f32 to vector<1x128xf32>
    %25 = arith.mulf %21#1, %24 : vector<1x128xf32>
    %26 = arith.mulf %23, %23 : vector<1x128xf32>
    %27 = arith.subf %25, %26 : vector<1x128xf32>
    %cst_24 = arith.constant 0.000000e+00 : f32
    %28 = vector.broadcast %cst_24 : f32 to vector<1x128xf32>
    %29 = arith.maximumf %27, %28 : vector<1x128xf32>
    %cst_25 = arith.constant 9.99999974E-6 : f32
    %30 = vector.broadcast %cst_25 : f32 to vector<1x128xf32>
    %31 = arith.addf %29, %30 : vector<1x128xf32>
    %32 = math.rsqrt %31 : vector<1x128xf32>
    %c0_i32_26 = arith.constant 0 : i32
    %c2_i32_27 = arith.constant 2 : i32
    %33 = arith.addi %c0_i32_26, %c2_i32_27 : i32
    %c1_i32_28 = arith.constant 1 : i32
    scf.for %arg7 = %c0_i32_26 to %33 step %c1_i32_28  : i32 {
      %c128_i32 = arith.constant 128 : i32
      %34 = arith.muli %arg7, %c128_i32 : i32
      %35 = tpu.assume_multiple %34, 128 : i32
      %36 = arith.index_cast %35 : i32 to index
      %c0_30 = arith.constant 0 : index
      %37 = vector.load %arg6[%36, %c0_30] : memref<256x128xf32, #tpu.memory_space<vmem>>, vector<128x128xf32>
      %38 = vector.broadcast %23 : vector<1x128xf32> to vector<128x128xf32>
      %39 = arith.subf %37, %38 : vector<128x128xf32>
      %40 = vector.broadcast %32 : vector<1x128xf32> to vector<128x128xf32>
      %41 = arith.mulf %39, %40 : vector<128x128xf32>
      %c8_i32 = arith.constant 8 : i32
      %42 = arith.muli %arg7, %c8_i32 : i32
      %43 = tpu.assume_multiple %42, 8 : i32
      %c1_i32_31 = arith.constant 1 : i32
      %44 = arith.addi %43, %c1_i32_31 : i32
      %c0_32 = arith.constant 0 : index
      %45 = arith.index_cast %44 : i32 to index
      %c1 = arith.constant 1 : index
      %c0_33 = arith.constant 0 : index
      %46 = vector.load %arg1[%c0_32, %45, %c1, %c0_33] : memref<1x18x18x128xbf16, #tpu.memory_space<vmem>>, vector<1x8x16x128xbf16>
      %47 = vector.shape_cast %46 : vector<1x8x16x128xbf16> to vector<128x128xbf16>
      %48 = arith.extf %47 : vector<128x128xbf16> to vector<128x128xf32>
      %49 = arith.addf %48, %41 : vector<128x128xf32>
      %50 = vector.shape_cast %49 : vector<128x128xf32> to vector<1x8x16x128xf32>
      %c0_34 = arith.constant 0 : index
      %51 = arith.index_cast %43 : i32 to index
      %c0_35 = arith.constant 0 : index
      %c0_36 = arith.constant 0 : index
      %52 = vector.load %arg4[%c0_34, %51, %c0_35, %c0_36] : memref<1x16x16x128xf32, #tpu.memory_space<vmem>>, vector<1x8x16x128xf32>
      tpu.vector_store %arg4[%c0_34, %51, %c0_35, %c0_36], %50 {strides = array<i32>} : memref<1x16x16x128xf32, #tpu.memory_space<vmem>>, vector<1x8x16x128xf32>,
    }
    %c2_i32_29 = arith.constant 2 : i32
    return
  }
  func.func @transform_0(%arg0: i32) -> (i32, i32, i32, i32) {
    %c0_i32 = arith.constant 0 : i32
    %c0_i32_0 = arith.constant 0 : i32
    %c0_i32_1 = arith.constant 0 : i32
    %c0_i32_2 = arith.constant 0 : i32
    return %arg0, %c0_i32, %c0_i32_0, %c0_i32_1 : i32, i32, i32, i32
  }
  func.func @transform_1(%arg0: i32) -> (i32, i32) {
    %c0_i32 = arith.constant 0 : i32
    %c0_i32_0 = arith.constant 0 : i32
    %c0_i32_1 = arith.constant 0 : i32
    return %c0_i32, %c0_i32_0 : i32, i32
  }
  func.func @transform_2(%arg0: i32) -> (i32, i32) {
    %c0_i32 = arith.constant 0 : i32
    %c0_i32_0 = arith.constant 0 : i32
    %c0_i32_1 = arith.constant 0 : i32
    return %c0_i32, %c0_i32_0 : i32, i32
  }
  func.func @transform_3(%arg0: i32) -> (i32, i32, i32, i32) {
    %c0_i32 = arith.constant 0 : i32
    %c0_i32_0 = arith.constant 0 : i32
    %c0_i32_1 = arith.constant 0 : i32
    %c0_i32_2 = arith.constant 0 : i32
    return %arg0, %c0_i32, %c0_i32_0, %c0_i32_1 : i32, i32, i32, i32
  }
}

module attributes {stable_mosaic.version = 11 : i64} {
  func.func @kernel(%arg0: i32, %arg1: memref<1x18x18x128xbf16, #tpu.memory_space<vmem>>, %arg2: memref<1152x128xbf16, #tpu.memory_space<vmem>>, %arg3: memref<1152x128xbf16, #tpu.memory_space<vmem>>, %arg4: memref<1x16x16x128xf32, #tpu.memory_space<vmem>>, %arg5: memref<18x18x128xbf16, #tpu.memory_space<vmem>>, %arg6: memref<256x128xf32, #tpu.memory_space<vmem>>) attributes {dimension_semantics = [#tpu.dimension_semantics<parallel>], iteration_bounds = array<i64: 2>, scalar_prefetch = 0 : i64, scratch_operands = 2 : i64, tpu.core_type = #tpu.core_type<tc>, window_params = [{transform_indices = @transform_0, window_bounds = array<i64: 1, 18, 18, 128>}, {pipeline_mode = #tpu.pipeline_mode<synchronous>, transform_indices = @transform_1, window_bounds = array<i64: 1152, 128>}, {pipeline_mode = #tpu.pipeline_mode<synchronous>, transform_indices = @transform_2, window_bounds = array<i64: 1152, 128>}, {transform_indices = @transform_3, window_bounds = array<i64: 1, 16, 16, 128>}]} {
    %cst = arith.constant 0.000000e+00 : f32
    %0 = vector.broadcast %cst : f32 to vector<1x128xf32>
    %c0_i32 = arith.constant 0 : i32
    %c2_i32 = arith.constant 2 : i32
    %1 = arith.addi %c0_i32, %c2_i32 : i32
    %c1_i32 = arith.constant 1 : i32
    %2:2 = scf.for %arg7 = %c0_i32 to %1 step %c1_i32 iter_args(%arg8 = %0, %arg9 = %0) -> (vector<1x128xf32>, vector<1x128xf32>)  : i32 {
      %c8_i32 = arith.constant 8 : i32
      %34 = arith.muli %arg7, %c8_i32 : i32
      %35 = tpu.assume_multiple %34, 8 : i32
      %c0_i32_30 = arith.constant 0 : i32
      %36 = arith.addi %35, %c0_i32_30 : i32
      %c0_31 = arith.constant 0 : index
      %37 = arith.index_cast %36 : i32 to index
      %c0_32 = arith.constant 0 : index
      %c0_33 = arith.constant 0 : index
      %38 = vector.load %arg1[%c0_31, %37, %c0_32, %c0_33] : memref<1x18x18x128xbf16, #tpu.memory_space<vmem>>, vector<1x8x16x128xbf16>
      %39 = vector.shape_cast %38 : vector<1x8x16x128xbf16> to vector<128x128xbf16>
      %c0_i32_34 = arith.constant 0 : i32
      %40 = arith.addi %35, %c0_i32_34 : i32
      %c0_35 = arith.constant 0 : index
      %41 = arith.index_cast %40 : i32 to index
      %c1 = arith.constant 1 : index
      %c0_36 = arith.constant 0 : index
      %42 = vector.load %arg1[%c0_35, %41, %c1, %c0_36] : memref<1x18x18x128xbf16, #tpu.memory_space<vmem>>, vector<1x8x16x128xbf16>
      %43 = vector.shape_cast %42 : vector<1x8x16x128xbf16> to vector<128x128xbf16>
      %c0_i32_37 = arith.constant 0 : i32
      %44 = arith.addi %35, %c0_i32_37 : i32
      %c0_38 = arith.constant 0 : index
      %45 = arith.index_cast %44 : i32 to index
      %c2_39 = arith.constant 2 : index
      %c0_40 = arith.constant 0 : index
      %46 = vector.load %arg1[%c0_38, %45, %c2_39, %c0_40] : memref<1x18x18x128xbf16, #tpu.memory_space<vmem>>, vector<1x8x16x128xbf16>
      %47 = vector.shape_cast %46 : vector<1x8x16x128xbf16> to vector<128x128xbf16>
      %c1_i32_41 = arith.constant 1 : i32
      %48 = arith.addi %35, %c1_i32_41 : i32
      %c0_42 = arith.constant 0 : index
      %49 = arith.index_cast %48 : i32 to index
      %c0_43 = arith.constant 0 : index
      %c0_44 = arith.constant 0 : index
      %50 = vector.load %arg1[%c0_42, %49, %c0_43, %c0_44] : memref<1x18x18x128xbf16, #tpu.memory_space<vmem>>, vector<1x8x16x128xbf16>
      %51 = vector.shape_cast %50 : vector<1x8x16x128xbf16> to vector<128x128xbf16>
      %c1_i32_45 = arith.constant 1 : i32
      %52 = arith.addi %35, %c1_i32_45 : i32
      %c0_46 = arith.constant 0 : index
      %53 = arith.index_cast %52 : i32 to index
      %c1_47 = arith.constant 1 : index
      %c0_48 = arith.constant 0 : index
      %54 = vector.load %arg1[%c0_46, %53, %c1_47, %c0_48] : memref<1x18x18x128xbf16, #tpu.memory_space<vmem>>, vector<1x8x16x128xbf16>
      %55 = vector.shape_cast %54 : vector<1x8x16x128xbf16> to vector<128x128xbf16>
      %c1_i32_49 = arith.constant 1 : i32
      %56 = arith.addi %35, %c1_i32_49 : i32
      %c0_50 = arith.constant 0 : index
      %57 = arith.index_cast %56 : i32 to index
      %c2_51 = arith.constant 2 : index
      %c0_52 = arith.constant 0 : index
      %58 = vector.load %arg1[%c0_50, %57, %c2_51, %c0_52] : memref<1x18x18x128xbf16, #tpu.memory_space<vmem>>, vector<1x8x16x128xbf16>
      %59 = vector.shape_cast %58 : vector<1x8x16x128xbf16> to vector<128x128xbf16>
      %c2_i32_53 = arith.constant 2 : i32
      %60 = arith.addi %35, %c2_i32_53 : i32
      %c0_54 = arith.constant 0 : index
      %61 = arith.index_cast %60 : i32 to index
      %c0_55 = arith.constant 0 : index
      %c0_56 = arith.constant 0 : index
      %62 = vector.load %arg1[%c0_54, %61, %c0_55, %c0_56] : memref<1x18x18x128xbf16, #tpu.memory_space<vmem>>, vector<1x8x16x128xbf16>
      %63 = vector.shape_cast %62 : vector<1x8x16x128xbf16> to vector<128x128xbf16>
      %c2_i32_57 = arith.constant 2 : i32
      %64 = arith.addi %35, %c2_i32_57 : i32
      %c0_58 = arith.constant 0 : index
      %65 = arith.index_cast %64 : i32 to index
      %c1_59 = arith.constant 1 : index
      %c0_60 = arith.constant 0 : index
      %66 = vector.load %arg1[%c0_58, %65, %c1_59, %c0_60] : memref<1x18x18x128xbf16, #tpu.memory_space<vmem>>, vector<1x8x16x128xbf16>
      %67 = vector.shape_cast %66 : vector<1x8x16x128xbf16> to vector<128x128xbf16>
      %c2_i32_61 = arith.constant 2 : i32
      %68 = arith.addi %35, %c2_i32_61 : i32
      %c0_62 = arith.constant 0 : index
      %69 = arith.index_cast %68 : i32 to index
      %c2_63 = arith.constant 2 : index
      %c0_64 = arith.constant 0 : index
      %70 = vector.load %arg1[%c0_62, %69, %c2_63, %c0_64] : memref<1x18x18x128xbf16, #tpu.memory_space<vmem>>, vector<1x8x16x128xbf16>
      %71 = vector.shape_cast %70 : vector<1x8x16x128xbf16> to vector<128x128xbf16>
      %72 = tpu.concatenate %39, %43, %47, %51, %55, %59, %63, %67, %71 in 1 : vector<128x128xbf16>, vector<128x128xbf16>, vector<128x128xbf16>, vector<128x128xbf16>, vector<128x128xbf16>, vector<128x128xbf16>, vector<128x128xbf16>, vector<128x128xbf16>, vector<128x128xbf16> -> vector<128x1152xbf16>
      %c0_65 = arith.constant 0 : index
      %c0_66 = arith.constant 0 : index
      %73 = vector.load %arg2[%c0_65, %c0_66] : memref<1152x128xbf16, #tpu.memory_space<vmem>>, vector<1152x128xbf16>
      %cst_67 = arith.constant dense<0.000000e+00> : vector<128x128xf32>
      %74 = tpu.matmul %72, %73, %cst_67 {dimension_numbers = #tpu.dot_dimension_numbers<[1], [0], [0], [1], [0, 0, 1, 1], [], []>} : vector<128x1152xbf16>, vector<1152x128xbf16>, vector<128x128xf32> -> vector<128x128xf32>
      %c128_i32 = arith.constant 128 : i32
      %75 = arith.muli %arg7, %c128_i32 : i32
      %76 = tpu.assume_multiple %75, 128 : i32
      %77 = arith.index_cast %76 : i32 to index
      %c0_68 = arith.constant 0 : index
      %78 = vector.load %arg6[%77, %c0_68] : memref<256x128xf32, #tpu.memory_space<vmem>>, vector<128x128xf32>
      tpu.vector_store %arg6[%77, %c0_68], %74 {strides = array<i32>} : memref<256x128xf32, #tpu.memory_space<vmem>>, vector<128x128xf32>,
      %cst_69 = arith.constant dense<0.000000e+00> : vector<128xf32>
      %79 = vector.multi_reduction <add>, %74, %cst_69 [0] : vector<128x128xf32> to vector<128xf32>
      %80 = vector.shape_cast %79 : vector<128xf32> to vector<1x128xf32>
      %81 = arith.addf %arg8, %80 : vector<1x128xf32>
      %82 = arith.mulf %74, %74 : vector<128x128xf32>
      %cst_70 = arith.constant dense<0.000000e+00> : vector<128xf32>
      %83 = vector.multi_reduction <add>, %82, %cst_70 [0] : vector<128x128xf32> to vector<128xf32>
      %84 = vector.shape_cast %83 : vector<128xf32> to vector<1x128xf32>
      %85 = arith.addf %arg9, %84 : vector<1x128xf32>
      scf.yield %81, %85 : vector<1x128xf32>, vector<1x128xf32>
    }
    %c2_i32_0 = arith.constant 2 : i32
    %cst_1 = arith.constant 3.906250e-03 : f32
    %3 = vector.broadcast %cst_1 : f32 to vector<1x128xf32>
    %4 = arith.mulf %2#0, %3 : vector<1x128xf32>
    %cst_2 = arith.constant 3.906250e-03 : f32
    %5 = vector.broadcast %cst_2 : f32 to vector<1x128xf32>
    %6 = arith.mulf %2#1, %5 : vector<1x128xf32>
    %7 = arith.mulf %4, %4 : vector<1x128xf32>
    %8 = arith.subf %6, %7 : vector<1x128xf32>
    %cst_3 = arith.constant 0.000000e+00 : f32
    %9 = vector.broadcast %cst_3 : f32 to vector<1x128xf32>
    %10 = arith.maximumf %8, %9 : vector<1x128xf32>
    %cst_4 = arith.constant 9.99999974E-6 : f32
    %11 = vector.broadcast %cst_4 : f32 to vector<1x128xf32>
    %12 = arith.addf %10, %11 : vector<1x128xf32>
    %13 = math.rsqrt %12 : vector<1x128xf32>
    %c0_i32_5 = arith.constant 0 : i32
    %c2_i32_6 = arith.constant 2 : i32
    %14 = arith.addi %c0_i32_5, %c2_i32_6 : i32
    %c1_i32_7 = arith.constant 1 : i32
    scf.for %arg7 = %c0_i32_5 to %14 step %c1_i32_7  : i32 {
      %c128_i32 = arith.constant 128 : i32
      %34 = arith.muli %arg7, %c128_i32 : i32
      %35 = tpu.assume_multiple %34, 128 : i32
      %36 = arith.index_cast %35 : i32 to index
      %c0_30 = arith.constant 0 : index
      %37 = vector.load %arg6[%36, %c0_30] : memref<256x128xf32, #tpu.memory_space<vmem>>, vector<128x128xf32>
      %38 = vector.broadcast %4 : vector<1x128xf32> to vector<128x128xf32>
      %39 = arith.subf %37, %38 : vector<128x128xf32>
      %40 = vector.broadcast %13 : vector<1x128xf32> to vector<128x128xf32>
      %41 = arith.mulf %39, %40 : vector<128x128xf32>
      %cst_31 = arith.constant 0.000000e+00 : f32
      %42 = vector.broadcast %cst_31 : f32 to vector<128x128xf32>
      %43 = arith.maximumf %41, %42 : vector<128x128xf32>
      %44 = arith.truncf %43 : vector<128x128xf32> to vector<128x128xbf16>
      %45 = vector.shape_cast %44 : vector<128x128xbf16> to vector<8x16x128xbf16>
      %46 = vector.extract_strided_slice %45 {offsets = [0, 1, 0], sizes = [8, 1, 128], strides = [1, 1, 1]} : vector<8x16x128xbf16> to vector<8x1x128xbf16>
      %47 = vector.extract_strided_slice %45 {offsets = [0, 14, 0], sizes = [8, 1, 128], strides = [1, 1, 1]} : vector<8x16x128xbf16> to vector<8x1x128xbf16>
      %48 = tpu.concatenate %46, %45, %47 in 1 : vector<8x1x128xbf16>, vector<8x16x128xbf16>, vector<8x1x128xbf16> -> vector<8x18x128xbf16>
      %c8_i32 = arith.constant 8 : i32
      %49 = arith.muli %arg7, %c8_i32 : i32
      %50 = tpu.assume_multiple %49, 8 : i32
      %c1_i32_32 = arith.constant 1 : i32
      %51 = arith.addi %50, %c1_i32_32 : i32
      %52 = arith.index_cast %51 : i32 to index
      %c0_33 = arith.constant 0 : index
      %c0_34 = arith.constant 0 : index
      %53 = vector.load %arg5[%52, %c0_33, %c0_34] : memref<18x18x128xbf16, #tpu.memory_space<vmem>>, vector<8x18x128xbf16>
      tpu.vector_store %arg5[%52, %c0_33, %c0_34], %48 {strides = array<i32>} : memref<18x18x128xbf16, #tpu.memory_space<vmem>>, vector<8x18x128xbf16>,
    }
    %c2_i32_8 = arith.constant 2 : i32
    %c2 = arith.constant 2 : index
    %c0 = arith.constant 0 : index
    %c0_9 = arith.constant 0 : index
    %15 = vector.load %arg5[%c2, %c0, %c0_9] : memref<18x18x128xbf16, #tpu.memory_space<vmem>>, vector<1x18x128xbf16>
    %c0_10 = arith.constant 0 : index
    %c0_11 = arith.constant 0 : index
    %c0_12 = arith.constant 0 : index
    %16 = vector.load %arg5[%c0_10, %c0_11, %c0_12] : memref<18x18x128xbf16, #tpu.memory_space<vmem>>, vector<1x18x128xbf16>
    tpu.vector_store %arg5[%c0_10, %c0_11, %c0_12], %15 {strides = array<i32>} : memref<18x18x128xbf16, #tpu.memory_space<vmem>>, vector<1x18x128xbf16>,
    %c15 = arith.constant 15 : index
    %c0_13 = arith.constant 0 : index
    %c0_14 = arith.constant 0 : index
    %17 = vector.load %arg5[%c15, %c0_13, %c0_14] : memref<18x18x128xbf16, #tpu.memory_space<vmem>>, vector<1x18x128xbf16>
    %c17 = arith.constant 17 : index
    %c0_15 = arith.constant 0 : index
    %c0_16 = arith.constant 0 : index
    %18 = vector.load %arg5[%c17, %c0_15, %c0_16] : memref<18x18x128xbf16, #tpu.memory_space<vmem>>, vector<1x18x128xbf16>
    tpu.vector_store %arg5[%c17, %c0_15, %c0_16], %17 {strides = array<i32>} : memref<18x18x128xbf16, #tpu.memory_space<vmem>>, vector<1x18x128xbf16>,
    %cst_17 = arith.constant 0.000000e+00 : f32
    %19 = vector.broadcast %cst_17 : f32 to vector<1x128xf32>
    %c0_i32_18 = arith.constant 0 : i32
    %c2_i32_19 = arith.constant 2 : i32
    %20 = arith.addi %c0_i32_18, %c2_i32_19 : i32
    %c1_i32_20 = arith.constant 1 : i32
    %21:2 = scf.for %arg7 = %c0_i32_18 to %20 step %c1_i32_20 iter_args(%arg8 = %19, %arg9 = %19) -> (vector<1x128xf32>, vector<1x128xf32>)  : i32 {
      %c8_i32 = arith.constant 8 : i32
      %34 = arith.muli %arg7, %c8_i32 : i32
      %35 = tpu.assume_multiple %34, 8 : i32
      %c0_i32_30 = arith.constant 0 : i32
      %36 = arith.addi %35, %c0_i32_30 : i32
      %37 = arith.index_cast %36 : i32 to index
      %c0_31 = arith.constant 0 : index
      %c0_32 = arith.constant 0 : index
      %38 = vector.load %arg5[%37, %c0_31, %c0_32] : memref<18x18x128xbf16, #tpu.memory_space<vmem>>, vector<8x16x128xbf16>
      %39 = vector.shape_cast %38 : vector<8x16x128xbf16> to vector<128x128xbf16>
      %c0_i32_33 = arith.constant 0 : i32
      %40 = arith.addi %35, %c0_i32_33 : i32
      %41 = arith.index_cast %40 : i32 to index
      %c1 = arith.constant 1 : index
      %c0_34 = arith.constant 0 : index
      %42 = vector.load %arg5[%41, %c1, %c0_34] : memref<18x18x128xbf16, #tpu.memory_space<vmem>>, vector<8x16x128xbf16>
      %43 = vector.shape_cast %42 : vector<8x16x128xbf16> to vector<128x128xbf16>
      %c0_i32_35 = arith.constant 0 : i32
      %44 = arith.addi %35, %c0_i32_35 : i32
      %45 = arith.index_cast %44 : i32 to index
      %c2_36 = arith.constant 2 : index
      %c0_37 = arith.constant 0 : index
      %46 = vector.load %arg5[%45, %c2_36, %c0_37] : memref<18x18x128xbf16, #tpu.memory_space<vmem>>, vector<8x16x128xbf16>
      %47 = vector.shape_cast %46 : vector<8x16x128xbf16> to vector<128x128xbf16>
      %c1_i32_38 = arith.constant 1 : i32
      %48 = arith.addi %35, %c1_i32_38 : i32
      %49 = arith.index_cast %48 : i32 to index
      %c0_39 = arith.constant 0 : index
      %c0_40 = arith.constant 0 : index
      %50 = vector.load %arg5[%49, %c0_39, %c0_40] : memref<18x18x128xbf16, #tpu.memory_space<vmem>>, vector<8x16x128xbf16>
      %51 = vector.shape_cast %50 : vector<8x16x128xbf16> to vector<128x128xbf16>
      %c1_i32_41 = arith.constant 1 : i32
      %52 = arith.addi %35, %c1_i32_41 : i32
      %53 = arith.index_cast %52 : i32 to index
      %c1_42 = arith.constant 1 : index
      %c0_43 = arith.constant 0 : index
      %54 = vector.load %arg5[%53, %c1_42, %c0_43] : memref<18x18x128xbf16, #tpu.memory_space<vmem>>, vector<8x16x128xbf16>
      %55 = vector.shape_cast %54 : vector<8x16x128xbf16> to vector<128x128xbf16>
      %c1_i32_44 = arith.constant 1 : i32
      %56 = arith.addi %35, %c1_i32_44 : i32
      %57 = arith.index_cast %56 : i32 to index
      %c2_45 = arith.constant 2 : index
      %c0_46 = arith.constant 0 : index
      %58 = vector.load %arg5[%57, %c2_45, %c0_46] : memref<18x18x128xbf16, #tpu.memory_space<vmem>>, vector<8x16x128xbf16>
      %59 = vector.shape_cast %58 : vector<8x16x128xbf16> to vector<128x128xbf16>
      %c2_i32_47 = arith.constant 2 : i32
      %60 = arith.addi %35, %c2_i32_47 : i32
      %61 = arith.index_cast %60 : i32 to index
      %c0_48 = arith.constant 0 : index
      %c0_49 = arith.constant 0 : index
      %62 = vector.load %arg5[%61, %c0_48, %c0_49] : memref<18x18x128xbf16, #tpu.memory_space<vmem>>, vector<8x16x128xbf16>
      %63 = vector.shape_cast %62 : vector<8x16x128xbf16> to vector<128x128xbf16>
      %c2_i32_50 = arith.constant 2 : i32
      %64 = arith.addi %35, %c2_i32_50 : i32
      %65 = arith.index_cast %64 : i32 to index
      %c1_51 = arith.constant 1 : index
      %c0_52 = arith.constant 0 : index
      %66 = vector.load %arg5[%65, %c1_51, %c0_52] : memref<18x18x128xbf16, #tpu.memory_space<vmem>>, vector<8x16x128xbf16>
      %67 = vector.shape_cast %66 : vector<8x16x128xbf16> to vector<128x128xbf16>
      %c2_i32_53 = arith.constant 2 : i32
      %68 = arith.addi %35, %c2_i32_53 : i32
      %69 = arith.index_cast %68 : i32 to index
      %c2_54 = arith.constant 2 : index
      %c0_55 = arith.constant 0 : index
      %70 = vector.load %arg5[%69, %c2_54, %c0_55] : memref<18x18x128xbf16, #tpu.memory_space<vmem>>, vector<8x16x128xbf16>
      %71 = vector.shape_cast %70 : vector<8x16x128xbf16> to vector<128x128xbf16>
      %72 = tpu.concatenate %39, %43, %47, %51, %55, %59, %63, %67, %71 in 1 : vector<128x128xbf16>, vector<128x128xbf16>, vector<128x128xbf16>, vector<128x128xbf16>, vector<128x128xbf16>, vector<128x128xbf16>, vector<128x128xbf16>, vector<128x128xbf16>, vector<128x128xbf16> -> vector<128x1152xbf16>
      %c0_56 = arith.constant 0 : index
      %c0_57 = arith.constant 0 : index
      %73 = vector.load %arg3[%c0_56, %c0_57] : memref<1152x128xbf16, #tpu.memory_space<vmem>>, vector<1152x128xbf16>
      %cst_58 = arith.constant dense<0.000000e+00> : vector<128x128xf32>
      %74 = tpu.matmul %72, %73, %cst_58 {dimension_numbers = #tpu.dot_dimension_numbers<[1], [0], [0], [1], [0, 0, 1, 1], [], []>} : vector<128x1152xbf16>, vector<1152x128xbf16>, vector<128x128xf32> -> vector<128x128xf32>
      %c128_i32 = arith.constant 128 : i32
      %75 = arith.muli %arg7, %c128_i32 : i32
      %76 = tpu.assume_multiple %75, 128 : i32
      %77 = arith.index_cast %76 : i32 to index
      %c0_59 = arith.constant 0 : index
      %78 = vector.load %arg6[%77, %c0_59] : memref<256x128xf32, #tpu.memory_space<vmem>>, vector<128x128xf32>
      tpu.vector_store %arg6[%77, %c0_59], %74 {strides = array<i32>} : memref<256x128xf32, #tpu.memory_space<vmem>>, vector<128x128xf32>,
      %cst_60 = arith.constant dense<0.000000e+00> : vector<128xf32>
      %79 = vector.multi_reduction <add>, %74, %cst_60 [0] : vector<128x128xf32> to vector<128xf32>
      %80 = vector.shape_cast %79 : vector<128xf32> to vector<1x128xf32>
      %81 = arith.addf %arg8, %80 : vector<1x128xf32>
      %82 = arith.mulf %74, %74 : vector<128x128xf32>
      %cst_61 = arith.constant dense<0.000000e+00> : vector<128xf32>
      %83 = vector.multi_reduction <add>, %82, %cst_61 [0] : vector<128x128xf32> to vector<128xf32>
      %84 = vector.shape_cast %83 : vector<128xf32> to vector<1x128xf32>
      %85 = arith.addf %arg9, %84 : vector<1x128xf32>
      scf.yield %81, %85 : vector<1x128xf32>, vector<1x128xf32>
    }
    %c2_i32_21 = arith.constant 2 : i32
    %cst_22 = arith.constant 3.906250e-03 : f32
    %22 = vector.broadcast %cst_22 : f32 to vector<1x128xf32>
    %23 = arith.mulf %21#0, %22 : vector<1x128xf32>
    %cst_23 = arith.constant 3.906250e-03 : f32
    %24 = vector.broadcast %cst_23 : f32 to vector<1x128xf32>
    %25 = arith.mulf %21#1, %24 : vector<1x128xf32>
    %26 = arith.mulf %23, %23 : vector<1x128xf32>
    %27 = arith.subf %25, %26 : vector<1x128xf32>
    %cst_24 = arith.constant 0.000000e+00 : f32
    %28 = vector.broadcast %cst_24 : f32 to vector<1x128xf32>
    %29 = arith.maximumf %27, %28 : vector<1x128xf32>
    %cst_25 = arith.constant 9.99999974E-6 : f32
    %30 = vector.broadcast %cst_25 : f32 to vector<1x128xf32>
    %31 = arith.addf %29, %30 : vector<1x128xf32>
    %32 = math.rsqrt %31 : vector<1x128xf32>
    %c0_i32_26 = arith.constant 0 : i32
    %c2_i32_27 = arith.constant 2 : i32
    %33 = arith.addi %c0_i32_26, %c2_i32_27 : i32
    %c1_i32_28 = arith.constant 1 : i32
    scf.for %arg7 = %c0_i32_26 to %33 step %c1_i32_28  : i32 {
      %c128_i32 = arith.constant 128 : i32
      %34 = arith.muli %arg7, %c128_i32 : i32
      %35 = tpu.assume_multiple %34, 128 : i32
      %36 = arith.index_cast %35 : i32 to index
      %c0_30 = arith.constant 0 : index
      %37 = vector.load %arg6[%36, %c0_30] : memref<256x128xf32, #tpu.memory_space<vmem>>, vector<128x128xf32>
      %38 = vector.broadcast %23 : vector<1x128xf32> to vector<128x128xf32>
      %39 = arith.subf %37, %38 : vector<128x128xf32>
      %40 = vector.broadcast %32 : vector<1x128xf32> to vector<128x128xf32>
      %41 = arith.mulf %39, %40 : vector<128x128xf32>
      %c8_i32 = arith.constant 8 : i32
      %42 = arith.muli %arg7, %c8_i32 : i32
      %43 = tpu.assume_multiple %42, 8 : i32
      %c1_i32_31 = arith.constant 1 : i32
      %44 = arith.addi %43, %c1_i32_31 : i32
      %c0_32 = arith.constant 0 : index
      %45 = arith.index_cast %44 : i32 to index
      %c1 = arith.constant 1 : index
      %c0_33 = arith.constant 0 : index
      %46 = vector.load %arg1[%c0_32, %45, %c1, %c0_33] : memref<1x18x18x128xbf16, #tpu.memory_space<vmem>>, vector<1x8x16x128xbf16>
      %47 = vector.shape_cast %46 : vector<1x8x16x128xbf16> to vector<128x128xbf16>
      %48 = arith.extf %47 : vector<128x128xbf16> to vector<128x128xf32>
      %49 = arith.addf %48, %41 : vector<128x128xf32>
      %50 = vector.shape_cast %49 : vector<128x128xf32> to vector<1x8x16x128xf32>
      %c0_34 = arith.constant 0 : index
      %51 = arith.index_cast %43 : i32 to index
      %c0_35 = arith.constant 0 : index
      %c0_36 = arith.constant 0 : index
      %52 = vector.load %arg4[%c0_34, %51, %c0_35, %c0_36] : memref<1x16x16x128xf32, #tpu.memory_space<vmem>>, vector<1x8x16x128xf32>
      tpu.vector_store %arg4[%c0_34, %51, %c0_35, %c0_36], %50 {strides = array<i32>} : memref<1x16x16x128xf32, #tpu.memory_space<vmem>>, vector<1x8x16x128xf32>,
    }
    %c2_i32_29 = arith.constant 2 : i32
    return
  }
  func.func @transform_0(%arg0: i32) -> (i32, i32, i32, i32) {
    %c0_i32 = arith.constant 0 : i32
    %c0_i32_0 = arith.constant 0 : i32
    %c0_i32_1 = arith.constant 0 : i32
    %c0_i32_2 = arith.constant 0 : i32
    return %arg0, %c0_i32, %c0_i32_0, %c0_i32_1 : i32, i32, i32, i32
  }
  func.func @transform_1(%arg0: i32) -> (i32, i32) {
    %c0_i32 = arith.constant 0 : i32
    %c0_i32_0 = arith.constant 0 : i32
    %c0_i32_1 = arith.constant 0 : i32
    return %c0_i32, %c0_i32_0 : i32, i32
  }
  func.func @transform_2(%arg0: i32) -> (i32, i32) {
    %c0_i32 = arith.constant 0 : i32
    %c0_i32_0 = arith.constant 0 : i32
    %c0_i32_1 = arith.constant 0 : i32
    return %c0_i32, %c0_i32_0 : i32, i32
  }
  func.func @transform_3(%arg0: i32) -> (i32, i32, i32, i32) {
    %c0_i32 = arith.constant 0 : i32
    %c0_i32_0 = arith.constant 0 : i32
    %c0_i32_1 = arith.constant 0 : i32
    %c0_i32_2 = arith.constant 0 : i32
    return %arg0, %c0_i32, %c0_i32_0, %c0_i32_1 : i32, i32, i32, i32
  }
}

</mosaic_0001>

<bundles_post_ra>
// kernel: tpu_custom_call.1
= control target key start
LH: loop header
LB: loop body
LE: loop exit
PB: predicated region body
PF: predicated region fallthrough
CT: control target
= control target key end

     0   :  { %8 = vsyncpa [#allocation5], 0  ;;  %s9355_s0 = inlined_call_operand.vmem [shape: bf16[2,18,18,128], index: 0, kind: input, shape index: {}]   ;;  %s9356_s1 = inlined_call_operand.vmem [shape: bf16[1152,128], index: 1, kind: input, shape index: {}]   ;;  %s9357_s2 = inlined_call_operand.hbm [shape: bf16[1152,128], index: 2, kind: input, shape index: {}]   ;;  %s9358_s3 = inlined_call_operand.hbm [shape: f32[2,16,16,128], index: 3, kind: output, shape index: {}]  }
   0x1   :  { %9 = vsyncpa [#allocation6], 0 }
   0x2   :  { %11 = vsyncpa [#allocation6 + $0x1], 0  ;;  %s7464_s12 = smov 0   ;;  %s7466_s13 = smov 0  }
   0x3   :  { %s7468_s14 = smov 0   ;;  %s7470_s15 = smov 0  }
   0x4 LB: > { %s7485_s16 = sadd.s32 4294967295, %s7405_s15   ;;  %s5853_s17 = sadd.s32 4294967294, %s7405_s15   ;;  %s7405_s15 = sphi %s7470_s15, %s9374_s15   ;;  %s7401_s14 = sphi %s7468_s14, %s9373_s14   ;;  %s7397_s13 = sphi %s7466_s13, %s9372_s13   ;;  %s7393_s12 = sphi %s7464_s12, %s9371_s12  }
   0x5   : > { %s7489_s18 = sadd.s32 1, %s7405_s15   ;;  %s92_s19 = sadd.s32 1, %s7401_s14 }
   0x6   : > { %s89_s20 = ssub.s32 %s7405_s15, %s7489_s18  ;;  %p102_p0 = scmp.ne.s32.totalorder %s7401_s14, %s7397_s13 }
   0x7   : > { %p90_p1 = scmp.eq.s32.totalorder %s89_s20, 0  ;;  %p103_p2 = scmp.eq.s32.totalorder %s7485_s16, 1 }
   0x8   : > { %p108_p3 = scmp.ne.s32.totalorder %s7397_s13, %s7393_s12  ;;  %p109_p4 = scmp.eq.s32.totalorder %s5853_s17, 1 }
   0x9   : > { %s7500_s21 = scalar_select %p90_p1, %s7401_s14, %s92_s19  }
   0xa   : > { %p7502_p5 = por %p103_p2, %p102_p0  ;;  %p7506_p6 = por %p109_p4, %p108_p3 }
   0xb   : > { %p5854_p7 = scmp.ge.s32.totalorder %s7405_s15, 1  ;;  %p116_p8 = scmp.lt.s32.totalorder %s7405_s15, 3 }
   0xc   : > { %p7141_p9 = scmp.eq.s32.totalorder %s7485_s16, 0  ;;  %s130_s26 = sshll.u32 %s9357_s2, 4  ;;  %s131_s26 = int_to_ptr.hbm [resolvable:$true] %s130_s26 }
   0xd   : > { %p117_p10 = pnand %p5854_p7, %p116_p8  ;;  %s7439_s27 = smov [#allocation4]  }
   0xe   : > { %s132_s28 = sshll.u32 %s7439_s27, 4  ;;  %s7440_s29 = smov 64   ;;  %s133_s28 = int_to_ptr.vmem [resolvable:$true] %s132_s28 }
   0xf   : > { %p7133_p11 = pneg %p117_p10  ;;  %s7441_s30 = smov 4  }
  0x10   : > { %156 = sbr.rel (%p117_p10) target bundleno = 1162 (0x48a), region = 32 }
  0x11   : > { %p7134_p12 = pnand %p7141_p9, %p7133_p11 }
  0x13   : > { %7136 = dma.hbm_to_vmem [thread:$0]  (!%p7134_p12), %s131_s26, 9216, %s133_s28, [#allocation5], %s7440_s29, %s7440_s29, %s7441_s30  }
  0x15   : > { %7384 = dma.done.wait (%p7141_p9), [#allocation5], 9216  }
  0x16   : > { %7386 = vsyncadd (%p7141_p9), [#allocation5], 4294958080  ;;  %s178_s4 = sand.u32 1, %s7397_s13   ;;  %p181_p13 = scmp.lt.s32.totalorder %s7485_s16, 1  ;;  %v7535_v0 = vmov 0.0   ;;  %v7537_v1 = vmov 0.0  }
  0x17   : > { %s7526_s5 = sshll.u32 %s178_s4, 8  ;;  %s7539_s17 = smov 0  }
  0x18   : > { %s182_s6 = scalar_select %p181_p13, %s7485_s16, 1 }
  0x19   : > { %s180_s11 = scalar_lea.vmem [#allocation7], %s7526_s5 }
  0x1a   : > { %s7126_s7 = smul.u32 216, %s182_s6 }
  0x1c   : > { %s7532_s10 = scalar_lea.vmem %s9355_s0, %s7126_s7 }
  0x1d LB: >> { %v6914_v2 = vld [vmem:[%s9356_s1 + $0x38] sm:$0xff]  ;;  %v6913_v3 = vld [vmem:[%s9356_s1 + $0x30] sm:$0xff]  ;;  %v6912_v4 = vld [vmem:[%s9356_s1 + $0x28] sm:$0xff]  ;;  %s6882_s20 = smul.u32 96, %s7417_s17  ;;  %vm222_vm0 = vsmask.f32 3328  ;;  %s7417_s17 = sphi %s7539_s17, %s191_s17   ;;  %v7413_v1 = vphi %v7537_v1, %v9366_v1   ;;  %v7409_v0 = vphi %v7535_v0, %v9365_v0  }
  0x1e   : >> { %7078 = vmatpush.bf16.msra.mxu1 %v6914_v2  ;;  %7079 = vmatpush.bf16.msra.mxu2 %v6914_v2  ;;  %v6911_v5 = vld [vmem:[%s9356_s1 + $0x20] sm:$0xff]  ;;  %v6910_v6 = vld [vmem:[%s9356_s1 + $0x18] sm:$0xff]  ;;  %v6909_v7 = vld [vmem:[%s9356_s1 + $0x10] sm:$0xff]  ;;  %vm223_vm1 = vsmask.f32 7440  ;;  %vm449_vm2 = vcmask 1042432  }
  0x1f   : >> { %7080 = vmatpush.bf16.msra.mxu3 %v6914_v2  ;;  %2012 = vmatpush.bf16.msra.mxu0 %v6914_v2  ;;  %v6908_v8 = vld [vmem:[%s9356_s1 + $0x8] sm:$0xff]  ;;  %v6907_v9 = vld [vmem:[%s9356_s1] sm:$0xff]  ;;  %s7576_s26 = scalar_lea.vmem %s7532_s10, %s6882_s20  ;;  %v6930_v10 = vld [vmem:[%s9356_s1 + $0xb8] sm:$0xff]  ;;  %vm450_vm3 = vcmask 1046532  }
  0x20   : >> { %v6922_v11 = vld [vmem:[%s9356_s1 + $0x78] sm:$0xff]  ;;  %v6887_v13 = vld [vmem:[%s7576_s26 + $0x30] sm:$0xff]  ;;  %v6889_v14 = vld [vmem:[%s7576_s26 + $0x48] sm:$0xff] }
  0x21   : >> { %v6885_v12 = vld [vmem:[%s7576_s26 + $0x18] sm:$0xff]  ;;  %v6883_v15 = vld [vmem:[%s7576_s26] sm:$0xff]  ;;  %v6929_v18 = vld [vmem:[%s9356_s1 + $0xb0] sm:$0xff] }
  0x22   : >> { %7081 = vmatpush.bf16.msra.mxu1 %v6913_v3  ;;  %7082 = vmatpush.bf16.msra.mxu2 %v6913_v3  ;;  %v6938_v16 = vld [vmem:[%s9356_s1 + $0xf8] sm:$0xff]  ;;  %v6921_v19 = vld [vmem:[%s9356_s1 + $0x70] sm:$0xff]  ;;  %v198_v20 = vld [vmem:[%s7576_s26] sm:$0xf] }
  0x23   : >> { %7083 = vmatpush.bf16.msra.mxu3 %v6913_v3  ;;  %2013 = vmatpush.bf16.msra.mxu0 %v6913_v3  ;;  %v6946_v17 = vld [vmem:[%s9356_s1 + $0x138] sm:$0xff]  ;;  %v7602_v21 = vld [vmem:[%s7576_s26 + $0x4] sm:$0xf]  ;;  %v6937_v22 = vld [vmem:[%s9356_s1 + $0xf0] sm:$0xff]  ;;  %v226_v27 = vshrl.u32 %v198_v20, 16  ;;  %v229_v28 = vshll.u32 %v198_v20, 16 }
  0x24   : >> { %v6945_v23 = vld [vmem:[%s9356_s1 + $0x130] sm:$0xff]  ;;  %v5874_v24 = vld [vmem:[%s7576_s26 + $0xc] sm:$0xf]  ;;  %v235_v30 = vshll.u32 %v7602_v21, 16  ;;  %v239_v31 = vshrl.u32 %v7602_v21, 16  ;;  %v6927_v38 = vld [vmem:[%s9356_s1 + $0xa0] sm:$0xff] }
  0x25   : >> { %v6928_v25 = vld [vmem:[%s9356_s1 + $0xa8] sm:$0xff]  ;;  %v5875_v29 = vld [vmem:[%s7576_s26 + $0x10] sm:$0xf]  ;;  %v537_v32 = vshrl.u32 %v5874_v24, 16  ;;  %v540_v33 = vshll.u32 %v5874_v24, 16  ;;  %v6919_v39 = vld [vmem:[%s9356_s1 + $0x60] sm:$0xff] }
  0x26   : >> { %7084 = vmatpush.bf16.msra.mxu1 %v6912_v4  ;;  %7085 = vmatpush.bf16.msra.mxu2 %v6912_v4  ;;  %v6920_v26 = vld [vmem:[%s9356_s1 + $0x68] sm:$0xff]  ;;  %v546_v36 = vshll.u32 %v5875_v29, 16  ;;  %v550_v37 = vshrl.u32 %v5875_v29, 16  ;;  %v228_v40 = vrot.slane %v226_v27, 4  ;;  %v231_v41 = vrot.slane %v229_v28, 5  ;;  %v6935_v44 = vld [vmem:[%s9356_s1 + $0xe0] sm:$0xff]  ;;  %vm7680_vm4 = vmor %vm222_vm0, %vm223_vm1 }
  0x27   : >> { %7086 = vmatpush.bf16.msra.mxu3 %v6912_v4  ;;  %2014 = vmatpush.bf16.msra.mxu0 %v6912_v4  ;;  %v6936_v34 = vld [vmem:[%s9356_s1 + $0xe8] sm:$0xff]  ;;  %v7632_v42 = vrot.slane %v235_v30, 5  ;;  %v241_v43 = vrot.slane %v239_v31, 4  ;;  %v539_v46 = vrot.slane %v537_v32, 4  ;;  %v542_v47 = vrot.slane %v540_v33, 5  ;;  %v6943_v48 = vld [vmem:[%s9356_s1 + $0x120] sm:$0xff]  ;;  %vm7694_vm5 = vmor %vm449_vm2, %vm450_vm3 }
  0x28   : >> { %v6944_v35 = vld [vmem:[%s9356_s1 + $0x128] sm:$0xff]  ;;  %v5890_v50 = vld [vmem:[%s7576_s26 + $0x14] sm:$0x1]  ;;  %v7645_v51 = vrot.slane %v546_v36, 5  ;;  %v552_v52 = vrot.slane %v550_v37, 4  ;;  %v6888_v53 = vld [vmem:[%s7576_s26 + $0x3c] sm:$0xff]  ;;  %v232_v56 = vor.u32 %v231_v41, %v228_v40 }
  0x29   : >> { %v7638_v45 = vld [vmem:[%s7576_s26 + $0x8] sm:$0x1]  ;;  %v6926_v54 = vld [vmem:[%s9356_s1 + $0x98] sm:$0xff]  ;;  %v6884_v59 = vld [vmem:[%s7576_s26 + $0xc] sm:$0xff]  ;;  %v242_v60 = vor.u32 %v241_v43, %v7632_v42  ;;  %v454_v62 = vrot.slane %v7602_v21, 5  ;;  %v543_v4 = vor.u32 %v542_v47, %v539_v46 }
  0x2a   : >> { %7087 = vmatpush.bf16.msra.mxu1 %v6911_v5  ;;  %7088 = vmatpush.bf16.msra.mxu2 %v6911_v5  ;;  %v6886_v49 = vld [vmem:[%s7576_s26 + $0x24] sm:$0xff]  ;;  %v6918_v55 = vld [vmem:[%s9356_s1 + $0x58] sm:$0xff]  ;;  %v245_v61 = vshll.u32 %v7638_v45, 16  ;;  %v6925_v2 = vld [vmem:[%s9356_s1 + $0x90] sm:$0xff] }
  0x2b   : >> { %7089 = vmatpush.bf16.msra.mxu3 %v6911_v5  ;;  %2015 = vmatpush.bf16.msra.mxu0 %v6911_v5  ;;  %v6890_v57 = vld [vmem:[%s7576_s26 + $0x54] sm:$0xff]  ;;  %v417_v3 = vld [vmem:[%s7576_s26] sm:$0xe]  ;;  %v556_v5 = vshll.u32 %v5890_v50, 16  ;;  %v5877_v21 = vld [vmem:[%s7576_s26 + $0x1c] sm:$0xf] }
  0x2c   : >> { %v6934_v58 = vld [vmem:[%s9356_s1 + $0xd8] sm:$0xff]  ;;  %v6924_v29 = vld [vmem:[%s9356_s1 + $0x88] sm:$0xff]  ;;  %v574_v36 = vshrl.u32 %v5877_v21, 16 }
  0x2d   : >> { %v6942_v63 = vld [vmem:[%s9356_s1 + $0x118] sm:$0xff]  ;;  %v6916_v30 = vld [vmem:[%s9356_s1 + $0x48] sm:$0xff] }
  0x2e   : >> { %7090 = vmatpush.bf16.msra.mxu1 %v6910_v6  ;;  %7091 = vmatpush.bf16.msra.mxu2 %v6910_v6  ;;  %v6932_v37 = vld [vmem:[%s9356_s1 + $0xc8] sm:$0xff] }
  0x2f   : >> { %7092 = vmatpush.bf16.msra.mxu3 %v6910_v6  ;;  %2016 = vmatpush.bf16.msra.mxu0 %v6910_v6  ;;  %v553_v6 = vor.u32 %v552_v52, %v7645_v51 }
  0x32   : >> { %7093 = vmatpush.bf16.msra.mxu1 %v6909_v7  ;;  %7094 = vmatpush.bf16.msra.mxu2 %v6909_v7 }
  0x33   : >> { %7095 = vmatpush.bf16.msra.mxu3 %v6909_v7  ;;  %2017 = vmatpush.bf16.msra.mxu0 %v6909_v7  ;;  %v200_v7 = vld [vmem:[%s7576_s26 + $0xc] sm:$0xf] }
  0x34   : >> { %v250_v20 = vshrl.u32 %v200_v7, 16 }
  0x36   : >> { %7096 = vmatpush.bf16.msra.mxu1 %v6908_v8  ;;  %7097 = vmatpush.bf16.msra.mxu2 %v6908_v8  ;;  %v252_v41 = vrot.slane %v250_v20, 4  ;;  %v202_v20 = vld [vmem:[%s7576_s26 + $0x18] sm:$0xf] }
  0x37   : >> { %7098 = vmatpush.bf16.msra.mxu3 %v6908_v8  ;;  %2018 = vmatpush.bf16.msra.mxu0 %v6908_v8  ;;  %v6917_v8 = vld [vmem:[%s9356_s1 + $0x50] sm:$0xff] }
  0x3a   : >> { %7099 = vmatpush.bf16.msra.mxu1 %v6907_v9  ;;  %7100 = vmatpush.bf16.msra.mxu2 %v6907_v9 }
  0x3b   : >> { %7101 = vmatpush.bf16.msra.mxu3 %v6907_v9  ;;  %2019 = vmatpush.bf16.msra.mxu0 %v6907_v9  ;;  %v233_v9 = vrot.slane %v232_v56, 4  ;;  %v6962_v56 = vld [vmem:[%s9356_s1 + $0x1b8] sm:$0xff] }
  0x3d   : >> { %2030 = vmatmul.bf16.vlgmr.msra.gmra.mxu1 %v6885_v12  ;;  %2040 = vmatmul.bf16.vlgmr.msra.gmra.mxu2 %v6887_v13  ;;  %v247_v12 = vrot.slane %v245_v61, 5  ;;  %v5864_v13 = vrot.slane %v417_v3, 9  ;;  %v238_v33 = vsel %vm7680_vm4, %v233_v9, %v7632_v42  ;;  %v6940_v42 = vld [vmem:[%s9356_s1 + $0x108] sm:$0xff]  ;;  %v6939_v3 = vld [vmem:[%s9356_s1 + $0x100] sm:$0xff] }
  0x3e   : >> { %2110 = vmatpush.bf16.msrb.mxu2 %v6930_v10  ;;  %2061 = vmatpush.bf16.msrb.mxu1 %v6922_v11  ;;  %v7675_v10 = vld [vmem:[%s7576_s26 + $0x10] sm:$0xf]  ;;  %v243_v11 = vrot.slane %v242_v60, 4  ;;  %v1164_v50 = vunpack.c.l.b16 %v238_v33 }
  0x3f   : >> { %2050 = vmatmul.bf16.vlgmr.msra.gmra.mxu3 %v6889_v14  ;;  %2020 = vmatmul.bf16.vlgmr.msra.gmra.mxu0 %v6883_v15  ;;  %v456_v14 = vrot.slane %v454_v62, 4  ;;  %v5876_v15 = vld [vmem:[%s7576_s26 + $0x18] sm:$0xf]  ;;  %v259_v27 = vshll.u32 %v7675_v10, 16  ;;  %v263_v28 = vshrl.u32 %v7675_v10, 16 }
  0x40   : >> { %2159 = vmatpush.bf16.msrb.mxu3 %v6938_v16  ;;  %2208 = vmatpush.bf16.msrb.mxu0 %v6946_v17  ;;  %v457_v17 = vrot.slane %v7638_v45, 5  ;;  %v561_v31 = vshrl.u32 %v5876_v15, 16  ;;  %v564_v32 = vshll.u32 %v5876_v15, 16 }
  0x41   : >> { %v7729_v46 = vrot.slane %v259_v27, 5  ;;  %v265_v47 = vrot.slane %v263_v28, 4 }
  0x42   : >> { %2111 = vmatpush.bf16.msrb.mxu2 %v6929_v18  ;;  %2062 = vmatpush.bf16.msrb.mxu1 %v6921_v19  ;;  %v544_v18 = vrot.slane %v543_v4, 4  ;;  %v558_v19 = vrot.slane %v556_v5, 5  ;;  %v563_v52 = vrot.slane %v561_v31, 4  ;;  %v6977_v31 = vld [vmem:[%s9356_s1 + $0x230] sm:$0xff] }
  0x43   : >> { %v266_v5 = vor.u32 %v265_v47, %v7729_v46  ;;  %v6976_v47 = vld [vmem:[%s9356_s1 + $0x228] sm:$0xff] }
  0x44   : >> { %2160 = vmatpush.bf16.msrb.mxu3 %v6937_v22  ;;  %2209 = vmatpush.bf16.msrb.mxu0 %v6945_v23  ;;  %v6933_v22 = vld [vmem:[%s9356_s1 + $0xd0] sm:$0xff]  ;;  %v549_v40 = vsel %vm7680_vm4, %v544_v18, %v7645_v51 }
  0x45   : >> { %v6941_v23 = vld [vmem:[%s9356_s1 + $0x110] sm:$0xff]  ;;  %v1268_v60 = vunpack.c.l.b16 %v549_v40  ;;  %v5878_v40 = vld [vmem:[%s7576_s26 + $0x24] sm:$0xf] }
  0x46   : >> { %2112 = vmatpush.bf16.msrb.mxu2 %v6928_v25  ;;  %2063 = vmatpush.bf16.msrb.mxu1 %v6920_v26  ;;  %v554_v25 = vrot.slane %v553_v6, 4  ;;  %v253_v26 = vshll.u32 %v200_v7, 16  ;;  %v6970_v6 = vld [vmem:[%s9356_s1 + $0x1f8] sm:$0xff] }
  0x47   : >> { %v6978_v7 = vld [vmem:[%s9356_s1 + $0x238] sm:$0xff] }
  0x48   : >> { %2161 = vmatpush.bf16.msrb.mxu3 %v6936_v34  ;;  %2210 = vmatpush.bf16.msrb.mxu0 %v6944_v35  ;;  %v248_v34 = vsel %vm7680_vm4, %v243_v11, %v247_v12  ;;  %v570_v35 = vshll.u32 %v5877_v21, 16  ;;  %v559_v43 = vsel %vm7680_vm4, %v554_v25, %v558_v19  ;;  %v255_v45 = vrot.slane %v253_v26, 5  ;;  %v7772_v25 = vld [vmem:[%s7576_s26 + $0x1c] sm:$0xf] }
  0x49   : >> { %v1165_v51 = vunpack.c.l.b16 %v248_v34  ;;  %v1269_v61 = vunpack.c.l.b16 %v559_v43  ;;  %v274_v34 = vshrl.u32 %v202_v20, 16 }
  0x4a   : >> { %2113 = vmatpush.bf16.msrb.mxu2 %v6927_v38  ;;  %2064 = vmatpush.bf16.msrb.mxu1 %v6919_v39  ;;  %v455_v38 = vsel %vm7694_vm5, %v5864_v13, %v454_v62  ;;  %v458_v39 = vsel %vm7694_vm5, %v456_v14, %v457_v17  ;;  %v256_v4 = vor.u32 %v255_v45, %v252_v41  ;;  %v418_v13 = vld [vmem:[%s7576_s26 + $0xc] sm:$0xe]  ;;  %v5879_v45 = vld [vmem:[%s7576_s26 + $0x28] sm:$0xf] }
  0x4b   : >> { %v1180_v11 = vpack.c.b16 %v1165_v51, %v1164_v50  ;;  %v6891_v17 = vld [vmem:[%s7576_s26 + $0xc] sm:$0xff]  ;;  %v1284_v18 = vpack.c.b16 %v1269_v61, %v1268_v60  ;;  %v5865_v26 = vrot.slane %v418_v13, 9  ;;  %v276_v50 = vrot.slane %v274_v34, 4 }
  0x4c   : >> { %2162 = vmatpush.bf16.msrb.mxu3 %v6935_v44  ;;  %2211 = vmatpush.bf16.msrb.mxu0 %v6943_v48  ;;  %v7727_v44 = vld [vmem:[%s7576_s26 + $0x14] sm:$0x1]  ;;  %v6923_v48 = vld [vmem:[%s9356_s1 + $0x80] sm:$0xff]  ;;  %v257_v21 = vrot.slane %v256_v4, 4  ;;  %v6952_v41 = vld [vmem:[%s9356_s1 + $0x168] sm:$0xff] }
  0x4d   : >> { %2035 = vmatmul.bf16.gmra.mxu1 %v6886_v49  ;;  %2045 = vmatmul.bf16.gmra.mxu2 %v6888_v53  ;;  %v6915_v49 = vld [vmem:[%s9356_s1 + $0x40] sm:$0xff]  ;;  %v566_v53 = vrot.slane %v564_v32, 5  ;;  %v269_v62 = vshll.u32 %v7727_v44, 16  ;;  %v464_v28 = vrot.slane %v7727_v44, 5 }
  0x4e   : >> { %2114 = vmatpush.bf16.msrb.mxu2 %v6926_v54  ;;  %2065 = vmatpush.bf16.msrb.mxu1 %v6918_v55  ;;  %v1196_v54 = vunpack.c.l.b16 %v455_v38  ;;  %v1197_v55 = vunpack.c.l.b16 %v458_v39  ;;  %v262_v38 = vsel %vm7680_vm4, %v257_v21, %v7729_v46  ;;  %v6960_v39 = vld [vmem:[%s9356_s1 + $0x1a8] sm:$0xff] }
  0x4f   : >> { %2055 = vmatmul.bf16.gmra.mxu3 %v6890_v57  ;;  %2025 = vmatmul.bf16.gmra.mxu0 %v6884_v59  ;;  %v6954_v57 = vld [vmem:[%s9356_s1 + $0x178] sm:$0xff]  ;;  %v576_v59 = vrot.slane %v574_v36, 4  ;;  %v567_v9 = vor.u32 %v566_v53, %v563_v52  ;;  %v271_v19 = vrot.slane %v269_v62, 5  ;;  %v283_v36 = vshll.u32 %v7772_v25, 16  ;;  %v6968_v46 = vld [vmem:[%s9356_s1 + $0x1e8] sm:$0xff] }
  0x50   : >> { %2163 = vmatpush.bf16.msrb.mxu3 %v6934_v58  ;;  %2212 = vmatpush.bf16.msrb.mxu0 %v6942_v63  ;;  %v7743_v58 = vrot.slane %v570_v35, 5  ;;  %v5891_v63 = vld [vmem:[%s7576_s26 + $0x20] sm:$0x1]  ;;  %v1212_v12 = vpack.c.b16 %v1197_v55, %v1196_v54  ;;  %v277_v35 = vshll.u32 %v202_v20, 16  ;;  %v585_v55 = vshrl.u32 %v5878_v40, 16 }
  0x51   : >> { %v580_v15 = vshll.u32 %v5891_v63, 16  ;;  %v216_v52 = vld [vmem:[%s7576_s26 + $0x20] sm:$0x1]  ;;  %v7812_v53 = vrot.slane %v283_v36, 5  ;;  %v1166_v60 = vunpack.c.l.b16 %v262_v38 }
  0x52   : >> { %2115 = vmatpush.bf16.msrb.mxu2 %v6925_v2  ;;  %2066 = vmatpush.bf16.msrb.mxu1 %v6917_v8  ;;  %v6931_v2 = vld [vmem:[%s9356_s1 + $0xc0] sm:$0xff]  ;;  %v461_v8 = vrot.slane %v7675_v10, 5  ;;  %v577_v14 = vor.u32 %v576_v59, %v7743_v58  ;;  %v6961_v10 = vld [vmem:[%s9356_s1 + $0x1b0] sm:$0xff]  ;;  %v279_v51 = vrot.slane %v277_v35, 5  ;;  %v598_v59 = vshrl.u32 %v5879_v45, 16 }
  0x53   : >> { %v582_v33 = vrot.slane %v580_v15, 5  ;;  %v6959_v35 = vld [vmem:[%s9356_s1 + $0x1a0] sm:$0xff] }
  0x54   : >> { %2164 = vmatpush.bf16.msrb.mxu3 %v6933_v22  ;;  %2213 = vmatpush.bf16.msrb.mxu0 %v6941_v23  ;;  %v267_v22 = vrot.slane %v266_v5, 4  ;;  %v6953_v23 = vld [vmem:[%s9356_s1 + $0x170] sm:$0xff]  ;;  %v463_v27 = vrot.slane %v461_v8, 4  ;;  %v578_v32 = vrot.slane %v577_v14, 4  ;;  %v462_v43 = vsel %vm7694_vm5, %v5865_v26, %v461_v8  ;;  %v6967_v36 = vld [vmem:[%s9356_s1 + $0x1e0] sm:$0xff] }
  0x55   : >> { %v1198_v62 = vunpack.c.l.b16 %v462_v43  ;;  %v280_v4 = vor.u32 %v279_v51, %v276_v50 }
  0x56   : >> { %2116 = vmatpush.bf16.msrb.mxu2 %v6924_v29  ;;  %2067 = vmatpush.bf16.msrb.mxu1 %v6916_v30  ;;  %v568_v29 = vrot.slane %v567_v9, 4  ;;  %v6969_v30 = vld [vmem:[%s9356_s1 + $0x1f0] sm:$0xff]  ;;  %v465_v44 = vsel %vm7694_vm5, %v463_v27, %v464_v28  ;;  %v600_v9 = vrot.slane %v598_v59, 4  ;;  %v204_v28 = vld [vmem:[%s7576_s26 + $0x24] sm:$0xf] }
  0x58   : >> { %2165 = vmatpush.bf16.msrb.mxu3 %v6932_v37  ;;  %2214 = vmatpush.bf16.msrb.mxu0 %v6940_v42  ;;  %v287_v37 = vshrl.u32 %v7772_v25, 16  ;;  %v272_v42 = vsel %vm7680_vm4, %v267_v22, %v271_v19  ;;  %v281_v19 = vrot.slane %v280_v4, 4 }
  0x59   : >> { %v1167_v61 = vunpack.c.l.b16 %v272_v42  ;;  %v6975_v42 = vld [vmem:[%s9356_s1 + $0x220] sm:$0xff] }
  0x5a   : >> { %2117 = vmatpush.bf16.msrb.mxu2 %v6923_v48  ;;  %2068 = vmatpush.bf16.msrb.mxu1 %v6915_v49  ;;  %v573_v48 = vsel %vm7680_vm4, %v568_v29, %v7743_v58  ;;  %v583_v49 = vsel %vm7680_vm4, %v578_v32, %v582_v33  ;;  %v289_v54 = vrot.slane %v287_v37, 4  ;;  %v1199_v58 = vunpack.c.l.b16 %v465_v44  ;;  %v7824_v29 = vld [vmem:[%s7576_s26 + $0x28] sm:$0xf]  ;;  %v6951_v37 = vld [vmem:[%s9356_s1 + $0x160] sm:$0xff] }
  0x5b   : >> { %v1270_v63 = vunpack.c.l.b16 %v573_v48  ;;  %v1181_v13 = vpack.c.b16 %v1167_v61, %v1166_v60  ;;  %v286_v32 = vsel %vm7680_vm4, %v281_v19, %v7812_v53  ;;  %v217_v60 = vld [vmem:[%s7576_s26 + $0x2c] sm:$0x1]  ;;  %v6893_v19 = vld [vmem:[%s7576_s26 + $0x24] sm:$0xff] }
  0x5c   : >> { %2166 = vmatpush.bf16.msrb.mxu3 %v6931_v2  ;;  %2215 = vmatpush.bf16.msrb.mxu0 %v6939_v3  ;;  %v1271_v2 = vunpack.c.l.b16 %v583_v49  ;;  %v293_v3 = vshll.u32 %v216_v52, 16  ;;  %v290_v5 = vor.u32 %v289_v54, %v7812_v53  ;;  %v1213_v14 = vpack.c.b16 %v1199_v58, %v1198_v62 }
  0x5d   : >> { %2069 = vmatmul.bf16.vlgmr.msrb.gmra.mxu1 %v1180_v11  ;;  %2118 = vmatmul.bf16.vlgmr.msrb.gmra.mxu2 %v1212_v12  ;;  %v468_v11 = vrot.slane %v7772_v25, 5  ;;  %v5892_v12 = vld [vmem:[%s7576_s26 + $0x2c] sm:$0x1]  ;;  %v471_v25 = vrot.slane %v216_v52, 5  ;;  %v1168_v51 = vunpack.c.l.b16 %v286_v32 }
  0x5e   : >> { %2306 = vmatpush.bf16.msra.mxu2 %v6962_v56  ;;  %2257 = vmatpush.bf16.msra.mxu1 %v6954_v57  ;;  %v588_v56 = vshll.u32 %v5878_v40, 16  ;;  %v594_v57 = vshll.u32 %v5879_v45, 16  ;;  %v1285_v15 = vpack.c.b16 %v1271_v2, %v1270_v63  ;;  %v291_v20 = vrot.slane %v290_v5, 4 }
  0x5f   : >> { %2167 = vmatmul.bf16.vlgmr.msrb.gmra.mxu3 %v6891_v17  ;;  %2216 = vmatmul.bf16.vlgmr.msrb.gmra.mxu0 %v1284_v18  ;;  %v419_v17 = vld [vmem:[%s7576_s26 + $0x18] sm:$0xe]  ;;  %v295_v21 = vrot.slane %v293_v3, 5  ;;  %v470_v27 = vrot.slane %v468_v11, 4  ;;  %v298_v40 = vshrl.u32 %v204_v28, 16  ;;  %v307_v45 = vshll.u32 %v7824_v29, 16 }
  0x60   : >> { %2355 = vmatpush.bf16.msra.mxu3 %v6970_v6  ;;  %2404 = vmatpush.bf16.msra.mxu0 %v6978_v7  ;;  %v587_v6 = vrot.slane %v585_v55, 4  ;;  %v590_v7 = vrot.slane %v588_v56, 5  ;;  %v7815_v8 = vrot.slane %v594_v57, 5  ;;  %v6892_v18 = vld [vmem:[%s7576_s26 + $0x18] sm:$0xff]  ;;  %v5866_v26 = vrot.slane %v419_v17, 9 }
  0x61   : >> { %v296_v33 = vsel %vm7680_vm4, %v291_v20, %v295_v21  ;;  %v472_v44 = vsel %vm7694_vm5, %v470_v27, %v471_v25  ;;  %v300_v55 = vrot.slane %v298_v40, 4  ;;  %v7857_v61 = vrot.slane %v307_v45, 5  ;;  %v206_v21 = vld [vmem:[%s7576_s26 + $0x30] sm:$0xf] }
  0x62   : >> { %2307 = vmatpush.bf16.msra.mxu2 %v6961_v10  ;;  %2258 = vmatpush.bf16.msra.mxu1 %v6953_v23  ;;  %v591_v22 = vor.u32 %v590_v7, %v587_v6  ;;  %v601_v10 = vor.u32 %v600_v9, %v7815_v8  ;;  %v604_v23 = vshll.u32 %v5892_v12, 16  ;;  %v469_v43 = vsel %vm7694_vm5, %v5866_v26, %v468_v11  ;;  %v5893_v6 = vld [vmem:[%s7576_s26 + $0x38] sm:$0x1] }
  0x63   : >> { %v1169_v52 = vunpack.c.l.b16 %v296_v33  ;;  %v1200_v57 = vunpack.c.l.b16 %v469_v43  ;;  %v1201_v59 = vunpack.c.l.b16 %v472_v44  ;;  %v475_v12 = vrot.slane %v7824_v29, 5  ;;  %v5882_v43 = vld [vmem:[%s7576_s26 + $0x3c] sm:$0xf]  ;;  %v5883_v44 = vld [vmem:[%s7576_s26 + $0x40] sm:$0xf] }
  0x64   : >> { %2356 = vmatpush.bf16.msra.mxu3 %v6969_v30  ;;  %2405 = vmatpush.bf16.msra.mxu0 %v6977_v31  ;;  %v5880_v30 = vld [vmem:[%s7576_s26 + $0x30] sm:$0xf]  ;;  %v5881_v31 = vld [vmem:[%s7576_s26 + $0x34] sm:$0xf]  ;;  %v592_v34 = vrot.slane %v591_v22, 4  ;;  %v602_v38 = vrot.slane %v601_v10, 4 }
  0x65   : >> { %v612_v48 = vshll.u32 %v5880_v30, 16  ;;  %v618_v49 = vshll.u32 %v5881_v31, 16  ;;  %v622_v50 = vshrl.u32 %v5881_v31, 16  ;;  %v1182_v9 = vpack.c.b16 %v1169_v52, %v1168_v51  ;;  %v7904_v52 = vld [vmem:[%s7576_s26 + $0x38] sm:$0x1] }
  0x66   : >> { %2308 = vmatpush.bf16.msra.mxu2 %v6960_v39  ;;  %2259 = vmatpush.bf16.msra.mxu1 %v6952_v41  ;;  %v606_v39 = vrot.slane %v604_v23, 5  ;;  %v301_v41 = vshll.u32 %v204_v28, 16  ;;  %v597_v53 = vsel %vm7680_vm4, %v592_v34, %v7815_v8  ;;  %v317_v8 = vshll.u32 %v217_v60, 16  ;;  %v7869_v23 = vld [vmem:[%s7576_s26 + $0x34] sm:$0xf] }
  0x67   : >> { %v614_v63 = vrot.slane %v612_v48, 5  ;;  %v7859_v2 = vrot.slane %v618_v49, 5  ;;  %v624_v3 = vrot.slane %v622_v50, 4  ;;  %v1272_v4 = vunpack.c.l.b16 %v597_v53 }
  0x68   : >> { %2357 = vmatpush.bf16.msra.mxu3 %v6968_v46  ;;  %2406 = vmatpush.bf16.msra.mxu0 %v6976_v47  ;;  %v311_v46 = vshrl.u32 %v7824_v29, 16  ;;  %v609_v47 = vshrl.u32 %v5880_v30, 16  ;;  %v607_v54 = vsel %vm7680_vm4, %v602_v38, %v606_v39  ;;  %v303_v56 = vrot.slane %v301_v41, 5  ;;  %v6950_v38 = vld [vmem:[%s9356_s1 + $0x158] sm:$0xff] }
  0x69   : >> { %v1273_v5 = vunpack.c.l.b16 %v607_v54  ;;  %v625_v17 = vor.u32 %v624_v3, %v7859_v2  ;;  %v319_v10 = vrot.slane %v317_v8, 5  ;;  %v477_v25 = vrot.slane %v475_v12, 4  ;;  %v6974_v39 = vld [vmem:[%s9356_s1 + $0x218] sm:$0xff]  ;;  %v5894_v8 = vld [vmem:[%s7576_s26 + $0x44] sm:$0x1] }
  0x6a   : >> { %2309 = vmatpush.bf16.msra.mxu2 %v6959_v35  ;;  %2260 = vmatpush.bf16.msra.mxu1 %v6951_v37  ;;  %v313_v62 = vrot.slane %v311_v46, 4  ;;  %v611_v58 = vrot.slane %v609_v47, 4  ;;  %v304_v7 = vor.u32 %v303_v56, %v300_v55  ;;  %v478_v28 = vrot.slane %v217_v60, 5  ;;  %v6966_v37 = vld [vmem:[%s9356_s1 + $0x1d8] sm:$0xff] }
  0x6b   : >> { %v1286_v20 = vpack.c.b16 %v1273_v5, %v1272_v4  ;;  %v626_v30 = vrot.slane %v625_v17, 4  ;;  %v322_v32 = vshrl.u32 %v206_v21, 16  ;;  %v325_v33 = vshll.u32 %v206_v21, 16 }
  0x6c   : >> { %2358 = vmatpush.bf16.msra.mxu3 %v6967_v36  ;;  %2407 = vmatpush.bf16.msra.mxu0 %v6975_v42  ;;  %v314_v11 = vor.u32 %v313_v62, %v7857_v61  ;;  %v305_v22 = vrot.slane %v304_v7, 4  ;;  %v331_v34 = vshll.u32 %v7869_v23, 16  ;;  %v335_v35 = vshrl.u32 %v7869_v23, 16  ;;  %v6958_v36 = vld [vmem:[%s9356_s1 + $0x198] sm:$0xff] }
  0x6d   : >> { %2074 = vmatmul.bf16.gmra.mxu1 %v1181_v13  ;;  %2123 = vmatmul.bf16.gmra.mxu2 %v1213_v14  ;;  %v1214_v13 = vpack.c.b16 %v1201_v59, %v1200_v57  ;;  %v420_v14 = vld [vmem:[%s7576_s26 + $0x24] sm:$0xe]  ;;  %v479_v45 = vsel %vm7694_vm5, %v477_v25, %v478_v28  ;;  %v324_v48 = vrot.slane %v322_v32, 4  ;;  %v327_v49 = vrot.slane %v325_v33, 5  ;;  %v6949_v32 = vld [vmem:[%s9356_s1 + $0x150] sm:$0xff] }
  0x6e   : >> { %v315_v26 = vrot.slane %v314_v11, 4  ;;  %v5867_v27 = vrot.slane %v420_v14, 9  ;;  %v310_v40 = vsel %vm7680_vm4, %v305_v22, %v7857_v61  ;;  %2310 = vmatpush.bf16.msra.mxu2 %v6958_v36  ;;  %2261 = vmatpush.bf16.msra.mxu1 %v6950_v38  ;;  %v7901_v50 = vrot.slane %v331_v34, 5  ;;  %v6973_v38 = vld [vmem:[%s9356_s1 + $0x210] sm:$0xff] }
  0x6f   : >> { %2172 = vmatmul.bf16.gmra.mxu3 %v6892_v18  ;;  %2221 = vmatmul.bf16.gmra.mxu0 %v1285_v15  ;;  %v615_v15 = vor.u32 %v614_v63, %v611_v58  ;;  %v628_v18 = vshll.u32 %v5893_v6, 16  ;;  %v337_v51 = vrot.slane %v335_v35, 4  ;;  %v633_v53 = vshrl.u32 %v5882_v43, 16 }
  0x70   : >> { %v320_v41 = vsel %vm7680_vm4, %v315_v26, %v319_v10  ;;  %v476_v42 = vsel %vm7694_vm5, %v5867_v27, %v475_v12  ;;  %2359 = vmatpush.bf16.msra.mxu3 %v6966_v37  ;;  %2408 = vmatpush.bf16.msra.mxu0 %v6974_v39  ;;  %v636_v54 = vshll.u32 %v5882_v43, 16  ;;  %v642_v55 = vshll.u32 %v5883_v44, 16  ;;  %v6894_v12 = vld [vmem:[%s7576_s26 + $0x30] sm:$0xff]  ;;  %v208_v10 = vld [vmem:[%s7576_s26 + $0x3c] sm:$0xf] }
  0x71   : >> { %v616_v29 = vrot.slane %v615_v15, 4  ;;  %v630_v31 = vrot.slane %v628_v18, 5  ;;  %v646_v56 = vshrl.u32 %v5883_v44, 16  ;;  %v1170_v57 = vunpack.c.l.b16 %v310_v40  ;;  %v7914_v26 = vld [vmem:[%s7576_s26 + $0x40] sm:$0xf] }
  0x72   : >> { %v1171_v59 = vunpack.c.l.b16 %v320_v41  ;;  %v1202_v60 = vunpack.c.l.b16 %v476_v42  ;;  %v1203_v61 = vunpack.c.l.b16 %v479_v45  ;;  %v328_v63 = vor.u32 %v327_v49, %v324_v48  ;;  %v5884_v27 = vld [vmem:[%s7576_s26 + $0x48] sm:$0xf]  ;;  %v5885_v37 = vld [vmem:[%s7576_s26 + $0x4c] sm:$0xf]  ;;  %2262 = vmatpush.bf16.msra.mxu1 %v6949_v32 }
  0x73   : >> { %v621_v46 = vsel %vm7680_vm4, %v616_v29, %v7859_v2  ;;  %v631_v47 = vsel %vm7680_vm4, %v626_v30, %v630_v31  ;;  %v338_v2 = vor.u32 %v337_v51, %v7901_v50  ;;  %v341_v3 = vshll.u32 %v7904_v52, 16  ;;  %v6957_v30 = vld [vmem:[%s9356_s1 + $0x190] sm:$0xff]  ;;  %v6964_v32 = vld [vmem:[%s9356_s1 + $0x1c8] sm:$0xff] }
  0x74   : >> { %v1274_v62 = vunpack.c.l.b16 %v621_v46  ;;  %v1275_v58 = vunpack.c.l.b16 %v631_v47  ;;  %v635_v4 = vrot.slane %v633_v53, 4  ;;  %v638_v5 = vrot.slane %v636_v54, 5  ;;  %v6965_v31 = vld [vmem:[%s9356_s1 + $0x1d0] sm:$0xff]  ;;  %2311 = vmatpush.bf16.msra.mxu2 %v6957_v30  ;;  %2409 = vmatpush.bf16.msra.mxu0 %v6973_v38  ;;  %v219_v53 = vld [vmem:[%s7576_s26 + $0x44] sm:$0x1]  ;;  %v6956_v30 = vld [vmem:[%s9356_s1 + $0x188] sm:$0xff] }
  0x75   : >> { %v644_v6 = vrot.slane %v642_v55, 5  ;;  %v648_v7 = vrot.slane %v646_v56, 4  ;;  %v1215_v11 = vpack.c.b16 %v1203_v61, %v1202_v60  ;;  %v329_v14 = vrot.slane %v328_v63, 4  ;;  %2360 = vmatpush.bf16.msra.mxu3 %v6965_v31  ;;  %v5886_v31 = vld [vmem:[%s7576_s26 + $0x54] sm:$0xf] }
  0x76   : >> { %v343_v15 = vrot.slane %v341_v3, 5  ;;  %v482_v17 = vrot.slane %v7869_v23, 5  ;;  %v339_v18 = vrot.slane %v338_v2, 4  ;;  %v652_v22 = vshll.u32 %v5894_v8, 16 }
  0x77   : >> { %v649_v21 = vor.u32 %v648_v7, %v644_v6  ;;  %v334_v25 = vsel %vm7680_vm4, %v329_v14, %v7901_v50  ;;  %v485_v29 = vrot.slane %v7904_v52, 5  ;;  %v346_v39 = vshrl.u32 %v208_v10, 16 }
  0x78   : >> { %v484_v23 = vrot.slane %v482_v17, 4  ;;  %v344_v33 = vsel %vm7680_vm4, %v339_v18, %v343_v15  ;;  %v654_v36 = vrot.slane %v652_v22, 5  ;;  %v349_v40 = vshll.u32 %v208_v10, 16  ;;  %v422_v15 = vld [vmem:[%s7576_s26 + $0x3c] sm:$0xe]  ;;  %2312 = vmatpush.bf16.msra.mxu2 %v6956_v30  ;;  %v6963_v30 = vld [vmem:[%s9356_s1 + $0x1c0] sm:$0xff] }
  0x79   : >> { %v650_v35 = vrot.slane %v649_v21, 4  ;;  %v355_v41 = vshll.u32 %v7914_v26, 16  ;;  %v359_v42 = vshrl.u32 %v7914_v26, 16  ;;  %v657_v43 = vshrl.u32 %v5884_v27, 16  ;;  %v210_v22 = vld [vmem:[%s7576_s26 + $0x48] sm:$0xf]  ;;  %2361 = vmatpush.bf16.msra.mxu3 %v6964_v32 }
  0x7a   : >> { %v660_v44 = vshll.u32 %v5884_v27, 16  ;;  %v486_v46 = vsel %vm7694_vm5, %v484_v23, %v485_v29  ;;  %v666_v47 = vshll.u32 %v5885_v37, 16  ;;  %v670_v48 = vshrl.u32 %v5885_v37, 16  ;;  %v7959_v10 = vld [vmem:[%s7576_s26 + $0x4c] sm:$0xf] }
  0x7b   : >> { %v1172_v49 = vunpack.c.l.b16 %v334_v25  ;;  %v1173_v50 = vunpack.c.l.b16 %v344_v33  ;;  %v655_v52 = vsel %vm7680_vm4, %v650_v35, %v654_v36  ;;  %v348_v54 = vrot.slane %v346_v39, 4  ;;  %v5887_v37 = vld [vmem:[%s7576_s26 + $0x58] sm:$0xf] }
  0x7c   : >> { %v351_v55 = vrot.slane %v349_v40, 5  ;;  %v7947_v56 = vrot.slane %v355_v41, 5  ;;  %v1205_v60 = vunpack.c.l.b16 %v486_v46  ;;  %v659_v61 = vrot.slane %v657_v43, 4 }
  0x7d   : >> { %2079 = vmatmul.bf16.gmra.mxu1 %v1182_v9  ;;  %2128 = vmatmul.bf16.gmra.mxu2 %v1214_v13  ;;  %v1183_v9 = vpack.c.b16 %v1171_v59, %v1170_v57  ;;  %v1287_v13 = vpack.c.b16 %v1275_v58, %v1274_v62  ;;  %v361_v57 = vrot.slane %v359_v42, 4  ;;  %v662_v62 = vrot.slane %v660_v44, 5  ;;  %v6948_v44 = vld [vmem:[%s9356_s1 + $0x148] sm:$0xff] }
  0x7e   : >> { %v1277_v63 = vunpack.c.l.b16 %v655_v52  ;;  %v7949_v2 = vrot.slane %v666_v47, 5  ;;  %v672_v3 = vrot.slane %v670_v48, 4  ;;  %v1184_v8 = vpack.c.b16 %v1173_v50, %v1172_v49  ;;  %2263 = vmatpush.bf16.msra.mxu1 %v6948_v44  ;;  %2362 = vmatpush.bf16.msra.mxu3 %v6963_v30 }
  0x7f   : >> { %2177 = vmatmul.bf16.gmra.mxu3 %v6893_v19  ;;  %2226 = vmatmul.bf16.gmra.mxu0 %v1286_v20  ;;  %v421_v19 = vld [vmem:[%s7576_s26 + $0x30] sm:$0xe]  ;;  %v639_v20 = vor.u32 %v638_v5, %v635_v4  ;;  %v365_v4 = vshll.u32 %v219_v53, 16  ;;  %v5895_v5 = vld [vmem:[%s7576_s26 + $0x50] sm:$0x1]  ;;  %v362_v7 = vor.u32 %v361_v57, %v7947_v56  ;;  %v5869_v27 = vrot.slane %v422_v15, 9 }
  0x80   : >> { %v5868_v28 = vrot.slane %v421_v19, 9  ;;  %v676_v18 = vshll.u32 %v5895_v5, 16  ;;  %v370_v33 = vshrl.u32 %v210_v22, 16  ;;  %v379_v35 = vshll.u32 %v7959_v10, 16  ;;  %v7996_v5 = vld [vmem:[%s7576_s26 + $0x5c] sm:$0x1] }
  0x81   : >> { %v640_v34 = vrot.slane %v639_v20, 4  ;;  %v367_v19 = vrot.slane %v365_v4, 5  ;;  %v363_v21 = vrot.slane %v362_v7, 4  ;;  %v383_v36 = vshrl.u32 %v7959_v10, 16 }
  0x82   : >> { %v483_v45 = vsel %vm7694_vm5, %v5868_v28, %v482_v17  ;;  %v673_v17 = vor.u32 %v672_v3, %v7949_v2  ;;  %v678_v29 = vrot.slane %v676_v18, 5  ;;  %v681_v42 = vshrl.u32 %v5886_v31, 16 }
  0x83   : >> { %v645_v51 = vsel %vm7680_vm4, %v640_v34, %v644_v6  ;;  %v1204_v59 = vunpack.c.l.b16 %v483_v45  ;;  %v352_v6 = vor.u32 %v351_v55, %v348_v54  ;;  %v373_v34 = vshll.u32 %v210_v22, 16 }
  0x84   : >> { %v1276_v58 = vunpack.c.l.b16 %v645_v51  ;;  %v674_v23 = vrot.slane %v673_v17, 4  ;;  %v368_v39 = vsel %vm7680_vm4, %v363_v21, %v367_v19  ;;  %v684_v43 = vshll.u32 %v5886_v31, 16 }
  0x85   : >> { %v353_v20 = vrot.slane %v352_v6, 4  ;;  %v690_v47 = vshll.u32 %v5887_v37, 16  ;;  %v694_v48 = vshrl.u32 %v5887_v37, 16  ;;  %v372_v49 = vrot.slane %v370_v33, 4 }
  0x86   : >> { %v1288_v14 = vpack.c.b16 %v1277_v63, %v1276_v58  ;;  %v679_v46 = vsel %vm7680_vm4, %v674_v23, %v678_v29  ;;  %v375_v50 = vrot.slane %v373_v34, 5  ;;  %v7988_v51 = vrot.slane %v379_v35, 5  ;;  %v8004_v23 = vld [vmem:[%s7576_s26 + $0x58] sm:$0xf]  ;;  %v6955_v29 = vld [vmem:[%s9356_s1 + $0x180] sm:$0xff] }
  0x87   : >> { %v358_v38 = vsel %vm7680_vm4, %v353_v20, %v7947_v56  ;;  %v385_v52 = vrot.slane %v383_v36, 4  ;;  %v1175_v55 = vunpack.c.l.b16 %v368_v39  ;;  %v1279_v58 = vunpack.c.l.b16 %v679_v46  ;;  %2313 = vmatpush.bf16.msra.mxu2 %v6955_v29  ;;  %v5888_v35 = vld [vmem:[%s7576_s26 + $0x60] sm:$0xf]  ;;  %v5889_v36 = vld [vmem:[%s7576_s26 + $0x64] sm:$0xf] }
  0x88   : >> { %v1174_v54 = vunpack.c.l.b16 %v358_v38  ;;  %v692_v63 = vrot.slane %v690_v47, 5  ;;  %v376_v3 = vor.u32 %v375_v50, %v372_v49  ;;  %v496_v7 = vrot.slane %v7959_v10, 5 }
  0x89   : >> { %v386_v4 = vor.u32 %v385_v52, %v7988_v51  ;;  %v700_v17 = vshll.u32 %v7996_v5, 16  ;;  %v403_v39 = vshll.u32 %v8004_v23, 16  ;;  %v705_v44 = vshrl.u32 %v5888_v35, 16 }
  0x8a   : >> { %v377_v18 = vrot.slane %v376_v3, 4  ;;  %v498_v22 = vrot.slane %v496_v7, 4  ;;  %v714_v46 = vshll.u32 %v5889_v36, 16  ;;  %v718_v47 = vshrl.u32 %v5889_v36, 16 }
  0x8b   : >> { %v387_v19 = vrot.slane %v386_v4, 4 }
  0x8c   : >> { %v382_v31 = vsel %vm7680_vm4, %v377_v18, %v7988_v51 }
  0x8d   : >> { %2084 = vmatmul.bf16.gmra.mxu1 %v1183_v9  ;;  %2133 = vmatmul.bf16.gmra.mxu2 %v1215_v11  ;;  %v1216_v9 = vpack.c.b16 %v1205_v60, %v1204_v59  ;;  %v489_v11 = vrot.slane %v7914_v26, 5  ;;  %v492_v26 = vrot.slane %v219_v53, 5  ;;  %v6972_v53 = vld [vmem:[%s9356_s1 + $0x208] sm:$0xff]  ;;  %v220_v59 = vld [vmem:[%s7576_s26 + $0x50] sm:$0x1]  ;;  %v683_v60 = vrot.slane %v681_v42, 4 }
  0x8e   : >> { %2410 = vmatpush.bf16.msra.mxu0 %v6972_v53  ;;  %v389_v6 = vshll.u32 %v220_v59, 16  ;;  %v1176_v49 = vunpack.c.l.b16 %v382_v31 }
  0x8f   : >> { %2182 = vmatmul.bf16.gmra.mxu3 %v6894_v12  ;;  %2231 = vmatmul.bf16.gmra.mxu0 %v1287_v13  ;;  %v663_v12 = vor.u32 %v662_v62, %v659_v61  ;;  %v6895_v13 = vld [vmem:[%s7576_s26 + $0x3c] sm:$0xff]  ;;  %v491_v25 = vrot.slane %v489_v11, 4  ;;  %v490_v40 = vsel %vm7694_vm5, %v5869_v27, %v489_v11  ;;  %v686_v61 = vrot.slane %v684_v43, 5  ;;  %v423_v11 = vld [vmem:[%s7576_s26 + $0x48] sm:$0xe] }
  0x90   : >> { %v1206_v56 = vunpack.c.l.b16 %v490_v40  ;;  %v391_v20 = vrot.slane %v389_v6, 5  ;;  %v5870_v21 = vrot.slane %v423_v11, 9  ;;  %v499_v27 = vrot.slane %v220_v59, 5 }
  0x91   : >> { %v664_v28 = vrot.slane %v663_v12, 4  ;;  %v493_v41 = vsel %vm7694_vm5, %v491_v25, %v492_v26  ;;  %v687_v12 = vor.u32 %v686_v61, %v683_v60  ;;  %v212_v25 = vld [vmem:[%s7576_s26 + $0x54] sm:$0xf]  ;;  %v407_v40 = vshrl.u32 %v8004_v23, 16  ;;  %v221_v60 = vld [vmem:[%s7576_s26 + $0x5c] sm:$0x1] }
  0x92   : >> { %v1207_v57 = vunpack.c.l.b16 %v493_v41  ;;  %v392_v32 = vsel %vm7680_vm4, %v387_v19, %v391_v20  ;;  %v497_v33 = vsel %vm7694_vm5, %v5870_v21, %v496_v7  ;;  %v500_v34 = vsel %vm7694_vm5, %v498_v22, %v499_v27  ;;  %v6947_v41 = vld [vmem:[%s9356_s1 + $0x140] sm:$0xff]  ;;  %v5916_v22 = vld [vmem:[%s7576_s26 + $0x18] sm:$0xf]  ;;  %v8049_v27 = vld [vmem:[%s7576_s26 + $0x1c] sm:$0xf] }
  0x93   : >> { %v669_v45 = vsel %vm7680_vm4, %v664_v28, %v7949_v2  ;;  %v696_v2 = vrot.slane %v694_v48, 4  ;;  %v688_v10 = vrot.slane %v687_v12, 4  ;;  %v702_v28 = vrot.slane %v700_v17, 5  ;;  %2264 = vmatpush.bf16.msra.mxu1 %v6947_v41  ;;  %v6971_v48 = vld [vmem:[%s9356_s1 + $0x200] sm:$0xff] }
  0x94   : >> { %v1278_v62 = vunpack.c.l.b16 %v669_v45  ;;  %v394_v37 = vshrl.u32 %v212_v25, 16  ;;  %v397_v38 = vshll.u32 %v212_v25, 16  ;;  %v708_v45 = vshll.u32 %v5888_v35, 16  ;;  %2411 = vmatpush.bf16.msra.mxu0 %v6971_v48 }
  0x95   : >> { %v697_v15 = vor.u32 %v696_v2, %v692_v63  ;;  %v693_v42 = vsel %vm7680_vm4, %v688_v10, %v692_v63  ;;  %v1177_v50 = vunpack.c.l.b16 %v392_v32  ;;  %v1208_v51 = vunpack.c.l.b16 %v497_v33  ;;  %v8037_v2 = vld [vmem:[%s7576_s26 + $0x68] sm:$0x1] }
  0x96   : >> { %v1209_v52 = vunpack.c.l.b16 %v500_v34  ;;  %v396_v53 = vrot.slane %v394_v37, 4  ;;  %v707_v61 = vrot.slane %v705_v44, 4  ;;  %v720_v63 = vrot.slane %v718_v47, 4 }
  0x97   : >> { %v698_v26 = vrot.slane %v697_v15, 4  ;;  %v1186_v3 = vpack.c.b16 %v1177_v50, %v1176_v49  ;;  %v413_v12 = vshll.u32 %v221_v60, 16  ;;  %v424_v15 = vld [vmem:[%s7576_s26 + $0x54] sm:$0xe]  ;;  %v724_v19 = vshll.u32 %v8037_v2, 16 }
  0x98   : >> { %v1218_v4 = vpack.c.b16 %v1209_v52, %v1208_v51  ;;  %v5871_v25 = vrot.slane %v424_v15, 9  ;;  %v845_v32 = vshrl.u32 %v5916_v22, 16  ;;  %v848_v33 = vshll.u32 %v5916_v22, 16 }
  0x99   : >> { %v703_v43 = vsel %vm7680_vm4, %v698_v26, %v702_v28  ;;  %v415_v10 = vrot.slane %v413_v12, 5  ;;  %v506_v28 = vrot.slane %v221_v60, 5  ;;  %v726_v30 = vrot.slane %v724_v19, 5  ;;  %v5940_v12 = vld [vmem:[%s7576_s26 + $0x18] sm:$0xe] }
  0x9a   : >> { %v1281_v59 = vunpack.c.l.b16 %v703_v43  ;;  %v854_v34 = vshll.u32 %v8049_v27, 16  ;;  %v858_v35 = vshrl.u32 %v8049_v27, 16 }
  0x9c   : >> { %v856_v47 = vrot.slane %v854_v34, 5  ;;  %v860_v48 = vrot.slane %v858_v35, 4 }
  0x9d   : >> { %2089 = vmatmul.bf16.gmra.mxu1 %v1184_v8  ;;  %2138 = vmatmul.bf16.gmra.mxu2 %v1216_v9  ;;  %v1185_v8 = vpack.c.b16 %v1175_v55, %v1174_v54  ;;  %v1217_v9 = vpack.c.b16 %v1207_v57, %v1206_v56  ;;  %v399_v54 = vrot.slane %v397_v38, 5  ;;  %v405_v55 = vrot.slane %v403_v39, 5 }
  0x9e   : >> { %v409_v56 = vrot.slane %v407_v40, 4  ;;  %v1280_v57 = vunpack.c.l.b16 %v693_v42 }
  0x9f   : >> { %2187 = vmatmul.bf16.gmra.mxu3 %v6895_v13  ;;  %2236 = vmatmul.bf16.gmra.mxu0 %v1288_v14  ;;  %v6896_v13 = vld [vmem:[%s7576_s26 + $0x48] sm:$0xff]  ;;  %v1289_v14 = vpack.c.b16 %v1279_v58, %v1278_v62  ;;  %v710_v62 = vrot.slane %v708_v45, 5  ;;  %v716_v58 = vrot.slane %v714_v46, 5  ;;  %v400_v6 = vor.u32 %v399_v54, %v396_v53 }
  0xa0   : >> { %v410_v7 = vor.u32 %v409_v56, %v405_v55  ;;  %v1290_v11 = vpack.c.b16 %v1281_v59, %v1280_v57  ;;  %v847_v45 = vrot.slane %v845_v32, 4  ;;  %v850_v46 = vrot.slane %v848_v33, 5  ;;  %v7245_v57 = vld [vmem:[%s7576_s26 + $0x10] sm:$0xf] }
  0xa1   : >> { %v711_v17 = vor.u32 %v710_v62, %v707_v61  ;;  %v721_v18 = vor.u32 %v720_v63, %v716_v58  ;;  %v401_v20 = vrot.slane %v400_v6, 4  ;;  %v762_v59 = vrot.slane %v7245_v57, 5  ;;  %v5933_v57 = vld [vmem:[%s7576_s26 + $0x2c] sm:$0x1] }
  0xa2   : >> { %v411_v21 = vrot.slane %v410_v7, 4  ;;  %v851_v60 = vor.u32 %v850_v46, %v847_v45  ;;  %v861_v61 = vor.u32 %v860_v48, %v856_v47  ;;  %v1070_v6 = vrot.slane %v8049_v27, 5 }
  0xa3   : >> { %v722_v29 = vrot.slane %v721_v18, 4  ;;  %v406_v38 = vsel %vm7680_vm4, %v401_v20, %v405_v55  ;;  %v5932_v55 = vld [vmem:[%s7576_s26 + $0x20] sm:$0x1]  ;;  %v764_v19 = vrot.slane %v762_v59, 4 }
  0xa4   : >> { %v416_v39 = vsel %vm7680_vm4, %v411_v21, %v415_v10  ;;  %v1178_v49 = vunpack.c.l.b16 %v406_v38  ;;  %v852_v20 = vrot.slane %v851_v60, 4  ;;  %v862_v21 = vrot.slane %v861_v61, 4 }
  0xa5   : >> { %v727_v44 = vsel %vm7680_vm4, %v722_v29, %v726_v30  ;;  %v1179_v50 = vunpack.c.l.b16 %v416_v39  ;;  %v5948_v10 = vrot.slane %v5940_v12, 9  ;;  %v1072_v27 = vrot.slane %v1070_v6, 4 }
  0xa6   : >> { %v1283_v54 = vunpack.c.l.b16 %v727_v44  ;;  %v857_v33 = vsel %vm7680_vm4, %v852_v20, %v856_v47 }
  0xa7   : >> { %v1071_v35 = vsel %vm7694_vm5, %v5948_v10, %v1070_v6  ;;  %v1372_v48 = vunpack.c.l.b16 %v857_v33 }
  0xad   : >> { %2094 = vmatmul.bf16.gmra.mxu1 %v1185_v8  ;;  %2143 = vmatmul.bf16.gmra.mxu2 %v1217_v9  ;;  %v6897_v9 = vld [vmem:[%s7576_s26 + $0x54] sm:$0xff] }
  0xaf   : >> { %2192 = vmatmul.bf16.gmra.mxu3 %v6896_v13  ;;  %2241 = vmatmul.bf16.gmra.mxu0 %v1289_v14  ;;  %v503_v13 = vrot.slane %v8004_v23, 5  ;;  %v712_v23 = vrot.slane %v711_v17, 4 }
  0xb1   : >> { %v505_v26 = vrot.slane %v503_v13, 4  ;;  %v504_v40 = vsel %vm7694_vm5, %v5871_v25, %v503_v13  ;;  %v717_v43 = vsel %vm7680_vm4, %v712_v23, %v716_v58  ;;  %v1187_v58 = vpack.c.b16 %v1179_v50, %v1178_v49  ;;  %v7246_v13 = vld [vmem:[%s7576_s26 + $0x14] sm:$0x1] }
  0xb2   : >> { %v1210_v51 = vunpack.c.l.b16 %v504_v40  ;;  %v1282_v53 = vunpack.c.l.b16 %v717_v43  ;;  %v765_v15 = vrot.slane %v7246_v13, 5  ;;  %v1073_v25 = vrot.slane %v5932_v55, 5 }
  0xb3   : >> { %v507_v41 = vsel %vm7694_vm5, %v505_v26, %v506_v28  ;;  %v5918_v26 = vld [vmem:[%s7576_s26 + $0x24] sm:$0xf]  ;;  %v8090_v28 = vld [vmem:[%s7576_s26 + $0x28] sm:$0xf]  ;;  %v1404_v50 = vunpack.c.l.b16 %v1071_v35 }
  0xb4   : >> { %v1211_v52 = vunpack.c.l.b16 %v507_v41  ;;  %v766_v30 = vsel %vm7694_vm5, %v764_v19, %v765_v15  ;;  %v1074_v38 = vsel %vm7694_vm5, %v1072_v27, %v1073_v25  ;;  %v869_v40 = vshrl.u32 %v5918_v26, 16  ;;  %v5920_v27 = vld [vmem:[%s7576_s26 + $0x30] sm:$0xf]  ;;  %v8127_v25 = vld [vmem:[%s7576_s26 + $0x34] sm:$0xf] }
  0xb5   : >> { %v872_v41 = vshll.u32 %v5918_v26, 16  ;;  %v878_v43 = vshll.u32 %v8090_v28, 16  ;;  %v882_v44 = vshrl.u32 %v8090_v28, 16  ;;  %v1301_v47 = vunpack.c.l.b16 %v766_v30  ;;  %v7248_v26 = vld [vmem:[%s7576_s26 + $0x20] sm:$0x1] }
  0xb6   : >> { %v1219_v63 = vpack.c.b16 %v1211_v52, %v1210_v51  ;;  %v1405_v51 = vunpack.c.l.b16 %v1074_v38  ;;  %v871_v52 = vrot.slane %v869_v40, 4  ;;  %v888_v15 = vshll.u32 %v5933_v57, 16 }
  0xb7   : >> { %v1077_v20 = vrot.slane %v8090_v28, 5  ;;  %v1080_v38 = vrot.slane %v5933_v57, 5  ;;  %v893_v28 = vshrl.u32 %v5920_v27, 16 }
  0xba   : >> { %v8039_v8 = vpop.f32.mrf.mxu1 }
  0xbc   : >> { %v8043_v14 = vpop.f32.mrf.mxu0 }
  0xbd   : >> { %2099 = vmatmul.bf16.gmra.mxu1 %v1186_v3  ;;  %2148 = vmatmul.bf16.gmra.mxu2 %v1218_v4  ;;  %v5898_v3 = vld [vmem:[%s7576_s26 + $0xc] sm:$0xe]  ;;  %v864_v4 = vshll.u32 %v5932_v55, 16  ;;  %v884_v55 = vrot.slane %v882_v44, 4  ;;  %v906_v44 = vshrl.u32 %v8127_v25, 16 }
  0xbe   : >> { %v5906_v18 = vrot.slane %v5898_v3, 9  ;;  %v7247_v3 = vld [vmem:[%s7576_s26 + $0x1c] sm:$0xf] }
  0xbf   : >> { %2197 = vmatmul.bf16.gmra.mxu3 %v6897_v9  ;;  %2246 = vmatmul.bf16.gmra.mxu0 %v1290_v11  ;;  %v6898_v9 = vld [vmem:[%s7576_s26 + $0x60] sm:$0xff]  ;;  %v1291_v11 = vpack.c.b16 %v1283_v54, %v1282_v53  ;;  %v866_v22 = vrot.slane %v864_v4, 5  ;;  %v874_v53 = vrot.slane %v872_v41, 5  ;;  %v880_v54 = vrot.slane %v878_v43, 5 }
  0xc0   : >> { %v8051_v31 = vpop.f32.mrf.mxu2  ;;  %v763_v29 = vsel %vm7694_vm5, %v5906_v18, %v762_v59  ;;  %v769_v4 = vrot.slane %v7247_v3, 5  ;;  %v896_v41 = vshll.u32 %v5920_v27, 16  ;;  %v902_v43 = vshll.u32 %v8127_v25, 16 }
  0xc1   : >> { %v867_v34 = vsel %vm7680_vm4, %v862_v21, %v866_v22  ;;  %v1300_v46 = vunpack.c.l.b16 %v763_v29  ;;  %v875_v12 = vor.u32 %v874_v53, %v871_v52  ;;  %v885_v13 = vor.u32 %v884_v55, %v880_v54  ;;  %v5941_v21 = vld [vmem:[%s7576_s26 + $0x24] sm:$0xe] }
  0xc2   : >> { %v8055_v36 = vpop.f32.mrf.mxu3  ;;  %v8057_v37 = vpop.f32.mrf.mxu1  ;;  %v1373_v49 = vunpack.c.l.b16 %v867_v34  ;;  %v771_v10 = vrot.slane %v769_v4, 4  ;;  %v772_v29 = vrot.slane %v7248_v26, 5  ;;  %v890_v34 = vrot.slane %v888_v15, 5 }
  0xc3   : >> { %v1316_v61 = vpack.c.b16 %v1301_v47, %v1300_v46  ;;  %v876_v30 = vrot.slane %v875_v12, 4  ;;  %v886_v33 = vrot.slane %v885_v13, 4  ;;  %v5949_v35 = vrot.slane %v5941_v21, 9 }
  0xc4   : >> { %v8067_v42 = vpop.f32.mrf.mxu0  ;;  %v898_v3 = vrot.slane %v896_v41, 5 }
  0xc5   : >> { %v891_v52 = vsel %vm7680_vm4, %v886_v33, %v890_v34 }
  0xc6   : >> { %v1375_v13 = vunpack.c.l.b16 %v891_v52 }
  0xc8   : >> { %v8074_v56 = vpop.f32.mrf.mxu2 }
  0xca   : >> { %v8077_v62 = vpop.f32.mrf.mxu3  ;;  %v8081_v7 = vpop.f32.mrf.mxu1 }
  0xcc   : >> { %v8086_v17 = vpop.f32.mrf.mxu0 }
  0xcd   : >> { %2104 = vmatmul.bf16.gmra.mxu1 %v1187_v58  ;;  %2153 = vmatmul.bf16.gmra.mxu2 %v1219_v63  ;;  %v6899_v58 = vld [vmem:[%s7576_s26 + $0x18] sm:$0xff]  ;;  %v1388_v63 = vpack.c.b16 %v1373_v49, %v1372_v48 }
  0xcf   : >> { %2202 = vmatmul.bf16.gmra.mxu3 %v6898_v9  ;;  %2251 = vmatmul.bf16.gmra.mxu0 %v1291_v11  ;;  %v1420_v9 = vpack.c.b16 %v1405_v51, %v1404_v50  ;;  %v5899_v11 = vld [vmem:[%s7576_s26 + $0x18] sm:$0xe]  ;;  %v773_v50 = vsel %vm7694_vm5, %v771_v10, %v772_v29  ;;  %v881_v51 = vsel %vm7680_vm4, %v876_v30, %v880_v54  ;;  %v908_v54 = vrot.slane %v906_v44, 4  ;;  %v5900_v10 = vld [vmem:[%s7576_s26 + $0x24] sm:$0xe] }
  0xd0   : >> { %v8092_v23 = vpop.f32.mrf.mxu2  ;;  %v5907_v22 = vrot.slane %v5899_v11, 9  ;;  %v5934_v11 = vld [vmem:[%s7576_s26 + $0x38] sm:$0x1] }
  0xd1   : >> { %v912_v29 = vshll.u32 %v5934_v11, 16 }
  0xd2   : >> { %v8098_v32 = vpop.f32.mrf.mxu3  ;;  %v8108_v39 = vpop.f32.mrf.mxu1  ;;  %v770_v49 = vsel %vm7694_vm5, %v5907_v22, %v769_v4  ;;  %v8145_v4 = vrot.slane %v902_v43, 5 }
  0xd3   : >> { %v914_v52 = vrot.slane %v912_v29, 5 }
  0xd4   : >> { %v8112_v45 = vpop.f32.mrf.mxu0  ;;  %v909_v26 = vor.u32 %v908_v54, %v8145_v4 }
  0xd8   : >> { %v8115_v59 = vpop.f32.mrf.mxu2 }
  0xda   : >> { %v8117_v60 = vpop.f32.mrf.mxu3  ;;  %v2070_v6 = vpop.f32.mrf.mxu1 }
  0xdb   : >> { %v2071_v18 = vadd.f32 %v2070_v6, %v8043_v14  ;;  %v1079_v14 = vrot.slane %v1077_v20, 4  ;;  %v1302_v6 = vunpack.c.l.b16 %v770_v49 }
  0xdc   : >> { %v2217_v19 = vpop.f32.mrf.mxu0 }
  0xdd   : >> { %2265 = vmatmul.bf16.vlgmr.msra.gmra.mxu1 %v1316_v61  ;;  %2314 = vmatmul.bf16.vlgmr.msra.gmra.mxu2 %v6899_v58  ;;  %v1078_v61 = vsel %vm7694_vm5, %v5949_v35, %v1077_v20  ;;  %v1081_v58 = vsel %vm7694_vm5, %v1079_v14, %v1080_v38  ;;  %v7249_v20 = vld [vmem:[%s7576_s26 + $0x28] sm:$0xf] }
  0xde   : >> { %v1406_v15 = vunpack.c.l.b16 %v1078_v61  ;;  %v776_v21 = vrot.slane %v7249_v20, 5  ;;  %v6900_v35 = vld [vmem:[%s7576_s26 + $0x24] sm:$0xff] }
  0xdf   : >> { %2363 = vmatmul.bf16.vlgmr.msra.gmra.mxu3 %v1388_v63  ;;  %2412 = vmatmul.bf16.vlgmr.msra.gmra.mxu0 %v1420_v9  ;;  %v895_v63 = vrot.slane %v893_v28, 4  ;;  %v1303_v9 = vunpack.c.l.b16 %v773_v50  ;;  %v5942_v28 = vld [vmem:[%s7576_s26 + $0x30] sm:$0xe] }
  0xe0   : >> { %v2119_v40 = vpop.f32.mrf.mxu2 }
  0xe1   : >> { %v2120_v46 = vadd.f32 %v2119_v40, %v2071_v18  ;;  %v1407_v18 = vunpack.c.l.b16 %v1081_v58  ;;  %v899_v27 = vor.u32 %v898_v3, %v895_v63  ;;  %v1317_v34 = vpack.c.b16 %v1303_v9, %v1302_v6  ;;  %v8162_v58 = vld [vmem:[%s7576_s26 + $0x40] sm:$0xf] }
  0xe2   : >> { %v2168_v47 = vpop.f32.mrf.mxu3  ;;  %v2072_v48 = vpop.f32.mrf.mxu1 }
  0xe3   : >> { %v2169_v53 = vadd.f32 %v2168_v47, %v2120_v46  ;;  %v2073_v55 = vadd.f32 %v2072_v48, %v8067_v42  ;;  %v1374_v42 = vunpack.c.l.b16 %v881_v51  ;;  %v1421_v40 = vpack.c.b16 %v1407_v18, %v1406_v15  ;;  %v7250_v48 = vld [vmem:[%s7576_s26 + $0x2c] sm:$0x1] }
  0xe4   : >> { %v2219_v57 = vpop.f32.mrf.mxu0  ;;  %v5908_v46 = vrot.slane %v5900_v10, 9  ;;  %v778_v47 = vrot.slane %v776_v21, 4  ;;  %v779_v49 = vrot.slane %v7250_v48, 5  ;;  %v900_v50 = vrot.slane %v899_v27, 4  ;;  %v6901_v48 = vld [vmem:[%s7576_s26 + $0x30] sm:$0xff] }
  0xe5   : >> { %v8148_v12 = vadd.f32 %v2217_v19, %v2169_v53  ;;  %v1084_v19 = vrot.slane %v8127_v25, 5  ;;  %v1389_v38 = vpack.c.b16 %v1375_v13, %v1374_v42  ;;  %v910_v51 = vrot.slane %v909_v26, 4 }
  0xe6   : >> { %v5950_v25 = vrot.slane %v5942_v28, 9  ;;  %v777_v3 = vsel %vm7694_vm5, %v5908_v46, %v776_v21  ;;  %v780_v54 = vsel %vm7694_vm5, %v778_v47, %v779_v49  ;;  %v905_v6 = vsel %vm7680_vm4, %v900_v50, %v8145_v4  ;;  %v7251_v50 = vld [vmem:[%s7576_s26 + $0x34] sm:$0xf] }
  0xe7   : >> { %v1086_v53 = vrot.slane %v1084_v19, 4  ;;  %v926_v21 = vshll.u32 %v8162_v58, 16  ;;  %v1304_v26 = vunpack.c.l.b16 %v777_v3  ;;  %v1305_v29 = vunpack.c.l.b16 %v780_v54 }
  0xe8   : >> { %v2121_v22 = vpop.f32.mrf.mxu2  ;;  %v1085_v42 = vsel %vm7694_vm5, %v5950_v25, %v1084_v19  ;;  %v5901_v25 = vld [vmem:[%s7576_s26 + $0x30] sm:$0xe] }
  0xe9   : >> { %v2122_v30 = vadd.f32 %v2121_v22, %v2073_v55  ;;  %v1087_v55 = vrot.slane %v5934_v11, 5  ;;  %v930_v22 = vshrl.u32 %v8162_v58, 16  ;;  %v1318_v47 = vpack.c.b16 %v1305_v29, %v1304_v26 }
  0xea   : >> { %v2170_v33 = vpop.f32.mrf.mxu3  ;;  %v2075_v14 = vpop.f32.mrf.mxu1 }
  0xeb   : >> { %v2171_v41 = vadd.f32 %v2170_v33, %v2122_v30  ;;  %v2076_v43 = vadd.f32 %v2075_v14, %v8086_v17  ;;  %v5922_v17 = vld [vmem:[%s7576_s26 + $0x3c] sm:$0xf]  ;;  %v1088_v13 = vsel %vm7694_vm5, %v1086_v53, %v1087_v55  ;;  %v1376_v30 = vunpack.c.l.b16 %v905_v6 }
  0xec   : >> { %v2222_v44 = vpop.f32.mrf.mxu0  ;;  %v917_v18 = vshrl.u32 %v5922_v17, 16  ;;  %v920_v20 = vshll.u32 %v5922_v17, 16  ;;  %v932_v28 = vrot.slane %v930_v22, 4  ;;  %v1091_v6 = vrot.slane %v8162_v58, 5 }
  0xed   : >> { %2270 = vmatmul.bf16.gmra.mxu1 %v1317_v34  ;;  %2319 = vmatmul.bf16.gmra.mxu2 %v6900_v35  ;;  %v8158_v61 = vadd.f32 %v2219_v57, %v2171_v41  ;;  %v915_v57 = vsel %vm7680_vm4, %v910_v51, %v914_v52  ;;  %v1408_v34 = vunpack.c.l.b16 %v1085_v42  ;;  %v1409_v35 = vunpack.c.l.b16 %v1088_v13  ;;  %v5935_v41 = vld [vmem:[%s7576_s26 + $0x44] sm:$0x1]  ;;  %v5924_v42 = vld [vmem:[%s7576_s26 + $0x48] sm:$0xf]  ;;  %v8194_v13 = vld [vmem:[%s7576_s26 + $0x4c] sm:$0xf] }
  0xee   : >> { %v1377_v33 = vunpack.c.l.b16 %v915_v57  ;;  %v919_v14 = vrot.slane %v917_v18, 4  ;;  %v783_v51 = vrot.slane %v7251_v50, 5  ;;  %v936_v17 = vshll.u32 %v5935_v41, 16  ;;  %v7252_v18 = vld [vmem:[%s7576_s26 + $0x38] sm:$0x1] }
  0xef   : >> { %2368 = vmatmul.bf16.gmra.mxu3 %v1389_v38  ;;  %2417 = vmatmul.bf16.gmra.mxu0 %v1421_v40  ;;  %v922_v38 = vrot.slane %v920_v20, 5  ;;  %v8182_v40 = vrot.slane %v926_v21, 5  ;;  %v786_v20 = vrot.slane %v7252_v18, 5  ;;  %v1094_v58 = vrot.slane %v5935_v41, 5 }
  0xf0   : >> { %v2124_v63 = vpop.f32.mrf.mxu2  ;;  %v1390_v49 = vpack.c.b16 %v1377_v33, %v1376_v30  ;;  %v785_v57 = vrot.slane %v783_v51, 4  ;;  %v941_v29 = vshrl.u32 %v5924_v42, 16  ;;  %v944_v30 = vshll.u32 %v5924_v42, 16 }
  0xf1   : >> { %v2125_v9 = vadd.f32 %v2124_v63, %v2076_v43  ;;  %v923_v53 = vor.u32 %v922_v38, %v919_v14  ;;  %v933_v55 = vor.u32 %v932_v28, %v8182_v40  ;;  %v950_v33 = vshll.u32 %v8194_v13, 16 }
  0xf2   : >> { %v2173_v11 = vpop.f32.mrf.mxu3  ;;  %v2077_v15 = vpop.f32.mrf.mxu1  ;;  %v787_v28 = vsel %vm7694_vm5, %v785_v57, %v786_v20  ;;  %v943_v50 = vrot.slane %v941_v29, 4  ;;  %v5902_v57 = vld [vmem:[%s7576_s26 + $0x3c] sm:$0xe]  ;;  %v5944_v29 = vld [vmem:[%s7576_s26 + $0x48] sm:$0xe] }
  0xf3   : >> { %v2174_v4 = vadd.f32 %v2173_v11, %v2125_v9  ;;  %v2078_v10 = vadd.f32 %v2077_v15, %v8112_v45  ;;  %v5943_v9 = vld [vmem:[%s7576_s26 + $0x3c] sm:$0xe]  ;;  %v5909_v11 = vrot.slane %v5901_v25, 9  ;;  %v924_v21 = vrot.slane %v923_v53, 4  ;;  %v5936_v53 = vld [vmem:[%s7576_s26 + $0x50] sm:$0x1] }
  0xf4   : >> { %v2224_v27 = vpop.f32.mrf.mxu0  ;;  %v934_v22 = vrot.slane %v933_v55, 4  ;;  %v1307_v25 = vunpack.c.l.b16 %v787_v28  ;;  %v960_v20 = vshll.u32 %v5936_v53, 16 }
  0xf5   : >> { %v8180_v19 = vadd.f32 %v2222_v44, %v2174_v4  ;;  %v1422_v44 = vpack.c.b16 %v1409_v35, %v1408_v34  ;;  %v5951_v4 = vrot.slane %v5943_v9, 9  ;;  %v954_v34 = vshrl.u32 %v8194_v13, 16 }
  0xf6   : >> { %v784_v38 = vsel %vm7694_vm5, %v5909_v11, %v783_v51  ;;  %v929_v41 = vsel %vm7680_vm4, %v924_v21, %v8182_v40  ;;  %v946_v51 = vrot.slane %v944_v30, 5 }
  0xf7   : >> { %v956_v40 = vrot.slane %v954_v34, 4 }
  0xf8   : >> { %v2126_v43 = vpop.f32.mrf.mxu2  ;;  %v947_v42 = vor.u32 %v946_v51, %v943_v50 }
  0xf9   : >> { %v2127_v45 = vadd.f32 %v2126_v43, %v2078_v10  ;;  %v1093_v10 = vrot.slane %v1091_v6, 4 }
  0xfa   : >> { %v2175_v46 = vpop.f32.mrf.mxu3  ;;  %v2080_v52 = vpop.f32.mrf.mxu1  ;;  %v948_v28 = vrot.slane %v947_v42, 4 }
  0xfb   : >> { %v2176_v63 = vadd.f32 %v2175_v46, %v2127_v45  ;;  %v2081_v3 = vadd.f32 %v2080_v52, %v8039_v8  ;;  %v938_v8 = vrot.slane %v936_v17, 5  ;;  %v8215_v52 = vrot.slane %v950_v33, 5 }
  0xfc   : >> { %v2227_v54 = vpop.f32.mrf.mxu0 }
  0xfd   : >> { %2275 = vmatmul.bf16.gmra.mxu1 %v1318_v47  ;;  %2324 = vmatmul.bf16.gmra.mxu2 %v6901_v48  ;;  %v8196_v15 = vadd.f32 %v2224_v27, %v2176_v63  ;;  %v939_v43 = vsel %vm7680_vm4, %v934_v22, %v938_v8  ;;  %v1092_v48 = vsel %vm7694_vm5, %v5951_v4, %v1091_v6  ;;  %v7253_v6 = vld [vmem:[%s7576_s26 + $0x40] sm:$0xf] }
  0xfe   : >> { %v1379_v17 = vunpack.c.l.b16 %v939_v43  ;;  %v1410_v63 = vunpack.c.l.b16 %v1092_v48  ;;  %v790_v9 = vrot.slane %v7253_v6, 5  ;;  %v957_v18 = vor.u32 %v956_v40, %v8215_v52  ;;  %v6902_v4 = vld [vmem:[%s7576_s26 + $0x3c] sm:$0xff] }
  0xff   : >> { %2373 = vmatmul.bf16.gmra.mxu3 %v1390_v49  ;;  %2422 = vmatmul.bf16.gmra.mxu0 %v1422_v44  ;;  %v1095_v49 = vsel %vm7694_vm5, %v1093_v10, %v1094_v58  ;;  %v1306_v44 = vunpack.c.l.b16 %v784_v38  ;;  %v962_v43 = vrot.slane %v960_v20, 5 }
 0x100   : >> { %v2129_v26 = vpop.f32.mrf.mxu2 }
 0x101   : >> { %v2130_v35 = vadd.f32 %v2129_v26, %v2081_v3  ;;  %v1411_v3 = vunpack.c.l.b16 %v1095_v49  ;;  %v1319_v8 = vpack.c.b16 %v1307_v25, %v1306_v44  ;;  %v8232_v49 = vld [vmem:[%s7576_s26 + $0x58] sm:$0xf]  ;;  %v953_v44 = vsel %vm7680_vm4, %v948_v28, %v8215_v52  ;;  %v7255_v28 = vld [vmem:[%s7576_s26 + $0x4c] sm:$0xf] }
 0x102   : >> { %v2178_v27 = vpop.f32.mrf.mxu3  ;;  %v2082_v14 = vpop.f32.mrf.mxu1 }
 0x103   : >> { %v2179_v45 = vadd.f32 %v2178_v27, %v2130_v35  ;;  %v2083_v46 = vadd.f32 %v2082_v14, %v8057_v37  ;;  %v1378_v37 = vunpack.c.l.b16 %v929_v41  ;;  %v1423_v26 = vpack.c.b16 %v1411_v3, %v1410_v63  ;;  %v7254_v14 = vld [vmem:[%s7576_s26 + $0x44] sm:$0x1] }
 0x104   : >> { %v2229_v47 = vpop.f32.mrf.mxu0  ;;  %v5910_v35 = vrot.slane %v5902_v57, 9  ;;  %v792_v27 = vrot.slane %v790_v9, 4  ;;  %v793_v38 = vrot.slane %v7254_v14, 5  ;;  %v958_v41 = vrot.slane %v957_v18, 4  ;;  %v6903_v14 = vld [vmem:[%s7576_s26 + $0x48] sm:$0xff] }
 0x105   : >> { %v8218_v55 = vadd.f32 %v2227_v54, %v2179_v45  ;;  %v1098_v54 = vrot.slane %v8194_v13, 5  ;;  %v1391_v58 = vpack.c.b16 %v1379_v17, %v1378_v37  ;;  %v5952_v13 = vrot.slane %v5944_v29, 9 }
 0x106   : >> { %v791_v51 = vsel %vm7694_vm5, %v5910_v35, %v790_v9  ;;  %v794_v40 = vsel %vm7694_vm5, %v792_v27, %v793_v38  ;;  %v974_v9 = vshll.u32 %v8232_v49, 16 }
 0x107   : >> { %v1100_v45 = vrot.slane %v1098_v54, 4  ;;  %v1099_v37 = vsel %vm7694_vm5, %v5952_v13, %v1098_v54  ;;  %v1308_v18 = vunpack.c.l.b16 %v791_v51  ;;  %v1309_v20 = vunpack.c.l.b16 %v794_v40  ;;  %v5903_v13 = vld [vmem:[%s7576_s26 + $0x48] sm:$0xe] }
 0x108   : >> { %v2131_v11 = vpop.f32.mrf.mxu2  ;;  %v1105_v40 = vrot.slane %v8232_v49, 5 }
 0x109   : >> { %v2132_v21 = vadd.f32 %v2131_v11, %v2083_v46  ;;  %v1101_v46 = vrot.slane %v5936_v53, 5  ;;  %v978_v11 = vshrl.u32 %v8232_v49, 16  ;;  %v1320_v27 = vpack.c.b16 %v1309_v20, %v1308_v18 }
 0x10a   : >> { %v2180_v22 = vpop.f32.mrf.mxu3  ;;  %v2085_v10 = vpop.f32.mrf.mxu1 }
 0x10b   : >> { %v2181_v30 = vadd.f32 %v2180_v22, %v2132_v21  ;;  %v2086_v33 = vadd.f32 %v2085_v10, %v8081_v7  ;;  %v5926_v7 = vld [vmem:[%s7576_s26 + $0x54] sm:$0xf]  ;;  %v1102_v17 = vsel %vm7694_vm5, %v1100_v45, %v1101_v46  ;;  %v1380_v21 = vunpack.c.l.b16 %v953_v44 }
 0x10c   : >> { %v2232_v34 = vpop.f32.mrf.mxu0  ;;  %v965_v3 = vshrl.u32 %v5926_v7, 16  ;;  %v968_v6 = vshll.u32 %v5926_v7, 16  ;;  %v980_v29 = vrot.slane %v978_v11, 4  ;;  %v5945_v44 = vld [vmem:[%s7576_s26 + $0x54] sm:$0xe] }
 0x10d   : >> { %2280 = vmatmul.bf16.gmra.mxu1 %v1319_v8  ;;  %2329 = vmatmul.bf16.gmra.mxu2 %v6902_v4  ;;  %v8228_v48 = vadd.f32 %v2229_v47, %v2181_v30  ;;  %v963_v47 = vsel %vm7680_vm4, %v958_v41, %v962_v43  ;;  %v1412_v8 = vunpack.c.l.b16 %v1099_v37  ;;  %v1413_v4 = vunpack.c.l.b16 %v1102_v17  ;;  %v5937_v30 = vld [vmem:[%s7576_s26 + $0x5c] sm:$0x1]  ;;  %v8263_v37 = vld [vmem:[%s7576_s26 + $0x64] sm:$0xf] }
 0x10e   : >> { %v1381_v22 = vunpack.c.l.b16 %v963_v47  ;;  %v967_v10 = vrot.slane %v965_v3, 4  ;;  %v797_v41 = vrot.slane %v7255_v28, 5  ;;  %v984_v7 = vshll.u32 %v5937_v30, 16  ;;  %v5928_v47 = vld [vmem:[%s7576_s26 + $0x60] sm:$0xf] }
 0x10f   : >> { %2378 = vmatmul.bf16.gmra.mxu3 %v1391_v58  ;;  %2427 = vmatmul.bf16.gmra.mxu0 %v1423_v26  ;;  %v970_v58 = vrot.slane %v968_v6, 5  ;;  %v8252_v26 = vrot.slane %v974_v9, 5  ;;  %v1424_v43 = vpack.c.b16 %v1413_v4, %v1412_v8  ;;  %v5953_v49 = vrot.slane %v5945_v44, 9 }
 0x110   : >> { %v2134_v50 = vpop.f32.mrf.mxu2  ;;  %v1392_v38 = vpack.c.b16 %v1381_v22, %v1380_v21  ;;  %v986_v11 = vrot.slane %v984_v7, 5  ;;  %v1108_v18 = vrot.slane %v5937_v30, 5  ;;  %v989_v21 = vshrl.u32 %v5928_v47, 16 }
 0x111   : >> { %v2135_v25 = vadd.f32 %v2134_v50, %v2086_v33  ;;  %v971_v45 = vor.u32 %v970_v58, %v967_v10  ;;  %v981_v46 = vor.u32 %v980_v29, %v8252_v26  ;;  %v992_v22 = vshll.u32 %v5928_v47, 16 }
 0x112   : >> { %v2183_v53 = vpop.f32.mrf.mxu3  ;;  %v2087_v63 = vpop.f32.mrf.mxu1  ;;  %v998_v8 = vshll.u32 %v8263_v37, 16 }
 0x113   : >> { %v2184_v52 = vadd.f32 %v2183_v53, %v2135_v25  ;;  %v2088_v57 = vadd.f32 %v2087_v63, %v8108_v39  ;;  %v5911_v25 = vrot.slane %v5903_v13, 9  ;;  %v799_v53 = vrot.slane %v797_v41, 4  ;;  %v7256_v63 = vld [vmem:[%s7576_s26 + $0x50] sm:$0x1]  ;;  %v5938_v13 = vld [vmem:[%s7576_s26 + $0x68] sm:$0x1] }
 0x114   : >> { %v2234_v42 = vpop.f32.mrf.mxu0  ;;  %v800_v3 = vrot.slane %v7256_v63, 5  ;;  %v972_v6 = vrot.slane %v971_v45, 4  ;;  %v982_v9 = vrot.slane %v981_v46, 4  ;;  %v994_v28 = vrot.slane %v992_v22, 5  ;;  %v5904_v63 = vld [vmem:[%s7576_s26 + $0x54] sm:$0xe] }
 0x115   : >> { %v8250_v54 = vadd.f32 %v2232_v34, %v2184_v52  ;;  %v798_v29 = vsel %vm7694_vm5, %v5911_v25, %v797_v41  ;;  %v8284_v41 = vrot.slane %v998_v8, 5  ;;  %v7257_v25 = vld [vmem:[%s7576_s26 + $0x58] sm:$0xf]  ;;  %v5946_v22 = vld [vmem:[%s7576_s26 + $0x60] sm:$0xe] }
 0x116   : >> { %v977_v30 = vsel %vm7680_vm4, %v972_v6, %v8252_v26 }
 0x117   : >> { %v1382_v46 = vunpack.c.l.b16 %v977_v30  ;;  %v5954_v30 = vrot.slane %v5946_v22, 9 }
 0x118   : >> { %v2136_v33 = vpop.f32.mrf.mxu2 }
 0x119   : >> { %v2137_v39 = vadd.f32 %v2136_v33, %v2088_v57  ;;  %v1107_v57 = vrot.slane %v1105_v40, 4 }
 0x11a   : >> { %v2185_v35 = vpop.f32.mrf.mxu3  ;;  %v2090_v34 = vpop.f32.mrf.mxu1 }
 0x11b   : >> { %v2186_v50 = vadd.f32 %v2185_v35, %v2137_v39  ;;  %v2091_v52 = vadd.f32 %v2090_v34, %v8051_v31  ;;  %v801_v31 = vsel %vm7694_vm5, %v799_v53, %v800_v3  ;;  %v987_v35 = vsel %vm7680_vm4, %v982_v9, %v986_v11 }
 0x11c   : >> { %v2237_v51 = vpop.f32.mrf.mxu0  ;;  %v1311_v26 = vunpack.c.l.b16 %v801_v31  ;;  %v1383_v7 = vunpack.c.l.b16 %v987_v35  ;;  %v804_v53 = vrot.slane %v7257_v25, 5  ;;  %v1008_v9 = vshll.u32 %v5938_v13, 16 }
 0x11d   : >> { %2285 = vmatmul.bf16.gmra.mxu1 %v1320_v27  ;;  %2334 = vmatmul.bf16.gmra.mxu2 %v6903_v14  ;;  %v8265_v17 = vadd.f32 %v2234_v42, %v2186_v50  ;;  %v1002_v42 = vshrl.u32 %v8263_v37, 16  ;;  %v1106_v27 = vsel %vm7694_vm5, %v5953_v49, %v1105_v40  ;;  %v1109_v14 = vsel %vm7694_vm5, %v1107_v57, %v1108_v18  ;;  %v6904_v49 = vld [vmem:[%s7576_s26 + $0x54] sm:$0xff] }
 0x11e   : >> { %v1414_v50 = vunpack.c.l.b16 %v1106_v27  ;;  %v1415_v44 = vunpack.c.l.b16 %v1109_v14  ;;  %v1112_v57 = vrot.slane %v8263_v37, 5  ;;  %v1010_v31 = vrot.slane %v1008_v9, 5  ;;  %v5930_v14 = vld [vmem:[%s7576_s26 + $0x6c] sm:$0xf] }
 0x11f   : >> { %2383 = vmatmul.bf16.gmra.mxu3 %v1392_v38  ;;  %2432 = vmatmul.bf16.gmra.mxu0 %v1424_v43  ;;  %v991_v38 = vrot.slane %v989_v21, 4  ;;  %v1004_v34 = vrot.slane %v1002_v42, 4  ;;  %v1310_v43 = vunpack.c.l.b16 %v798_v29  ;;  %v5912_v42 = vrot.slane %v5904_v63, 9 }
 0x120   : >> { %v2139_v20 = vpop.f32.mrf.mxu2  ;;  %v1425_v21 = vpack.c.b16 %v1415_v44, %v1414_v50  ;;  %v1115_v37 = vrot.slane %v5938_v13, 5  ;;  %v1013_v50 = vshrl.u32 %v5930_v14, 16  ;;  %v1016_v44 = vshll.u32 %v5930_v14, 16 }
 0x121   : >> { %v2140_v4 = vadd.f32 %v2139_v20, %v2091_v52  ;;  %v995_v3 = vor.u32 %v994_v28, %v991_v38  ;;  %v1005_v6 = vor.u32 %v1004_v34, %v8284_v41  ;;  %v1393_v20 = vpack.c.b16 %v1383_v7, %v1382_v46  ;;  %v8302_v38 = vld [vmem:[%s7576_s26 + $0x70] sm:$0xf] }
 0x122   : >> { %v2188_v10 = vpop.f32.mrf.mxu3  ;;  %v2092_v58 = vpop.f32.mrf.mxu1  ;;  %v1026_v25 = vshrl.u32 %v8302_v38, 16 }
 0x123   : >> { %v2189_v33 = vadd.f32 %v2188_v10, %v2140_v4  ;;  %v2093_v40 = vadd.f32 %v2092_v58, %v8074_v56  ;;  %v806_v4 = vrot.slane %v804_v53, 4  ;;  %v807_v10 = vrot.slane %v7996_v5, 5 }
 0x124   : >> { %v2239_v39 = vpop.f32.mrf.mxu0  ;;  %v996_v58 = vrot.slane %v995_v3, 4  ;;  %v1006_v29 = vrot.slane %v1005_v6, 4  ;;  %v805_v5 = vsel %vm7694_vm5, %v5912_v42, %v804_v53 }
 0x125   : >> { %v8287_v45 = vadd.f32 %v2237_v51, %v2189_v33  ;;  %v1321_v51 = vpack.c.b16 %v1311_v26, %v1310_v43  ;;  %v1114_v33 = vrot.slane %v1112_v57, 4  ;;  %v808_v34 = vsel %vm7694_vm5, %v806_v4, %v807_v10  ;;  %v6905_v10 = vld [vmem:[%s7576_s26 + $0x60] sm:$0xff] }
 0x126   : >> { %v1001_v43 = vsel %vm7680_vm4, %v996_v58, %v8284_v41  ;;  %v1011_v13 = vsel %vm7680_vm4, %v1006_v29, %v1010_v31  ;;  %v1313_v63 = vunpack.c.l.b16 %v808_v34  ;;  %v7258_v29 = vld [vmem:[%s7576_s26 + $0x64] sm:$0xf]  ;;  %v5947_v34 = vld [vmem:[%s7576_s26 + $0x6c] sm:$0xe] }
 0x127   : >> { %v1116_v46 = vsel %vm7694_vm5, %v1114_v33, %v1115_v37  ;;  %v1384_v3 = vunpack.c.l.b16 %v1001_v43  ;;  %v1385_v6 = vunpack.c.l.b16 %v1011_v13  ;;  %v811_v31 = vrot.slane %v7258_v29, 5  ;;  %v5905_v33 = vld [vmem:[%s7576_s26 + $0x60] sm:$0xe] }
 0x128   : >> { %v2141_v47 = vpop.f32.mrf.mxu2  ;;  %v5913_v43 = vrot.slane %v5905_v33, 9  ;;  %v814_v13 = vrot.slane %v8037_v2, 5 }
 0x129   : >> { %v2142_v11 = vadd.f32 %v2141_v47, %v2093_v40  ;;  %v1022_v40 = vshll.u32 %v8302_v38, 16  ;;  %v1312_v47 = vunpack.c.l.b16 %v805_v5  ;;  %v1394_v58 = vpack.c.b16 %v1385_v6, %v1384_v3 }
 0x12a   : >> { %v2190_v52 = vpop.f32.mrf.mxu3  ;;  %v2095_v18 = vpop.f32.mrf.mxu1 }
 0x12b   : >> { %v2191_v56 = vadd.f32 %v2190_v52, %v2142_v11  ;;  %v2096_v27 = vadd.f32 %v2095_v18, %v8092_v23  ;;  %v1113_v23 = vsel %vm7694_vm5, %v5954_v30, %v1112_v57  ;;  %v1417_v11 = vunpack.c.l.b16 %v1116_v46 }
 0x12c   : >> { %v2242_v8 = vpop.f32.mrf.mxu0  ;;  %v1416_v9 = vunpack.c.l.b16 %v1113_v23  ;;  %v1024_v57 = vrot.slane %v1022_v40, 5  ;;  %v1028_v18 = vrot.slane %v1026_v25, 4  ;;  %v1322_v4 = vpack.c.b16 %v1313_v63, %v1312_v47 }
 0x12d   : >> { %2290 = vmatmul.bf16.gmra.mxu1 %v1321_v51  ;;  %2339 = vmatmul.bf16.gmra.mxu2 %v6904_v49  ;;  %v8297_v35 = vadd.f32 %v2239_v39, %v2191_v56  ;;  %v1015_v51 = vrot.slane %v1013_v50, 4  ;;  %v1018_v49 = vrot.slane %v1016_v44, 5  ;;  %v5955_v44 = vrot.slane %v5947_v34, 9 }
 0x12f   : >> { %2388 = vmatmul.bf16.gmra.mxu3 %v1393_v20  ;;  %2437 = vmatmul.bf16.gmra.mxu0 %v1425_v21  ;;  %v5939_v21 = vld [vmem:[%s7576_s26 + $0x74] sm:$0x1]  ;;  %v1019_v37 = vor.u32 %v1018_v49, %v1015_v51 }
 0x130   : >> { %v2144_v28 = vpop.f32.mrf.mxu2  ;;  %v1032_v14 = vshll.u32 %v5939_v21, 16  ;;  %v1122_v25 = vrot.slane %v5939_v21, 5 }
 0x131   : >> { %v2145_v39 = vadd.f32 %v2144_v28, %v2096_v27  ;;  %v1029_v27 = vor.u32 %v1028_v18, %v1024_v57  ;;  %v1020_v23 = vrot.slane %v1019_v37, 4 }
 0x132   : >> { %v2193_v26 = vpop.f32.mrf.mxu3  ;;  %v2097_v7 = vpop.f32.mrf.mxu1 }
 0x133   : >> { %v2194_v41 = vadd.f32 %v2193_v26, %v2145_v39  ;;  %v2098_v20 = vadd.f32 %v2097_v7, %v8115_v59  ;;  %v1119_v59 = vrot.slane %v8302_v38, 5  ;;  %v813_v39 = vrot.slane %v811_v31, 4 }
 0x134   : >> { %v2244_v53 = vpop.f32.mrf.mxu0  ;;  %v1030_v46 = vrot.slane %v1029_v27, 4  ;;  %v1034_v7 = vrot.slane %v1032_v14, 5  ;;  %v1025_v2 = vsel %vm7680_vm4, %v1020_v23, %v1024_v57 }
 0x135   : >> { %v8319_v52 = vadd.f32 %v2242_v8, %v2194_v41  ;;  %v1426_v8 = vpack.c.b16 %v1417_v11, %v1416_v9  ;;  %v1121_v40 = vrot.slane %v1119_v59, 4  ;;  %v815_v3 = vsel %vm7694_vm5, %v813_v39, %v814_v13 }
 0x136   : >> { %v1120_v11 = vsel %vm7694_vm5, %v5955_v44, %v1119_v59  ;;  %v1315_v18 = vunpack.c.l.b16 %v815_v3  ;;  %v1386_v21 = vunpack.c.l.b16 %v1025_v2 }
 0x137   : >> { %v1123_v51 = vsel %vm7694_vm5, %v1121_v40, %v1122_v25 }
 0x138   : >> { %v2146_v22 = vpop.f32.mrf.mxu2  ;;  %v1419_v57 = vunpack.c.l.b16 %v1123_v51 }
 0x139   : >> { %v2147_v56 = vadd.f32 %v2146_v22, %v2098_v20 }
 0x13a   : >> { %v2195_v42 = vpop.f32.mrf.mxu3  ;;  %v2100_v30 = vpop.f32.mrf.mxu1 }
 0x13b   : >> { %v2196_v28 = vadd.f32 %v2195_v42, %v2147_v56  ;;  %v2101_v50 = vadd.f32 %v2100_v30, %v8055_v36  ;;  %v1035_v36 = vsel %vm7680_vm4, %v1030_v46, %v1034_v7  ;;  %v1418_v56 = vunpack.c.l.b16 %v1120_v11 }
 0x13c   : >> { %v2247_v5 = vpop.f32.mrf.mxu0  ;;  %v1387_v22 = vunpack.c.l.b16 %v1035_v36 }
 0x13d   : >> { %2295 = vmatmul.bf16.gmra.mxu1 %v1322_v4  ;;  %2344 = vmatmul.bf16.gmra.mxu2 %v6905_v10  ;;  %v8328_v26 = vadd.f32 %v2244_v53, %v2196_v28  ;;  %v812_v53 = vsel %vm7694_vm5, %v5913_v43, %v811_v31  ;;  %v6906_v31 = vld [vmem:[%s7576_s26 + $0x6c] sm:$0xff]  ;;  %v1427_v33 = vpack.c.b16 %v1419_v57, %v1418_v56  ;;  %s6340_s26 = sshll.u32 %s7417_s17, 7  ;;  %s191_s17 = sadd.s32 1, %s7417_s17  }
 0x13e   : >> { %v1314_v49 = vunpack.c.l.b16 %v812_v53  ;;  %s8358_s19 = scalar_lea.vmem [#allocation3], %s6340_s26  ;;  %p188_p0 = scmp.ge.s32.totalorder %s191_s17, 2  }
 0x13f   : >> { %2393 = vmatmul.bf16.gmra.mxu3 %v1394_v58  ;;  %2442 = vmatmul.bf16.gmra.mxu0 %v1426_v8  ;;  %v1395_v8 = vpack.c.b16 %v1387_v22, %v1386_v21  ;;  %s8406_s17 = smov (%p188_p0), 0  }
 0x140   : >> { %v2149_v38 = vpop.f32.mrf.mxu2  ;;  %v1323_v29 = vpack.c.b16 %v1315_v18, %v1314_v49 }
 0x141   : >> { %v2150_v41 = vadd.f32 %v2149_v38, %v2101_v50 }
 0x142   : >> { %v2198_v47 = vpop.f32.mrf.mxu3  ;;  %v2102_v63 = vpop.f32.mrf.mxu1 }
 0x143   : >> { %v2199_v6 = vadd.f32 %v2198_v47, %v2150_v41  ;;  %v2103_v42 = vadd.f32 %v2102_v63, %v8077_v62 }
 0x144   : >> { %v2249_v9 = vpop.f32.mrf.mxu0 }
 0x145   : >> { %v8344_v20 = vadd.f32 %v2247_v5, %v2199_v6 }
 0x148   : >> { %v2151_v4 = vpop.f32.mrf.mxu2 }
 0x149   : >> { %v2152_v10 = vadd.f32 %v2151_v4, %v2103_v42 }
 0x14a   : >> { %v2200_v58 = vpop.f32.mrf.mxu3  ;;  %v2105_v30 = vpop.f32.mrf.mxu1 }
 0x14b   : >> { %v2201_v37 = vadd.f32 %v2200_v58, %v2152_v10  ;;  %v2106_v28 = vadd.f32 %v2105_v30, %v8098_v32 }
 0x14c   : >> { %v2252_v27 = vpop.f32.mrf.mxu0 }
 0x14d   : >> { %2300 = vmatmul.bf16.gmra.mxu1 %v1323_v29  ;;  %2349 = vmatmul.bf16.gmra.mxu2 %v6906_v31  ;;  %v8348_v14 = vadd.f32 %v2249_v9, %v2201_v37 }
 0x14f   : >> { %2398 = vmatmul.bf16.gmra.mxu3 %v1395_v8  ;;  %2447 = vmatmul.bf16.gmra.mxu0 %v1427_v33 }
 0x150   : >> { %v2154_v5 = vpop.f32.mrf.mxu2 }
 0x151   : >> { %v2155_v62 = vadd.f32 %v2154_v5, %v2106_v28 }
 0x152   : >> { %v2203_v59 = vpop.f32.mrf.mxu3  ;;  %v2107_v34 = vpop.f32.mrf.mxu1 }
 0x153   : >> { %v2204_v43 = vadd.f32 %v2203_v59, %v2155_v62  ;;  %v2108_v23 = vadd.f32 %v2107_v34, %v8117_v60 }
 0x154   : >> { %v2254_v39 = vpop.f32.mrf.mxu0 }
 0x155   : >> { %v8351_v13 = vadd.f32 %v2252_v27, %v2204_v43 }
 0x158   : >> { %v2156_v46 = vpop.f32.mrf.mxu2 }
 0x159   : >> { %v2157_v7 = vadd.f32 %v2156_v46, %v2108_v23 }
 0x15a   : >> { %v2205_v50 = vpop.f32.mrf.mxu3  ;;  %v2266_v44 = vpop.f32.mrf.mxu1 }
 0x15b   : >> { %v2206_v40 = vadd.f32 %v2205_v50, %v2157_v7  ;;  %v2267_v32 = vadd.f32 %v2266_v44, %v8148_v12 }
 0x15c   : >> { %v2413_v25 = vpop.f32.mrf.mxu0 }
 0x15d   : >> { %v8354_v38 = vadd.f32 %v2254_v39, %v2206_v40 }
 0x160   : >> { %v2315_v41 = vpop.f32.mrf.mxu2 }
 0x161   : >> { %v2316_v47 = vadd.f32 %v2315_v41, %v2267_v32 }
 0x162   : >> { %v2364_v63 = vpop.f32.mrf.mxu3  ;;  %v2268_v53 = vpop.f32.mrf.mxu1 }
 0x163   : >> { %v2365_v3 = vadd.f32 %v2364_v63, %v2316_v47  ;;  %v2269_v60 = vadd.f32 %v2268_v53, %v8158_v61 }
 0x164   : >> { %v2415_v2 = vpop.f32.mrf.mxu0 }
 0x165   : >> { %v2414_v6 = vadd.f32 %v2413_v25, %v2365_v3 }
 0x167   : >> { %2455 = vst [vmem:[%s8358_s19] sm:$0xff] %v2414_v6  ;;  %v2493_v21 = vmul.f32 %v2414_v6, %v2414_v6 }
 0x168   : >> { %v2317_v9 = vpop.f32.mrf.mxu2 }
 0x169   : >> { %v2318_v36 = vadd.f32 %v2317_v9, %v2269_v60 }
 0x16a   : >> { %v2366_v11 = vpop.f32.mrf.mxu3  ;;  %v2271_v51 = vpop.f32.mrf.mxu1 }
 0x16b   : >> { %v2367_v12 = vadd.f32 %v2366_v11, %v2318_v36  ;;  %v2272_v57 = vadd.f32 %v2271_v51, %v8180_v19 }
 0x16c   : >> { %v2418_v49 = vpop.f32.mrf.mxu0 }
 0x16d   : >> { %v2416_v18 = vadd.f32 %v2415_v2, %v2367_v12 }
 0x16f   : >> { %2456 = vst [vmem:[%s8358_s19 + $0x8] sm:$0xff] %v2416_v18  ;;  %v2471_v22 = vadd.f32 %v2416_v18, %v2414_v6  ;;  %v2494_v56 = vmul.f32 %v2416_v18, %v2416_v18 }
 0x170   : >> { %v2320_v42 = vpop.f32.mrf.mxu2 }
 0x171   : >> { %v2509_v4 = vadd.f32 %v2494_v56, %v2493_v21  ;;  %v2321_v10 = vadd.f32 %v2320_v42, %v2272_v57 }
 0x172   : >> { %v2369_v58 = vpop.f32.mrf.mxu3  ;;  %v2273_v29 = vpop.f32.mrf.mxu1 }
 0x173   : >> { %v2370_v61 = vadd.f32 %v2369_v58, %v2321_v10  ;;  %v2274_v37 = vadd.f32 %v2273_v29, %v8196_v15 }
 0x174   : >> { %v2420_v31 = vpop.f32.mrf.mxu0 }
 0x175   : >> { %v2419_v30 = vadd.f32 %v2418_v49, %v2370_v61 }
 0x177   : >> { %2457 = vst [vmem:[%s8358_s19 + $0x10] sm:$0xff] %v2419_v30  ;;  %v2472_v8 = vadd.f32 %v2471_v22, %v2419_v30  ;;  %v2495_v33 = vmul.f32 %v2419_v30, %v2419_v30 }
 0x178   : >> { %v2322_v27 = vpop.f32.mrf.mxu2 }
 0x179   : >> { %v2510_v28 = vadd.f32 %v2509_v4, %v2495_v33  ;;  %v2323_v5 = vadd.f32 %v2322_v27, %v2274_v37 }
 0x17a   : >> { %v2371_v62 = vpop.f32.mrf.mxu3  ;;  %v2276_v59 = vpop.f32.mrf.mxu1 }
 0x17b   : >> { %v2372_v19 = vadd.f32 %v2371_v62, %v2323_v5  ;;  %v2277_v46 = vadd.f32 %v2276_v59, %v8218_v55 }
 0x17c   : >> { %v2423_v34 = vpop.f32.mrf.mxu0 }
 0x17d   : >> { %v2421_v43 = vadd.f32 %v2420_v31, %v2372_v19 }
 0x17f   : >> { %2458 = vst [vmem:[%s8358_s19 + $0x18] sm:$0xff] %v2421_v43  ;;  %v2473_v39 = vadd.f32 %v2472_v8, %v2421_v43  ;;  %v2496_v23 = vmul.f32 %v2421_v43, %v2421_v43 }
 0x180   : >> { %v2325_v7 = vpop.f32.mrf.mxu2 }
 0x181   : >> { %v2511_v50 = vadd.f32 %v2510_v28, %v2496_v23  ;;  %v2326_v44 = vadd.f32 %v2325_v7, %v2277_v46 }
 0x182   : >> { %v2374_v40 = vpop.f32.mrf.mxu3  ;;  %v2278_v25 = vpop.f32.mrf.mxu1 }
 0x183   : >> { %v2375_v15 = vadd.f32 %v2374_v40, %v2326_v44  ;;  %v2279_v53 = vadd.f32 %v2278_v25, %v8228_v48 }
 0x184   : >> { %v2425_v32 = vpop.f32.mrf.mxu0 }
 0x185   : >> { %v2424_v41 = vadd.f32 %v2423_v34, %v2375_v15 }
 0x187   : >> { %2459 = vst [vmem:[%s8358_s19 + $0x20] sm:$0xff] %v2424_v41  ;;  %v2474_v47 = vadd.f32 %v2473_v39, %v2424_v41  ;;  %v2497_v63 = vmul.f32 %v2424_v41, %v2424_v41 }
 0x188   : >> { %v2327_v3 = vpop.f32.mrf.mxu2 }
 0x189   : >> { %v2512_v2 = vadd.f32 %v2511_v50, %v2497_v63  ;;  %v2328_v6 = vadd.f32 %v2327_v3, %v2279_v53 }
 0x18a   : >> { %v2376_v60 = vpop.f32.mrf.mxu3  ;;  %v2281_v9 = vpop.f32.mrf.mxu1 }
 0x18b   : >> { %v2377_v55 = vadd.f32 %v2376_v60, %v2328_v6  ;;  %v2282_v49 = vadd.f32 %v2281_v9, %v8250_v54 }
 0x18c   : >> { %v2428_v36 = vpop.f32.mrf.mxu0 }
 0x18d   : >> { %v2426_v11 = vadd.f32 %v2425_v32, %v2377_v55 }
 0x18f   : >> { %2460 = vst [vmem:[%s8358_s19 + $0x28] sm:$0xff] %v2426_v11  ;;  %v2475_v51 = vadd.f32 %v2474_v47, %v2426_v11  ;;  %v2498_v12 = vmul.f32 %v2426_v11, %v2426_v11 }
 0x190   : >> { %v2330_v18 = vpop.f32.mrf.mxu2 }
 0x191   : >> { %v2513_v21 = vadd.f32 %v2512_v2, %v2498_v12  ;;  %v2331_v22 = vadd.f32 %v2330_v18, %v2282_v49 }
 0x192   : >> { %v2379_v56 = vpop.f32.mrf.mxu3  ;;  %v2283_v57 = vpop.f32.mrf.mxu1 }
 0x193   : >> { %v2380_v48 = vadd.f32 %v2379_v56, %v2331_v22  ;;  %v2284_v29 = vadd.f32 %v2283_v57, %v8265_v17 }
 0x194   : >> { %v2430_v42 = vpop.f32.mrf.mxu0 }
 0x195   : >> { %v2429_v4 = vadd.f32 %v2428_v36, %v2380_v48 }
 0x197   : >> { %2461 = vst [vmem:[%s8358_s19 + $0x30] sm:$0xff] %v2429_v4  ;;  %v2476_v10 = vadd.f32 %v2475_v51, %v2429_v4  ;;  %v2499_v58 = vmul.f32 %v2429_v4, %v2429_v4 }
 0x198   : >> { %v2332_v61 = vpop.f32.mrf.mxu2 }
 0x199   : >> { %v2514_v31 = vadd.f32 %v2513_v21, %v2499_v58  ;;  %v2333_v30 = vadd.f32 %v2332_v61, %v2284_v29 }
 0x19a   : >> { %v2381_v8 = vpop.f32.mrf.mxu3  ;;  %v2286_v33 = vpop.f32.mrf.mxu1 }
 0x19b   : >> { %v2382_v54 = vadd.f32 %v2381_v8, %v2333_v30  ;;  %v2287_v62 = vadd.f32 %v2286_v33, %v8287_v45 }
 0x19c   : >> { %v2433_v37 = vpop.f32.mrf.mxu0 }
 0x19d   : >> { %v2431_v27 = vadd.f32 %v2430_v42, %v2382_v54 }
 0x19f   : >> { %2462 = vst [vmem:[%s8358_s19 + $0x38] sm:$0xff] %v2431_v27  ;;  %v2477_v28 = vadd.f32 %v2476_v10, %v2431_v27  ;;  %v2500_v5 = vmul.f32 %v2431_v27, %v2431_v27 }
 0x1a0   : >> { %v2335_v59 = vpop.f32.mrf.mxu2 }
 0x1a1   : >> { %v2515_v19 = vadd.f32 %v2514_v31, %v2500_v5  ;;  %v2336_v34 = vadd.f32 %v2335_v59, %v2287_v62 }
 0x1a2   : >> { %v2384_v43 = vpop.f32.mrf.mxu3  ;;  %v2288_v39 = vpop.f32.mrf.mxu1 }
 0x1a3   : >> { %v2385_v17 = vadd.f32 %v2384_v43, %v2336_v34  ;;  %v2289_v44 = vadd.f32 %v2288_v39, %v8297_v35 }
 0x1a4   : >> { %v2435_v23 = vpop.f32.mrf.mxu0 }
 0x1a5   : >> { %v2434_v46 = vadd.f32 %v2433_v37, %v2385_v17 }
 0x1a7   : >> { %2463 = vst [vmem:[%s8358_s19 + $0x40] sm:$0xff] %v2434_v46  ;;  %v2478_v7 = vadd.f32 %v2477_v28, %v2434_v46  ;;  %v2501_v50 = vmul.f32 %v2434_v46, %v2434_v46 }
 0x1a8   : >> { %v2337_v40 = vpop.f32.mrf.mxu2 }
 0x1a9   : >> { %v2516_v25 = vadd.f32 %v2515_v19, %v2501_v50  ;;  %v2338_v15 = vadd.f32 %v2337_v40, %v2289_v44 }
 0x1aa   : >> { %v2386_v32 = vpop.f32.mrf.mxu3  ;;  %v2291_v41 = vpop.f32.mrf.mxu1 }
 0x1ab   : >> { %v2387_v45 = vadd.f32 %v2386_v32, %v2338_v15  ;;  %v2292_v2 = vadd.f32 %v2291_v41, %v8319_v52 }
 0x1ac   : >> { %v2438_v47 = vpop.f32.mrf.mxu0 }
 0x1ad   : >> { %v2436_v63 = vadd.f32 %v2435_v23, %v2387_v45 }
 0x1af   : >> { %2464 = vst [vmem:[%s8358_s19 + $0x48] sm:$0xff] %v2436_v63  ;;  %v2479_v53 = vadd.f32 %v2478_v7, %v2436_v63  ;;  %v2502_v3 = vmul.f32 %v2436_v63, %v2436_v63 }
 0x1b0   : >> { %v2340_v6 = vpop.f32.mrf.mxu2 }
 0x1b1   : >> { %v2517_v60 = vadd.f32 %v2516_v25, %v2502_v3  ;;  %v2341_v9 = vadd.f32 %v2340_v6, %v2292_v2 }
 0x1b2   : >> { %v2389_v55 = vpop.f32.mrf.mxu3  ;;  %v2293_v36 = vpop.f32.mrf.mxu1 }
 0x1b3   : >> { %v2390_v35 = vadd.f32 %v2389_v55, %v2341_v9  ;;  %v2294_v18 = vadd.f32 %v2293_v36, %v8328_v26 }
 0x1b4   : >> { %v2440_v11 = vpop.f32.mrf.mxu0 }
 0x1b5   : >> { %v2439_v51 = vadd.f32 %v2438_v47, %v2390_v35 }
 0x1b7   : >> { %2465 = vst [vmem:[%s8358_s19 + $0x50] sm:$0xff] %v2439_v51  ;;  %v2480_v12 = vadd.f32 %v2479_v53, %v2439_v51  ;;  %v2503_v49 = vmul.f32 %v2439_v51, %v2439_v51 }
 0x1b8   : >> { %v2342_v21 = vpop.f32.mrf.mxu2 }
 0x1b9   : >> { %v2518_v22 = vadd.f32 %v2517_v60, %v2503_v49  ;;  %v2343_v56 = vadd.f32 %v2342_v21, %v2294_v18 }
 0x1ba   : >> { %v2391_v57 = vpop.f32.mrf.mxu3  ;;  %v2296_v52 = vpop.f32.mrf.mxu1 }
 0x1bb   : >> { %v2392_v48 = vadd.f32 %v2391_v57, %v2343_v56  ;;  %v2297_v29 = vadd.f32 %v2296_v52, %v8344_v20 }
 0x1bc   : >> { %v2443_v4 = vpop.f32.mrf.mxu0 }
 0x1bd   : >> { %v2441_v42 = vadd.f32 %v2440_v11, %v2392_v48 }
 0x1bf   : >> { %2466 = vst [vmem:[%s8358_s19 + $0x58] sm:$0xff] %v2441_v42  ;;  %v2481_v10 = vadd.f32 %v2480_v12, %v2441_v42  ;;  %v2504_v58 = vmul.f32 %v2441_v42, %v2441_v42 }
 0x1c0   : >> { %v2345_v61 = vpop.f32.mrf.mxu2 }
 0x1c1   : >> { %v2519_v31 = vadd.f32 %v2518_v22, %v2504_v58  ;;  %v2346_v30 = vadd.f32 %v2345_v61, %v2297_v29 }
 0x1c2   : >> { %v2394_v8 = vpop.f32.mrf.mxu3  ;;  %v2298_v26 = vpop.f32.mrf.mxu1 }
 0x1c3   : >> { %v2395_v33 = vadd.f32 %v2394_v8, %v2346_v30  ;;  %v2299_v28 = vadd.f32 %v2298_v26, %v8348_v14 }
 0x1c4   : >> { %v2445_v5 = vpop.f32.mrf.mxu0 }
 0x1c5   : >> { %v2444_v54 = vadd.f32 %v2443_v4, %v2395_v33 }
 0x1c7   : >> { %2467 = vst [vmem:[%s8358_s19 + $0x60] sm:$0xff] %v2444_v54  ;;  %v2482_v37 = vadd.f32 %v2481_v10, %v2444_v54  ;;  %v2505_v27 = vmul.f32 %v2444_v54, %v2444_v54 }
 0x1c8   : >> { %v2347_v62 = vpop.f32.mrf.mxu2 }
 0x1c9   : >> { %v2520_v59 = vadd.f32 %v2519_v31, %v2505_v27  ;;  %v2348_v19 = vadd.f32 %v2347_v62, %v2299_v28 }
 0x1ca   : >> { %v2396_v34 = vpop.f32.mrf.mxu3  ;;  %v2301_v20 = vpop.f32.mrf.mxu1 }
 0x1cb   : >> { %v2397_v43 = vadd.f32 %v2396_v34, %v2348_v19  ;;  %v2302_v46 = vadd.f32 %v2301_v20, %v8351_v13 }
 0x1cc   : >> { %v2448_v14 = vpop.f32.mrf.mxu0 }
 0x1cd   : >> { %v2446_v39 = vadd.f32 %v2445_v5, %v2397_v43 }
 0x1cf   : >> { %2468 = vst [vmem:[%s8358_s19 + $0x68] sm:$0xff] %v2446_v39  ;;  %v2483_v17 = vadd.f32 %v2482_v37, %v2446_v39  ;;  %v2506_v23 = vmul.f32 %v2446_v39, %v2446_v39 }
 0x1d0   : >> { %v2350_v7 = vpop.f32.mrf.mxu2 }
 0x1d1   : >> { %v2521_v50 = vadd.f32 %v2520_v59, %v2506_v23  ;;  %v2351_v44 = vadd.f32 %v2350_v7, %v2302_v46 }
 0x1d2   : >> { %v2399_v40 = vpop.f32.mrf.mxu3  ;;  %v2303_v15 = vpop.f32.mrf.mxu1 }
 0x1d3   : >> { %v2400_v25 = vadd.f32 %v2399_v40, %v2351_v44  ;;  %v2304_v47 = vadd.f32 %v2303_v15, %v8354_v38 }
 0x1d4   : >> { %v2450_v13 = vpop.f32.mrf.mxu0 }
 0x1d5   : >> { %v2449_v32 = vadd.f32 %v2448_v14, %v2400_v25 }
 0x1d7   : >> { %2469 = vst [vmem:[%s8358_s19 + $0x70] sm:$0xff] %v2449_v32  ;;  %v2484_v41 = vadd.f32 %v2483_v17, %v2449_v32  ;;  %v2507_v45 = vmul.f32 %v2449_v32, %v2449_v32 }
 0x1d8   : >> { %v2352_v63 = vpop.f32.mrf.mxu2 }
 0x1d9   : >> { %v2522_v53 = vadd.f32 %v2521_v50, %v2507_v45  ;;  %v2353_v3 = vadd.f32 %v2352_v63, %v2304_v47 }
 0x1da   : >> { %v2401_v2 = vpop.f32.mrf.mxu3 }
 0x1db   : >> { %v2402_v6 = vadd.f32 %v2401_v2, %v2353_v3 }
 0x1dd   : >> { %v2451_v60 = vadd.f32 %v2450_v13, %v2402_v6 }
 0x1df   : >> { %2470 = vst [vmem:[%s8358_s19 + $0x78] sm:$0xff] %v2451_v60  ;;  %v2485_v9 = vadd.f32 %v2484_v41, %v2451_v60  ;;  %v2508_v55 = vmul.f32 %v2451_v60, %v2451_v60 }
 0x1e1   : >> { %v2486_v36 = vrot.slane %v2485_v9, 4  ;;  %v2523_v35 = vadd.f32 %v2522_v53, %v2508_v55 }
 0x1e3   : >> { %v2487_v11 = vadd.f32 %v2486_v36, %v2485_v9  ;;  %v2524_v51 = vrot.slane %v2523_v35, 4 }
 0x1e5   : >> { %v2488_v12 = vrot.slane %v2487_v11, 2  ;;  %v2525_v49 = vadd.f32 %v2524_v51, %v2523_v35 }
 0x1e7   : >> { %v2489_v18 = vadd.f32 %v2488_v12, %v2487_v11  ;;  %v2526_v21 = vrot.slane %v2525_v49, 2 }
 0x1e9   : >> { %v2490_v22 = vrot.slane %v2489_v18, 1  ;;  %v2527_v38 = vadd.f32 %v2526_v21, %v2525_v49 }
 0x1eb   : >> { %v2491_v56 = vadd.f32 %v2490_v22, %v2489_v18  ;;  %v2528_v57 = vrot.slane %v2527_v38, 1 }
 0x1ed   : >> { %v2492_v52 = vadd.f32 %v7413_v1, %v2491_v56   ;;  %v2529_v48 = vadd.f32 %v2528_v57, %v2527_v38  ;;  %190 = sbr.rel (!%p188_p0) target bundleno = 29 (0x1d), region = 116 }
 0x1ef   : >> { %v2530_v42 = vadd.f32 %v7409_v0, %v2529_v48   ;;  %v9366_v1 = vmov %v2492_v52  ;;  %v8400_v4 = vmul.f32 (%p188_p0), 0.00390625, %v2492_v52 }
 0x1f1   : >> { %v9365_v0 = vmov %v2530_v42  ;;  %v2532_v10 = vmul.f32 (%p188_p0), 0.00390625, %v2530_v42  ;;  %v2533_v58 = vmul.f32 (%p188_p0), %v8400_v4, %v8400_v4 }
 0x1f3   : > { %v2534_v1 = vsub.f32 %v2532_v10, %v2533_v58 }
 0x1f5   : > { %v2535_v29 = vmax.f32 %v2534_v1, 0.0 }
 0x1f7   : > { %v2536_v61 = vadd.f32 1e-05, %v2535_v29 }
 0x1f9   : > { %7259 = vrsqrt.f32 %v2536_v61  ;;  %vm2543_vm6 = vweird.f32 %v2536_v61 }
 0x1ff   : > { %v7260_v31 = vpop.eup %7259 }
 0x200   : > { %v2538_v30 = vmul.f32 %v7260_v31, %v2536_v61  ;;  %vm2544_vm7 = vweird.f32 %v7260_v31 }
 0x201   : > { %vm2545_vm8 = vmor %vm2543_vm6, %vm2544_vm7 }
 0x202   : > { %v2539_v8 = vmul.f32 %v7260_v31, %v2538_v30 }
 0x204   : > { %v2540_v26 = vmul.f32 0.5, %v2539_v8 }
 0x206   : > { %v2541_v33 = vsub.f32 1.5, %v2540_v26 }
 0x208   : > { %v2542_v54 = vmul.f32 %v7260_v31, %v2541_v33 }
 0x20a   : > { %v8404_v37 = vsel %vm2545_vm8, %v7260_v31, %v2542_v54 }
 0x20b LB: >> { %s6341_s20 = sshll.u32 %s7421_s17, 7  ;;  %vm2835_vm9 = vcmask 1040384   ;;  %vm2836_vm10 = vsmask.f32 256  ;;  %s6343_s25 = smul.u32 96, %s7421_s17  ;;  %s7421_s17 = sphi %s8406_s17, %s2552_s17  }
 0x20c   : >> { %s8412_s24 = scalar_lea.vmem [#allocation3], %s6341_s20  ;;  %vm8442_vm11 = vmand %vm2835_vm9, %vm2836_vm10  ;;  %s2552_s17 = sadd.s32 1, %s7421_s17  }
 0x20d   : >> { %v2555_v0 = vld [vmem:[%s8412_s24] sm:$0xff]  ;;  %v2556_v27 = vld [vmem:[%s8412_s24 + $0x8] sm:$0xff]  ;;  %v2557_v28 = vld [vmem:[%s8412_s24 + $0x10] sm:$0xff]  ;;  %s8460_s27 = scalar_lea.vmem [#allocation2], %s6343_s25  ;;  %p2549_p1 = scmp.ge.s32.totalorder %s2552_s17, 2  }
 0x20e   : >> { %v2571_v5 = vsub.f32 %v2555_v0, %v8400_v4  ;;  %v2572_v62 = vsub.f32 %v2556_v27, %v8400_v4  ;;  %v2558_v59 = vld [vmem:[%s8412_s24 + $0x18] sm:$0xff]  ;;  %v2573_v19 = vsub.f32 %v2557_v28, %v8400_v4  ;;  %v2559_v34 = vld [vmem:[%s8412_s24 + $0x20] sm:$0xff]  ;;  %v2560_v20 = vld [vmem:[%s8412_s24 + $0x28] sm:$0xff]  ;;  %s8539_s28 = smov (%p2549_p1), 0  }
 0x20f   : >> { %v2574_v43 = vsub.f32 %v2558_v59, %v8400_v4  ;;  %v2575_v39 = vsub.f32 %v2559_v34, %v8400_v4  ;;  %v2576_v17 = vsub.f32 %v2560_v20, %v8400_v4  ;;  %v2561_v23 = vld [vmem:[%s8412_s24 + $0x30] sm:$0xff]  ;;  %v2562_v46 = vld [vmem:[%s8412_s24 + $0x38] sm:$0xff] }
 0x210   : >> { %v2587_v7 = vmul.f32 %v2571_v5, %v8404_v37  ;;  %v2588_v50 = vmul.f32 %v2572_v62, %v8404_v37  ;;  %v2589_v44 = vmul.f32 %v2573_v19, %v8404_v37  ;;  %v2577_v40 = vsub.f32 %v2561_v23, %v8400_v4 }
 0x211   : >> { %v2590_v14 = vmul.f32 %v2574_v43, %v8404_v37  ;;  %v2591_v25 = vmul.f32 %v2575_v39, %v8404_v37  ;;  %v2592_v15 = vmul.f32 %v2576_v17, %v8404_v37  ;;  %v2578_v32 = vsub.f32 %v2562_v46, %v8400_v4 }
 0x212   : >> { %v2603_v41 = vmax.f32 %v2587_v7, 0.0  ;;  %v2604_v45 = vmax.f32 %v2588_v50, 0.0  ;;  %v2605_v47 = vmax.f32 %v2589_v44, 0.0  ;;  %v2593_v63 = vmul.f32 %v2577_v40, %v8404_v37 }
 0x213   : >> { %v2606_v53 = vmax.f32 %v2590_v14, 0.0  ;;  %v2607_v3 = vmax.f32 %v2591_v25, 0.0  ;;  %v2608_v2 = vmax.f32 %v2592_v15, 0.0  ;;  %v2594_v6 = vmul.f32 %v2578_v32, %v8404_v37 }
 0x214   : >> { %v2619_v13 = vpack.c.bf16 %v2603_v41, %v2603_v41  ;;  %v2620_v60 = vpack.c.bf16 %v2604_v45, %v2604_v45  ;;  %v2621_v9 = vpack.c.bf16 %v2605_v47, %v2605_v47  ;;  %v2609_v55 = vmax.f32 %v2593_v63, 0.0 }
 0x215   : >> { %v2622_v36 = vpack.c.bf16 %v2606_v53, %v2606_v53  ;;  %v2623_v35 = vpack.c.bf16 %v2607_v3, %v2607_v3  ;;  %v2624_v11 = vpack.c.bf16 %v2608_v2, %v2608_v2  ;;  %v2610_v51 = vmax.f32 %v2594_v6, 0.0 }
 0x216   : >> { %v2643_v12 = vunpack.c.l.b16 %v2619_v13  ;;  %v2699_v49 = vunpack.c.l.b16 %v2620_v60  ;;  %v2644_v18 = vunpack.c.l.b16 %v2621_v9  ;;  %v2625_v21 = vpack.c.bf16 %v2609_v55, %v2609_v55  ;;  %v2563_v60 = vld [vmem:[%s8412_s24 + $0x40] sm:$0xff] }
 0x217   : >> { %v2700_v22 = vunpack.c.l.b16 %v2622_v36  ;;  %v2645_v38 = vunpack.c.l.b16 %v2623_v35  ;;  %v2701_v56 = vunpack.c.l.b16 %v2624_v11  ;;  %v8438_v57 = vpack.c.bf16 %v2610_v51, %v2610_v51  ;;  %v2564_v11 = vld [vmem:[%s8412_s24 + $0x48] sm:$0xff]  ;;  %v2565_v51 = vld [vmem:[%s8412_s24 + $0x50] sm:$0xff] }
 0x218   : >> { %v2651_v52 = vpack.c.b16 %v2643_v12, %v2643_v12  ;;  %v2707_v48 = vpack.c.b16 %v2699_v49, %v2643_v12  ;;  %v2787_v42 = vpack.c.b16 %v2699_v49, %v2699_v49  ;;  %v2652_v10 = vpack.c.b16 %v2644_v18, %v2644_v18  ;;  %v2566_v12 = vld [vmem:[%s8412_s24 + $0x58] sm:$0xff] }
 0x219   : >> { %v2708_v58 = vpack.c.b16 %v2700_v22, %v2644_v18  ;;  %v2788_v1 = vpack.c.b16 %v2700_v22, %v2700_v22  ;;  %v2653_v29 = vpack.c.b16 %v2645_v38, %v2645_v38  ;;  %v2709_v61 = vpack.c.b16 %v2701_v56, %v2645_v38 }
 0x21a   : >> { %v2660_v31 = vshrl.u32 %v2651_v52, 16  ;;  %v2716_v30 = vshrl.u32 %v2707_v48, 16  ;;  %v2719_v8 = vshll.u32 %v2707_v48, 16  ;;  %v2796_v26 = vshll.u32 %v2787_v42, 16  ;;  %v2567_v42 = vld [vmem:[%s8412_s24 + $0x60] sm:$0xff] }
 0x21b   : >> { %v2663_v54 = vshrl.u32 %v2652_v10, 16  ;;  %v2723_v0 = vshrl.u32 %v2708_v58, 16  ;;  %v2726_v27 = vshll.u32 %v2708_v58, 16  ;;  %v2800_v28 = vshll.u32 %v2788_v1, 16 }
 0x21c   : >> { %v2718_v5 = vrot.slane %v2716_v30, 7  ;;  %v2798_v62 = vrot.slane %v2796_v26, 3  ;;  %v2666_v59 = vshrl.u32 %v2653_v29, 16  ;;  %v2730_v19 = vshrl.u32 %v2709_v61, 16 }
 0x21d   : >> { %v2725_v34 = vrot.slane %v2723_v0, 7  ;;  %v2802_v20 = vrot.slane %v2800_v28, 3  ;;  %v2733_v43 = vshll.u32 %v2709_v61, 16  ;;  %v2789_v39 = vpack.c.b16 %v2701_v56, %v2701_v56  ;;  %v2568_v0 = vld [vmem:[%s8412_s24 + $0x68] sm:$0xff] }
 0x21e   : >> { %v2721_v17 = vor.u32 %v2719_v8, %v2718_v5  ;;  %v2846_v23 = vsel %vm8442_vm11, %v2718_v5, %v2798_v62  ;;  %v2732_v46 = vrot.slane %v2730_v19, 7  ;;  %v2646_v7 = vunpack.c.l.b16 %v2625_v21 }
 0x21f   : >> { %v2874_v50 = vunpack.c.l.b16 %v2846_v23  ;;  %v2728_v44 = vor.u32 %v2726_v27, %v2725_v34  ;;  %v2847_v40 = vsel %vm8442_vm11, %v2725_v34, %v2802_v20  ;;  %v2804_v14 = vshll.u32 %v2789_v39, 16 }
 0x220   : >> { %v2838_v25 = vsel %vm8442_vm11, %v2660_v31, %v2721_v17  ;;  %v2877_v15 = vunpack.c.l.b16 %v2847_v40  ;;  %v2735_v32 = vor.u32 %v2733_v43, %v2732_v46  ;;  %v2654_v41 = vpack.c.b16 %v2646_v7, %v2646_v7 }
 0x221   : >> { %v2872_v45 = vunpack.c.l.b16 %v2838_v25  ;;  %v2873_v47 = vunpack.c.h.b16 %v2838_v25  ;;  %v2898_v63 = vpack.c.b16 %v2874_v50, %v2874_v50  ;;  %v2839_v53 = vsel %vm8442_vm11, %v2663_v54, %v2728_v44 }
 0x222   : >> { %v2875_v3 = vunpack.c.l.b16 %v2839_v53  ;;  %v2876_v2 = vunpack.c.h.b16 %v2839_v53  ;;  %v2901_v6 = vpack.c.b16 %v2877_v15, %v2877_v15  ;;  %v2840_v13 = vsel %vm8442_vm11, %v2666_v59, %v2735_v32 }
 0x223   : >> { %v2896_v9 = vpack.c.b16 %v2872_v45, %v2872_v45  ;;  %v2897_v55 = vpack.c.b16 %v2873_v47, %v2873_v47  ;;  %6346 = vst [vmem:[%s8460_s27 + $0x14] sm:$0x1] %v2898_v63  ;;  %v2878_v36 = vunpack.c.l.b16 %v2840_v13  ;;  %v2879_v35 = vunpack.c.h.b16 %v2840_v13 }
 0x224   : >> { %v2899_v49 = vpack.c.b16 %v2875_v3, %v2875_v3  ;;  %v2900_v18 = vpack.c.b16 %v2876_v2, %v2876_v2  ;;  %6349 = vst [vmem:[%s8460_s27 + $0x20] sm:$0x1] %v2901_v6  ;;  %v2806_v21 = vrot.slane %v2804_v14, 3  ;;  %v2669_v22 = vshrl.u32 %v2654_v41, 16 }
 0x225   : >> { %6344 = vst [vmem:[%s8460_s27 + $0xc] sm:$0xf] %v2896_v9  ;;  %v2902_v38 = vpack.c.b16 %v2878_v36, %v2878_v36  ;;  %v2903_v56 = vpack.c.b16 %v2879_v35, %v2879_v35  ;;  %v2702_v52 = vunpack.c.l.b16 %v8438_v57  ;;  %v2579_v48 = vsub.f32 %v2563_v60, %v8400_v4 }
 0x226   : >> { %6345 = vst [vmem:[%s8460_s27 + $0x10] sm:$0xf] %v2897_v55  ;;  %v2848_v10 = vsel %vm8442_vm11, %v2732_v46, %v2806_v21  ;;  %v2580_v58 = vsub.f32 %v2564_v11, %v8400_v4  ;;  %v2581_v1 = vsub.f32 %v2565_v51, %v8400_v4  ;;  %v2582_v29 = vsub.f32 %v2566_v12, %v8400_v4 }
 0x227   : >> { %6347 = vst [vmem:[%s8460_s27 + $0x18] sm:$0xf] %v2899_v49  ;;  %v2880_v61 = vunpack.c.l.b16 %v2848_v10  ;;  %v2710_v31 = vpack.c.b16 %v2702_v52, %v2646_v7  ;;  %v2790_v57 = vpack.c.b16 %v2702_v52, %v2702_v52  ;;  %v2595_v30 = vmul.f32 %v2579_v48, %v8404_v37 }
 0x228   : >> { %6348 = vst [vmem:[%s8460_s27 + $0x1c] sm:$0xf] %v2900_v18  ;;  %v2596_v8 = vmul.f32 %v2580_v58, %v8404_v37  ;;  %v2597_v26 = vmul.f32 %v2581_v1, %v8404_v37  ;;  %v2598_v54 = vmul.f32 %v2582_v29, %v8404_v37  ;;  %v2583_v27 = vsub.f32 %v2567_v42, %v8400_v4  ;;  %v2570_v42 = vld [vmem:[%s8412_s24 + $0x78] sm:$0xff] }
 0x229   : >> { %6350 = vst [vmem:[%s8460_s27 + $0x24] sm:$0xf] %v2902_v38  ;;  %v2904_v28 = vpack.c.b16 %v2880_v61, %v2880_v61  ;;  %v2737_v5 = vshrl.u32 %v2710_v31, 16  ;;  %v2740_v62 = vshll.u32 %v2710_v31, 16  ;;  %v2808_v59 = vshll.u32 %v2790_v57, 16 }
 0x22a   : >> { %6351 = vst [vmem:[%s8460_s27 + $0x28] sm:$0xf] %v2903_v56  ;;  %v2611_v19 = vmax.f32 %v2595_v30, 0.0  ;;  %v2612_v34 = vmax.f32 %v2596_v8, 0.0  ;;  %v2613_v20 = vmax.f32 %v2597_v26, 0.0  ;;  %v2614_v43 = vmax.f32 %v2598_v54, 0.0 }
 0x22b   : >> { %6352 = vst [vmem:[%s8460_s27 + $0x2c] sm:$0x1] %v2904_v28  ;;  %v2739_v39 = vrot.slane %v2737_v5, 7  ;;  %v2810_v17 = vrot.slane %v2808_v59, 3  ;;  %v2584_v23 = vsub.f32 %v2568_v0, %v8400_v4  ;;  %v2599_v46 = vmul.f32 %v2583_v27, %v8404_v37 }
 0x22c   : >> { %v2627_v7 = vpack.c.bf16 %v2611_v19, %v2611_v19  ;;  %v2628_v50 = vpack.c.bf16 %v2612_v34, %v2612_v34  ;;  %v2629_v44 = vpack.c.bf16 %v2613_v20, %v2613_v20  ;;  %v2630_v40 = vpack.c.bf16 %v2614_v43, %v2614_v43 }
 0x22d   : >> { %v2742_v14 = vor.u32 %v2740_v62, %v2739_v39  ;;  %v2849_v25 = vsel %vm8442_vm11, %v2739_v39, %v2810_v17  ;;  %v2600_v15 = vmul.f32 %v2584_v23, %v8404_v37  ;;  %v2615_v32 = vmax.f32 %v2599_v46, 0.0 }
 0x22e   : >> { %v2883_v41 = vunpack.c.l.b16 %v2849_v25  ;;  %v2647_v45 = vunpack.c.l.b16 %v2627_v7  ;;  %v2703_v47 = vunpack.c.l.b16 %v2628_v50  ;;  %v2648_v63 = vunpack.c.l.b16 %v2629_v44 }
 0x22f   : >> { %v2841_v53 = vsel %vm8442_vm11, %v2669_v22, %v2742_v14  ;;  %v2704_v3 = vunpack.c.l.b16 %v2630_v40  ;;  %v2616_v2 = vmax.f32 %v2600_v15, 0.0  ;;  %v2631_v6 = vpack.c.bf16 %v2615_v32, %v2615_v32  ;;  %v2569_v22 = vld [vmem:[%s8412_s24 + $0x70] sm:$0xff] }
 0x230   : >> { %v2881_v13 = vunpack.c.l.b16 %v2841_v53  ;;  %v2882_v60 = vunpack.c.h.b16 %v2841_v53  ;;  %v2907_v9 = vpack.c.b16 %v2883_v41, %v2883_v41  ;;  %v2655_v55 = vpack.c.b16 %v2647_v45, %v2647_v45 }
 0x231   : >> { %v2711_v36 = vpack.c.b16 %v2703_v47, %v2647_v45  ;;  %v2791_v35 = vpack.c.b16 %v2703_v47, %v2703_v47  ;;  %v2656_v11 = vpack.c.b16 %v2648_v63, %v2648_v63  ;;  %v2712_v51 = vpack.c.b16 %v2704_v3, %v2648_v63 }
 0x232   : >> { %v2905_v12 = vpack.c.b16 %v2881_v13, %v2881_v13  ;;  %v2906_v49 = vpack.c.b16 %v2882_v60, %v2882_v60  ;;  %6355 = vst [vmem:[%s8460_s27 + $0x38] sm:$0x1] %v2907_v9  ;;  %v2672_v18 = vshrl.u32 %v2655_v55, 16  ;;  %v2792_v21 = vpack.c.b16 %v2704_v3, %v2704_v3 }
 0x233   : >> { %v2744_v38 = vshrl.u32 %v2711_v36, 16  ;;  %v2747_v56 = vshll.u32 %v2711_v36, 16  ;;  %v2812_v52 = vshll.u32 %v2791_v35, 16  ;;  %v2675_v48 = vshrl.u32 %v2656_v11, 16 }
 0x234   : >> { %6353 = vst [vmem:[%s8460_s27 + $0x30] sm:$0xf] %v2905_v12  ;;  %v2751_v10 = vshrl.u32 %v2712_v51, 16  ;;  %v2754_v58 = vshll.u32 %v2712_v51, 16  ;;  %v2816_v1 = vshll.u32 %v2792_v21, 16  ;;  %v2632_v29 = vpack.c.bf16 %v2616_v2, %v2616_v2 }
 0x235   : >> { %6354 = vst [vmem:[%s8460_s27 + $0x34] sm:$0xf] %v2906_v49  ;;  %v2746_v61 = vrot.slane %v2744_v38, 7  ;;  %v2814_v31 = vrot.slane %v2812_v52, 3  ;;  %v2649_v57 = vunpack.c.l.b16 %v2631_v6  ;;  %v2585_v30 = vsub.f32 %v2569_v22, %v8400_v4 }
 0x236   : >> { %v2753_v8 = vrot.slane %v2751_v10, 7  ;;  %v2818_v26 = vrot.slane %v2816_v1, 3  ;;  %v2705_v54 = vunpack.c.l.b16 %v2632_v29  ;;  %v2586_v0 = vsub.f32 %v2570_v42, %v8400_v4 }
 0x237   : >> { %v2749_v27 = vor.u32 %v2747_v56, %v2746_v61  ;;  %v2850_v28 = vsel %vm8442_vm11, %v2746_v61, %v2814_v31  ;;  %v2657_v5 = vpack.c.b16 %v2649_v57, %v2649_v57  ;;  %v2601_v62 = vmul.f32 %v2585_v30, %v8404_v37 }
 0x238   : >> { %v2886_v59 = vunpack.c.l.b16 %v2850_v28  ;;  %v2756_v19 = vor.u32 %v2754_v58, %v2753_v8  ;;  %v2851_v34 = vsel %vm8442_vm11, %v2753_v8, %v2818_v26  ;;  %v2713_v20 = vpack.c.b16 %v2705_v54, %v2649_v57 }
 0x239   : >> { %v2842_v43 = vsel %vm8442_vm11, %v2672_v18, %v2749_v27  ;;  %v2889_v39 = vunpack.c.l.b16 %v2851_v34  ;;  %v2678_v17 = vshrl.u32 %v2657_v5, 16  ;;  %v2793_v23 = vpack.c.b16 %v2705_v54, %v2705_v54 }
 0x23a   : >> { %v2884_v46 = vunpack.c.l.b16 %v2842_v43  ;;  %v2885_v7 = vunpack.c.h.b16 %v2842_v43  ;;  %v2910_v50 = vpack.c.b16 %v2886_v59, %v2886_v59  ;;  %v2843_v44 = vsel %vm8442_vm11, %v2675_v48, %v2756_v19 }
 0x23b   : >> { %v2887_v40 = vunpack.c.l.b16 %v2843_v44  ;;  %v2888_v14 = vunpack.c.h.b16 %v2843_v44  ;;  %v2913_v25 = vpack.c.b16 %v2889_v39, %v2889_v39  ;;  %v2758_v15 = vshrl.u32 %v2713_v20, 16 }
 0x23c   : >> { %v2908_v32 = vpack.c.b16 %v2884_v46, %v2884_v46  ;;  %v2909_v41 = vpack.c.b16 %v2885_v7, %v2885_v7  ;;  %6358 = vst [vmem:[%s8460_s27 + $0x44] sm:$0x1] %v2910_v50  ;;  %v2761_v45 = vshll.u32 %v2713_v20, 16  ;;  %v2820_v47 = vshll.u32 %v2793_v23, 16 }
 0x23d   : >> { %v2911_v63 = vpack.c.b16 %v2887_v40, %v2887_v40  ;;  %v2912_v53 = vpack.c.b16 %v2888_v14, %v2888_v14  ;;  %6361 = vst [vmem:[%s8460_s27 + $0x50] sm:$0x1] %v2913_v25  ;;  %v2760_v3 = vrot.slane %v2758_v15, 7  ;;  %v2602_v2 = vmul.f32 %v2586_v0, %v8404_v37 }
 0x23e   : >> { %6356 = vst [vmem:[%s8460_s27 + $0x3c] sm:$0xf] %v2908_v32  ;;  %v2822_v6 = vrot.slane %v2820_v47, 3  ;;  %v2617_v13 = vmax.f32 %v2601_v62, 0.0  ;;  %v8535_v34 = vmov (%p2549_p1), 0.0   ;;  %v8537_v20 = vmov (%p2549_p1), 0.0  }
 0x23f   : >> { %6357 = vst [vmem:[%s8460_s27 + $0x40] sm:$0xf] %v2909_v41  ;;  %v2763_v60 = vor.u32 %v2761_v45, %v2760_v3  ;;  %v2618_v9 = vmax.f32 %v2602_v2, 0.0 }
 0x240   : >> { %6359 = vst [vmem:[%s8460_s27 + $0x48] sm:$0xf] %v2911_v63  ;;  %v2852_v55 = vsel %vm8442_vm11, %v2760_v3, %v2822_v6  ;;  %v2633_v36 = vpack.c.bf16 %v2617_v13, %v2617_v13 }
 0x241   : >> { %6360 = vst [vmem:[%s8460_s27 + $0x4c] sm:$0xf] %v2912_v53  ;;  %v2844_v35 = vsel %vm8442_vm11, %v2678_v17, %v2763_v60  ;;  %v2892_v11 = vunpack.c.l.b16 %v2852_v55  ;;  %v2634_v51 = vpack.c.bf16 %v2618_v9, %v2618_v9 }
 0x242   : >> { %v2890_v12 = vunpack.c.l.b16 %v2844_v35  ;;  %v2891_v49 = vunpack.c.h.b16 %v2844_v35  ;;  %v2650_v18 = vunpack.c.l.b16 %v2633_v36 }
 0x243   : >> { %v2916_v21 = vpack.c.b16 %v2892_v11, %v2892_v11  ;;  %v2706_v22 = vunpack.c.l.b16 %v2634_v51 }
 0x244   : >> { %v2914_v38 = vpack.c.b16 %v2890_v12, %v2890_v12  ;;  %v2915_v56 = vpack.c.b16 %v2891_v49, %v2891_v49  ;;  %v2658_v52 = vpack.c.b16 %v2650_v18, %v2650_v18 }
 0x245   : >> { %6364 = vst [vmem:[%s8460_s27 + $0x5c] sm:$0x1] %v2916_v21  ;;  %v2714_v48 = vpack.c.b16 %v2706_v22, %v2650_v18  ;;  %v2794_v42 = vpack.c.b16 %v2706_v22, %v2706_v22 }
 0x246   : >> { %6362 = vst [vmem:[%s8460_s27 + $0x54] sm:$0xf] %v2914_v38  ;;  %v2681_v29 = vshrl.u32 %v2658_v52, 16 }
 0x247   : >> { %6363 = vst [vmem:[%s8460_s27 + $0x58] sm:$0xf] %v2915_v56  ;;  %v2765_v10 = vshrl.u32 %v2714_v48, 16  ;;  %v2768_v58 = vshll.u32 %v2714_v48, 16  ;;  %v2824_v1 = vshll.u32 %v2794_v42, 16 }
 0x249   : >> { %v2767_v61 = vrot.slane %v2765_v10, 7  ;;  %v2826_v31 = vrot.slane %v2824_v1, 3 }
 0x24b   : >> { %v2770_v57 = vor.u32 %v2768_v58, %v2767_v61  ;;  %v2853_v30 = vsel %vm8442_vm11, %v2767_v61, %v2826_v31 }
 0x24c   : >> { %v2895_v8 = vunpack.c.l.b16 %v2853_v30 }
 0x24d   : >> { %v2845_v26 = vsel %vm8442_vm11, %v2681_v29, %v2770_v57 }
 0x24e   : >> { %v2893_v54 = vunpack.c.l.b16 %v2845_v26  ;;  %v2894_v0 = vunpack.c.h.b16 %v2845_v26  ;;  %v2919_v27 = vpack.c.b16 %v2895_v8, %v2895_v8 }
 0x24f   : > { %2551 = sbr.rel (!%p2549_p1) target bundleno = 523 (0x20b), region = 127 }
 0x250   : >> { %v2917_v28 = vpack.c.b16 %v2893_v54, %v2893_v54  ;;  %v2918_v5 = vpack.c.b16 %v2894_v0, %v2894_v0  ;;  %6367 = vst [vmem:[%s8460_s27 + $0x68] sm:$0x1] %v2919_v27 }
 0x252   : >> { %6365 = vst [vmem:[%s8460_s27 + $0x60] sm:$0xf] %v2917_v28 }
 0x253   : >> { %6366 = vst [vmem:[%s8460_s27 + $0x64] sm:$0xf] %v2918_v5 }
 0x25a   : > { %v2972_v62 = vld [vmem:[#allocation2 + $0x18] sm:$0xff]   ;;  %v2974_v59 = vld [vmem:[#allocation2 + $0x20] sm:$0x1] }
 0x25b   : > { %v2979_v19 = vld [vmem:[#allocation2 + $0xb4] sm:$0xff]   ;;  %2975 = vst [vmem:[#allocation2] sm:$0xff] %v2972_v62   ;;  %v2981_v33 = vld [vmem:[#allocation2 + $0xbc] sm:$0x1] }
 0x25c   : > { %2977 = vst [vmem:[#allocation2 + $0x8] sm:$0x1] %v2974_v59 }
 0x25d   : > { %2983 = vst [vmem:[#allocation2 + $0xcc] sm:$0xff] %v2979_v19  }
 0x25e   : > { %2985 = vst [vmem:[#allocation2 + $0xd4] sm:$0x1] %v2981_v33 }
 0x25f LB: >> { %v7011_v4 = vld [vmem:[#allocation4 + $0x38] sm:$0xff]  ;;  %v7010_v37 = vld [vmem:[#allocation4 + $0x30] sm:$0xff]  ;;  %v7009_v43 = vld [vmem:[#allocation4 + $0x28] sm:$0xff]  ;;  %s6979_s29 = smul.u32 96, %s7433_s28  ;;  %s6847_s6 = sshll.u32 %s7433_s28, 7  ;;  %s7433_s28 = sphi %s8539_s28, %s2991_s28   ;;  %v7429_v20 = vphi %v8537_v20, %v9370_v20   ;;  %v7425_v34 = vphi %v8535_v34, %v9369_v34  }
 0x260   : >> { %7102 = vmatpush.bf16.msra.mxu1 %v7011_v4  ;;  %7103 = vmatpush.bf16.msra.mxu2 %v7011_v4  ;;  %v7008_v39 = vld [vmem:[#allocation4 + $0x20] sm:$0xff]  ;;  %v7007_v17 = vld [vmem:[#allocation4 + $0x18] sm:$0xff]  ;;  %v7006_v23 = vld [vmem:[#allocation4 + $0x10] sm:$0xff]  ;;  %s9129_s7 = scalar_lea.vmem [#allocation3], %s6847_s6  ;;  %s2991_s28 = sadd.s32 1, %s7433_s28  }
 0x261   : >> { %7104 = vmatpush.bf16.msra.mxu3 %v7011_v4  ;;  %4812 = vmatpush.bf16.msra.mxu0 %v7011_v4  ;;  %v7005_v46 = vld [vmem:[#allocation4 + $0x8] sm:$0xff]  ;;  %v7004_v7 = vld [vmem:[#allocation4] sm:$0xff]  ;;  %v7027_v50 = vld [vmem:[#allocation4 + $0xb8] sm:$0xff]  ;;  %s8551_s30 = scalar_lea.vmem [#allocation2], %s6979_s29  ;;  %p2988_p2 = scmp.ge.s32.totalorder %s2991_s28, 2  }
 0x262   : >> { %v7019_v44 = vld [vmem:[#allocation4 + $0x78] sm:$0xff]  ;;  %v7026_v45 = vld [vmem:[#allocation4 + $0xb0] sm:$0xff]  ;;  %v7025_v60 = vld [vmem:[#allocation4 + $0xa8] sm:$0xff]  ;;  %s9177_s8 = smov (%p2988_p2), 0  }
 0x263   : >> { %v7035_v32 = vld [vmem:[#allocation4 + $0xf8] sm:$0xff]  ;;  %v7018_v47 = vld [vmem:[#allocation4 + $0x70] sm:$0xff]  ;;  %v7017_v9 = vld [vmem:[#allocation4 + $0x68] sm:$0xff] }
 0x264   : >> { %7105 = vmatpush.bf16.msra.mxu1 %v7010_v37  ;;  %7106 = vmatpush.bf16.msra.mxu2 %v7010_v37  ;;  %v7043_v41 = vld [vmem:[#allocation4 + $0x138] sm:$0xff]  ;;  %v7034_v53 = vld [vmem:[#allocation4 + $0xf0] sm:$0xff]  ;;  %v7033_v21 = vld [vmem:[#allocation4 + $0xe8] sm:$0xff] }
 0x265   : >> { %7107 = vmatpush.bf16.msra.mxu3 %v7010_v37  ;;  %4813 = vmatpush.bf16.msra.mxu0 %v7010_v37  ;;  %v6982_v40 = vld [vmem:[%s8551_s30 + $0x18] sm:$0xff]  ;;  %v6984_v14 = vld [vmem:[%s8551_s30 + $0x30] sm:$0xff]  ;;  %v6986_v25 = vld [vmem:[%s8551_s30 + $0x48] sm:$0xff] }
 0x266   : >> { %v6980_v15 = vld [vmem:[%s8551_s30] sm:$0xff]  ;;  %v7042_v2 = vld [vmem:[#allocation4 + $0x130] sm:$0xff]  ;;  %v6382_v13 = vld [vmem:[%s8551_s30 + $0x10] sm:$0xf] }
 0x267   : >> { %v2998_v63 = vld [vmem:[%s8551_s30] sm:$0xf]  ;;  %v8559_v3 = vld [vmem:[%s8551_s30 + $0x4] sm:$0xf]  ;;  %v6381_v6 = vld [vmem:[%s8551_s30 + $0xc] sm:$0xf] }
 0x268   : >> { %7108 = vmatpush.bf16.msra.mxu1 %v7009_v43  ;;  %7109 = vmatpush.bf16.msra.mxu2 %v7009_v43  ;;  %v3026_v55 = vshrl.u32 %v2998_v63, 16  ;;  %v3029_v36 = vshll.u32 %v2998_v63, 16  ;;  %v3035_v35 = vshll.u32 %v8559_v3, 16  ;;  %v3039_v11 = vshrl.u32 %v8559_v3, 16  ;;  %v7041_v22 = vld [vmem:[#allocation4 + $0x128] sm:$0xff]  ;;  %v7024_v38 = vld [vmem:[#allocation4 + $0xa0] sm:$0xff] }
 0x269   : >> { %7110 = vmatpush.bf16.msra.mxu3 %v7009_v43  ;;  %4814 = vmatpush.bf16.msra.mxu0 %v7009_v43  ;;  %v3337_v51 = vshrl.u32 %v6381_v6, 16  ;;  %v3340_v12 = vshll.u32 %v6381_v6, 16  ;;  %v3346_v49 = vshll.u32 %v6382_v13, 16  ;;  %v3350_v18 = vshrl.u32 %v6382_v13, 16  ;;  %v7016_v56 = vld [vmem:[#allocation4 + $0x60] sm:$0xff]  ;;  %v7023_v26 = vld [vmem:[#allocation4 + $0x98] sm:$0xff] }
 0x26a   : >> { %v3028_v52 = vrot.slane %v3026_v55, 4  ;;  %v3031_v48 = vrot.slane %v3029_v36, 5  ;;  %v8565_v42 = vrot.slane %v3035_v35, 5  ;;  %v3041_v10 = vrot.slane %v3039_v11, 4  ;;  %v8568_v58 = vld [vmem:[%s8551_s30 + $0x8] sm:$0x1] }
 0x26b   : >> { %v3339_v1 = vrot.slane %v3337_v51, 4  ;;  %v3342_v29 = vrot.slane %v3340_v12, 5  ;;  %v8570_v61 = vrot.slane %v3346_v49, 5  ;;  %v3352_v31 = vrot.slane %v3350_v18, 4  ;;  %v7032_v57 = vld [vmem:[#allocation4 + $0xe0] sm:$0xff]  ;;  %v7015_v54 = vld [vmem:[#allocation4 + $0x58] sm:$0xff] }
 0x26c   : >> { %7111 = vmatpush.bf16.msra.mxu1 %v7008_v39  ;;  %7112 = vmatpush.bf16.msra.mxu2 %v7008_v39  ;;  %v7040_v30 = vld [vmem:[#allocation4 + $0x120] sm:$0xff]  ;;  %v6397_v8 = vld [vmem:[%s8551_s30 + $0x14] sm:$0x1]  ;;  %v3032_v0 = vor.u32 %v3031_v48, %v3028_v52  ;;  %v6983_v27 = vld [vmem:[%s8551_s30 + $0x24] sm:$0xff]  ;;  %v3042_v5 = vor.u32 %v3041_v10, %v8565_v42  ;;  %v3045_v62 = vshll.u32 %v8568_v58, 16  ;;  %v3254_v59 = vrot.slane %v8559_v3, 5 }
 0x26d   : >> { %7113 = vmatpush.bf16.msra.mxu3 %v7008_v39  ;;  %4815 = vmatpush.bf16.msra.mxu0 %v7008_v39  ;;  %v6985_v28 = vld [vmem:[%s8551_s30 + $0x3c] sm:$0xff]  ;;  %v6987_v19 = vld [vmem:[%s8551_s30 + $0x54] sm:$0xff]  ;;  %v6981_v33 = vld [vmem:[%s8551_s30 + $0xc] sm:$0xff]  ;;  %v3343_v37 = vor.u32 %v3342_v29, %v3339_v1  ;;  %v3353_v43 = vor.u32 %v3352_v31, %v8570_v61  ;;  %v3356_v39 = vshll.u32 %v6397_v8, 16 }
 0x26e   : >> { %v3217_v4 = vld [vmem:[%s8551_s30] sm:$0xe]  ;;  %v6384_v3 = vld [vmem:[%s8551_s30 + $0x1c] sm:$0xf]  ;;  %v7038_v6 = vld [vmem:[#allocation4 + $0x110] sm:$0xff] }
 0x26f   : >> { %v3354_v63 = vrot.slane %v3353_v43, 4  ;;  %v7021_v36 = vld [vmem:[#allocation4 + $0x88] sm:$0xff]  ;;  %v3370_v18 = vshll.u32 %v6384_v3, 16  ;;  %v8606_v10 = vld [vmem:[%s8551_s30 + $0x14] sm:$0x1]  ;;  %v7028_v43 = vld [vmem:[#allocation4 + $0xc0] sm:$0xff] }
 0x270   : >> { %7114 = vmatpush.bf16.msra.mxu1 %v7007_v17  ;;  %7115 = vmatpush.bf16.msra.mxu2 %v7007_v17  ;;  %v7013_v35 = vld [vmem:[#allocation4 + $0x48] sm:$0xff] }
 0x271   : >> { %7116 = vmatpush.bf16.msra.mxu3 %v7007_v17  ;;  %4816 = vmatpush.bf16.msra.mxu0 %v7007_v17  ;;  %v7031_v17 = vld [vmem:[#allocation4 + $0xd8] sm:$0xff] }
 0x274   : >> { %7117 = vmatpush.bf16.msra.mxu1 %v7006_v23  ;;  %7118 = vmatpush.bf16.msra.mxu2 %v7006_v23 }
 0x275   : >> { %7119 = vmatpush.bf16.msra.mxu3 %v7006_v23  ;;  %4817 = vmatpush.bf16.msra.mxu0 %v7006_v23  ;;  %v7039_v23 = vld [vmem:[#allocation4 + $0x118] sm:$0xff] }
 0x278   : >> { %7120 = vmatpush.bf16.msra.mxu1 %v7005_v46  ;;  %7121 = vmatpush.bf16.msra.mxu2 %v7005_v46 }
 0x279   : >> { %7122 = vmatpush.bf16.msra.mxu3 %v7005_v46  ;;  %4818 = vmatpush.bf16.msra.mxu0 %v7005_v46  ;;  %v7022_v46 = vld [vmem:[#allocation4 + $0x90] sm:$0xff] }
 0x27c   : >> { %7123 = vmatpush.bf16.msra.mxu1 %v7004_v7  ;;  %7124 = vmatpush.bf16.msra.mxu2 %v7004_v7 }
 0x27d   : >> { %7125 = vmatpush.bf16.msra.mxu3 %v7004_v7  ;;  %4819 = vmatpush.bf16.msra.mxu0 %v7004_v7  ;;  %v7014_v7 = vld [vmem:[#allocation4 + $0x50] sm:$0xff] }
 0x27f   : >> { %4830 = vmatmul.bf16.vlgmr.msra.gmra.mxu1 %v6982_v40  ;;  %4840 = vmatmul.bf16.vlgmr.msra.gmra.mxu2 %v6984_v14  ;;  %v8584_v40 = vld [vmem:[%s8551_s30 + $0x10] sm:$0xf]  ;;  %v3043_v14 = vrot.slane %v3042_v5, 4 }
 0x280   : >> { %4910 = vmatpush.bf16.msrb.mxu2 %v7027_v50  ;;  %4861 = vmatpush.bf16.msrb.mxu1 %v7019_v44  ;;  %v3033_v50 = vrot.slane %v3032_v0, 4  ;;  %v3000_v44 = vld [vmem:[%s8551_s30 + $0xc] sm:$0xf]  ;;  %v3063_v55 = vshrl.u32 %v8584_v40, 16  ;;  %v7051_v5 = vld [vmem:[#allocation4 + $0x178] sm:$0xff] }
 0x281   : >> { %4850 = vmatmul.bf16.vlgmr.msra.gmra.mxu3 %v6986_v25  ;;  %4820 = vmatmul.bf16.vlgmr.msra.gmra.mxu0 %v6980_v15  ;;  %v3047_v25 = vrot.slane %v3045_v62, 5  ;;  %v6371_v15 = vrot.slane %v3217_v4, 9  ;;  %v3050_v13 = vshrl.u32 %v3000_v44, 16  ;;  %v8610_v62 = vrot.slane %v3370_v18, 5 }
 0x282   : >> { %4959 = vmatpush.bf16.msrb.mxu3 %v7035_v32  ;;  %5008 = vmatpush.bf16.msrb.mxu0 %v7043_v41  ;;  %v3256_v32 = vrot.slane %v3254_v59, 4  ;;  %v6383_v41 = vld [vmem:[%s8551_s30 + $0x18] sm:$0xf]  ;;  %v3038_v12 = vsel %vm7680_vm4, %v3033_v50, %v8565_v42  ;;  %v3065_v31 = vrot.slane %v3063_v55, 4  ;;  %v3069_v4 = vshll.u32 %v8606_v10, 16 }
 0x283   : >> { %v3361_v11 = vshrl.u32 %v6383_v41, 16  ;;  %v3364_v51 = vshll.u32 %v6383_v41, 16  ;;  %v3255_v49 = vsel %vm7694_vm5, %v6371_v15, %v3254_v59  ;;  %v3964_v8 = vunpack.c.l.b16 %v3038_v12  ;;  %v3218_v15 = vld [vmem:[%s8551_s30 + $0xc] sm:$0xe] }
 0x284   : >> { %4911 = vmatpush.bf16.msrb.mxu2 %v7026_v45  ;;  %4862 = vmatpush.bf16.msrb.mxu1 %v7018_v47  ;;  %v3257_v45 = vrot.slane %v8568_v58, 5  ;;  %v3344_v47 = vrot.slane %v3343_v37, 4  ;;  %v3052_v58 = vrot.slane %v3050_v13, 4  ;;  %v6398_v37 = vld [vmem:[%s8551_s30 + $0x20] sm:$0x1]  ;;  %v3261_v50 = vrot.slane %v8584_v40, 5 }
 0x285   : >> { %v3380_v41 = vshll.u32 %v6398_v37, 16  ;;  %v8621_v13 = vld [vmem:[%s8551_s30 + $0x1c] sm:$0xf]  ;;  %v3264_v55 = vrot.slane %v8606_v10, 5 }
 0x286   : >> { %4960 = vmatpush.bf16.msrb.mxu3 %v7034_v53  ;;  %5009 = vmatpush.bf16.msrb.mxu0 %v7042_v2  ;;  %v3358_v53 = vrot.slane %v3356_v39, 5  ;;  %v7030_v2 = vld [vmem:[#allocation4 + $0xd0] sm:$0xff]  ;;  %v3258_v52 = vsel %vm7694_vm5, %v3256_v32, %v3257_v45  ;;  %v3349_v48 = vsel %vm7680_vm4, %v3344_v47, %v8570_v61  ;;  %v3363_v61 = vrot.slane %v3361_v11, 4  ;;  %v7036_v39 = vld [vmem:[#allocation4 + $0x100] sm:$0xff] }
 0x287   : >> { %v6988_v45 = vld [vmem:[%s8551_s30 + $0xc] sm:$0xff]  ;;  %v3382_v12 = vrot.slane %v3380_v41, 5 }
 0x288   : >> { %4912 = vmatpush.bf16.msrb.mxu2 %v7025_v60  ;;  %4863 = vmatpush.bf16.msrb.mxu1 %v7017_v9  ;;  %v3053_v60 = vshll.u32 %v3000_v44, 16  ;;  %v3059_v9 = vshll.u32 %v8584_v40, 16  ;;  %v3359_v42 = vsel %vm7680_vm4, %v3354_v63, %v3358_v53  ;;  %v3071_v63 = vrot.slane %v3069_v4, 5  ;;  %v3002_v53 = vld [vmem:[%s8551_s30 + $0x18] sm:$0xf]  ;;  %v7050_v40 = vld [vmem:[#allocation4 + $0x170] sm:$0xff] }
 0x289   : >> { %v7074_v11 = vld [vmem:[#allocation4 + $0x230] sm:$0xff]  ;;  %v3077_v18 = vshll.u32 %v3002_v53, 16 }
 0x28a   : >> { %4961 = vmatpush.bf16.msrb.mxu3 %v7033_v21  ;;  %5010 = vmatpush.bf16.msrb.mxu0 %v7041_v22  ;;  %v3374_v21 = vshrl.u32 %v6384_v3, 16  ;;  %v7029_v22 = vld [vmem:[#allocation4 + $0xc8] sm:$0xff]  ;;  %v3055_v1 = vrot.slane %v3053_v60, 5  ;;  %v8608_v29 = vrot.slane %v3059_v9, 5  ;;  %v6372_v60 = vrot.slane %v3218_v15, 9 }
 0x28b   : >> { %v3263_v9 = vrot.slane %v3261_v50, 4 }
 0x28c   : >> { %4913 = vmatpush.bf16.msrb.mxu2 %v7024_v38  ;;  %4864 = vmatpush.bf16.msrb.mxu1 %v7016_v56  ;;  %v7037_v38 = vld [vmem:[#allocation4 + $0x108] sm:$0xff]  ;;  %v3048_v56 = vsel %vm7680_vm4, %v3043_v14, %v3047_v25  ;;  %v3376_v59 = vrot.slane %v3374_v21, 4  ;;  %v3083_v21 = vshll.u32 %v8621_v13, 16  ;;  %v3262_v10 = vsel %vm7694_vm5, %v6372_v60, %v3261_v50 }
 0x28d   : >> { %v3965_v0 = vunpack.c.l.b16 %v3048_v56  ;;  %v7057_v56 = vld [vmem:[#allocation4 + $0x1a8] sm:$0xff]  ;;  %v3998_v4 = vunpack.c.l.b16 %v3262_v10 }
 0x28e   : >> { %4962 = vmatpush.bf16.msrb.mxu3 %v7032_v57  ;;  %5011 = vmatpush.bf16.msrb.mxu0 %v7040_v30  ;;  %v7020_v57 = vld [vmem:[#allocation4 + $0x80] sm:$0xff]  ;;  %v3377_v32 = vor.u32 %v3376_v59, %v8610_v62 }
 0x28f   : >> { %4835 = vmatmul.bf16.gmra.mxu1 %v6983_v27  ;;  %4845 = vmatmul.bf16.gmra.mxu2 %v6985_v28  ;;  %v7012_v30 = vld [vmem:[#allocation4 + $0x40] sm:$0xff]  ;;  %v3997_v27 = vunpack.c.l.b16 %v3258_v52  ;;  %v7059_v28 = vld [vmem:[#allocation4 + $0x1b8] sm:$0xff]  ;;  %v3980_v14 = vpack.c.b16 %v3965_v0, %v3964_v8  ;;  %v6385_v52 = vld [vmem:[%s8551_s30 + $0x24] sm:$0xf] }
 0x290   : >> { %4914 = vmatpush.bf16.msrb.mxu2 %v7023_v26  ;;  %4865 = vmatpush.bf16.msrb.mxu1 %v7015_v54  ;;  %v3996_v26 = vunpack.c.l.b16 %v3255_v49  ;;  %v3366_v54 = vrot.slane %v3364_v51, 5  ;;  %v3378_v51 = vrot.slane %v3377_v32, 4  ;;  %v3074_v49 = vshrl.u32 %v3002_v53, 16 }
 0x291   : >> { %4855 = vmatmul.bf16.gmra.mxu3 %v6987_v19  ;;  %4825 = vmatmul.bf16.gmra.mxu0 %v6981_v33  ;;  %v4068_v19 = vunpack.c.l.b16 %v3349_v48  ;;  %v4069_v33 = vunpack.c.l.b16 %v3359_v42  ;;  %v7049_v48 = vld [vmem:[#allocation4 + $0x168] sm:$0xff] }
 0x292   : >> { %4963 = vmatpush.bf16.msrb.mxu3 %v7031_v17  ;;  %5012 = vmatpush.bf16.msrb.mxu0 %v7039_v23  ;;  %v3056_v17 = vor.u32 %v3055_v1, %v3052_v58  ;;  %v3066_v23 = vor.u32 %v3065_v31, %v8608_v29  ;;  %v3367_v44 = vor.u32 %v3366_v54, %v3363_v61  ;;  %v6386_v1 = vld [vmem:[%s8551_s30 + $0x28] sm:$0xf]  ;;  %v7065_v31 = vld [vmem:[#allocation4 + $0x1e8] sm:$0xff]  ;;  %v3076_v8 = vrot.slane %v3074_v49, 4 }
 0x293   : >> { %v4012_v25 = vpack.c.b16 %v3997_v27, %v3996_v26  ;;  %v4084_v47 = vpack.c.b16 %v4069_v33, %v4068_v19  ;;  %v3265_v58 = vsel %vm7694_vm5, %v3263_v9, %v3264_v55  ;;  %v3079_v26 = vrot.slane %v3077_v18, 5  ;;  %v3016_v61 = vld [vmem:[%s8551_s30 + $0x20] sm:$0x1]  ;;  %v3004_v55 = vld [vmem:[%s8551_s30 + $0x24] sm:$0xf]  ;;  %v7056_v18 = vld [vmem:[#allocation4 + $0x1a0] sm:$0xff] }
 0x294   : >> { %4915 = vmatpush.bf16.msrb.mxu2 %v7022_v46  ;;  %4866 = vmatpush.bf16.msrb.mxu1 %v7014_v7  ;;  %v7067_v46 = vld [vmem:[#allocation4 + $0x1f8] sm:$0xff]  ;;  %v3057_v3 = vrot.slane %v3056_v17, 4  ;;  %v8643_v54 = vrot.slane %v3083_v21, 5  ;;  %v3385_v27 = vshrl.u32 %v6385_v52, 16  ;;  %v3398_v59 = vshrl.u32 %v6386_v1, 16  ;;  %v7064_v21 = vld [vmem:[#allocation4 + $0x1e0] sm:$0xff] }
 0x295   : >> { %v7075_v7 = vld [vmem:[#allocation4 + $0x238] sm:$0xff]  ;;  %v3080_v17 = vor.u32 %v3079_v26, %v3076_v8 }
 0x296   : >> { %4964 = vmatpush.bf16.msrb.mxu3 %v7030_v2  ;;  %5013 = vmatpush.bf16.msrb.mxu0 %v7038_v6  ;;  %v3067_v2 = vrot.slane %v3066_v23, 4  ;;  %v7058_v6 = vld [vmem:[#allocation4 + $0x1b0] sm:$0xff] }
 0x298   : >> { %4916 = vmatpush.bf16.msrb.mxu2 %v7021_v36  ;;  %4867 = vmatpush.bf16.msrb.mxu1 %v7013_v35  ;;  %v3368_v36 = vrot.slane %v3367_v44, 4  ;;  %v7066_v35 = vld [vmem:[#allocation4 + $0x1f0] sm:$0xff]  ;;  %v3072_v42 = vsel %vm7680_vm4, %v3067_v2, %v3071_v63  ;;  %v3400_v44 = vrot.slane %v3398_v59, 4  ;;  %v3081_v63 = vrot.slane %v3080_v17, 4 }
 0x299   : >> { %v3967_v33 = vunpack.c.l.b16 %v3072_v42  ;;  %v7072_v42 = vld [vmem:[#allocation4 + $0x220] sm:$0xff] }
 0x29a   : >> { %4965 = vmatpush.bf16.msrb.mxu3 %v7029_v22  ;;  %5014 = vmatpush.bf16.msrb.mxu0 %v7037_v38  ;;  %v3087_v22 = vshrl.u32 %v8621_v13, 16  ;;  %v3062_v38 = vsel %vm7680_vm4, %v3057_v3, %v8608_v29  ;;  %v7073_v29 = vld [vmem:[#allocation4 + $0x228] sm:$0xff] }
 0x29b   : >> { %v3966_v19 = vunpack.c.l.b16 %v3062_v38 }
 0x29c   : >> { %4917 = vmatpush.bf16.msrb.mxu2 %v7020_v57  ;;  %4868 = vmatpush.bf16.msrb.mxu1 %v7012_v30  ;;  %v3373_v57 = vsel %vm7680_vm4, %v3368_v36, %v8610_v62  ;;  %v3383_v30 = vsel %vm7680_vm4, %v3378_v51, %v3382_v12  ;;  %v3089_v0 = vrot.slane %v3087_v22, 4  ;;  %v3999_v62 = vunpack.c.l.b16 %v3265_v58  ;;  %v8655_v36 = vld [vmem:[%s8551_s30 + $0x28] sm:$0xf]  ;;  %v7048_v22 = vld [vmem:[#allocation4 + $0x160] sm:$0xff] }
 0x29d   : >> { %v4070_v37 = vunpack.c.l.b16 %v3373_v57  ;;  %v3981_v15 = vpack.c.b16 %v3967_v33, %v3966_v19  ;;  %v3086_v51 = vsel %vm7680_vm4, %v3081_v63, %v8643_v54  ;;  %v3017_v19 = vld [vmem:[%s8551_s30 + $0x2c] sm:$0x1]  ;;  %v6990_v63 = vld [vmem:[%s8551_s30 + $0x24] sm:$0xff] }
 0x29e   : >> { %4966 = vmatpush.bf16.msrb.mxu3 %v7028_v43  ;;  %5015 = vmatpush.bf16.msrb.mxu0 %v7036_v39  ;;  %v4071_v43 = vunpack.c.l.b16 %v3383_v30  ;;  %v3093_v39 = vshll.u32 %v3016_v61, 16  ;;  %v3090_v23 = vor.u32 %v3089_v0, %v8643_v54  ;;  %v4013_v32 = vpack.c.b16 %v3999_v62, %v3998_v4 }
 0x29f   : >> { %4869 = vmatmul.bf16.vlgmr.msrb.gmra.mxu1 %v3980_v14  ;;  %4918 = vmatmul.bf16.vlgmr.msrb.gmra.mxu2 %v4012_v25  ;;  %v3268_v14 = vrot.slane %v8621_v13, 5  ;;  %v6399_v25 = vld [vmem:[%s8551_s30 + $0x2c] sm:$0x1]  ;;  %v3271_v13 = vrot.slane %v3016_v61, 5  ;;  %v3968_v26 = vunpack.c.l.b16 %v3086_v51 }
 0x2a0   : >> { %5106 = vmatpush.bf16.msra.mxu2 %v7059_v28  ;;  %5057 = vmatpush.bf16.msra.mxu1 %v7051_v5  ;;  %v3388_v28 = vshll.u32 %v6385_v52, 16  ;;  %v3394_v5 = vshll.u32 %v6386_v1, 16  ;;  %v4085_v41 = vpack.c.b16 %v4071_v43, %v4070_v37  ;;  %v3091_v53 = vrot.slane %v3090_v23, 4 }
 0x2a1   : >> { %4967 = vmatmul.bf16.vlgmr.msrb.gmra.mxu3 %v6988_v45  ;;  %5016 = vmatmul.bf16.vlgmr.msrb.gmra.mxu0 %v4084_v47  ;;  %v3219_v45 = vld [vmem:[%s8551_s30 + $0x18] sm:$0xe]  ;;  %v3095_v3 = vrot.slane %v3093_v39, 5  ;;  %v3270_v9 = vrot.slane %v3268_v14, 4  ;;  %v3098_v52 = vshrl.u32 %v3004_v55, 16  ;;  %v3107_v1 = vshll.u32 %v8655_v36, 16 }
 0x2a2   : >> { %5155 = vmatpush.bf16.msra.mxu3 %v7067_v46  ;;  %5204 = vmatpush.bf16.msra.mxu0 %v7075_v7  ;;  %v3387_v46 = vrot.slane %v3385_v27, 4  ;;  %v3390_v7 = vrot.slane %v3388_v28, 5  ;;  %v8646_v50 = vrot.slane %v3394_v5, 5  ;;  %v6989_v47 = vld [vmem:[%s8551_s30 + $0x18] sm:$0xff]  ;;  %v6373_v60 = vrot.slane %v3219_v45, 9 }
 0x2a3   : >> { %v3096_v12 = vsel %vm7680_vm4, %v3091_v53, %v3095_v3  ;;  %v3272_v58 = vsel %vm7694_vm5, %v3270_v9, %v3271_v13  ;;  %v3100_v27 = vrot.slane %v3098_v52, 4  ;;  %v8676_v33 = vrot.slane %v3107_v1, 5  ;;  %v3006_v3 = vld [vmem:[%s8551_s30 + $0x30] sm:$0xf] }
 0x2a4   : >> { %5107 = vmatpush.bf16.msra.mxu2 %v7058_v6  ;;  %5058 = vmatpush.bf16.msra.mxu1 %v7050_v40  ;;  %v3391_v2 = vor.u32 %v3390_v7, %v3387_v46  ;;  %v3401_v6 = vor.u32 %v3400_v44, %v8646_v50  ;;  %v3404_v40 = vshll.u32 %v6399_v25, 16  ;;  %v3269_v10 = vsel %vm7694_vm5, %v6373_v60, %v3268_v14  ;;  %v6400_v46 = vld [vmem:[%s8551_s30 + $0x38] sm:$0x1] }
 0x2a5   : >> { %v3969_v61 = vunpack.c.l.b16 %v3096_v12  ;;  %v4000_v5 = vunpack.c.l.b16 %v3269_v10  ;;  %v4001_v59 = vunpack.c.l.b16 %v3272_v58  ;;  %v3275_v25 = vrot.slane %v8655_v36, 5  ;;  %v6389_v10 = vld [vmem:[%s8551_s30 + $0x3c] sm:$0xf]  ;;  %v6390_v58 = vld [vmem:[%s8551_s30 + $0x40] sm:$0xf] }
 0x2a6   : >> { %5156 = vmatpush.bf16.msra.mxu3 %v7066_v35  ;;  %5205 = vmatpush.bf16.msra.mxu0 %v7074_v11  ;;  %v6387_v35 = vld [vmem:[%s8551_s30 + $0x30] sm:$0xf]  ;;  %v6388_v11 = vld [vmem:[%s8551_s30 + $0x34] sm:$0xf]  ;;  %v3392_v49 = vrot.slane %v3391_v2, 4  ;;  %v3402_v38 = vrot.slane %v3401_v6, 4 }
 0x2a7   : >> { %v3412_v57 = vshll.u32 %v6387_v35, 16  ;;  %v3418_v30 = vshll.u32 %v6388_v11, 16  ;;  %v3422_v8 = vshrl.u32 %v6388_v11, 16  ;;  %v3982_v44 = vpack.c.b16 %v3969_v61, %v3968_v26  ;;  %v8711_v61 = vld [vmem:[%s8551_s30 + $0x38] sm:$0x1] }
 0x2a8   : >> { %5108 = vmatpush.bf16.msra.mxu2 %v7057_v56  ;;  %5059 = vmatpush.bf16.msra.mxu1 %v7049_v48  ;;  %v3406_v56 = vrot.slane %v3404_v40, 5  ;;  %v3101_v48 = vshll.u32 %v3004_v55, 16  ;;  %v3397_v54 = vsel %vm7680_vm4, %v3392_v49, %v8646_v50  ;;  %v3117_v50 = vshll.u32 %v3017_v19, 16  ;;  %v8688_v40 = vld [vmem:[%s8551_s30 + $0x34] sm:$0xf] }
 0x2a9   : >> { %v3414_v37 = vrot.slane %v3412_v57, 5  ;;  %v8678_v43 = vrot.slane %v3418_v30, 5  ;;  %v3424_v39 = vrot.slane %v3422_v8, 4  ;;  %v4072_v17 = vunpack.c.l.b16 %v3397_v54 }
 0x2aa   : >> { %5157 = vmatpush.bf16.msra.mxu3 %v7065_v31  ;;  %5206 = vmatpush.bf16.msra.mxu0 %v7073_v29  ;;  %v3111_v31 = vshrl.u32 %v8655_v36, 16  ;;  %v3409_v29 = vshrl.u32 %v6387_v35, 16  ;;  %v3407_v0 = vsel %vm7680_vm4, %v3402_v38, %v3406_v56  ;;  %v3103_v28 = vrot.slane %v3101_v48, 5  ;;  %v7047_v38 = vld [vmem:[#allocation4 + $0x158] sm:$0xff] }
 0x2ab   : >> { %v4073_v23 = vunpack.c.l.b16 %v3407_v0  ;;  %v3425_v45 = vor.u32 %v3424_v39, %v8678_v43  ;;  %v3119_v6 = vrot.slane %v3117_v50, 5  ;;  %v3277_v13 = vrot.slane %v3275_v25, 4  ;;  %v7071_v56 = vld [vmem:[#allocation4 + $0x218] sm:$0xff]  ;;  %v6401_v50 = vld [vmem:[%s8551_s30 + $0x44] sm:$0x1] }
 0x2ac   : >> { %5109 = vmatpush.bf16.msra.mxu2 %v7056_v18  ;;  %5060 = vmatpush.bf16.msra.mxu1 %v7048_v22  ;;  %v3113_v4 = vrot.slane %v3111_v31, 4  ;;  %v3411_v62 = vrot.slane %v3409_v29, 4  ;;  %v3104_v7 = vor.u32 %v3103_v28, %v3100_v27  ;;  %v3278_v55 = vrot.slane %v3017_v19, 5  ;;  %v7063_v22 = vld [vmem:[#allocation4 + $0x1d8] sm:$0xff] }
 0x2ad   : >> { %v4086_v53 = vpack.c.b16 %v4073_v23, %v4072_v17  ;;  %v3426_v35 = vrot.slane %v3425_v45, 4  ;;  %v3122_v51 = vshrl.u32 %v3006_v3, 16  ;;  %v3125_v12 = vshll.u32 %v3006_v3, 16 }
 0x2ae   : >> { %5158 = vmatpush.bf16.msra.mxu3 %v7064_v21  ;;  %5207 = vmatpush.bf16.msra.mxu0 %v7072_v42  ;;  %v3114_v14 = vor.u32 %v3113_v4, %v8676_v33  ;;  %v3105_v2 = vrot.slane %v3104_v7, 4  ;;  %v3131_v49 = vshll.u32 %v8688_v40, 16  ;;  %v3135_v18 = vshrl.u32 %v8688_v40, 16  ;;  %v7055_v21 = vld [vmem:[#allocation4 + $0x198] sm:$0xff] }
 0x2af   : >> { %4874 = vmatmul.bf16.gmra.mxu1 %v3981_v15  ;;  %4923 = vmatmul.bf16.gmra.mxu2 %v4013_v32  ;;  %v4014_v15 = vpack.c.b16 %v4001_v59, %v4000_v5  ;;  %v3220_v32 = vld [vmem:[%s8551_s30 + $0x24] sm:$0xe]  ;;  %v3279_v1 = vsel %vm7694_vm5, %v3277_v13, %v3278_v55  ;;  %v3124_v57 = vrot.slane %v3122_v51, 4  ;;  %v3127_v30 = vrot.slane %v3125_v12, 5  ;;  %v7046_v51 = vld [vmem:[#allocation4 + $0x150] sm:$0xff] }
 0x2b0   : >> { %v3115_v60 = vrot.slane %v3114_v14, 4  ;;  %v6374_v9 = vrot.slane %v3220_v32, 9  ;;  %v3110_v52 = vsel %vm7680_vm4, %v3105_v2, %v8676_v33  ;;  %5110 = vmatpush.bf16.msra.mxu2 %v7055_v21  ;;  %5061 = vmatpush.bf16.msra.mxu1 %v7047_v38  ;;  %v8708_v8 = vrot.slane %v3131_v49, 5  ;;  %v7070_v38 = vld [vmem:[#allocation4 + $0x210] sm:$0xff] }
 0x2b1   : >> { %4972 = vmatmul.bf16.gmra.mxu3 %v6989_v47  ;;  %5021 = vmatmul.bf16.gmra.mxu0 %v4085_v41  ;;  %v3415_v41 = vor.u32 %v3414_v37, %v3411_v62  ;;  %v3428_v47 = vshll.u32 %v6400_v46, 16  ;;  %v3137_v26 = vrot.slane %v3135_v18, 4  ;;  %v3433_v54 = vshrl.u32 %v6389_v10, 16 }
 0x2b2   : >> { %v3120_v48 = vsel %vm7680_vm4, %v3115_v60, %v3119_v6  ;;  %v3276_v42 = vsel %vm7694_vm5, %v6374_v9, %v3275_v25  ;;  %5159 = vmatpush.bf16.msra.mxu3 %v7063_v22  ;;  %5208 = vmatpush.bf16.msra.mxu0 %v7071_v56  ;;  %v3436_v0 = vshll.u32 %v6389_v10, 16  ;;  %v3442_v27 = vshll.u32 %v6390_v58, 16  ;;  %v6991_v25 = vld [vmem:[%s8551_s30 + $0x30] sm:$0xff]  ;;  %v3008_v6 = vld [vmem:[%s8551_s30 + $0x3c] sm:$0xf] }
 0x2b3   : >> { %v3416_v36 = vrot.slane %v3415_v41, 4  ;;  %v3430_v11 = vrot.slane %v3428_v47, 5  ;;  %v3446_v28 = vshrl.u32 %v6390_v58, 16  ;;  %v3970_v5 = vunpack.c.l.b16 %v3110_v52  ;;  %v8721_v60 = vld [vmem:[%s8551_s30 + $0x40] sm:$0xf] }
 0x2b4   : >> { %v3971_v59 = vunpack.c.l.b16 %v3120_v48  ;;  %v4002_v19 = vunpack.c.l.b16 %v3276_v42  ;;  %v4003_v33 = vunpack.c.l.b16 %v3279_v1  ;;  %v3128_v37 = vor.u32 %v3127_v30, %v3124_v57  ;;  %v6391_v9 = vld [vmem:[%s8551_s30 + $0x48] sm:$0xf]  ;;  %v6392_v22 = vld [vmem:[%s8551_s30 + $0x4c] sm:$0xf]  ;;  %5062 = vmatpush.bf16.msra.mxu1 %v7046_v51  ;;  %v7061_v51 = vld [vmem:[#allocation4 + $0x1c8] sm:$0xff] }
 0x2b5   : >> { %v3421_v31 = vsel %vm7680_vm4, %v3416_v36, %v8678_v43  ;;  %v3431_v29 = vsel %vm7680_vm4, %v3426_v35, %v3430_v11  ;;  %v3138_v43 = vor.u32 %v3137_v26, %v8708_v8  ;;  %v3141_v39 = vshll.u32 %v8711_v61, 16  ;;  %v7054_v35 = vld [vmem:[#allocation4 + $0x190] sm:$0xff] }
 0x2b6   : >> { %v4074_v4 = vunpack.c.l.b16 %v3421_v31  ;;  %v4075_v62 = vunpack.c.l.b16 %v3431_v29  ;;  %v3435_v17 = vrot.slane %v3433_v54, 4  ;;  %v3438_v23 = vrot.slane %v3436_v0, 5  ;;  %v7062_v11 = vld [vmem:[#allocation4 + $0x1d0] sm:$0xff]  ;;  %5111 = vmatpush.bf16.msra.mxu2 %v7054_v35  ;;  %5209 = vmatpush.bf16.msra.mxu0 %v7070_v38  ;;  %v3019_v54 = vld [vmem:[%s8551_s30 + $0x44] sm:$0x1] }
 0x2b7   : >> { %v3444_v46 = vrot.slane %v3442_v27, 5  ;;  %v3448_v7 = vrot.slane %v3446_v28, 4  ;;  %v4015_v14 = vpack.c.b16 %v4003_v33, %v4002_v19  ;;  %v3129_v32 = vrot.slane %v3128_v37, 4  ;;  %5160 = vmatpush.bf16.msra.mxu3 %v7062_v11  ;;  %v7053_v35 = vld [vmem:[#allocation4 + $0x188] sm:$0xff]  ;;  %v6393_v11 = vld [vmem:[%s8551_s30 + $0x54] sm:$0xf] }
 0x2b8   : >> { %v3143_v41 = vrot.slane %v3141_v39, 5  ;;  %v3282_v45 = vrot.slane %v8688_v40, 5  ;;  %v3139_v47 = vrot.slane %v3138_v43, 4  ;;  %v3452_v2 = vshll.u32 %v6401_v50, 16 }
 0x2b9   : >> { %v3449_v3 = vor.u32 %v3448_v7, %v3444_v46  ;;  %v3134_v13 = vsel %vm7680_vm4, %v3129_v32, %v8708_v8  ;;  %v3285_v36 = vrot.slane %v8711_v61, 5  ;;  %v3146_v56 = vshrl.u32 %v3008_v6, 16 }
 0x2ba   : >> { %v3284_v40 = vrot.slane %v3282_v45, 4  ;;  %v3144_v12 = vsel %vm7680_vm4, %v3139_v47, %v3143_v41  ;;  %v3454_v21 = vrot.slane %v3452_v2, 5  ;;  %v3149_v52 = vshll.u32 %v3008_v6, 16  ;;  %v3222_v41 = vld [vmem:[%s8551_s30 + $0x3c] sm:$0xe]  ;;  %5112 = vmatpush.bf16.msra.mxu2 %v7053_v35 }
 0x2bb   : >> { %v3450_v18 = vrot.slane %v3449_v3, 4  ;;  %v3155_v48 = vshll.u32 %v8721_v60, 16  ;;  %v3159_v42 = vshrl.u32 %v8721_v60, 16  ;;  %v3457_v10 = vshrl.u32 %v6391_v9, 16  ;;  %v3010_v2 = vld [vmem:[%s8551_s30 + $0x48] sm:$0xf]  ;;  %5161 = vmatpush.bf16.msra.mxu3 %v7061_v51 }
 0x2bc   : >> { %v3460_v58 = vshll.u32 %v6391_v9, 16  ;;  %v3286_v31 = vsel %vm7694_vm5, %v3284_v40, %v3285_v36  ;;  %v3466_v29 = vshll.u32 %v6392_v22, 16  ;;  %v3470_v57 = vshrl.u32 %v6392_v22, 16  ;;  %v8754_v6 = vld [vmem:[%s8551_s30 + $0x4c] sm:$0xf]  ;;  %v7060_v35 = vld [vmem:[#allocation4 + $0x1c0] sm:$0xff] }
 0x2bd   : >> { %v3972_v30 = vunpack.c.l.b16 %v3134_v13  ;;  %v3973_v8 = vunpack.c.l.b16 %v3144_v12  ;;  %v3455_v61 = vsel %vm7680_vm4, %v3450_v18, %v3454_v21  ;;  %v3148_v0 = vrot.slane %v3146_v56, 4  ;;  %v6394_v22 = vld [vmem:[%s8551_s30 + $0x58] sm:$0xf] }
 0x2be   : >> { %v3151_v27 = vrot.slane %v3149_v52, 5  ;;  %v8742_v28 = vrot.slane %v3155_v48, 5  ;;  %v4005_v19 = vunpack.c.l.b16 %v3286_v31  ;;  %v3459_v33 = vrot.slane %v3457_v10, 4 }
 0x2bf   : >> { %4879 = vmatmul.bf16.gmra.mxu1 %v3982_v44  ;;  %4928 = vmatmul.bf16.gmra.mxu2 %v4014_v15  ;;  %v3983_v44 = vpack.c.b16 %v3971_v59, %v3970_v5  ;;  %v4087_v15 = vpack.c.b16 %v4075_v62, %v4074_v4  ;;  %v3161_v5 = vrot.slane %v3159_v42, 4  ;;  %v3462_v4 = vrot.slane %v3460_v58, 5  ;;  %v7045_v58 = vld [vmem:[#allocation4 + $0x148] sm:$0xff] }
 0x2c0   : >> { %v4077_v37 = vunpack.c.l.b16 %v3455_v61  ;;  %v8744_v43 = vrot.slane %v3466_v29, 5  ;;  %v3472_v39 = vrot.slane %v3470_v57, 4  ;;  %v3984_v50 = vpack.c.b16 %v3973_v8, %v3972_v30  ;;  %5063 = vmatpush.bf16.msra.mxu1 %v7045_v58  ;;  %5162 = vmatpush.bf16.msra.mxu3 %v7060_v35 }
 0x2c1   : >> { %4977 = vmatmul.bf16.gmra.mxu3 %v6990_v63  ;;  %5026 = vmatmul.bf16.gmra.mxu0 %v4086_v53  ;;  %v3221_v63 = vld [vmem:[%s8551_s30 + $0x30] sm:$0xe]  ;;  %v3439_v53 = vor.u32 %v3438_v23, %v3435_v17  ;;  %v3165_v17 = vshll.u32 %v3019_v54, 16  ;;  %v6402_v23 = vld [vmem:[%s8551_s30 + $0x50] sm:$0x1]  ;;  %v3162_v7 = vor.u32 %v3161_v5, %v8742_v28  ;;  %v6376_v9 = vrot.slane %v3222_v41, 9 }
 0x2c2   : >> { %v6375_v55 = vrot.slane %v3221_v63, 9  ;;  %v3476_v47 = vshll.u32 %v6402_v23, 16  ;;  %v3170_v12 = vshrl.u32 %v3010_v2, 16  ;;  %v3179_v18 = vshll.u32 %v8754_v6, 16  ;;  %v8779_v23 = vld [vmem:[%s8551_s30 + $0x5c] sm:$0x1] }
 0x2c3   : >> { %v3440_v49 = vrot.slane %v3439_v53, 4  ;;  %v3167_v63 = vrot.slane %v3165_v17, 5  ;;  %v3163_v3 = vrot.slane %v3162_v7, 4  ;;  %v3183_v21 = vshrl.u32 %v8754_v6, 16 }
 0x2c4   : >> { %v3283_v1 = vsel %vm7694_vm5, %v6375_v55, %v3282_v45  ;;  %v3473_v45 = vor.u32 %v3472_v39, %v8744_v43  ;;  %v3478_v36 = vrot.slane %v3476_v47, 5  ;;  %v3481_v42 = vshrl.u32 %v6393_v11, 16 }
 0x2c5   : >> { %v3445_v26 = vsel %vm7680_vm4, %v3440_v49, %v3444_v46  ;;  %v4004_v59 = vunpack.c.l.b16 %v3283_v1  ;;  %v3152_v46 = vor.u32 %v3151_v27, %v3148_v0  ;;  %v3173_v49 = vshll.u32 %v3010_v2, 16 }
 0x2c6   : >> { %v4076_v62 = vunpack.c.l.b16 %v3445_v26  ;;  %v3474_v40 = vrot.slane %v3473_v45, 4  ;;  %v3168_v56 = vsel %vm7680_vm4, %v3163_v3, %v3167_v63  ;;  %v3484_v10 = vshll.u32 %v6393_v11, 16 }
 0x2c7   : >> { %v3153_v53 = vrot.slane %v3152_v46, 4  ;;  %v3490_v29 = vshll.u32 %v6394_v22, 16  ;;  %v3494_v57 = vshrl.u32 %v6394_v22, 16  ;;  %v3172_v30 = vrot.slane %v3170_v12, 4 }
 0x2c8   : >> { %v4088_v32 = vpack.c.b16 %v4077_v37, %v4076_v62  ;;  %v3479_v31 = vsel %vm7680_vm4, %v3474_v40, %v3478_v36  ;;  %v3175_v8 = vrot.slane %v3173_v49, 5  ;;  %v8774_v26 = vrot.slane %v3179_v18, 5  ;;  %v8787_v40 = vld [vmem:[%s8551_s30 + $0x58] sm:$0xf]  ;;  %v6395_v18 = vld [vmem:[%s8551_s30 + $0x60] sm:$0xf] }
 0x2c9   : >> { %v3158_v38 = vsel %vm7680_vm4, %v3153_v53, %v8742_v28  ;;  %v3185_v61 = vrot.slane %v3183_v21, 4  ;;  %v3975_v27 = vunpack.c.l.b16 %v3168_v56  ;;  %v4079_v62 = vunpack.c.l.b16 %v3479_v31  ;;  %v7052_v36 = vld [vmem:[#allocation4 + $0x180] sm:$0xff]  ;;  %v6396_v21 = vld [vmem:[%s8551_s30 + $0x64] sm:$0xf] }
 0x2ca   : >> { %v3974_v0 = vunpack.c.l.b16 %v3158_v38  ;;  %v3492_v37 = vrot.slane %v3490_v29, 5  ;;  %v3176_v39 = vor.u32 %v3175_v8, %v3172_v30  ;;  %v3296_v7 = vrot.slane %v8754_v6, 5  ;;  %5113 = vmatpush.bf16.msra.mxu2 %v7052_v36 }
 0x2cb   : >> { %v3186_v17 = vor.u32 %v3185_v61, %v8774_v26  ;;  %v3500_v45 = vshll.u32 %v8779_v23, 16  ;;  %v3203_v56 = vshll.u32 %v8787_v40, 16  ;;  %v3505_v58 = vshrl.u32 %v6395_v18, 16 }
 0x2cc   : >> { %v3177_v47 = vrot.slane %v3176_v39, 4  ;;  %v3298_v2 = vrot.slane %v3296_v7, 4  ;;  %v3514_v31 = vshll.u32 %v6396_v21, 16  ;;  %v3518_v29 = vshrl.u32 %v6396_v21, 16 }
 0x2cd   : >> { %v3187_v63 = vrot.slane %v3186_v17, 4 }
 0x2ce   : >> { %v3182_v11 = vsel %vm7680_vm4, %v3177_v47, %v8774_v26 }
 0x2cf   : >> { %4884 = vmatmul.bf16.gmra.mxu1 %v3983_v44  ;;  %4933 = vmatmul.bf16.gmra.mxu2 %v4015_v14  ;;  %v4016_v44 = vpack.c.b16 %v4005_v19, %v4004_v59  ;;  %v3289_v14 = vrot.slane %v8721_v60, 5  ;;  %v3292_v60 = vrot.slane %v3019_v54, 5  ;;  %v7069_v54 = vld [vmem:[#allocation4 + $0x208] sm:$0xff]  ;;  %v3020_v59 = vld [vmem:[%s8551_s30 + $0x50] sm:$0x1]  ;;  %v3483_v19 = vrot.slane %v3481_v42, 4 }
 0x2d0   : >> { %5210 = vmatpush.bf16.msra.mxu0 %v7069_v54  ;;  %v3189_v46 = vshll.u32 %v3020_v59, 16  ;;  %v3976_v30 = vunpack.c.l.b16 %v3182_v11 }
 0x2d1   : >> { %4982 = vmatmul.bf16.gmra.mxu3 %v6991_v25  ;;  %5031 = vmatmul.bf16.gmra.mxu0 %v4087_v15  ;;  %v3463_v25 = vor.u32 %v3462_v4, %v3459_v33  ;;  %v6992_v15 = vld [vmem:[%s8551_s30 + $0x3c] sm:$0xff]  ;;  %v3291_v13 = vrot.slane %v3289_v14, 4  ;;  %v3290_v52 = vsel %vm7694_vm5, %v6376_v9, %v3289_v14  ;;  %v3486_v33 = vrot.slane %v3484_v10, 5  ;;  %v3223_v14 = vld [vmem:[%s8551_s30 + $0x48] sm:$0xe] }
 0x2d2   : >> { %v4006_v28 = vunpack.c.l.b16 %v3290_v52  ;;  %v3191_v53 = vrot.slane %v3189_v46, 5  ;;  %v6377_v3 = vrot.slane %v3223_v14, 9  ;;  %v3299_v9 = vrot.slane %v3020_v59, 5 }
 0x2d3   : >> { %v3464_v55 = vrot.slane %v3463_v25, 4  ;;  %v3293_v48 = vsel %vm7694_vm5, %v3291_v13, %v3292_v60  ;;  %v3487_v25 = vor.u32 %v3486_v33, %v3483_v19  ;;  %v3012_v13 = vld [vmem:[%s8551_s30 + $0x54] sm:$0xf]  ;;  %v3207_v52 = vshrl.u32 %v8787_v40, 16  ;;  %v3021_v19 = vld [vmem:[%s8551_s30 + $0x5c] sm:$0x1] }
 0x2d4   : >> { %v4007_v5 = vunpack.c.l.b16 %v3293_v48  ;;  %v3192_v51 = vsel %vm7680_vm4, %v3187_v63, %v3191_v53  ;;  %v3297_v12 = vsel %vm7694_vm5, %v6377_v3, %v3296_v7  ;;  %v3300_v49 = vsel %vm7694_vm5, %v3298_v2, %v3299_v9  ;;  %v7044_v48 = vld [vmem:[#allocation4 + $0x140] sm:$0xff] }
 0x2d5   : >> { %v3469_v1 = vsel %vm7680_vm4, %v3464_v55, %v8744_v43  ;;  %v3496_v43 = vrot.slane %v3494_v57, 4  ;;  %v3488_v6 = vrot.slane %v3487_v25, 4  ;;  %v3502_v55 = vrot.slane %v3500_v45, 5  ;;  %5064 = vmatpush.bf16.msra.mxu1 %v7044_v48  ;;  %v7068_v57 = vld [vmem:[#allocation4 + $0x200] sm:$0xff] }
 0x2d6   : >> { %v4078_v4 = vunpack.c.l.b16 %v3469_v1  ;;  %v3194_v22 = vshrl.u32 %v3012_v13, 16  ;;  %v3197_v38 = vshll.u32 %v3012_v13, 16  ;;  %v3508_v1 = vshll.u32 %v6395_v18, 16  ;;  %5211 = vmatpush.bf16.msra.mxu0 %v7068_v57  ;;  %v6423_v2 = vld [vmem:[%s8551_s30 + $0x18] sm:$0xf] }
 0x2d7   : >> { %v3497_v41 = vor.u32 %v3496_v43, %v3492_v37  ;;  %v3493_v42 = vsel %vm7680_vm4, %v3488_v6, %v3492_v37  ;;  %v3977_v8 = vunpack.c.l.b16 %v3192_v51  ;;  %v4008_v26 = vunpack.c.l.b16 %v3297_v12  ;;  %v8808_v43 = vld [vmem:[%s8551_s30 + $0x68] sm:$0x1]  ;;  %v8820_v9 = vld [vmem:[%s8551_s30 + $0x1c] sm:$0xf] }
 0x2d8   : >> { %v4009_v61 = vunpack.c.l.b16 %v3300_v49  ;;  %v3196_v54 = vrot.slane %v3194_v22, 4  ;;  %v3507_v33 = vrot.slane %v3505_v58, 4  ;;  %v3520_v37 = vrot.slane %v3518_v29, 4 }
 0x2d9   : >> { %v3498_v60 = vrot.slane %v3497_v41, 4  ;;  %v3986_v39 = vpack.c.b16 %v3977_v8, %v3976_v30  ;;  %v3213_v25 = vshll.u32 %v3021_v19, 16  ;;  %v3224_v41 = vld [vmem:[%s8551_s30 + $0x54] sm:$0xe]  ;;  %v3524_v63 = vshll.u32 %v8808_v43, 16 }
 0x2da   : >> { %v4018_v17 = vpack.c.b16 %v4009_v61, %v4008_v26  ;;  %v6378_v13 = vrot.slane %v3224_v41, 9  ;;  %v3645_v51 = vshrl.u32 %v6423_v2, 16  ;;  %v3648_v12 = vshll.u32 %v6423_v2, 16 }
 0x2db   : >> { %v3503_v10 = vsel %vm7680_vm4, %v3498_v60, %v3502_v55  ;;  %v3215_v6 = vrot.slane %v3213_v25, 5  ;;  %v3306_v55 = vrot.slane %v3021_v19, 5  ;;  %v3526_v35 = vrot.slane %v3524_v63, 5  ;;  %v6447_v25 = vld [vmem:[%s8551_s30 + $0x18] sm:$0xe] }
 0x2dc   : >> { %v4081_v59 = vunpack.c.l.b16 %v3503_v10  ;;  %v3654_v49 = vshll.u32 %v8820_v9, 16  ;;  %v3658_v18 = vshrl.u32 %v8820_v9, 16 }
 0x2de   : >> { %v3656_v29 = vrot.slane %v3654_v49, 5  ;;  %v3660_v57 = vrot.slane %v3658_v18, 4 }
 0x2df   : >> { %4889 = vmatmul.bf16.gmra.mxu1 %v3984_v50  ;;  %4938 = vmatmul.bf16.gmra.mxu2 %v4016_v44  ;;  %v3985_v50 = vpack.c.b16 %v3975_v27, %v3974_v0  ;;  %v4017_v44 = vpack.c.b16 %v4007_v5, %v4006_v28  ;;  %v3199_v0 = vrot.slane %v3197_v38, 5  ;;  %v3205_v27 = vrot.slane %v3203_v56, 5 }
 0x2e0   : >> { %v3209_v28 = vrot.slane %v3207_v52, 4  ;;  %v4080_v5 = vunpack.c.l.b16 %v3493_v42 }
 0x2e1   : >> { %4987 = vmatmul.bf16.gmra.mxu3 %v6992_v15  ;;  %5036 = vmatmul.bf16.gmra.mxu0 %v4088_v32  ;;  %v6993_v15 = vld [vmem:[%s8551_s30 + $0x48] sm:$0xff]  ;;  %v4089_v32 = vpack.c.b16 %v4079_v62, %v4078_v4  ;;  %v3510_v4 = vrot.slane %v3508_v1, 5  ;;  %v3516_v62 = vrot.slane %v3514_v31, 5  ;;  %v3200_v46 = vor.u32 %v3199_v0, %v3196_v54 }
 0x2e2   : >> { %v3210_v7 = vor.u32 %v3209_v28, %v3205_v27  ;;  %v4090_v14 = vpack.c.b16 %v4081_v59, %v4080_v5  ;;  %v3647_v1 = vrot.slane %v3645_v51, 4  ;;  %v3650_v31 = vrot.slane %v3648_v12, 5  ;;  %v7261_v5 = vld [vmem:[%s8551_s30 + $0x10] sm:$0xf] }
 0x2e3   : >> { %v3511_v45 = vor.u32 %v3510_v4, %v3507_v33  ;;  %v3521_v47 = vor.u32 %v3520_v37, %v3516_v62  ;;  %v3201_v53 = vrot.slane %v3200_v46, 4  ;;  %v3562_v59 = vrot.slane %v7261_v5, 5  ;;  %v6440_v5 = vld [vmem:[%s8551_s30 + $0x2c] sm:$0x1] }
 0x2e4   : >> { %v3211_v3 = vrot.slane %v3210_v7, 4  ;;  %v3651_v19 = vor.u32 %v3650_v31, %v3647_v1  ;;  %v3661_v33 = vor.u32 %v3660_v57, %v3656_v29  ;;  %v3870_v46 = vrot.slane %v8820_v9, 5 }
 0x2e5   : >> { %v3522_v36 = vrot.slane %v3521_v47, 4  ;;  %v3206_v38 = vsel %vm7680_vm4, %v3201_v53, %v3205_v27  ;;  %v6439_v27 = vld [vmem:[%s8551_s30 + $0x20] sm:$0x1]  ;;  %v3564_v63 = vrot.slane %v3562_v59, 4 }
 0x2e6   : >> { %v3216_v56 = vsel %vm7680_vm4, %v3211_v3, %v3215_v6  ;;  %v3978_v30 = vunpack.c.l.b16 %v3206_v38  ;;  %v3652_v53 = vrot.slane %v3651_v19, 4  ;;  %v3662_v3 = vrot.slane %v3661_v33, 4 }
 0x2e7   : >> { %v3527_v58 = vsel %vm7680_vm4, %v3522_v36, %v3526_v35  ;;  %v3979_v8 = vunpack.c.l.b16 %v3216_v56  ;;  %v6455_v6 = vrot.slane %v6447_v25, 9  ;;  %v3872_v9 = vrot.slane %v3870_v46, 4 }
 0x2e8   : >> { %v4083_v0 = vunpack.c.l.b16 %v3527_v58  ;;  %v3657_v12 = vsel %vm7680_vm4, %v3652_v53, %v3656_v29 }
 0x2e9   : >> { %v3871_v18 = vsel %vm7694_vm5, %v6455_v6, %v3870_v46  ;;  %v4172_v57 = vunpack.c.l.b16 %v3657_v12 }
 0x2ef   : >> { %4894 = vmatmul.bf16.gmra.mxu1 %v3985_v50  ;;  %4943 = vmatmul.bf16.gmra.mxu2 %v4017_v44  ;;  %v6994_v44 = vld [vmem:[%s8551_s30 + $0x54] sm:$0xff] }
 0x2f1   : >> { %4992 = vmatmul.bf16.gmra.mxu3 %v6993_v15  ;;  %5041 = vmatmul.bf16.gmra.mxu0 %v4089_v32  ;;  %v3303_v15 = vrot.slane %v8787_v40, 5  ;;  %v3512_v40 = vrot.slane %v3511_v45, 4 }
 0x2f3   : >> { %v3305_v60 = vrot.slane %v3303_v15, 4  ;;  %v3304_v52 = vsel %vm7694_vm5, %v6378_v13, %v3303_v15  ;;  %v3517_v10 = vsel %vm7680_vm4, %v3512_v40, %v3516_v62  ;;  %v3987_v62 = vpack.c.b16 %v3979_v8, %v3978_v30  ;;  %v7262_v15 = vld [vmem:[%s8551_s30 + $0x14] sm:$0x1] }
 0x2f4   : >> { %v4010_v26 = vunpack.c.l.b16 %v3304_v52  ;;  %v4082_v54 = vunpack.c.l.b16 %v3517_v10  ;;  %v3565_v41 = vrot.slane %v7262_v15, 5  ;;  %v3873_v13 = vrot.slane %v6439_v27, 5 }
 0x2f5   : >> { %v3307_v48 = vsel %vm7694_vm5, %v3305_v60, %v3306_v55  ;;  %v6425_v60 = vld [vmem:[%s8551_s30 + $0x24] sm:$0xf]  ;;  %v8861_v55 = vld [vmem:[%s8551_s30 + $0x28] sm:$0xf]  ;;  %v4204_v8 = vunpack.c.l.b16 %v3871_v18 }
 0x2f6   : >> { %v4011_v61 = vunpack.c.l.b16 %v3307_v48  ;;  %v3566_v35 = vsel %vm7694_vm5, %v3564_v63, %v3565_v41  ;;  %v3874_v38 = vsel %vm7694_vm5, %v3872_v9, %v3873_v13  ;;  %v3669_v52 = vshrl.u32 %v6425_v60, 16  ;;  %v6427_v9 = vld [vmem:[%s8551_s30 + $0x30] sm:$0xf]  ;;  %v8898_v13 = vld [vmem:[%s8551_s30 + $0x34] sm:$0xf] }
 0x2f7   : >> { %v3672_v48 = vshll.u32 %v6425_v60, 16  ;;  %v3678_v10 = vshll.u32 %v8861_v55, 16  ;;  %v3682_v58 = vshrl.u32 %v8861_v55, 16  ;;  %v4101_v29 = vunpack.c.l.b16 %v3566_v35  ;;  %v7264_v60 = vld [vmem:[%s8551_s30 + $0x20] sm:$0x1] }
 0x2f8   : >> { %v4019_v37 = vpack.c.b16 %v4011_v61, %v4010_v26  ;;  %v4205_v26 = vunpack.c.l.b16 %v3874_v38  ;;  %v3671_v61 = vrot.slane %v3669_v52, 4  ;;  %v3688_v41 = vshll.u32 %v6440_v5, 16 }
 0x2f9   : >> { %v3877_v53 = vrot.slane %v8861_v55, 5  ;;  %v3880_v38 = vrot.slane %v6440_v5, 5  ;;  %v3693_v55 = vshrl.u32 %v6427_v9, 16 }
 0x2fc   : >> { %v8810_v50 = vpop.f32.mrf.mxu1 }
 0x2fe   : >> { %v8814_v32 = vpop.f32.mrf.mxu0 }
 0x2ff   : >> { %4899 = vmatmul.bf16.gmra.mxu1 %v3986_v39  ;;  %4948 = vmatmul.bf16.gmra.mxu2 %v4018_v17  ;;  %v6405_v39 = vld [vmem:[%s8551_s30 + $0xc] sm:$0xe]  ;;  %v3664_v17 = vshll.u32 %v6439_v27, 16  ;;  %v3684_v27 = vrot.slane %v3682_v58, 4  ;;  %v3706_v58 = vshrl.u32 %v8898_v13, 16 }
 0x300   : >> { %v6413_v47 = vrot.slane %v6405_v39, 9  ;;  %v7263_v39 = vld [vmem:[%s8551_s30 + $0x1c] sm:$0xf] }
 0x301   : >> { %4997 = vmatmul.bf16.gmra.mxu3 %v6994_v44  ;;  %5046 = vmatmul.bf16.gmra.mxu0 %v4090_v14  ;;  %v6995_v44 = vld [vmem:[%s8551_s30 + $0x60] sm:$0xff]  ;;  %v4091_v14 = vpack.c.b16 %v4083_v0, %v4082_v54  ;;  %v3666_v2 = vrot.slane %v3664_v17, 5  ;;  %v3674_v54 = vrot.slane %v3672_v48, 5  ;;  %v3680_v0 = vrot.slane %v3678_v10, 5 }
 0x302   : >> { %v8822_v11 = vpop.f32.mrf.mxu2  ;;  %v3563_v36 = vsel %vm7694_vm5, %v6413_v47, %v3562_v59  ;;  %v3569_v17 = vrot.slane %v7263_v39, 5  ;;  %v3696_v48 = vshll.u32 %v6427_v9, 16  ;;  %v3702_v10 = vshll.u32 %v8898_v13, 16 }
 0x303   : >> { %v3667_v49 = vsel %vm7680_vm4, %v3662_v3, %v3666_v2  ;;  %v4100_v31 = vunpack.c.l.b16 %v3563_v36  ;;  %v3675_v25 = vor.u32 %v3674_v54, %v3671_v61  ;;  %v3685_v15 = vor.u32 %v3684_v27, %v3680_v0  ;;  %v6448_v3 = vld [vmem:[%s8551_s30 + $0x24] sm:$0xe] }
 0x304   : >> { %v8826_v21 = vpop.f32.mrf.mxu3  ;;  %v8828_v22 = vpop.f32.mrf.mxu1  ;;  %v4173_v30 = vunpack.c.l.b16 %v3667_v49  ;;  %v3571_v6 = vrot.slane %v3569_v17, 4  ;;  %v3572_v36 = vrot.slane %v7264_v60, 5  ;;  %v3690_v49 = vrot.slane %v3688_v41, 5 }
 0x305   : >> { %v4116_v33 = vpack.c.b16 %v4101_v29, %v4100_v31  ;;  %v3676_v35 = vrot.slane %v3675_v25, 4  ;;  %v3686_v12 = vrot.slane %v3685_v15, 4  ;;  %v6456_v18 = vrot.slane %v6448_v3, 9 }
 0x306   : >> { %v8838_v42 = vpop.f32.mrf.mxu0  ;;  %v3698_v39 = vrot.slane %v3696_v48, 5 }
 0x307   : >> { %v3691_v61 = vsel %vm7680_vm4, %v3686_v12, %v3690_v49 }
 0x308   : >> { %v4175_v15 = vunpack.c.l.b16 %v3691_v61 }
 0x30a   : >> { %v8845_v28 = vpop.f32.mrf.mxu2 }
 0x30c   : >> { %v8848_v4 = vpop.f32.mrf.mxu3  ;;  %v8852_v7 = vpop.f32.mrf.mxu1 }
 0x30e   : >> { %v8857_v45 = vpop.f32.mrf.mxu0 }
 0x30f   : >> { %4904 = vmatmul.bf16.gmra.mxu1 %v3987_v62  ;;  %4953 = vmatmul.bf16.gmra.mxu2 %v4019_v37  ;;  %v6996_v62 = vld [vmem:[%s8551_s30 + $0x18] sm:$0xff]  ;;  %v4188_v37 = vpack.c.b16 %v4173_v30, %v4172_v57 }
 0x311   : >> { %5002 = vmatmul.bf16.gmra.mxu3 %v6995_v44  ;;  %5051 = vmatmul.bf16.gmra.mxu0 %v4091_v14  ;;  %v4220_v44 = vpack.c.b16 %v4205_v26, %v4204_v8  ;;  %v6406_v14 = vld [vmem:[%s8551_s30 + $0x18] sm:$0xe]  ;;  %v3573_v8 = vsel %vm7694_vm5, %v3571_v6, %v3572_v36  ;;  %v3681_v26 = vsel %vm7680_vm4, %v3676_v35, %v3680_v0  ;;  %v3708_v0 = vrot.slane %v3706_v58, 4  ;;  %v6407_v6 = vld [vmem:[%s8551_s30 + $0x24] sm:$0xe] }
 0x312   : >> { %v8863_v40 = vpop.f32.mrf.mxu2  ;;  %v6414_v2 = vrot.slane %v6406_v14, 9  ;;  %v6441_v14 = vld [vmem:[%s8551_s30 + $0x38] sm:$0x1] }
 0x313   : >> { %v3712_v36 = vshll.u32 %v6441_v14, 16 }
 0x314   : >> { %v8869_v51 = vpop.f32.mrf.mxu3  ;;  %v8879_v56 = vpop.f32.mrf.mxu1  ;;  %v3570_v30 = vsel %vm7694_vm5, %v6414_v2, %v3569_v17  ;;  %v8916_v17 = vrot.slane %v3702_v10, 5 }
 0x315   : >> { %v3714_v61 = vrot.slane %v3712_v36, 5 }
 0x316   : >> { %v8883_v1 = vpop.f32.mrf.mxu0  ;;  %v3709_v60 = vor.u32 %v3708_v0, %v8916_v17 }
 0x31a   : >> { %v8886_v59 = vpop.f32.mrf.mxu2 }
 0x31c   : >> { %v8888_v19 = vpop.f32.mrf.mxu3  ;;  %v4870_v46 = vpop.f32.mrf.mxu1 }
 0x31d   : >> { %v4871_v47 = vadd.f32 %v4870_v46, %v8814_v32  ;;  %v3879_v32 = vrot.slane %v3877_v53, 4  ;;  %v4102_v46 = vunpack.c.l.b16 %v3570_v30 }
 0x31e   : >> { %v5017_v63 = vpop.f32.mrf.mxu0 }
 0x31f   : >> { %5065 = vmatmul.bf16.vlgmr.msra.gmra.mxu1 %v4116_v33  ;;  %5114 = vmatmul.bf16.vlgmr.msra.gmra.mxu2 %v6996_v62  ;;  %v3878_v33 = vsel %vm7694_vm5, %v6456_v18, %v3877_v53  ;;  %v3881_v62 = vsel %vm7694_vm5, %v3879_v32, %v3880_v38  ;;  %v7265_v53 = vld [vmem:[%s8551_s30 + $0x28] sm:$0xf] }
 0x320   : >> { %v4206_v41 = vunpack.c.l.b16 %v3878_v33  ;;  %v3576_v3 = vrot.slane %v7265_v53, 5  ;;  %v6997_v18 = vld [vmem:[%s8551_s30 + $0x24] sm:$0xff] }
 0x321   : >> { %5163 = vmatmul.bf16.vlgmr.msra.gmra.mxu3 %v4188_v37  ;;  %5212 = vmatmul.bf16.vlgmr.msra.gmra.mxu0 %v4220_v44  ;;  %v3695_v37 = vrot.slane %v3693_v55, 4  ;;  %v4103_v44 = vunpack.c.l.b16 %v3573_v8  ;;  %v6449_v55 = vld [vmem:[%s8551_s30 + $0x30] sm:$0xe] }
 0x322   : >> { %v4919_v52 = vpop.f32.mrf.mxu2 }
 0x323   : >> { %v4920_v31 = vadd.f32 %v4919_v52, %v4871_v47  ;;  %v4207_v47 = vunpack.c.l.b16 %v3881_v62  ;;  %v3699_v9 = vor.u32 %v3698_v39, %v3695_v37  ;;  %v4117_v49 = vpack.c.b16 %v4103_v44, %v4102_v46  ;;  %v8933_v62 = vld [vmem:[%s8551_s30 + $0x40] sm:$0xf] }
 0x324   : >> { %v4968_v29 = vpop.f32.mrf.mxu3  ;;  %v4872_v57 = vpop.f32.mrf.mxu1 }
 0x325   : >> { %v4969_v54 = vadd.f32 %v4968_v29, %v4920_v31  ;;  %v4873_v27 = vadd.f32 %v4872_v57, %v8838_v42  ;;  %v4174_v42 = vunpack.c.l.b16 %v3681_v26  ;;  %v4221_v52 = vpack.c.b16 %v4207_v47, %v4206_v41  ;;  %v7266_v57 = vld [vmem:[%s8551_s30 + $0x2c] sm:$0x1] }
 0x326   : >> { %v5019_v5 = vpop.f32.mrf.mxu0  ;;  %v6415_v31 = vrot.slane %v6407_v6, 9  ;;  %v3578_v29 = vrot.slane %v3576_v3, 4  ;;  %v3579_v30 = vrot.slane %v7266_v57, 5  ;;  %v3700_v8 = vrot.slane %v3699_v9, 4  ;;  %v6998_v57 = vld [vmem:[%s8551_s30 + $0x30] sm:$0xff] }
 0x327   : >> { %v8919_v25 = vadd.f32 %v5017_v63, %v4969_v54  ;;  %v3884_v63 = vrot.slane %v8898_v13, 5  ;;  %v4189_v38 = vpack.c.b16 %v4175_v15, %v4174_v42  ;;  %v3710_v26 = vrot.slane %v3709_v60, 4 }
 0x328   : >> { %v6457_v13 = vrot.slane %v6449_v55, 9  ;;  %v3577_v39 = vsel %vm7694_vm5, %v6415_v31, %v3576_v3  ;;  %v3580_v0 = vsel %vm7694_vm5, %v3578_v29, %v3579_v30  ;;  %v3705_v46 = vsel %vm7680_vm4, %v3700_v8, %v8916_v17  ;;  %v7267_v8 = vld [vmem:[%s8551_s30 + $0x34] sm:$0xf] }
 0x329   : >> { %v3886_v54 = vrot.slane %v3884_v63, 4  ;;  %v3726_v3 = vshll.u32 %v8933_v62, 16  ;;  %v4104_v60 = vunpack.c.l.b16 %v3577_v39  ;;  %v4105_v36 = vunpack.c.l.b16 %v3580_v0 }
 0x32a   : >> { %v4921_v2 = vpop.f32.mrf.mxu2  ;;  %v3885_v42 = vsel %vm7694_vm5, %v6457_v13, %v3884_v63  ;;  %v6408_v13 = vld [vmem:[%s8551_s30 + $0x30] sm:$0xe] }
 0x32b   : >> { %v4922_v35 = vadd.f32 %v4921_v2, %v4873_v27  ;;  %v3887_v27 = vrot.slane %v6441_v14, 5  ;;  %v3730_v2 = vshrl.u32 %v8933_v62, 16  ;;  %v4118_v29 = vpack.c.b16 %v4105_v36, %v4104_v60 }
 0x32c   : >> { %v4970_v12 = vpop.f32.mrf.mxu3  ;;  %v4875_v32 = vpop.f32.mrf.mxu1 }
 0x32d   : >> { %v4971_v48 = vadd.f32 %v4970_v12, %v4922_v35  ;;  %v4876_v10 = vadd.f32 %v4875_v32, %v8857_v45  ;;  %v6429_v45 = vld [vmem:[%s8551_s30 + $0x3c] sm:$0xf]  ;;  %v3888_v15 = vsel %vm7694_vm5, %v3886_v54, %v3887_v27  ;;  %v4176_v35 = vunpack.c.l.b16 %v3705_v46 }
 0x32e   : >> { %v5022_v58 = vpop.f32.mrf.mxu0  ;;  %v3717_v47 = vshrl.u32 %v6429_v45, 16  ;;  %v3720_v53 = vshll.u32 %v6429_v45, 16  ;;  %v3732_v55 = vrot.slane %v3730_v2, 4  ;;  %v3891_v46 = vrot.slane %v8933_v62, 5 }
 0x32f   : >> { %5070 = vmatmul.bf16.gmra.mxu1 %v4117_v49  ;;  %5119 = vmatmul.bf16.gmra.mxu2 %v6997_v18  ;;  %v8929_v33 = vadd.f32 %v5019_v5, %v4971_v48  ;;  %v3715_v5 = vsel %vm7680_vm4, %v3710_v26, %v3714_v61  ;;  %v4208_v49 = vunpack.c.l.b16 %v3885_v42  ;;  %v4209_v18 = vunpack.c.l.b16 %v3888_v15  ;;  %v6442_v48 = vld [vmem:[%s8551_s30 + $0x44] sm:$0x1]  ;;  %v6431_v42 = vld [vmem:[%s8551_s30 + $0x48] sm:$0xf]  ;;  %v8965_v15 = vld [vmem:[%s8551_s30 + $0x4c] sm:$0xf] }
 0x330   : >> { %v4177_v12 = vunpack.c.l.b16 %v3715_v5  ;;  %v3719_v32 = vrot.slane %v3717_v47, 4  ;;  %v3583_v26 = vrot.slane %v7267_v8, 5  ;;  %v3736_v45 = vshll.u32 %v6442_v48, 16  ;;  %v7268_v47 = vld [vmem:[%s8551_s30 + $0x38] sm:$0x1] }
 0x331   : >> { %5168 = vmatmul.bf16.gmra.mxu3 %v4189_v38  ;;  %5217 = vmatmul.bf16.gmra.mxu0 %v4221_v52  ;;  %v3722_v38 = vrot.slane %v3720_v53, 5  ;;  %v8953_v52 = vrot.slane %v3726_v3, 5  ;;  %v3586_v53 = vrot.slane %v7268_v47, 5  ;;  %v3894_v62 = vrot.slane %v6442_v48, 5 }
 0x332   : >> { %v4924_v37 = vpop.f32.mrf.mxu2  ;;  %v4190_v30 = vpack.c.b16 %v4177_v12, %v4176_v35  ;;  %v3585_v5 = vrot.slane %v3583_v26, 4  ;;  %v3741_v36 = vshrl.u32 %v6431_v42, 16  ;;  %v3744_v35 = vshll.u32 %v6431_v42, 16 }
 0x333   : >> { %v4925_v44 = vadd.f32 %v4924_v37, %v4876_v10  ;;  %v3723_v54 = vor.u32 %v3722_v38, %v3719_v32  ;;  %v3733_v27 = vor.u32 %v3732_v55, %v8953_v52  ;;  %v3750_v12 = vshll.u32 %v8965_v15, 16 }
 0x334   : >> { %v4973_v14 = vpop.f32.mrf.mxu3  ;;  %v4877_v41 = vpop.f32.mrf.mxu1  ;;  %v3587_v55 = vsel %vm7694_vm5, %v3585_v5, %v3586_v53  ;;  %v3743_v8 = vrot.slane %v3741_v36, 4  ;;  %v6409_v5 = vld [vmem:[%s8551_s30 + $0x3c] sm:$0xe]  ;;  %v6451_v36 = vld [vmem:[%s8551_s30 + $0x48] sm:$0xe] }
 0x335   : >> { %v4974_v17 = vadd.f32 %v4973_v14, %v4925_v44  ;;  %v4878_v6 = vadd.f32 %v4877_v41, %v8883_v1  ;;  %v6450_v44 = vld [vmem:[%s8551_s30 + $0x3c] sm:$0xe]  ;;  %v6416_v14 = vrot.slane %v6408_v13, 9  ;;  %v3724_v3 = vrot.slane %v3723_v54, 4  ;;  %v6443_v54 = vld [vmem:[%s8551_s30 + $0x50] sm:$0x1] }
 0x336   : >> { %v5024_v9 = vpop.f32.mrf.mxu0  ;;  %v3734_v2 = vrot.slane %v3733_v27, 4  ;;  %v4107_v13 = vunpack.c.l.b16 %v3587_v55  ;;  %v3760_v53 = vshll.u32 %v6443_v54, 16 }
 0x337   : >> { %v8951_v63 = vadd.f32 %v5022_v58, %v4974_v17  ;;  %v4222_v58 = vpack.c.b16 %v4209_v18, %v4208_v49  ;;  %v6458_v17 = vrot.slane %v6450_v44, 9  ;;  %v3754_v49 = vshrl.u32 %v8965_v15, 16 }
 0x338   : >> { %v3584_v38 = vsel %vm7694_vm5, %v6416_v14, %v3583_v26  ;;  %v3729_v48 = vsel %vm7680_vm4, %v3724_v3, %v8953_v52  ;;  %v3746_v26 = vrot.slane %v3744_v35, 5 }
 0x339   : >> { %v3756_v52 = vrot.slane %v3754_v49, 4 }
 0x33a   : >> { %v4926_v10 = vpop.f32.mrf.mxu2  ;;  %v3747_v42 = vor.u32 %v3746_v26, %v3743_v8 }
 0x33b   : >> { %v4927_v1 = vadd.f32 %v4926_v10, %v4878_v6  ;;  %v3893_v6 = vrot.slane %v3891_v46, 4 }
 0x33c   : >> { %v4975_v31 = vpop.f32.mrf.mxu3  ;;  %v4880_v61 = vpop.f32.mrf.mxu1  ;;  %v3748_v55 = vrot.slane %v3747_v42, 4 }
 0x33d   : >> { %v4976_v37 = vadd.f32 %v4975_v31, %v4927_v1  ;;  %v4881_v39 = vadd.f32 %v4880_v61, %v8810_v50  ;;  %v3738_v50 = vrot.slane %v3736_v45, 5  ;;  %v8986_v61 = vrot.slane %v3750_v12, 5 }
 0x33e   : >> { %v5027_v0 = vpop.f32.mrf.mxu0 }
 0x33f   : >> { %5075 = vmatmul.bf16.gmra.mxu1 %v4118_v29  ;;  %5124 = vmatmul.bf16.gmra.mxu2 %v6998_v57  ;;  %v8967_v41 = vadd.f32 %v5024_v9, %v4976_v37  ;;  %v3739_v10 = vsel %vm7680_vm4, %v3734_v2, %v3738_v50  ;;  %v3892_v57 = vsel %vm7694_vm5, %v6458_v17, %v3891_v46  ;;  %v7269_v46 = vld [vmem:[%s8551_s30 + $0x40] sm:$0xf] }
 0x340   : >> { %v4179_v45 = vunpack.c.l.b16 %v3739_v10  ;;  %v4210_v37 = vunpack.c.l.b16 %v3892_v57  ;;  %v3590_v44 = vrot.slane %v7269_v46, 5  ;;  %v3757_v47 = vor.u32 %v3756_v52, %v8986_v61  ;;  %v6999_v17 = vld [vmem:[%s8551_s30 + $0x3c] sm:$0xff] }
 0x341   : >> { %5173 = vmatmul.bf16.gmra.mxu3 %v4190_v30  ;;  %5222 = vmatmul.bf16.gmra.mxu0 %v4222_v58  ;;  %v3895_v30 = vsel %vm7694_vm5, %v3893_v6, %v3894_v62  ;;  %v4106_v58 = vunpack.c.l.b16 %v3584_v38  ;;  %v3762_v10 = vrot.slane %v3760_v53, 5 }
 0x342   : >> { %v4929_v60 = vpop.f32.mrf.mxu2 }
 0x343   : >> { %v4930_v18 = vadd.f32 %v4929_v60, %v4881_v39  ;;  %v4211_v39 = vunpack.c.l.b16 %v3895_v30  ;;  %v4119_v50 = vpack.c.b16 %v4107_v13, %v4106_v58  ;;  %v9003_v30 = vld [vmem:[%s8551_s30 + $0x58] sm:$0xf]  ;;  %v3753_v58 = vsel %vm7680_vm4, %v3748_v55, %v8986_v61  ;;  %v7271_v55 = vld [vmem:[%s8551_s30 + $0x4c] sm:$0xf] }
 0x344   : >> { %v4978_v9 = vpop.f32.mrf.mxu3  ;;  %v4882_v32 = vpop.f32.mrf.mxu1 }
 0x345   : >> { %v4979_v1 = vadd.f32 %v4978_v9, %v4930_v18  ;;  %v4883_v31 = vadd.f32 %v4882_v32, %v8828_v22  ;;  %v4178_v22 = vunpack.c.l.b16 %v3729_v48  ;;  %v4223_v60 = vpack.c.b16 %v4211_v39, %v4210_v37  ;;  %v7270_v32 = vld [vmem:[%s8551_s30 + $0x44] sm:$0x1] }
 0x346   : >> { %v5029_v29 = vpop.f32.mrf.mxu0  ;;  %v6417_v18 = vrot.slane %v6409_v5, 9  ;;  %v3592_v9 = vrot.slane %v3590_v44, 4  ;;  %v3593_v38 = vrot.slane %v7270_v32, 5  ;;  %v3758_v48 = vrot.slane %v3757_v47, 4  ;;  %v7000_v32 = vld [vmem:[%s8551_s30 + $0x48] sm:$0xff] }
 0x347   : >> { %v8989_v27 = vadd.f32 %v5027_v0, %v4979_v1  ;;  %v3898_v0 = vrot.slane %v8965_v15, 5  ;;  %v4191_v62 = vpack.c.b16 %v4179_v45, %v4178_v22  ;;  %v6459_v15 = vrot.slane %v6451_v36, 9 }
 0x348   : >> { %v3591_v26 = vsel %vm7694_vm5, %v6417_v18, %v3590_v44  ;;  %v3594_v52 = vsel %vm7694_vm5, %v3592_v9, %v3593_v38  ;;  %v3774_v44 = vshll.u32 %v9003_v30, 16 }
 0x349   : >> { %v3900_v1 = vrot.slane %v3898_v0, 4  ;;  %v3899_v22 = vsel %vm7694_vm5, %v6459_v15, %v3898_v0  ;;  %v4108_v47 = vunpack.c.l.b16 %v3591_v26  ;;  %v4109_v53 = vunpack.c.l.b16 %v3594_v52  ;;  %v6410_v15 = vld [vmem:[%s8551_s30 + $0x48] sm:$0xe] }
 0x34a   : >> { %v4931_v14 = vpop.f32.mrf.mxu2  ;;  %v3905_v52 = vrot.slane %v9003_v30, 5 }
 0x34b   : >> { %v4932_v3 = vadd.f32 %v4931_v14, %v4883_v31  ;;  %v3901_v31 = vrot.slane %v6443_v54, 5  ;;  %v3778_v14 = vshrl.u32 %v9003_v30, 16  ;;  %v4120_v9 = vpack.c.b16 %v4109_v53, %v4108_v47 }
 0x34c   : >> { %v4980_v2 = vpop.f32.mrf.mxu3  ;;  %v4885_v6 = vpop.f32.mrf.mxu1 }
 0x34d   : >> { %v4981_v35 = vadd.f32 %v4980_v2, %v4932_v3  ;;  %v4886_v12 = vadd.f32 %v4885_v6, %v8852_v7  ;;  %v6433_v7 = vld [vmem:[%s8551_s30 + $0x54] sm:$0xf]  ;;  %v3902_v45 = vsel %vm7694_vm5, %v3900_v1, %v3901_v31  ;;  %v4180_v3 = vunpack.c.l.b16 %v3753_v58 }
 0x34e   : >> { %v5032_v49 = vpop.f32.mrf.mxu0  ;;  %v3765_v39 = vshrl.u32 %v6433_v7, 16  ;;  %v3768_v46 = vshll.u32 %v6433_v7, 16  ;;  %v3780_v36 = vrot.slane %v3778_v14, 4  ;;  %v6452_v58 = vld [vmem:[%s8551_s30 + $0x54] sm:$0xe] }
 0x34f   : >> { %5080 = vmatmul.bf16.gmra.mxu1 %v4119_v50  ;;  %5129 = vmatmul.bf16.gmra.mxu2 %v6999_v17  ;;  %v8999_v57 = vadd.f32 %v5029_v29, %v4981_v35  ;;  %v3763_v29 = vsel %vm7680_vm4, %v3758_v48, %v3762_v10  ;;  %v4212_v50 = vunpack.c.l.b16 %v3899_v22  ;;  %v4213_v17 = vunpack.c.l.b16 %v3902_v45  ;;  %v6444_v35 = vld [vmem:[%s8551_s30 + $0x5c] sm:$0x1]  ;;  %v9034_v22 = vld [vmem:[%s8551_s30 + $0x64] sm:$0xf] }
 0x350   : >> { %v4181_v2 = vunpack.c.l.b16 %v3763_v29  ;;  %v3767_v6 = vrot.slane %v3765_v39, 4  ;;  %v3597_v48 = vrot.slane %v7271_v55, 5  ;;  %v3784_v7 = vshll.u32 %v6444_v35, 16  ;;  %v6435_v29 = vld [vmem:[%s8551_s30 + $0x60] sm:$0xf] }
 0x351   : >> { %5178 = vmatmul.bf16.gmra.mxu3 %v4191_v62  ;;  %5227 = vmatmul.bf16.gmra.mxu0 %v4223_v60  ;;  %v3770_v62 = vrot.slane %v3768_v46, 5  ;;  %v9023_v60 = vrot.slane %v3774_v44, 5  ;;  %v4224_v10 = vpack.c.b16 %v4213_v17, %v4212_v50  ;;  %v6460_v30 = vrot.slane %v6452_v58, 9 }
 0x352   : >> { %v4934_v8 = vpop.f32.mrf.mxu2  ;;  %v4192_v38 = vpack.c.b16 %v4181_v2, %v4180_v3  ;;  %v3786_v14 = vrot.slane %v3784_v7, 5  ;;  %v3908_v47 = vrot.slane %v6444_v35, 5  ;;  %v3789_v3 = vshrl.u32 %v6435_v29, 16 }
 0x353   : >> { %v4935_v13 = vadd.f32 %v4934_v8, %v4886_v12  ;;  %v3771_v1 = vor.u32 %v3770_v62, %v3767_v6  ;;  %v3781_v31 = vor.u32 %v3780_v36, %v9023_v60  ;;  %v3792_v2 = vshll.u32 %v6435_v29, 16 }
 0x354   : >> { %v4983_v54 = vpop.f32.mrf.mxu3  ;;  %v4887_v37 = vpop.f32.mrf.mxu1  ;;  %v3798_v50 = vshll.u32 %v9034_v22, 16 }
 0x355   : >> { %v4984_v61 = vadd.f32 %v4983_v54, %v4935_v13  ;;  %v4888_v5 = vadd.f32 %v4887_v37, %v8879_v56  ;;  %v6418_v13 = vrot.slane %v6410_v15, 9  ;;  %v3599_v54 = vrot.slane %v3597_v48, 4  ;;  %v7272_v37 = vld [vmem:[%s8551_s30 + $0x50] sm:$0x1]  ;;  %v6445_v15 = vld [vmem:[%s8551_s30 + $0x68] sm:$0x1] }
 0x356   : >> { %v5034_v42 = vpop.f32.mrf.mxu0  ;;  %v3600_v39 = vrot.slane %v7272_v37, 5  ;;  %v3772_v46 = vrot.slane %v3771_v1, 4  ;;  %v3782_v44 = vrot.slane %v3781_v31, 4  ;;  %v3794_v55 = vrot.slane %v3792_v2, 5  ;;  %v6411_v37 = vld [vmem:[%s8551_s30 + $0x54] sm:$0xe] }
 0x357   : >> { %v9021_v0 = vadd.f32 %v5032_v49, %v4984_v61  ;;  %v3598_v36 = vsel %vm7694_vm5, %v6418_v13, %v3597_v48  ;;  %v9055_v48 = vrot.slane %v3798_v50, 5  ;;  %v7273_v13 = vld [vmem:[%s8551_s30 + $0x58] sm:$0xf]  ;;  %v6453_v2 = vld [vmem:[%s8551_s30 + $0x60] sm:$0xe] }
 0x358   : >> { %v3777_v35 = vsel %vm7680_vm4, %v3772_v46, %v9023_v60 }
 0x359   : >> { %v4182_v31 = vunpack.c.l.b16 %v3777_v35  ;;  %v6461_v35 = vrot.slane %v6453_v2, 9 }
 0x35a   : >> { %v4936_v12 = vpop.f32.mrf.mxu2 }
 0x35b   : >> { %v4937_v56 = vadd.f32 %v4936_v12, %v4888_v5  ;;  %v3907_v5 = vrot.slane %v3905_v52, 4 }
 0x35c   : >> { %v4985_v18 = vpop.f32.mrf.mxu3  ;;  %v4890_v49 = vpop.f32.mrf.mxu1 }
 0x35d   : >> { %v4986_v8 = vadd.f32 %v4985_v18, %v4937_v56  ;;  %v4891_v61 = vadd.f32 %v4890_v49, %v8822_v11  ;;  %v3601_v11 = vsel %vm7694_vm5, %v3599_v54, %v3600_v39  ;;  %v3787_v18 = vsel %vm7680_vm4, %v3782_v44, %v3786_v14 }
 0x35e   : >> { %v5037_v26 = vpop.f32.mrf.mxu0  ;;  %v4111_v60 = vunpack.c.l.b16 %v3601_v11  ;;  %v4183_v7 = vunpack.c.l.b16 %v3787_v18  ;;  %v3604_v54 = vrot.slane %v7273_v13, 5  ;;  %v3808_v44 = vshll.u32 %v6445_v15, 16 }
 0x35f   : >> { %5085 = vmatmul.bf16.gmra.mxu1 %v4120_v9  ;;  %5134 = vmatmul.bf16.gmra.mxu2 %v7000_v32  ;;  %v9036_v45 = vadd.f32 %v5034_v42, %v4986_v8  ;;  %v3802_v42 = vshrl.u32 %v9034_v22, 16  ;;  %v3906_v9 = vsel %vm7694_vm5, %v6460_v30, %v3905_v52  ;;  %v3909_v32 = vsel %vm7694_vm5, %v3907_v5, %v3908_v47  ;;  %v7001_v30 = vld [vmem:[%s8551_s30 + $0x54] sm:$0xff] }
 0x360   : >> { %v4214_v8 = vunpack.c.l.b16 %v3906_v9  ;;  %v4215_v58 = vunpack.c.l.b16 %v3909_v32  ;;  %v3912_v5 = vrot.slane %v9034_v22, 5  ;;  %v3810_v11 = vrot.slane %v3808_v44, 5  ;;  %v6437_v32 = vld [vmem:[%s8551_s30 + $0x6c] sm:$0xf] }
 0x361   : >> { %5183 = vmatmul.bf16.gmra.mxu3 %v4192_v38  ;;  %5232 = vmatmul.bf16.gmra.mxu0 %v4224_v10  ;;  %v3791_v38 = vrot.slane %v3789_v3, 4  ;;  %v3804_v49 = vrot.slane %v3802_v42, 4  ;;  %v4110_v10 = vunpack.c.l.b16 %v3598_v36  ;;  %v6419_v42 = vrot.slane %v6411_v37, 9 }
 0x362   : >> { %v4939_v53 = vpop.f32.mrf.mxu2  ;;  %v4225_v3 = vpack.c.b16 %v4215_v58, %v4214_v8  ;;  %v3915_v22 = vrot.slane %v6445_v15, 5  ;;  %v3813_v8 = vshrl.u32 %v6437_v32, 16  ;;  %v3816_v58 = vshll.u32 %v6437_v32, 16 }
 0x363   : >> { %v4940_v17 = vadd.f32 %v4939_v53, %v4891_v61  ;;  %v3795_v39 = vor.u32 %v3794_v55, %v3791_v38  ;;  %v3805_v46 = vor.u32 %v3804_v49, %v9055_v48  ;;  %v4193_v53 = vpack.c.b16 %v4183_v7, %v4182_v31  ;;  %v9073_v38 = vld [vmem:[%s8551_s30 + $0x70] sm:$0xf] }
 0x364   : >> { %v4988_v6 = vpop.f32.mrf.mxu3  ;;  %v4892_v62 = vpop.f32.mrf.mxu1  ;;  %v3826_v13 = vshrl.u32 %v9073_v38, 16 }
 0x365   : >> { %v4989_v12 = vadd.f32 %v4988_v6, %v4940_v17  ;;  %v4893_v52 = vadd.f32 %v4892_v62, %v8845_v28  ;;  %v3606_v17 = vrot.slane %v3604_v54, 4  ;;  %v3607_v6 = vrot.slane %v8779_v23, 5 }
 0x366   : >> { %v5039_v56 = vpop.f32.mrf.mxu0  ;;  %v3796_v62 = vrot.slane %v3795_v39, 4  ;;  %v3806_v36 = vrot.slane %v3805_v46, 4  ;;  %v3605_v23 = vsel %vm7694_vm5, %v6419_v42, %v3604_v54 }
 0x367   : >> { %v9058_v1 = vadd.f32 %v5037_v26, %v4989_v12  ;;  %v4121_v26 = vpack.c.b16 %v4111_v60, %v4110_v10  ;;  %v3914_v12 = vrot.slane %v3912_v5, 4  ;;  %v3608_v49 = vsel %vm7694_vm5, %v3606_v17, %v3607_v6  ;;  %v7002_v6 = vld [vmem:[%s8551_s30 + $0x60] sm:$0xff] }
 0x368   : >> { %v3801_v10 = vsel %vm7680_vm4, %v3796_v62, %v9055_v48  ;;  %v3811_v15 = vsel %vm7680_vm4, %v3806_v36, %v3810_v11  ;;  %v4113_v37 = vunpack.c.l.b16 %v3608_v49  ;;  %v7274_v36 = vld [vmem:[%s8551_s30 + $0x64] sm:$0xf]  ;;  %v6454_v49 = vld [vmem:[%s8551_s30 + $0x6c] sm:$0xe] }
 0x369   : >> { %v3916_v31 = vsel %vm7694_vm5, %v3914_v12, %v3915_v22  ;;  %v4184_v39 = vunpack.c.l.b16 %v3801_v10  ;;  %v4185_v46 = vunpack.c.l.b16 %v3811_v15  ;;  %v3611_v11 = vrot.slane %v7274_v36, 5  ;;  %v6412_v12 = vld [vmem:[%s8551_s30 + $0x60] sm:$0xe] }
 0x36a   : >> { %v4941_v29 = vpop.f32.mrf.mxu2  ;;  %v6420_v10 = vrot.slane %v6412_v12, 9  ;;  %v3614_v15 = vrot.slane %v8808_v43, 5 }
 0x36b   : >> { %v4942_v14 = vadd.f32 %v4941_v29, %v4893_v52  ;;  %v3822_v52 = vshll.u32 %v9073_v38, 16  ;;  %v4112_v29 = vunpack.c.l.b16 %v3605_v23  ;;  %v4194_v62 = vpack.c.b16 %v4185_v46, %v4184_v39 }
 0x36c   : >> { %v4990_v61 = vpop.f32.mrf.mxu3  ;;  %v4895_v47 = vpop.f32.mrf.mxu1 }
 0x36d   : >> { %v4991_v28 = vadd.f32 %v4990_v61, %v4942_v14  ;;  %v4896_v9 = vadd.f32 %v4895_v47, %v8863_v40  ;;  %v3913_v40 = vsel %vm7694_vm5, %v6461_v35, %v3912_v5  ;;  %v4217_v14 = vunpack.c.l.b16 %v3916_v31 }
 0x36e   : >> { %v5042_v50 = vpop.f32.mrf.mxu0  ;;  %v4216_v44 = vunpack.c.l.b16 %v3913_v40  ;;  %v3824_v5 = vrot.slane %v3822_v52, 5  ;;  %v3828_v47 = vrot.slane %v3826_v13, 4  ;;  %v4122_v17 = vpack.c.b16 %v4113_v37, %v4112_v29 }
 0x36f   : >> { %5090 = vmatmul.bf16.gmra.mxu1 %v4121_v26  ;;  %5139 = vmatmul.bf16.gmra.mxu2 %v7001_v30  ;;  %v9068_v18 = vadd.f32 %v5039_v56, %v4991_v28  ;;  %v3815_v26 = vrot.slane %v3813_v8, 4  ;;  %v3818_v30 = vrot.slane %v3816_v58, 5  ;;  %v6462_v58 = vrot.slane %v6454_v49, 9 }
 0x371   : >> { %5188 = vmatmul.bf16.gmra.mxu3 %v4193_v53  ;;  %5237 = vmatmul.bf16.gmra.mxu0 %v4225_v3  ;;  %v6446_v3 = vld [vmem:[%s8551_s30 + $0x74] sm:$0x1]  ;;  %v3819_v22 = vor.u32 %v3818_v30, %v3815_v26 }
 0x372   : >> { %v4944_v55 = vpop.f32.mrf.mxu2  ;;  %v3832_v32 = vshll.u32 %v6446_v3, 16  ;;  %v3922_v13 = vrot.slane %v6446_v3, 5 }
 0x373   : >> { %v4945_v56 = vadd.f32 %v4944_v55, %v4896_v9  ;;  %v3829_v9 = vor.u32 %v3828_v47, %v3824_v5  ;;  %v3820_v40 = vrot.slane %v3819_v22, 4 }
 0x374   : >> { %v4993_v60 = vpop.f32.mrf.mxu3  ;;  %v4897_v7 = vpop.f32.mrf.mxu1 }
 0x375   : >> { %v4994_v48 = vadd.f32 %v4993_v60, %v4945_v56  ;;  %v4898_v53 = vadd.f32 %v4897_v7, %v8886_v59  ;;  %v3919_v59 = vrot.slane %v9073_v38, 5  ;;  %v3613_v56 = vrot.slane %v3611_v11, 4 }
 0x376   : >> { %v5044_v54 = vpop.f32.mrf.mxu0  ;;  %v3830_v31 = vrot.slane %v3829_v9, 4  ;;  %v3834_v7 = vrot.slane %v3832_v32, 5  ;;  %v3825_v43 = vsel %vm7680_vm4, %v3820_v40, %v3824_v5 }
 0x377   : >> { %v9090_v61 = vadd.f32 %v5042_v50, %v4994_v48  ;;  %v4226_v50 = vpack.c.b16 %v4217_v14, %v4216_v44  ;;  %v3921_v52 = vrot.slane %v3919_v59, 4  ;;  %v3615_v39 = vsel %vm7694_vm5, %v3613_v56, %v3614_v15 }
 0x378   : >> { %v3920_v14 = vsel %vm7694_vm5, %v6462_v58, %v3919_v59  ;;  %v4115_v47 = vunpack.c.l.b16 %v3615_v39  ;;  %v4186_v3 = vunpack.c.l.b16 %v3825_v43 }
 0x379   : >> { %v3923_v26 = vsel %vm7694_vm5, %v3921_v52, %v3922_v13 }
 0x37a   : >> { %v4946_v2 = vpop.f32.mrf.mxu2  ;;  %v4219_v5 = vunpack.c.l.b16 %v3923_v26 }
 0x37b   : >> { %v4947_v28 = vadd.f32 %v4946_v2, %v4898_v53 }
 0x37c   : >> { %v4995_v42 = vpop.f32.mrf.mxu3  ;;  %v4900_v35 = vpop.f32.mrf.mxu1 }
 0x37d   : >> { %v4996_v55 = vadd.f32 %v4995_v42, %v4947_v28  ;;  %v4901_v8 = vadd.f32 %v4900_v35, %v8826_v21  ;;  %v3835_v21 = vsel %vm7680_vm4, %v3830_v31, %v3834_v7  ;;  %v4218_v28 = vunpack.c.l.b16 %v3920_v14 }
 0x37e   : >> { %v5047_v23 = vpop.f32.mrf.mxu0  ;;  %v4187_v2 = vunpack.c.l.b16 %v3835_v21 }
 0x37f   : >> { %5095 = vmatmul.bf16.gmra.mxu1 %v4122_v17  ;;  %5144 = vmatmul.bf16.gmra.mxu2 %v7002_v6  ;;  %v9099_v60 = vadd.f32 %v5044_v54, %v4996_v55  ;;  %v3612_v54 = vsel %vm7694_vm5, %v6420_v10, %v3611_v11  ;;  %v7003_v11 = vld [vmem:[%s8551_s30 + $0x6c] sm:$0xff]  ;;  %v4227_v12 = vpack.c.b16 %v4219_v5, %v4218_v28 }
 0x380   : >> { %v4114_v30 = vunpack.c.l.b16 %v3612_v54 }
 0x381   : >> { %5193 = vmatmul.bf16.gmra.mxu3 %v4194_v62  ;;  %5242 = vmatmul.bf16.gmra.mxu0 %v4226_v50  ;;  %v4195_v50 = vpack.c.b16 %v4187_v2, %v4186_v3 }
 0x382   : >> { %v4949_v38 = vpop.f32.mrf.mxu2  ;;  %v4123_v36 = vpack.c.b16 %v4115_v47, %v4114_v30 }
 0x383   : >> { %v4950_v48 = vadd.f32 %v4949_v38, %v4901_v8 }
 0x384   : >> { %v4998_v29 = vpop.f32.mrf.mxu3  ;;  %v4902_v37 = vpop.f32.mrf.mxu1 }
 0x385   : >> { %v4999_v46 = vadd.f32 %v4998_v29, %v4950_v48  ;;  %v4903_v42 = vadd.f32 %v4902_v37, %v8848_v4 }
 0x386   : >> { %v5049_v44 = vpop.f32.mrf.mxu0 }
 0x387   : >> { %v9115_v53 = vadd.f32 %v5047_v23, %v4999_v46 }
 0x38a   : >> { %v4951_v17 = vpop.f32.mrf.mxu2 }
 0x38b   : >> { %v4952_v6 = vadd.f32 %v4951_v17, %v4903_v42 }
 0x38c   : >> { %v5000_v62 = vpop.f32.mrf.mxu3  ;;  %v4905_v35 = vpop.f32.mrf.mxu1 }
 0x38d   : >> { %v5001_v22 = vadd.f32 %v5000_v62, %v4952_v6  ;;  %v4906_v55 = vadd.f32 %v4905_v35, %v8869_v51 }
 0x38e   : >> { %v5052_v9 = vpop.f32.mrf.mxu0 }
 0x38f   : >> { %5100 = vmatmul.bf16.gmra.mxu1 %v4123_v36  ;;  %5149 = vmatmul.bf16.gmra.mxu2 %v7003_v11  ;;  %v9119_v32 = vadd.f32 %v5049_v44, %v5001_v22 }
 0x391   : >> { %5198 = vmatmul.bf16.gmra.mxu3 %v4195_v50  ;;  %5247 = vmatmul.bf16.gmra.mxu0 %v4227_v12 }
 0x392   : >> { %v4954_v23 = vpop.f32.mrf.mxu2 }
 0x393   : >> { %v4955_v4 = vadd.f32 %v4954_v23, %v4906_v55 }
 0x394   : >> { %v5003_v59 = vpop.f32.mrf.mxu3  ;;  %v4907_v49 = vpop.f32.mrf.mxu1 }
 0x395   : >> { %v5004_v10 = vadd.f32 %v5003_v59, %v4955_v4  ;;  %v4908_v40 = vadd.f32 %v4907_v49, %v8888_v19 }
 0x396   : >> { %v5054_v56 = vpop.f32.mrf.mxu0 }
 0x397   : >> { %v9122_v15 = vadd.f32 %v5052_v9, %v5004_v10 }
 0x39a   : >> { %v4956_v31 = vpop.f32.mrf.mxu2 }
 0x39b   : >> { %v4957_v7 = vadd.f32 %v4956_v31, %v4908_v40 }
 0x39c   : >> { %v5005_v8 = vpop.f32.mrf.mxu3  ;;  %v5066_v58 = vpop.f32.mrf.mxu1 }
 0x39d   : >> { %v5006_v52 = vadd.f32 %v5005_v8, %v4957_v7  ;;  %v5067_v51 = vadd.f32 %v5066_v58, %v8919_v25 }
 0x39e   : >> { %v5213_v13 = vpop.f32.mrf.mxu0 }
 0x39f   : >> { %v9125_v38 = vadd.f32 %v5054_v56, %v5006_v52 }
 0x3a2   : >> { %v5115_v48 = vpop.f32.mrf.mxu2 }
 0x3a3   : >> { %v5116_v29 = vadd.f32 %v5115_v48, %v5067_v51 }
 0x3a4   : >> { %v5164_v37 = vpop.f32.mrf.mxu3  ;;  %v5068_v54 = vpop.f32.mrf.mxu1 }
 0x3a5   : >> { %v5165_v39 = vadd.f32 %v5164_v37, %v5116_v29  ;;  %v5069_v19 = vadd.f32 %v5068_v54, %v8929_v33 }
 0x3a6   : >> { %v5215_v43 = vpop.f32.mrf.mxu0 }
 0x3a7   : >> { %v5214_v46 = vadd.f32 %v5213_v13, %v5165_v39 }
 0x3a9   : >> { %5255 = vst [vmem:[%s9129_s7] sm:$0xff] %v5214_v46  ;;  %v5293_v3 = vmul.f32 %v5214_v46, %v5214_v46 }
 0x3aa   : >> { %v5117_v44 = vpop.f32.mrf.mxu2 }
 0x3ab   : >> { %v5118_v21 = vadd.f32 %v5117_v44, %v5069_v19 }
 0x3ac   : >> { %v5166_v14 = vpop.f32.mrf.mxu3  ;;  %v5071_v26 = vpop.f32.mrf.mxu1 }
 0x3ad   : >> { %v5167_v25 = vadd.f32 %v5166_v14, %v5118_v21  ;;  %v5072_v5 = vadd.f32 %v5071_v26, %v8951_v63 }
 0x3ae   : >> { %v5218_v30 = vpop.f32.mrf.mxu0 }
 0x3af   : >> { %v5216_v47 = vadd.f32 %v5215_v43, %v5167_v25 }
 0x3b1   : >> { %5256 = vst [vmem:[%s9129_s7 + $0x8] sm:$0xff] %v5216_v47  ;;  %v5271_v2 = vadd.f32 %v5216_v47, %v5214_v46  ;;  %v5294_v28 = vmul.f32 %v5216_v47, %v5216_v47 }
 0x3b2   : >> { %v5120_v42 = vpop.f32.mrf.mxu2 }
 0x3b3   : >> { %v5309_v17 = vadd.f32 %v5294_v28, %v5293_v3  ;;  %v5121_v6 = vadd.f32 %v5120_v42, %v5072_v5 }
 0x3b4   : >> { %v5169_v62 = vpop.f32.mrf.mxu3  ;;  %v5073_v36 = vpop.f32.mrf.mxu1 }
 0x3b5   : >> { %v5170_v33 = vadd.f32 %v5169_v62, %v5121_v6  ;;  %v5074_v22 = vadd.f32 %v5073_v36, %v8967_v41 }
 0x3b6   : >> { %v5220_v11 = vpop.f32.mrf.mxu0 }
 0x3b7   : >> { %v5219_v35 = vadd.f32 %v5218_v30, %v5170_v33 }
 0x3b9   : >> { %5257 = vst [vmem:[%s9129_s7 + $0x10] sm:$0xff] %v5219_v35  ;;  %v5272_v50 = vadd.f32 %v5271_v2, %v5219_v35  ;;  %v5295_v12 = vmul.f32 %v5219_v35, %v5219_v35 }
 0x3ba   : >> { %v5122_v9 = vpop.f32.mrf.mxu2 }
 0x3bb   : >> { %v5310_v55 = vadd.f32 %v5309_v17, %v5295_v12  ;;  %v5123_v23 = vadd.f32 %v5122_v9, %v5074_v22 }
 0x3bc   : >> { %v5171_v4 = vpop.f32.mrf.mxu3  ;;  %v5076_v59 = vpop.f32.mrf.mxu1 }
 0x3bd   : >> { %v5172_v63 = vadd.f32 %v5171_v4, %v5123_v23  ;;  %v5077_v31 = vadd.f32 %v5076_v59, %v8989_v27 }
 0x3be   : >> { %v5223_v49 = vpop.f32.mrf.mxu0 }
 0x3bf   : >> { %v5221_v10 = vadd.f32 %v5220_v11, %v5172_v63 }
 0x3c1   : >> { %5258 = vst [vmem:[%s9129_s7 + $0x18] sm:$0xff] %v5221_v10  ;;  %v5273_v56 = vadd.f32 %v5272_v50, %v5221_v10  ;;  %v5296_v40 = vmul.f32 %v5221_v10, %v5221_v10 }
 0x3c2   : >> { %v5125_v7 = vpop.f32.mrf.mxu2 }
 0x3c3   : >> { %v5311_v8 = vadd.f32 %v5310_v55, %v5296_v40  ;;  %v5126_v58 = vadd.f32 %v5125_v7, %v5077_v31 }
 0x3c4   : >> { %v5174_v52 = vpop.f32.mrf.mxu3  ;;  %v5078_v13 = vpop.f32.mrf.mxu1 }
 0x3c5   : >> { %v5175_v41 = vadd.f32 %v5174_v52, %v5126_v58  ;;  %v5079_v54 = vadd.f32 %v5078_v13, %v8999_v57 }
 0x3c6   : >> { %v5225_v51 = vpop.f32.mrf.mxu0 }
 0x3c7   : >> { %v5224_v48 = vadd.f32 %v5223_v49, %v5175_v41 }
 0x3c9   : >> { %5259 = vst [vmem:[%s9129_s7 + $0x20] sm:$0xff] %v5224_v48  ;;  %v5274_v29 = vadd.f32 %v5273_v56, %v5224_v48  ;;  %v5297_v37 = vmul.f32 %v5224_v48, %v5224_v48 }
 0x3ca   : >> { %v5127_v39 = vpop.f32.mrf.mxu2 }
 0x3cb   : >> { %v5312_v43 = vadd.f32 %v5311_v8, %v5297_v37  ;;  %v5128_v46 = vadd.f32 %v5127_v39, %v5079_v54 }
 0x3cc   : >> { %v5176_v19 = vpop.f32.mrf.mxu3  ;;  %v5081_v44 = vpop.f32.mrf.mxu1 }
 0x3cd   : >> { %v5177_v27 = vadd.f32 %v5176_v19, %v5128_v46  ;;  %v5082_v30 = vadd.f32 %v5081_v44, %v9021_v0 }
 0x3ce   : >> { %v5228_v21 = vpop.f32.mrf.mxu0 }
 0x3cf   : >> { %v5226_v14 = vadd.f32 %v5225_v51, %v5177_v27 }
 0x3d1   : >> { %5260 = vst [vmem:[%s9129_s7 + $0x28] sm:$0xff] %v5226_v14  ;;  %v5275_v26 = vadd.f32 %v5274_v29, %v5226_v14  ;;  %v5298_v25 = vmul.f32 %v5226_v14, %v5226_v14 }
 0x3d2   : >> { %v5130_v47 = vpop.f32.mrf.mxu2 }
 0x3d3   : >> { %v5313_v3 = vadd.f32 %v5312_v43, %v5298_v25  ;;  %v5131_v2 = vadd.f32 %v5130_v47, %v5082_v30 }
 0x3d4   : >> { %v5179_v28 = vpop.f32.mrf.mxu3  ;;  %v5083_v5 = vpop.f32.mrf.mxu1 }
 0x3d5   : >> { %v5180_v57 = vadd.f32 %v5179_v28, %v5131_v2  ;;  %v5084_v36 = vadd.f32 %v5083_v5, %v9036_v45 }
 0x3d6   : >> { %v5230_v42 = vpop.f32.mrf.mxu0 }
 0x3d7   : >> { %v5229_v17 = vadd.f32 %v5228_v21, %v5180_v57 }
 0x3d9   : >> { %5261 = vst [vmem:[%s9129_s7 + $0x30] sm:$0xff] %v5229_v17  ;;  %v5276_v6 = vadd.f32 %v5275_v26, %v5229_v17  ;;  %v5299_v62 = vmul.f32 %v5229_v17, %v5229_v17 }
 0x3da   : >> { %v5132_v33 = vpop.f32.mrf.mxu2 }
 0x3db   : >> { %v5314_v11 = vadd.f32 %v5313_v3, %v5299_v62  ;;  %v5133_v35 = vadd.f32 %v5132_v33, %v5084_v36 }
 0x3dc   : >> { %v5181_v50 = vpop.f32.mrf.mxu3  ;;  %v5086_v12 = vpop.f32.mrf.mxu1 }
 0x3dd   : >> { %v5182_v0 = vadd.f32 %v5181_v50, %v5133_v35  ;;  %v5087_v4 = vadd.f32 %v5086_v12, %v9058_v1 }
 0x3de   : >> { %v5233_v22 = vpop.f32.mrf.mxu0 }
 0x3df   : >> { %v5231_v9 = vadd.f32 %v5230_v42, %v5182_v0 }
 0x3e1   : >> { %5262 = vst [vmem:[%s9129_s7 + $0x38] sm:$0xff] %v5231_v9  ;;  %v5277_v55 = vadd.f32 %v5276_v6, %v5231_v9  ;;  %v5300_v23 = vmul.f32 %v5231_v9, %v5231_v9 }
 0x3e2   : >> { %v5135_v59 = vpop.f32.mrf.mxu2 }
 0x3e3   : >> { %v5315_v63 = vadd.f32 %v5314_v11, %v5300_v23  ;;  %v5136_v49 = vadd.f32 %v5135_v59, %v5087_v4 }
 0x3e4   : >> { %v5184_v10 = vpop.f32.mrf.mxu3  ;;  %v5088_v56 = vpop.f32.mrf.mxu1 }
 0x3e5   : >> { %v5185_v45 = vadd.f32 %v5184_v10, %v5136_v49  ;;  %v5089_v58 = vadd.f32 %v5088_v56, %v9068_v18 }
 0x3e6   : >> { %v5235_v40 = vpop.f32.mrf.mxu0 }
 0x3e7   : >> { %v5234_v31 = vadd.f32 %v5233_v22, %v5185_v45 }
 0x3e9   : >> { %5263 = vst [vmem:[%s9129_s7 + $0x40] sm:$0xff] %v5234_v31  ;;  %v5278_v7 = vadd.f32 %v5277_v55, %v5234_v31  ;;  %v5301_v8 = vmul.f32 %v5234_v31, %v5234_v31 }
 0x3ea   : >> { %v5137_v52 = vpop.f32.mrf.mxu2 }
 0x3eb   : >> { %v5316_v13 = vadd.f32 %v5315_v63, %v5301_v8  ;;  %v5138_v41 = vadd.f32 %v5137_v52, %v5089_v58 }
 0x3ec   : >> { %v5186_v51 = vpop.f32.mrf.mxu3  ;;  %v5091_v48 = vpop.f32.mrf.mxu1 }
 0x3ed   : >> { %v5187_v1 = vadd.f32 %v5186_v51, %v5138_v41  ;;  %v5092_v43 = vadd.f32 %v5091_v48, %v9090_v61 }
 0x3ee   : >> { %v5238_v29 = vpop.f32.mrf.mxu0 }
 0x3ef   : >> { %v5236_v37 = vadd.f32 %v5235_v40, %v5187_v1 }
 0x3f1   : >> { %5264 = vst [vmem:[%s9129_s7 + $0x48] sm:$0xff] %v5236_v37  ;;  %v5279_v54 = vadd.f32 %v5278_v7, %v5236_v37  ;;  %v5302_v39 = vmul.f32 %v5236_v37, %v5236_v37 }
 0x3f2   : >> { %v5140_v46 = vpop.f32.mrf.mxu2 }
 0x3f3   : >> { %v5317_v19 = vadd.f32 %v5316_v13, %v5302_v39  ;;  %v5141_v44 = vadd.f32 %v5140_v46, %v5092_v43 }
 0x3f4   : >> { %v5189_v27 = vpop.f32.mrf.mxu3  ;;  %v5093_v21 = vpop.f32.mrf.mxu1 }
 0x3f5   : >> { %v5190_v18 = vadd.f32 %v5189_v27, %v5141_v44  ;;  %v5094_v47 = vadd.f32 %v5093_v21, %v9099_v60 }
 0x3f6   : >> { %v5240_v14 = vpop.f32.mrf.mxu0 }
 0x3f7   : >> { %v5239_v26 = vadd.f32 %v5238_v29, %v5190_v18 }
 0x3f9   : >> { %5265 = vst [vmem:[%s9129_s7 + $0x50] sm:$0xff] %v5239_v26  ;;  %v5280_v25 = vadd.f32 %v5279_v54, %v5239_v26  ;;  %v5303_v30 = vmul.f32 %v5239_v26, %v5239_v26 }
 0x3fa   : >> { %v5142_v3 = vpop.f32.mrf.mxu2 }
 0x3fb   : >> { %v5318_v2 = vadd.f32 %v5317_v19, %v5303_v30  ;;  %v5143_v28 = vadd.f32 %v5142_v3, %v5094_v47 }
 0x3fc   : >> { %v5191_v5 = vpop.f32.mrf.mxu3  ;;  %v5096_v61 = vpop.f32.mrf.mxu1 }
 0x3fd   : >> { %v5192_v57 = vadd.f32 %v5191_v5, %v5143_v28  ;;  %v5097_v36 = vadd.f32 %v5096_v61, %v9115_v53 }
 0x3fe   : >> { %v5243_v17 = vpop.f32.mrf.mxu0 }
 0x3ff   : >> { %v5241_v42 = vadd.f32 %v5240_v14, %v5192_v57 }
 0x401   : >> { %5266 = vst [vmem:[%s9129_s7 + $0x58] sm:$0xff] %v5241_v42  ;;  %v5281_v6 = vadd.f32 %v5280_v25, %v5241_v42  ;;  %v5304_v62 = vmul.f32 %v5241_v42, %v5241_v42 }
 0x402   : >> { %v5145_v33 = vpop.f32.mrf.mxu2 }
 0x403   : >> { %v5319_v11 = vadd.f32 %v5318_v2, %v5304_v62  ;;  %v5146_v35 = vadd.f32 %v5145_v33, %v5097_v36 }
 0x404   : >> { %v5194_v50 = vpop.f32.mrf.mxu3  ;;  %v5098_v60 = vpop.f32.mrf.mxu1 }
 0x405   : >> { %v5195_v12 = vadd.f32 %v5194_v50, %v5146_v35  ;;  %v5099_v55 = vadd.f32 %v5098_v60, %v9119_v32 }
 0x406   : >> { %v5245_v23 = vpop.f32.mrf.mxu0 }
 0x407   : >> { %v5244_v0 = vadd.f32 %v5243_v17, %v5195_v12 }
 0x409   : >> { %5267 = vst [vmem:[%s9129_s7 + $0x60] sm:$0xff] %v5244_v0  ;;  %v5282_v22 = vadd.f32 %v5281_v6, %v5244_v0  ;;  %v5305_v9 = vmul.f32 %v5244_v0, %v5244_v0 }
 0x40a   : >> { %v5147_v4 = vpop.f32.mrf.mxu2 }
 0x40b   : >> { %v5320_v59 = vadd.f32 %v5319_v11, %v5305_v9  ;;  %v5148_v63 = vadd.f32 %v5147_v4, %v5099_v55 }
 0x40c   : >> { %v5196_v49 = vpop.f32.mrf.mxu3  ;;  %v5101_v53 = vpop.f32.mrf.mxu1 }
 0x40d   : >> { %v5197_v10 = vadd.f32 %v5196_v49, %v5148_v63  ;;  %v5102_v31 = vadd.f32 %v5101_v53, %v9122_v15 }
 0x40e   : >> { %v5248_v32 = vpop.f32.mrf.mxu0 }
 0x40f   : >> { %v5246_v56 = vadd.f32 %v5245_v23, %v5197_v10 }
 0x411   : >> { %5268 = vst [vmem:[%s9129_s7 + $0x68] sm:$0xff] %v5246_v56  ;;  %v5283_v45 = vadd.f32 %v5282_v22, %v5246_v56  ;;  %v5306_v40 = vmul.f32 %v5246_v56, %v5246_v56 }
 0x412   : >> { %v5150_v7 = vpop.f32.mrf.mxu2 }
 0x413   : >> { %v5321_v8 = vadd.f32 %v5320_v59, %v5306_v40  ;;  %v5151_v58 = vadd.f32 %v5150_v7, %v5102_v31 }
 0x414   : >> { %v5199_v52 = vpop.f32.mrf.mxu3  ;;  %v5103_v41 = vpop.f32.mrf.mxu1 }
 0x415   : >> { %v5200_v13 = vadd.f32 %v5199_v52, %v5151_v58  ;;  %v5104_v29 = vadd.f32 %v5103_v41, %v9125_v38 }
 0x416   : >> { %v5250_v15 = vpop.f32.mrf.mxu0 }
 0x417   : >> { %v5249_v51 = vadd.f32 %v5248_v32, %v5200_v13 }
 0x419   : >> { %5269 = vst [vmem:[%s9129_s7 + $0x70] sm:$0xff] %v5249_v51  ;;  %v5284_v48 = vadd.f32 %v5283_v45, %v5249_v51  ;;  %v5307_v1 = vmul.f32 %v5249_v51, %v5249_v51 }
 0x41a   : >> { %v5152_v37 = vpop.f32.mrf.mxu2 }
 0x41b   : >> { %v5322_v54 = vadd.f32 %v5321_v8, %v5307_v1  ;;  %v5153_v39 = vadd.f32 %v5152_v37, %v5104_v29 }
 0x41c   : >> { %v5201_v43 = vpop.f32.mrf.mxu3 }
 0x41d   : >> { %v5202_v46 = vadd.f32 %v5201_v43, %v5153_v39 }
 0x41f   : >> { %v5251_v19 = vadd.f32 %v5250_v15, %v5202_v46 }
 0x421   : >> { %5270 = vst [vmem:[%s9129_s7 + $0x78] sm:$0xff] %v5251_v19  ;;  %v5285_v44 = vadd.f32 %v5284_v48, %v5251_v19  ;;  %v5308_v27 = vmul.f32 %v5251_v19, %v5251_v19 }
 0x423   : >> { %v5286_v21 = vrot.slane %v5285_v44, 4  ;;  %v5323_v18 = vadd.f32 %v5322_v54, %v5308_v27 }
 0x425   : >> { %v5287_v14 = vadd.f32 %v5286_v21, %v5285_v44  ;;  %v5324_v26 = vrot.slane %v5323_v18, 4 }
 0x427   : >> { %v5288_v25 = vrot.slane %v5287_v14, 2  ;;  %v5325_v30 = vadd.f32 %v5324_v26, %v5323_v18 }
 0x429   : >> { %v5289_v47 = vadd.f32 %v5288_v25, %v5287_v14  ;;  %v5326_v3 = vrot.slane %v5325_v30, 2 }
 0x42b   : >> { %v5290_v2 = vrot.slane %v5289_v47, 1  ;;  %v5327_v38 = vadd.f32 %v5326_v3, %v5325_v30 }
 0x42d   : >> { %v5291_v28 = vadd.f32 %v5290_v2, %v5289_v47  ;;  %v5328_v5 = vrot.slane %v5327_v38, 1 }
 0x42f   : >> { %v5292_v61 = vadd.f32 %v7429_v20, %v5291_v28   ;;  %v5329_v57 = vadd.f32 %v5328_v5, %v5327_v38  ;;  %2990 = sbr.rel (!%p2988_p2) target bundleno = 607 (0x25f), region = 138 }
 0x431   : >> { %v5330_v42 = vadd.f32 %v7425_v34, %v5329_v57   ;;  %v9370_v20 = vmov %v5292_v61  ;;  %v9171_v17 = vmul.f32 (%p2988_p2), 0.00390625, %v5292_v61 }
 0x433   : >> { %v9369_v34 = vmov %v5330_v42  ;;  %v5332_v6 = vmul.f32 (%p2988_p2), 0.00390625, %v5330_v42  ;;  %v5333_v62 = vmul.f32 (%p2988_p2), %v9171_v17, %v9171_v17 }
 0x435   : > { %v5334_v20 = vsub.f32 %v5332_v6, %v5333_v62 }
 0x437   : > { %v5335_v36 = vmax.f32 %v5334_v20, 0.0 }
 0x439   : > { %v5336_v33 = vadd.f32 1e-05, %v5335_v36 }
 0x43b   : > { %7275 = vrsqrt.f32 %v5336_v33  ;;  %vm5343_vm12 = vweird.f32 %v5336_v33 }
 0x441   : > { %v7276_v11 = vpop.eup %7275 }
 0x442   : > { %v5338_v35 = vmul.f32 %v7276_v11, %v5336_v33  ;;  %vm5344_vm13 = vweird.f32 %v7276_v11 }
 0x443   : > { %vm5345_vm14 = vmor %vm5343_vm12, %vm5344_vm13 }
 0x444   : > { %v5339_v50 = vmul.f32 %v7276_v11, %v5338_v35 }
 0x446   : > { %v5340_v60 = vmul.f32 0.5, %v5339_v50 }
 0x448   : > { %v5341_v12 = vsub.f32 1.5, %v5340_v60 }
 0x44a   : > { %v5342_v0 = vmul.f32 %v7276_v11, %v5341_v12 }
 0x44c   : > { %v9175_v22 = vsel %vm5345_vm14, %v7276_v11, %v5342_v0 }
 0x44d LB: >> { %s6848_s9 = sshll.u32 %s7437_s8, 7  ;;  %s6851_s26 = smul.u32 96, %s7437_s8  ;;  %s7437_s8 = sphi %s9177_s8, %s5352_s8  }
 0x44e   : >> { %s9186_s19 = scalar_lea.vmem [#allocation3], %s6848_s9  ;;  %s9222_s20 = scalar_lea.vmem %s180_s11, %s6848_s9 [#allocation7] }
 0x44f   : >> { %v5355_v24 = vld [vmem:[%s9186_s19] sm:$0xff]  ;;  %s9190_s17 = scalar_lea.vmem %s7532_s10, %s6851_s26  ;;  %v5356_v34 = vld [vmem:[%s9186_s19 + $0x8] sm:$0xff]  ;;  %v5357_v9 = vld [vmem:[%s9186_s19 + $0x10] sm:$0xff]  ;;  %s5352_s8 = sadd.s32 1, %s7437_s8  }
 0x450   : >> { %v5371_v55 = vsub.f32 %v5355_v24, %v9171_v17  ;;  %v6852_v23 = vld [vmem:[%s9190_s17 + $0xc] sm:$0xf]  ;;  %v6853_v4 = vld [vmem:[%s9190_s17 + $0x10] sm:$0xf]  ;;  %v5372_v59 = vsub.f32 %v5356_v34, %v9171_v17  ;;  %v6854_v63 = vld [vmem:[%s9190_s17 + $0x14] sm:$0x1]  ;;  %v5373_v8 = vsub.f32 %v5357_v9, %v9171_v17 }
 0x451   : >> { %v5436_v49 = vshrl.u32 %v6852_v23, 16  ;;  %v5439_v53 = vshll.u32 %v6852_v23, 16  ;;  %v5445_v10 = vshll.u32 %v6853_v4, 16  ;;  %v5449_v56 = vshrl.u32 %v6853_v4, 16  ;;  %v6855_v45 = vld [vmem:[%s9190_s17 + $0x18] sm:$0xf] }
 0x452   : >> { %v5387_v40 = vmul.f32 %v5371_v55, %v9175_v22  ;;  %v5388_v31 = vmul.f32 %v5372_v59, %v9175_v22  ;;  %v5455_v7 = vshll.u32 %v6854_v63, 16  ;;  %v6856_v58 = vld [vmem:[%s9190_s17 + $0x1c] sm:$0xf]  ;;  %v6857_v48 = vld [vmem:[%s9190_s17 + $0x20] sm:$0x1]  ;;  %v5460_v29 = vshrl.u32 %v6855_v45, 16 }
 0x453   : >> { %v5358_v52 = vld [vmem:[%s9186_s19 + $0x18] sm:$0xff]  ;;  %v5438_v32 = vrot.slane %v5436_v49, 4  ;;  %v5441_v13 = vrot.slane %v5439_v53, 5  ;;  %v5447_v41 = vrot.slane %v5445_v10, 5  ;;  %v5451_v51 = vrot.slane %v5449_v56, 4  ;;  %v5359_v47 = vld [vmem:[%s9186_s19 + $0x20] sm:$0xff] }
 0x454   : >> { %v5457_v1 = vrot.slane %v5455_v7, 5  ;;  %v5463_v37 = vshll.u32 %v6855_v45, 16  ;;  %v5469_v54 = vshll.u32 %v6856_v58, 16  ;;  %v5473_v46 = vshrl.u32 %v6856_v58, 16  ;;  %v6858_v19 = vld [vmem:[%s9190_s17 + $0x24] sm:$0xf] }
 0x455   : >> { %v5442_v39 = vor.u32 %v5441_v13, %v5438_v32  ;;  %v5452_v43 = vor.u32 %v5451_v51, %v5447_v41  ;;  %v5374_v15 = vsub.f32 %v5358_v52, %v9171_v17  ;;  %v5462_v44 = vrot.slane %v5460_v29, 4  ;;  %v6859_v28 = vld [vmem:[%s9190_s17 + $0x28] sm:$0xf]  ;;  %v6860_v0 = vld [vmem:[%s9190_s17 + $0x2c] sm:$0x1]  ;;  %v5361_v23 = vld [vmem:[%s9186_s19 + $0x30] sm:$0xff] }
 0x456   : >> { %v5465_v27 = vrot.slane %v5463_v37, 5  ;;  %v5471_v21 = vrot.slane %v5469_v54, 5  ;;  %v5479_v18 = vshll.u32 %v6857_v48, 16  ;;  %v5389_v25 = vmul.f32 %v5373_v8, %v9175_v22  ;;  %v5360_v11 = vld [vmem:[%s9186_s19 + $0x28] sm:$0xff]  ;;  %v6861_v4 = vld [vmem:[%s9190_s17 + $0x30] sm:$0xf] }
 0x457   : >> { %v5443_v14 = vrot.slane %v5442_v39, 4  ;;  %v5453_v26 = vrot.slane %v5452_v43, 4  ;;  %v5475_v30 = vrot.slane %v5473_v46, 4  ;;  %v5390_v2 = vmul.f32 %v5374_v15, %v9175_v22  ;;  %v6862_v58 = vld [vmem:[%s9190_s17 + $0x34] sm:$0xf]  ;;  %v5362_v48 = vld [vmem:[%s9186_s19 + $0x38] sm:$0xff] }
 0x458   : >> { %v5466_v3 = vor.u32 %v5465_v27, %v5462_v44  ;;  %v5481_v38 = vrot.slane %v5479_v18, 5  ;;  %v5484_v5 = vshrl.u32 %v6858_v19, 16  ;;  %v5487_v6 = vshll.u32 %v6858_v19, 16  ;;  %v5363_v44 = vld [vmem:[%s9186_s19 + $0x40] sm:$0xff]  ;;  %p5349_p3 = scmp.ge.s32.totalorder %s5352_s8, 2  }
 0x459   : >> { %v5448_v61 = vsel %vm7680_vm4, %v5443_v14, %v5447_v41  ;;  %v5458_v57 = vsel %vm7680_vm4, %v5453_v26, %v5457_v1  ;;  %v5476_v42 = vor.u32 %v5475_v30, %v5471_v21  ;;  %v5375_v33 = vsub.f32 %v5359_v47, %v9171_v17  ;;  %v6863_v1 = vld [vmem:[%s9190_s17 + $0x38] sm:$0x1]  ;;  %v6864_v26 = vld [vmem:[%s9190_s17 + $0x3c] sm:$0xf]  ;;  %s7077_s24 = sshll.u32 (%p5349_p3), %s7485_s16, 8  ;;  %s5706_s29 = sshll.u32 (%p5349_p3), %s180_s11, 4  ;;  %s5707_s29 = int_to_ptr.vmem [resolvable:$true] %s5706_s29 }
 0x45a   : >> { %v5643_v62 = vunpack.c.l.bf16 %v5448_v61  ;;  %v5644_v20 = vunpack.c.l.bf16 %v5458_v57  ;;  %v5467_v36 = vrot.slane %v5466_v3, 4  ;;  %v5486_v50 = vrot.slane %v5484_v5, 4  ;;  %v5364_v57 = vld [vmem:[%s9186_s19 + $0x48] sm:$0xff]  ;;  %s5705_s28 = scalar_lea.hbm (%p5349_p3), %s9358_s3, %s7077_s24  ;;  %s5694_s6 = scalar_lea.sflag (%p5349_p3), [#allocation6], %s178_s4 }
 0x45b   : >> { %v5477_v35 = vrot.slane %v5476_v42, 4  ;;  %v5489_v60 = vrot.slane %v5487_v6, 5  ;;  %v5493_v12 = vshll.u32 %v6859_v28, 16  ;;  %v5497_v55 = vshrl.u32 %v6859_v28, 16  ;;  %s5708_s30 = sshll.u32 (%p5349_p3), %s5705_s28, 4  ;;  %s7327_s9 = scalar_lea.hbm (%p5349_p3), %s9358_s3, 512  ;;  %s5709_s30 = int_to_ptr.hbm [resolvable:$true] %s5708_s30 }
 0x45c   : >> { %v5659_v24 = vadd.f32 %v5643_v62, %v5387_v40  ;;  %v5660_v34 = vadd.f32 %v5644_v20, %v5388_v31  ;;  %v5472_v9 = vsel %vm7680_vm4, %v5467_v36, %v5471_v21  ;;  %v5376_v56 = vsub.f32 %v5360_v11, %v9171_v17  ;;  %v6866_v36 = vld [vmem:[%s9190_s17 + $0x44] sm:$0x1]  ;;  %s7321_s7 = sshra.s32 (%p5349_p3), %s5709_s30, 4  ;;  %s7322_s7 = int_to_ptr.hbm [resolvable:$true] %s7321_s7 }
 0x45d   : >> { %v5645_v59 = vunpack.c.l.bf16 %v5472_v9  ;;  %v5482_v63 = vsel %vm7680_vm4, %v5477_v35, %v5481_v38  ;;  %v5490_v49 = vor.u32 %v5489_v60, %v5486_v50  ;;  %v5495_v53 = vrot.slane %v5493_v12, 5  ;;  %s7323_s8 = scalar_lea.hbm (%p5349_p3), %s7322_s7, 256  ;;  %p7328_p9 = scmp.lt.s32.totalorder (%p5349_p3), %s7322_s7, %s9358_s3 }
 0x45e   : >> { %5677 = vst [vmem:[%s9222_s20] sm:$0xff] %v5659_v24  ;;  %v5646_v10 = vunpack.c.l.bf16 %v5482_v63  ;;  %v5499_v45 = vrot.slane %v5497_v55, 4  ;;  %v5503_v40 = vshll.u32 %v6860_v0, 16  ;;  %v5377_v8 = vsub.f32 %v5361_v23, %v9171_v17  ;;  %p7324_p4 = scmp.ne.s32.totalorder (%p5349_p3), %s7322_s7, %s7323_s8  ;;  %p7329_p10 = scmp.lt.s32.totalorder (%p5349_p3), %s7327_s9, %s7323_s8 }
 0x45f   : >> { %5678 = vst [vmem:[%s9222_s20 + $0x8] sm:$0xff] %v5660_v34  ;;  %v5661_v31 = vadd.f32 %v5645_v59, %v5389_v25  ;;  %v5491_v7 = vrot.slane %v5490_v49, 4  ;;  %v5508_v52 = vshrl.u32 %v6861_v4, 16  ;;  %v5391_v13 = vmul.f32 %v5375_v33, %v9175_v22 }
 0x460   : >> { %v5662_v32 = vadd.f32 %v5646_v10, %v5390_v2  ;;  %v5500_v41 = vor.u32 %v5499_v45, %v5495_v53  ;;  %v5505_v51 = vrot.slane %v5503_v40, 5  ;;  %v5392_v37 = vmul.f32 %v5376_v56, %v9175_v22  ;;  %v6865_v2 = vld [vmem:[%s9190_s17 + $0x40] sm:$0xf]  ;;  %v5365_v10 = vld [vmem:[%s9186_s19 + $0x50] sm:$0xff]  ;;  %v6868_v56 = vld [vmem:[%s9190_s17 + $0x4c] sm:$0xf]  ;;  %p7325_p7 = pnand (%p5349_p3), %p7324_p4, %p7502_p5  ;;  %p7330_p11 = por (%p5349_p3), %p7329_p10, %p7328_p9 }
 0x461   : >> { %5679 = vst [vmem:[%s9222_s20 + $0x10] sm:$0xff] %v5661_v31  ;;  %v5496_v29 = vsel %vm7680_vm4, %v5491_v7, %v5495_v53  ;;  %v5510_v54 = vrot.slane %v5508_v52, 4  ;;  %v5511_v39 = vshll.u32 %v6861_v4, 16  ;;  %v5517_v15 = vshll.u32 %v6862_v58, 16  ;;  %v6867_v4 = vld [vmem:[%s9190_s17 + $0x48] sm:$0xf] }
 0x462   : >> { %5680 = vst [vmem:[%s9222_s20 + $0x18] sm:$0xff] %v5662_v32  ;;  %v5647_v43 = vunpack.c.l.bf16 %v5496_v29  ;;  %v5501_v46 = vrot.slane %v5500_v41, 4  ;;  %v5521_v19 = vshrl.u32 %v6862_v58, 16  ;;  %v5393_v27 = vmul.f32 %v5377_v8, %v9175_v22  ;;  %v6869_v29 = vld [vmem:[%s9190_s17 + $0x50] sm:$0x1]  ;;  %p7326_p8 = pneg (%p5349_p3), %p7325_p7 }
 0x463   : >> { %v5513_v21 = vrot.slane %v5511_v39, 5  ;;  %v5378_v18 = vsub.f32 %v5362_v48, %v9171_v17  ;;  %v5527_v14 = vshll.u32 %v6863_v1, 16  ;;  %v5519_v47 = vrot.slane %v5517_v15, 5  ;;  %v6870_v15 = vld [vmem:[%s9190_s17 + $0x54] sm:$0xf] }
 0x464   : >> { %v5663_v25 = vadd.f32 %v5647_v43, %v5391_v13  ;;  %v5506_v30 = vsel %vm7680_vm4, %v5501_v46, %v5505_v51  ;;  %v5523_v3 = vrot.slane %v5521_v19, 4  ;;  %v5379_v61 = vsub.f32 %v5363_v44, %v9171_v17  ;;  %v5366_v13 = vld [vmem:[%s9186_s19 + $0x58] sm:$0xff]  ;;  %p7331_p12 = pnand (%p5349_p3), %p7330_p11, %p7326_p8 }
 0x465   : >> { %v5648_v38 = vunpack.c.l.bf16 %v5506_v30  ;;  %v5514_v28 = vor.u32 %v5513_v21, %v5510_v54  ;;  %v5394_v5 = vmul.f32 %v5378_v18, %v9175_v22  ;;  %v5529_v6 = vrot.slane %v5527_v14, 5  ;;  %v6871_v30 = vld [vmem:[%s9190_s17 + $0x58] sm:$0xf] }
 0x466   : >> { %5681 = vst [vmem:[%s9222_s20 + $0x20] sm:$0xff] %v5663_v25  ;;  %v5524_v42 = vor.u32 %v5523_v3, %v5519_v47  ;;  %v5532_v62 = vshrl.u32 %v6864_v26, 16  ;;  %v5535_v20 = vshll.u32 %v6864_v26, 16  ;;  %v5541_v35 = vshll.u32 %v6865_v2, 16 }
 0x467   : >> { %v5664_v33 = vadd.f32 %v5648_v38, %v5392_v37  ;;  %v5515_v11 = vrot.slane %v5514_v28, 4  ;;  %v5545_v50 = vshrl.u32 %v6865_v2, 16  ;;  %v5380_v24 = vsub.f32 %v5364_v57, %v9171_v17  ;;  %v5367_v37 = vld [vmem:[%s9186_s19 + $0x60] sm:$0xff]  ;;  %v5368_v28 = vld [vmem:[%s9186_s19 + $0x68] sm:$0xff] }
 0x468   : >> { %v5525_v60 = vrot.slane %v5524_v42, 4  ;;  %v5534_v12 = vrot.slane %v5532_v62, 4  ;;  %v5537_v0 = vrot.slane %v5535_v20, 5  ;;  %v5543_v9 = vrot.slane %v5541_v35, 5 }
 0x469   : >> { %5682 = vst [vmem:[%s9222_s20 + $0x28] sm:$0xff] %v5664_v33  ;;  %v5520_v34 = vsel %vm7680_vm4, %v5515_v11, %v5519_v47  ;;  %v5547_v55 = vrot.slane %v5545_v50, 4  ;;  %v5551_v23 = vshll.u32 %v6866_v36, 16  ;;  %v5395_v49 = vmul.f32 %v5379_v61, %v9175_v22 }
 0x46a   : >> { %v5649_v59 = vunpack.c.l.bf16 %v5520_v34  ;;  %v5530_v63 = vsel %vm7680_vm4, %v5525_v60, %v5529_v6  ;;  %v5538_v53 = vor.u32 %v5537_v0, %v5534_v12  ;;  %v5396_v40 = vmul.f32 %v5380_v24, %v9175_v22  ;;  %v6872_v6 = vld [vmem:[%s9190_s17 + $0x5c] sm:$0x1] }
 0x46b   : >> { %v5650_v45 = vunpack.c.l.bf16 %v5530_v63  ;;  %v5548_v31 = vor.u32 %v5547_v55, %v5543_v9  ;;  %v5553_v7 = vrot.slane %v5551_v23, 5  ;;  %v5556_v52 = vshrl.u32 %v6867_v4, 16 }
 0x46c   : >> { %v5665_v8 = vadd.f32 %v5649_v59, %v5393_v27  ;;  %v5539_v58 = vrot.slane %v5538_v53, 4  ;;  %v5559_v32 = vshll.u32 %v6867_v4, 16  ;;  %v5381_v48 = vsub.f32 %v5365_v10, %v9171_v17  ;;  %v6874_v59 = vld [vmem:[%s9190_s17 + $0x64] sm:$0xf] }
 0x46d   : >> { %v5666_v41 = vadd.f32 %v5650_v45, %v5394_v5  ;;  %v5549_v51 = vrot.slane %v5548_v31, 4  ;;  %v5565_v1 = vshll.u32 %v6868_v56, 16  ;;  %v5558_v39 = vrot.slane %v5556_v52, 4 }
 0x46e   : >> { %5683 = vst [vmem:[%s9222_s20 + $0x30] sm:$0xff] %v5665_v8  ;;  %v5544_v54 = vsel %vm7680_vm4, %v5539_v58, %v5543_v9  ;;  %v5561_v43 = vrot.slane %v5559_v32, 5  ;;  %v5569_v46 = vshrl.u32 %v6868_v56, 16  ;;  %v5382_v21 = vsub.f32 %v5366_v13, %v9171_v17  ;;  %v6873_v9 = vld [vmem:[%s9190_s17 + $0x60] sm:$0xf]  ;;  %v5369_v56 = vld [vmem:[%s9186_s19 + $0x70] sm:$0xff] }
 0x46f   : >> { %5684 = vst [vmem:[%s9222_s20 + $0x38] sm:$0xff] %v5666_v41  ;;  %v5651_v19 = vunpack.c.l.bf16 %v5544_v54  ;;  %v5554_v44 = vsel %vm7680_vm4, %v5549_v51, %v5553_v7  ;;  %v5567_v27 = vrot.slane %v5565_v1, 5  ;;  %v5575_v25 = vshll.u32 %v6869_v29, 16  ;;  %v6875_v8 = vld [vmem:[%s9190_s17 + $0x68] sm:$0x1]  ;;  %v5370_v41 = vld [vmem:[%s9186_s19 + $0x78] sm:$0xff] }
 0x470   : >> { %v5652_v18 = vunpack.c.l.bf16 %v5554_v44  ;;  %v5562_v14 = vor.u32 %v5561_v43, %v5558_v39  ;;  %v5571_v26 = vrot.slane %v5569_v46, 4  ;;  %v5397_v3 = vmul.f32 %v5381_v48, %v9175_v22 }
 0x471   : >> { %v5667_v47 = vadd.f32 %v5651_v19, %v5395_v49  ;;  %v5383_v2 = vsub.f32 %v5367_v37, %v9171_v17  ;;  %v5580_v38 = vshrl.u32 %v6870_v15, 16  ;;  %v5577_v42 = vrot.slane %v5575_v25, 5 }
 0x472   : >> { %v5668_v5 = vadd.f32 %v5652_v18, %v5396_v40  ;;  %v5563_v61 = vrot.slane %v5562_v14, 4  ;;  %v5572_v57 = vor.u32 %v5571_v26, %v5567_v27  ;;  %v5398_v62 = vmul.f32 %v5382_v21, %v9175_v22 }
 0x473   : >> { %5685 = vst [vmem:[%s9222_s20 + $0x40] sm:$0xff] %v5667_v47  ;;  %v5582_v20 = vrot.slane %v5580_v38, 4  ;;  %v5583_v36 = vshll.u32 %v6870_v15, 16  ;;  %v5589_v33 = vshll.u32 %v6871_v30, 16  ;;  %v5593_v50 = vshrl.u32 %v6871_v30, 16 }
 0x474   : >> { %5686 = vst [vmem:[%s9222_s20 + $0x48] sm:$0xff] %v5668_v5  ;;  %v5568_v11 = vsel %vm7680_vm4, %v5563_v61, %v5567_v27  ;;  %v5573_v35 = vrot.slane %v5572_v57, 4  ;;  %v5384_v60 = vsub.f32 %v5368_v28, %v9171_v17  ;;  %v5599_v34 = vshll.u32 %v6872_v6, 16 }
 0x475   : >> { %v5653_v12 = vunpack.c.l.bf16 %v5568_v11  ;;  %v5585_v0 = vrot.slane %v5583_v36, 5  ;;  %v5591_v24 = vrot.slane %v5589_v33, 5  ;;  %v5399_v23 = vmul.f32 %v5383_v2, %v9175_v22 }
 0x476   : >> { %v5578_v55 = vsel %vm7680_vm4, %v5573_v35, %v5577_v42  ;;  %v5595_v4 = vrot.slane %v5593_v50, 4  ;;  %v5400_v10 = vmul.f32 %v5384_v60, %v9175_v22  ;;  %v5601_v40 = vrot.slane %v5599_v34, 5 }
 0x477   : >> { %v5669_v63 = vadd.f32 %v5653_v12, %v5397_v3  ;;  %v5654_v49 = vunpack.c.l.bf16 %v5578_v55  ;;  %v5586_v53 = vor.u32 %v5585_v0, %v5582_v20  ;;  %v5604_v31 = vshrl.u32 %v6873_v9, 16 }
 0x478   : >> { %v5596_v45 = vor.u32 %v5595_v4, %v5591_v24  ;;  %v5607_v7 = vshll.u32 %v6873_v9, 16  ;;  %v5613_v32 = vshll.u32 %v6874_v59, 16  ;;  %v5617_v13 = vshrl.u32 %v6874_v59, 16 }
 0x479   : >> { %5687 = vst [vmem:[%s9222_s20 + $0x50] sm:$0xff] %v5669_v63  ;;  %v5670_v58 = vadd.f32 %v5654_v49, %v5398_v62  ;;  %v5587_v52 = vrot.slane %v5586_v53, 4  ;;  %v5385_v48 = vsub.f32 %v5369_v56, %v9171_v17  ;;  %v5606_v1 = vrot.slane %v5604_v31, 4 }
 0x47a   : >> { %v5597_v51 = vrot.slane %v5596_v45, 4  ;;  %v5609_v29 = vrot.slane %v5607_v7, 5  ;;  %v5615_v54 = vrot.slane %v5613_v32, 5  ;;  %v5619_v39 = vrot.slane %v5617_v13, 4 }
 0x47b   : >> { %5688 = vst [vmem:[%s9222_s20 + $0x58] sm:$0xff] %v5670_v58  ;;  %v5592_v37 = vsel %vm7680_vm4, %v5587_v52, %v5591_v24  ;;  %v5623_v43 = vshll.u32 %v6875_v8, 16  ;;  %v5386_v44 = vsub.f32 %v5370_v41, %v9171_v17  ;;  %v5401_v30 = vmul.f32 %v5385_v48, %v9175_v22 }
 0x47c   : >> { %v5655_v46 = vunpack.c.l.bf16 %v5592_v37  ;;  %v5602_v15 = vsel %vm7680_vm4, %v5597_v51, %v5601_v40  ;;  %v5610_v19 = vor.u32 %v5609_v29, %v5606_v1  ;;  %v5620_v21 = vor.u32 %v5619_v39, %v5615_v54 }
 0x47d   : >> { %v5656_v27 = vunpack.c.l.bf16 %v5602_v15  ;;  %v5625_v18 = vrot.slane %v5623_v43, 5  ;;  %v5402_v2 = vmul.f32 %v5386_v44, %v9175_v22 }
 0x47e   : >> { %v5671_v14 = vadd.f32 %v5655_v46, %v5399_v23  ;;  %v5611_v26 = vrot.slane %v5610_v19, 4  ;;  %v5621_v47 = vrot.slane %v5620_v21, 4 }
 0x47f   : >> { %v5672_v25 = vadd.f32 %v5656_v27, %v5400_v10 }
 0x480   : >> { %5689 = vst [vmem:[%s9222_s20 + $0x60] sm:$0xff] %v5671_v14  ;;  %v5616_v3 = vsel %vm7680_vm4, %v5611_v26, %v5615_v54  ;;  %v5626_v28 = vsel %vm7680_vm4, %v5621_v47, %v5625_v18 }
 0x481   : >> { %5690 = vst [vmem:[%s9222_s20 + $0x68] sm:$0xff] %v5672_v25  ;;  %v5657_v38 = vunpack.c.l.bf16 %v5616_v3  ;;  %v5658_v5 = vunpack.c.l.bf16 %v5626_v28 }
 0x482   : > { %5351 = sbr.rel (!%p5349_p3) target bundleno = 1101 (0x44d), region = 149 }
 0x483   : >> { %v5673_v61 = vadd.f32 %v5657_v38, %v5401_v30  ;;  %v5674_v57 = vadd.f32 %v5658_v5, %v5402_v2 }
 0x485   : >> { %5691 = vst [vmem:[%s9222_s20 + $0x70] sm:$0xff] %v5673_v61 }
 0x486   : >> { %5692 = vst [vmem:[%s9222_s20 + $0x78] sm:$0xff] %v5674_v57 }
 0x487   : > { %7334 = shalt.err (!%p7331_p12)
}
 0x488   : > { %s7442_s4 = smov 128   ;;  %s7443_s5 = smov 8  }
 0x489   : > { %7131 = dma.vmem_to_hbm [thread:$0]  (%p7502_p5), %s5707_s29, 4096, %s5709_s30, %s5694_s6, %s7442_s4, %s7442_s4, %s7443_s5  }
 0x48a PF: > { %p7143_p13 = scmp.ge.s32.totalorder %s7405_s15, 2  ;;  %s5723_s11 = sand.u32 1, %s7393_s12  }
 0x48b   : > { %s5724_s17 = scalar_lea.sflag [#allocation6], %s5723_s11 }
 0x48c   : > { %p7138_p0 = pnand %p7143_p13, %p7506_p6 }
 0x48e   : > { %p7139_p1 = pneg %p7138_p0 }
 0x490   : > { %7388 = dma.done.wait (%p7139_p1), %s5724_s17, 4096  }
 0x491   : > { %7390 = vsyncadd (%p7139_p1), %s5724_s17, 4294963200  ;;  %p14_p2 = scmp.ge.s32.totalorder %s7489_s18, 4   ;;  %s9371_s12 = smov %s7397_s13 }
 0x492   : > { %s9372_s13 = smov %s7401_s14  ;;  %s9373_s14 = smov %s7500_s21 }
 0x493   : > { %s9374_s15 = smov %s7489_s18  ;;  %16 = sbr.rel (!%p14_p2) target bundleno = 4 (0x4), region = 160 }
 0x498   :  { %5730 = vsyncpa [#allocation5], 1 }
 0x499   :  { %5732 = vsyncpa [#allocation5 + $0x1], 1 }
 0x49a   :  { %5733 = vsyncpa [#allocation6], 1 }
 0x49b   :  { %5735 = vsyncpa [#allocation6 + $0x1], 1 }

// kernel: tpu_custom_call.1
= control target key start
LH: loop header
LB: loop body
LE: loop exit
PB: predicated region body
PF: predicated region fallthrough
CT: control target
= control target key end

     0   :  { %8 = vsyncpa [#allocation5], 0  ;;  %s9355_s0 = inlined_call_operand.vmem [shape: bf16[2,18,18,128], index: 0, kind: input, shape index: {}]   ;;  %s9356_s1 = inlined_call_operand.vmem [shape: bf16[1152,128], index: 1, kind: input, shape index: {}]   ;;  %s9357_s2 = inlined_call_operand.hbm [shape: bf16[1152,128], index: 2, kind: input, shape index: {}]   ;;  %s9358_s3 = inlined_call_operand.hbm [shape: f32[2,16,16,128], index: 3, kind: output, shape index: {}]  }
   0x1   :  { %9 = vsyncpa [#allocation6], 0 }
   0x2   :  { %11 = vsyncpa [#allocation6 + $0x1], 0  ;;  %s7464_s12 = smov 0   ;;  %s7466_s13 = smov 0  }
   0x3   :  { %s7468_s14 = smov 0   ;;  %s7470_s15 = smov 0  }
   0x4 LB: > { %s7485_s16 = sadd.s32 4294967295, %s7405_s15   ;;  %s5853_s17 = sadd.s32 4294967294, %s7405_s15   ;;  %s7405_s15 = sphi %s7470_s15, %s9374_s15   ;;  %s7401_s14 = sphi %s7468_s14, %s9373_s14   ;;  %s7397_s13 = sphi %s7466_s13, %s9372_s13   ;;  %s7393_s12 = sphi %s7464_s12, %s9371_s12  }
   0x5   : > { %s7489_s18 = sadd.s32 1, %s7405_s15   ;;  %s92_s19 = sadd.s32 1, %s7401_s14 }
   0x6   : > { %s89_s20 = ssub.s32 %s7405_s15, %s7489_s18  ;;  %p102_p0 = scmp.ne.s32.totalorder %s7401_s14, %s7397_s13 }
   0x7   : > { %p90_p1 = scmp.eq.s32.totalorder %s89_s20, 0  ;;  %p103_p2 = scmp.eq.s32.totalorder %s7485_s16, 1 }
   0x8   : > { %p108_p3 = scmp.ne.s32.totalorder %s7397_s13, %s7393_s12  ;;  %p109_p4 = scmp.eq.s32.totalorder %s5853_s17, 1 }
   0x9   : > { %s7500_s21 = scalar_select %p90_p1, %s7401_s14, %s92_s19  }
   0xa   : > { %p7502_p5 = por %p103_p2, %p102_p0  ;;  %p7506_p6 = por %p109_p4, %p108_p3 }
   0xb   : > { %p5854_p7 = scmp.ge.s32.totalorder %s7405_s15, 1  ;;  %p116_p8 = scmp.lt.s32.totalorder %s7405_s15, 3 }
   0xc   : > { %p7141_p9 = scmp.eq.s32.totalorder %s7485_s16, 0  ;;  %s130_s26 = sshll.u32 %s9357_s2, 4  ;;  %s131_s26 = int_to_ptr.hbm [resolvable:$true] %s130_s26 }
   0xd   : > { %p117_p10 = pnand %p5854_p7, %p116_p8  ;;  %s7439_s27 = smov [#allocation4]  }
   0xe   : > { %s132_s28 = sshll.u32 %s7439_s27, 4  ;;  %s7440_s29 = smov 64   ;;  %s133_s28 = int_to_ptr.vmem [resolvable:$true] %s132_s28 }
   0xf   : > { %p7133_p11 = pneg %p117_p10  ;;  %s7441_s30 = smov 4  }
  0x10   : > { %156 = sbr.rel (%p117_p10) target bundleno = 1162 (0x48a), region = 32 }
  0x11   : > { %p7134_p12 = pnand %p7141_p9, %p7133_p11 }
  0x13   : > { %7136 = dma.hbm_to_vmem [thread:$0]  (!%p7134_p12), %s131_s26, 9216, %s133_s28, [#allocation5], %s7440_s29, %s7440_s29, %s7441_s30  }
  0x15   : > { %7384 = dma.done.wait (%p7141_p9), [#allocation5], 9216  }
  0x16   : > { %7386 = vsyncadd (%p7141_p9), [#allocation5], 4294958080  ;;  %s178_s4 = sand.u32 1, %s7397_s13   ;;  %p181_p13 = scmp.lt.s32.totalorder %s7485_s16, 1  ;;  %v7535_v0 = vmov 0.0   ;;  %v7537_v1 = vmov 0.0  }
  0x17   : > { %s7526_s5 = sshll.u32 %s178_s4, 8  ;;  %s7539_s17 = smov 0  }
  0x18   : > { %s182_s6 = scalar_select %p181_p13, %s7485_s16, 1 }
  0x19   : > { %s180_s11 = scalar_lea.vmem [#allocation7], %s7526_s5 }
  0x1a   : > { %s7126_s7 = smul.u32 216, %s182_s6 }
  0x1c   : > { %s7532_s10 = scalar_lea.vmem %s9355_s0, %s7126_s7 }
  0x1d LB: >> { %v6914_v2 = vld [vmem:[%s9356_s1 + $0x38] sm:$0xff]  ;;  %v6913_v3 = vld [vmem:[%s9356_s1 + $0x30] sm:$0xff]  ;;  %v6912_v4 = vld [vmem:[%s9356_s1 + $0x28] sm:$0xff]  ;;  %s6882_s20 = smul.u32 96, %s7417_s17  ;;  %vm222_vm0 = vsmask.f32 3328  ;;  %s7417_s17 = sphi %s7539_s17, %s191_s17   ;;  %v7413_v1 = vphi %v7537_v1, %v9366_v1   ;;  %v7409_v0 = vphi %v7535_v0, %v9365_v0  }
  0x1e   : >> { %7078 = vmatpush.bf16.msra.mxu1 %v6914_v2  ;;  %7079 = vmatpush.bf16.msra.mxu2 %v6914_v2  ;;  %v6911_v5 = vld [vmem:[%s9356_s1 + $0x20] sm:$0xff]  ;;  %v6910_v6 = vld [vmem:[%s9356_s1 + $0x18] sm:$0xff]  ;;  %v6909_v7 = vld [vmem:[%s9356_s1 + $0x10] sm:$0xff]  ;;  %vm223_vm1 = vsmask.f32 7440  ;;  %vm449_vm2 = vcmask 1042432  }
  0x1f   : >> { %7080 = vmatpush.bf16.msra.mxu3 %v6914_v2  ;;  %2012 = vmatpush.bf16.msra.mxu0 %v6914_v2  ;;  %v6908_v8 = vld [vmem:[%s9356_s1 + $0x8] sm:$0xff]  ;;  %v6907_v9 = vld [vmem:[%s9356_s1] sm:$0xff]  ;;  %s7576_s26 = scalar_lea.vmem %s7532_s10, %s6882_s20  ;;  %v6930_v10 = vld [vmem:[%s9356_s1 + $0xb8] sm:$0xff]  ;;  %vm450_vm3 = vcmask 1046532  }
  0x20   : >> { %v6922_v11 = vld [vmem:[%s9356_s1 + $0x78] sm:$0xff]  ;;  %v6887_v13 = vld [vmem:[%s7576_s26 + $0x30] sm:$0xff]  ;;  %v6889_v14 = vld [vmem:[%s7576_s26 + $0x48] sm:$0xff] }
  0x21   : >> { %v6885_v12 = vld [vmem:[%s7576_s26 + $0x18] sm:$0xff]  ;;  %v6883_v15 = vld [vmem:[%s7576_s26] sm:$0xff]  ;;  %v6929_v18 = vld [vmem:[%s9356_s1 + $0xb0] sm:$0xff] }
  0x22   : >> { %7081 = vmatpush.bf16.msra.mxu1 %v6913_v3  ;;  %7082 = vmatpush.bf16.msra.mxu2 %v6913_v3  ;;  %v6938_v16 = vld [vmem:[%s9356_s1 + $0xf8] sm:$0xff]  ;;  %v6921_v19 = vld [vmem:[%s9356_s1 + $0x70] sm:$0xff]  ;;  %v198_v20 = vld [vmem:[%s7576_s26] sm:$0xf] }
  0x23   : >> { %7083 = vmatpush.bf16.msra.mxu3 %v6913_v3  ;;  %2013 = vmatpush.bf16.msra.mxu0 %v6913_v3  ;;  %v6946_v17 = vld [vmem:[%s9356_s1 + $0x138] sm:$0xff]  ;;  %v7602_v21 = vld [vmem:[%s7576_s26 + $0x4] sm:$0xf]  ;;  %v6937_v22 = vld [vmem:[%s9356_s1 + $0xf0] sm:$0xff]  ;;  %v226_v27 = vshrl.u32 %v198_v20, 16  ;;  %v229_v28 = vshll.u32 %v198_v20, 16 }
  0x24   : >> { %v6945_v23 = vld [vmem:[%s9356_s1 + $0x130] sm:$0xff]  ;;  %v5874_v24 = vld [vmem:[%s7576_s26 + $0xc] sm:$0xf]  ;;  %v235_v30 = vshll.u32 %v7602_v21, 16  ;;  %v239_v31 = vshrl.u32 %v7602_v21, 16  ;;  %v6927_v38 = vld [vmem:[%s9356_s1 + $0xa0] sm:$0xff] }
  0x25   : >> { %v6928_v25 = vld [vmem:[%s9356_s1 + $0xa8] sm:$0xff]  ;;  %v5875_v29 = vld [vmem:[%s7576_s26 + $0x10] sm:$0xf]  ;;  %v537_v32 = vshrl.u32 %v5874_v24, 16  ;;  %v540_v33 = vshll.u32 %v5874_v24, 16  ;;  %v6919_v39 = vld [vmem:[%s9356_s1 + $0x60] sm:$0xff] }
  0x26   : >> { %7084 = vmatpush.bf16.msra.mxu1 %v6912_v4  ;;  %7085 = vmatpush.bf16.msra.mxu2 %v6912_v4  ;;  %v6920_v26 = vld [vmem:[%s9356_s1 + $0x68] sm:$0xff]  ;;  %v546_v36 = vshll.u32 %v5875_v29, 16  ;;  %v550_v37 = vshrl.u32 %v5875_v29, 16  ;;  %v228_v40 = vrot.slane %v226_v27, 4  ;;  %v231_v41 = vrot.slane %v229_v28, 5  ;;  %v6935_v44 = vld [vmem:[%s9356_s1 + $0xe0] sm:$0xff]  ;;  %vm7680_vm4 = vmor %vm222_vm0, %vm223_vm1 }
  0x27   : >> { %7086 = vmatpush.bf16.msra.mxu3 %v6912_v4  ;;  %2014 = vmatpush.bf16.msra.mxu0 %v6912_v4  ;;  %v6936_v34 = vld [vmem:[%s9356_s1 + $0xe8] sm:$0xff]  ;;  %v7632_v42 = vrot.slane %v235_v30, 5  ;;  %v241_v43 = vrot.slane %v239_v31, 4  ;;  %v539_v46 = vrot.slane %v537_v32, 4  ;;  %v542_v47 = vrot.slane %v540_v33, 5  ;;  %v6943_v48 = vld [vmem:[%s9356_s1 + $0x120] sm:$0xff]  ;;  %vm7694_vm5 = vmor %vm449_vm2, %vm450_vm3 }
  0x28   : >> { %v6944_v35 = vld [vmem:[%s9356_s1 + $0x128] sm:$0xff]  ;;  %v5890_v50 = vld [vmem:[%s7576_s26 + $0x14] sm:$0x1]  ;;  %v7645_v51 = vrot.slane %v546_v36, 5  ;;  %v552_v52 = vrot.slane %v550_v37, 4  ;;  %v6888_v53 = vld [vmem:[%s7576_s26 + $0x3c] sm:$0xff]  ;;  %v232_v56 = vor.u32 %v231_v41, %v228_v40 }
  0x29   : >> { %v7638_v45 = vld [vmem:[%s7576_s26 + $0x8] sm:$0x1]  ;;  %v6926_v54 = vld [vmem:[%s9356_s1 + $0x98] sm:$0xff]  ;;  %v6884_v59 = vld [vmem:[%s7576_s26 + $0xc] sm:$0xff]  ;;  %v242_v60 = vor.u32 %v241_v43, %v7632_v42  ;;  %v454_v62 = vrot.slane %v7602_v21, 5  ;;  %v543_v4 = vor.u32 %v542_v47, %v539_v46 }
  0x2a   : >> { %7087 = vmatpush.bf16.msra.mxu1 %v6911_v5  ;;  %7088 = vmatpush.bf16.msra.mxu2 %v6911_v5  ;;  %v6886_v49 = vld [vmem:[%s7576_s26 + $0x24] sm:$0xff]  ;;  %v6918_v55 = vld [vmem:[%s9356_s1 + $0x58] sm:$0xff]  ;;  %v245_v61 = vshll.u32 %v7638_v45, 16  ;;  %v6925_v2 = vld [vmem:[%s9356_s1 + $0x90] sm:$0xff] }
  0x2b   : >> { %7089 = vmatpush.bf16.msra.mxu3 %v6911_v5  ;;  %2015 = vmatpush.bf16.msra.mxu0 %v6911_v5  ;;  %v6890_v57 = vld [vmem:[%s7576_s26 + $0x54] sm:$0xff]  ;;  %v417_v3 = vld [vmem:[%s7576_s26] sm:$0xe]  ;;  %v556_v5 = vshll.u32 %v5890_v50, 16  ;;  %v5877_v21 = vld [vmem:[%s7576_s26 + $0x1c] sm:$0xf] }
  0x2c   : >> { %v6934_v58 = vld [vmem:[%s9356_s1 + $0xd8] sm:$0xff]  ;;  %v6924_v29 = vld [vmem:[%s9356_s1 + $0x88] sm:$0xff]  ;;  %v574_v36 = vshrl.u32 %v5877_v21, 16 }
  0x2d   : >> { %v6942_v63 = vld [vmem:[%s9356_s1 + $0x118] sm:$0xff]  ;;  %v6916_v30 = vld [vmem:[%s9356_s1 + $0x48] sm:$0xff] }
  0x2e   : >> { %7090 = vmatpush.bf16.msra.mxu1 %v6910_v6  ;;  %7091 = vmatpush.bf16.msra.mxu2 %v6910_v6  ;;  %v6932_v37 = vld [vmem:[%s9356_s1 + $0xc8] sm:$0xff] }
  0x2f   : >> { %7092 = vmatpush.bf16.msra.mxu3 %v6910_v6  ;;  %2016 = vmatpush.bf16.msra.mxu0 %v6910_v6  ;;  %v553_v6 = vor.u32 %v552_v52, %v7645_v51 }
  0x32   : >> { %7093 = vmatpush.bf16.msra.mxu1 %v6909_v7  ;;  %7094 = vmatpush.bf16.msra.mxu2 %v6909_v7 }
  0x33   : >> { %7095 = vmatpush.bf16.msra.mxu3 %v6909_v7  ;;  %2017 = vmatpush.bf16.msra.mxu0 %v6909_v7  ;;  %v200_v7 = vld [vmem:[%s7576_s26 + $0xc] sm:$0xf] }
  0x34   : >> { %v250_v20 = vshrl.u32 %v200_v7, 16 }
  0x36   : >> { %7096 = vmatpush.bf16.msra.mxu1 %v6908_v8  ;;  %7097 = vmatpush.bf16.msra.mxu2 %v6908_v8  ;;  %v252_v41 = vrot.slane %v250_v20, 4  ;;  %v202_v20 = vld [vmem:[%s7576_s26 + $0x18] sm:$0xf] }
  0x37   : >> { %7098 = vmatpush.bf16.msra.mxu3 %v6908_v8  ;;  %2018 = vmatpush.bf16.msra.mxu0 %v6908_v8  ;;  %v6917_v8 = vld [vmem:[%s9356_s1 + $0x50] sm:$0xff] }
  0x3a   : >> { %7099 = vmatpush.bf16.msra.mxu1 %v6907_v9  ;;  %7100 = vmatpush.bf16.msra.mxu2 %v6907_v9 }
  0x3b   : >> { %7101 = vmatpush.bf16.msra.mxu3 %v6907_v9  ;;  %2019 = vmatpush.bf16.msra.mxu0 %v6907_v9  ;;  %v233_v9 = vrot.slane %v232_v56, 4  ;;  %v6962_v56 = vld [vmem:[%s9356_s1 + $0x1b8] sm:$0xff] }
  0x3d   : >> { %2030 = vmatmul.bf16.vlgmr.msra.gmra.mxu1 %v6885_v12  ;;  %2040 = vmatmul.bf16.vlgmr.msra.gmra.mxu2 %v6887_v13  ;;  %v247_v12 = vrot.slane %v245_v61, 5  ;;  %v5864_v13 = vrot.slane %v417_v3, 9  ;;  %v238_v33 = vsel %vm7680_vm4, %v233_v9, %v7632_v42  ;;  %v6940_v42 = vld [vmem:[%s9356_s1 + $0x108] sm:$0xff]  ;;  %v6939_v3 = vld [vmem:[%s9356_s1 + $0x100] sm:$0xff] }
  0x3e   : >> { %2110 = vmatpush.bf16.msrb.mxu2 %v6930_v10  ;;  %2061 = vmatpush.bf16.msrb.mxu1 %v6922_v11  ;;  %v7675_v10 = vld [vmem:[%s7576_s26 + $0x10] sm:$0xf]  ;;  %v243_v11 = vrot.slane %v242_v60, 4  ;;  %v1164_v50 = vunpack.c.l.b16 %v238_v33 }
  0x3f   : >> { %2050 = vmatmul.bf16.vlgmr.msra.gmra.mxu3 %v6889_v14  ;;  %2020 = vmatmul.bf16.vlgmr.msra.gmra.mxu0 %v6883_v15  ;;  %v456_v14 = vrot.slane %v454_v62, 4  ;;  %v5876_v15 = vld [vmem:[%s7576_s26 + $0x18] sm:$0xf]  ;;  %v259_v27 = vshll.u32 %v7675_v10, 16  ;;  %v263_v28 = vshrl.u32 %v7675_v10, 16 }
  0x40   : >> { %2159 = vmatpush.bf16.msrb.mxu3 %v6938_v16  ;;  %2208 = vmatpush.bf16.msrb.mxu0 %v6946_v17  ;;  %v457_v17 = vrot.slane %v7638_v45, 5  ;;  %v561_v31 = vshrl.u32 %v5876_v15, 16  ;;  %v564_v32 = vshll.u32 %v5876_v15, 16 }
  0x41   : >> { %v7729_v46 = vrot.slane %v259_v27, 5  ;;  %v265_v47 = vrot.slane %v263_v28, 4 }
  0x42   : >> { %2111 = vmatpush.bf16.msrb.mxu2 %v6929_v18  ;;  %2062 = vmatpush.bf16.msrb.mxu1 %v6921_v19  ;;  %v544_v18 = vrot.slane %v543_v4, 4  ;;  %v558_v19 = vrot.slane %v556_v5, 5  ;;  %v563_v52 = vrot.slane %v561_v31, 4  ;;  %v6977_v31 = vld [vmem:[%s9356_s1 + $0x230] sm:$0xff] }
  0x43   : >> { %v266_v5 = vor.u32 %v265_v47, %v7729_v46  ;;  %v6976_v47 = vld [vmem:[%s9356_s1 + $0x228] sm:$0xff] }
  0x44   : >> { %2160 = vmatpush.bf16.msrb.mxu3 %v6937_v22  ;;  %2209 = vmatpush.bf16.msrb.mxu0 %v6945_v23  ;;  %v6933_v22 = vld [vmem:[%s9356_s1 + $0xd0] sm:$0xff]  ;;  %v549_v40 = vsel %vm7680_vm4, %v544_v18, %v7645_v51 }
  0x45   : >> { %v6941_v23 = vld [vmem:[%s9356_s1 + $0x110] sm:$0xff]  ;;  %v1268_v60 = vunpack.c.l.b16 %v549_v40  ;;  %v5878_v40 = vld [vmem:[%s7576_s26 + $0x24] sm:$0xf] }
  0x46   : >> { %2112 = vmatpush.bf16.msrb.mxu2 %v6928_v25  ;;  %2063 = vmatpush.bf16.msrb.mxu1 %v6920_v26  ;;  %v554_v25 = vrot.slane %v553_v6, 4  ;;  %v253_v26 = vshll.u32 %v200_v7, 16  ;;  %v6970_v6 = vld [vmem:[%s9356_s1 + $0x1f8] sm:$0xff] }
  0x47   : >> { %v6978_v7 = vld [vmem:[%s9356_s1 + $0x238] sm:$0xff] }
  0x48   : >> { %2161 = vmatpush.bf16.msrb.mxu3 %v6936_v34  ;;  %2210 = vmatpush.bf16.msrb.mxu0 %v6944_v35  ;;  %v248_v34 = vsel %vm7680_vm4, %v243_v11, %v247_v12  ;;  %v570_v35 = vshll.u32 %v5877_v21, 16  ;;  %v559_v43 = vsel %vm7680_vm4, %v554_v25, %v558_v19  ;;  %v255_v45 = vrot.slane %v253_v26, 5  ;;  %v7772_v25 = vld [vmem:[%s7576_s26 + $0x1c] sm:$0xf] }
  0x49   : >> { %v1165_v51 = vunpack.c.l.b16 %v248_v34  ;;  %v1269_v61 = vunpack.c.l.b16 %v559_v43  ;;  %v274_v34 = vshrl.u32 %v202_v20, 16 }
  0x4a   : >> { %2113 = vmatpush.bf16.msrb.mxu2 %v6927_v38  ;;  %2064 = vmatpush.bf16.msrb.mxu1 %v6919_v39  ;;  %v455_v38 = vsel %vm7694_vm5, %v5864_v13, %v454_v62  ;;  %v458_v39 = vsel %vm7694_vm5, %v456_v14, %v457_v17  ;;  %v256_v4 = vor.u32 %v255_v45, %v252_v41  ;;  %v418_v13 = vld [vmem:[%s7576_s26 + $0xc] sm:$0xe]  ;;  %v5879_v45 = vld [vmem:[%s7576_s26 + $0x28] sm:$0xf] }
  0x4b   : >> { %v1180_v11 = vpack.c.b16 %v1165_v51, %v1164_v50  ;;  %v6891_v17 = vld [vmem:[%s7576_s26 + $0xc] sm:$0xff]  ;;  %v1284_v18 = vpack.c.b16 %v1269_v61, %v1268_v60  ;;  %v5865_v26 = vrot.slane %v418_v13, 9  ;;  %v276_v50 = vrot.slane %v274_v34, 4 }
  0x4c   : >> { %2162 = vmatpush.bf16.msrb.mxu3 %v6935_v44  ;;  %2211 = vmatpush.bf16.msrb.mxu0 %v6943_v48  ;;  %v7727_v44 = vld [vmem:[%s7576_s26 + $0x14] sm:$0x1]  ;;  %v6923_v48 = vld [vmem:[%s9356_s1 + $0x80] sm:$0xff]  ;;  %v257_v21 = vrot.slane %v256_v4, 4  ;;  %v6952_v41 = vld [vmem:[%s9356_s1 + $0x168] sm:$0xff] }
  0x4d   : >> { %2035 = vmatmul.bf16.gmra.mxu1 %v6886_v49  ;;  %2045 = vmatmul.bf16.gmra.mxu2 %v6888_v53  ;;  %v6915_v49 = vld [vmem:[%s9356_s1 + $0x40] sm:$0xff]  ;;  %v566_v53 = vrot.slane %v564_v32, 5  ;;  %v269_v62 = vshll.u32 %v7727_v44, 16  ;;  %v464_v28 = vrot.slane %v7727_v44, 5 }
  0x4e   : >> { %2114 = vmatpush.bf16.msrb.mxu2 %v6926_v54  ;;  %2065 = vmatpush.bf16.msrb.mxu1 %v6918_v55  ;;  %v1196_v54 = vunpack.c.l.b16 %v455_v38  ;;  %v1197_v55 = vunpack.c.l.b16 %v458_v39  ;;  %v262_v38 = vsel %vm7680_vm4, %v257_v21, %v7729_v46  ;;  %v6960_v39 = vld [vmem:[%s9356_s1 + $0x1a8] sm:$0xff] }
  0x4f   : >> { %2055 = vmatmul.bf16.gmra.mxu3 %v6890_v57  ;;  %2025 = vmatmul.bf16.gmra.mxu0 %v6884_v59  ;;  %v6954_v57 = vld [vmem:[%s9356_s1 + $0x178] sm:$0xff]  ;;  %v576_v59 = vrot.slane %v574_v36, 4  ;;  %v567_v9 = vor.u32 %v566_v53, %v563_v52  ;;  %v271_v19 = vrot.slane %v269_v62, 5  ;;  %v283_v36 = vshll.u32 %v7772_v25, 16  ;;  %v6968_v46 = vld [vmem:[%s9356_s1 + $0x1e8] sm:$0xff] }
  0x50   : >> { %2163 = vmatpush.bf16.msrb.mxu3 %v6934_v58  ;;  %2212 = vmatpush.bf16.msrb.mxu0 %v6942_v63  ;;  %v7743_v58 = vrot.slane %v570_v35, 5  ;;  %v5891_v63 = vld [vmem:[%s7576_s26 + $0x20] sm:$0x1]  ;;  %v1212_v12 = vpack.c.b16 %v1197_v55, %v1196_v54  ;;  %v277_v35 = vshll.u32 %v202_v20, 16  ;;  %v585_v55 = vshrl.u32 %v5878_v40, 16 }
  0x51   : >> { %v580_v15 = vshll.u32 %v5891_v63, 16  ;;  %v216_v52 = vld [vmem:[%s7576_s26 + $0x20] sm:$0x1]  ;;  %v7812_v53 = vrot.slane %v283_v36, 5  ;;  %v1166_v60 = vunpack.c.l.b16 %v262_v38 }
  0x52   : >> { %2115 = vmatpush.bf16.msrb.mxu2 %v6925_v2  ;;  %2066 = vmatpush.bf16.msrb.mxu1 %v6917_v8  ;;  %v6931_v2 = vld [vmem:[%s9356_s1 + $0xc0] sm:$0xff]  ;;  %v461_v8 = vrot.slane %v7675_v10, 5  ;;  %v577_v14 = vor.u32 %v576_v59, %v7743_v58  ;;  %v6961_v10 = vld [vmem:[%s9356_s1 + $0x1b0] sm:$0xff]  ;;  %v279_v51 = vrot.slane %v277_v35, 5  ;;  %v598_v59 = vshrl.u32 %v5879_v45, 16 }
  0x53   : >> { %v582_v33 = vrot.slane %v580_v15, 5  ;;  %v6959_v35 = vld [vmem:[%s9356_s1 + $0x1a0] sm:$0xff] }
  0x54   : >> { %2164 = vmatpush.bf16.msrb.mxu3 %v6933_v22  ;;  %2213 = vmatpush.bf16.msrb.mxu0 %v6941_v23  ;;  %v267_v22 = vrot.slane %v266_v5, 4  ;;  %v6953_v23 = vld [vmem:[%s9356_s1 + $0x170] sm:$0xff]  ;;  %v463_v27 = vrot.slane %v461_v8, 4  ;;  %v578_v32 = vrot.slane %v577_v14, 4  ;;  %v462_v43 = vsel %vm7694_vm5, %v5865_v26, %v461_v8  ;;  %v6967_v36 = vld [vmem:[%s9356_s1 + $0x1e0] sm:$0xff] }
  0x55   : >> { %v1198_v62 = vunpack.c.l.b16 %v462_v43  ;;  %v280_v4 = vor.u32 %v279_v51, %v276_v50 }
  0x56   : >> { %2116 = vmatpush.bf16.msrb.mxu2 %v6924_v29  ;;  %2067 = vmatpush.bf16.msrb.mxu1 %v6916_v30  ;;  %v568_v29 = vrot.slane %v567_v9, 4  ;;  %v6969_v30 = vld [vmem:[%s9356_s1 + $0x1f0] sm:$0xff]  ;;  %v465_v44 = vsel %vm7694_vm5, %v463_v27, %v464_v28  ;;  %v600_v9 = vrot.slane %v598_v59, 4  ;;  %v204_v28 = vld [vmem:[%s7576_s26 + $0x24] sm:$0xf] }
  0x58   : >> { %2165 = vmatpush.bf16.msrb.mxu3 %v6932_v37  ;;  %2214 = vmatpush.bf16.msrb.mxu0 %v6940_v42  ;;  %v287_v37 = vshrl.u32 %v7772_v25, 16  ;;  %v272_v42 = vsel %vm7680_vm4, %v267_v22, %v271_v19  ;;  %v281_v19 = vrot.slane %v280_v4, 4 }
  0x59   : >> { %v1167_v61 = vunpack.c.l.b16 %v272_v42  ;;  %v6975_v42 = vld [vmem:[%s9356_s1 + $0x220] sm:$0xff] }
  0x5a   : >> { %2117 = vmatpush.bf16.msrb.mxu2 %v6923_v48  ;;  %2068 = vmatpush.bf16.msrb.mxu1 %v6915_v49  ;;  %v573_v48 = vsel %vm7680_vm4, %v568_v29, %v7743_v58  ;;  %v583_v49 = vsel %vm7680_vm4, %v578_v32, %v582_v33  ;;  %v289_v54 = vrot.slane %v287_v37, 4  ;;  %v1199_v58 = vunpack.c.l.b16 %v465_v44  ;;  %v7824_v29 = vld [vmem:[%s7576_s26 + $0x28] sm:$0xf]  ;;  %v6951_v37 = vld [vmem:[%s9356_s1 + $0x160] sm:$0xff] }
  0x5b   : >> { %v1270_v63 = vunpack.c.l.b16 %v573_v48  ;;  %v1181_v13 = vpack.c.b16 %v1167_v61, %v1166_v60  ;;  %v286_v32 = vsel %vm7680_vm4, %v281_v19, %v7812_v53  ;;  %v217_v60 = vld [vmem:[%s7576_s26 + $0x2c] sm:$0x1]  ;;  %v6893_v19 = vld [vmem:[%s7576_s26 + $0x24] sm:$0xff] }
  0x5c   : >> { %2166 = vmatpush.bf16.msrb.mxu3 %v6931_v2  ;;  %2215 = vmatpush.bf16.msrb.mxu0 %v6939_v3  ;;  %v1271_v2 = vunpack.c.l.b16 %v583_v49  ;;  %v293_v3 = vshll.u32 %v216_v52, 16  ;;  %v290_v5 = vor.u32 %v289_v54, %v7812_v53  ;;  %v1213_v14 = vpack.c.b16 %v1199_v58, %v1198_v62 }
  0x5d   : >> { %2069 = vmatmul.bf16.vlgmr.msrb.gmra.mxu1 %v1180_v11  ;;  %2118 = vmatmul.bf16.vlgmr.msrb.gmra.mxu2 %v1212_v12  ;;  %v468_v11 = vrot.slane %v7772_v25, 5  ;;  %v5892_v12 = vld [vmem:[%s7576_s26 + $0x2c] sm:$0x1]  ;;  %v471_v25 = vrot.slane %v216_v52, 5  ;;  %v1168_v51 = vunpack.c.l.b16 %v286_v32 }
  0x5e   : >> { %2306 = vmatpush.bf16.msra.mxu2 %v6962_v56  ;;  %2257 = vmatpush.bf16.msra.mxu1 %v6954_v57  ;;  %v588_v56 = vshll.u32 %v5878_v40, 16  ;;  %v594_v57 = vshll.u32 %v5879_v45, 16  ;;  %v1285_v15 = vpack.c.b16 %v1271_v2, %v1270_v63  ;;  %v291_v20 = vrot.slane %v290_v5, 4 }
  0x5f   : >> { %2167 = vmatmul.bf16.vlgmr.msrb.gmra.mxu3 %v6891_v17  ;;  %2216 = vmatmul.bf16.vlgmr.msrb.gmra.mxu0 %v1284_v18  ;;  %v419_v17 = vld [vmem:[%s7576_s26 + $0x18] sm:$0xe]  ;;  %v295_v21 = vrot.slane %v293_v3, 5  ;;  %v470_v27 = vrot.slane %v468_v11, 4  ;;  %v298_v40 = vshrl.u32 %v204_v28, 16  ;;  %v307_v45 = vshll.u32 %v7824_v29, 16 }
  0x60   : >> { %2355 = vmatpush.bf16.msra.mxu3 %v6970_v6  ;;  %2404 = vmatpush.bf16.msra.mxu0 %v6978_v7  ;;  %v587_v6 = vrot.slane %v585_v55, 4  ;;  %v590_v7 = vrot.slane %v588_v56, 5  ;;  %v7815_v8 = vrot.slane %v594_v57, 5  ;;  %v6892_v18 = vld [vmem:[%s7576_s26 + $0x18] sm:$0xff]  ;;  %v5866_v26 = vrot.slane %v419_v17, 9 }
  0x61   : >> { %v296_v33 = vsel %vm7680_vm4, %v291_v20, %v295_v21  ;;  %v472_v44 = vsel %vm7694_vm5, %v470_v27, %v471_v25  ;;  %v300_v55 = vrot.slane %v298_v40, 4  ;;  %v7857_v61 = vrot.slane %v307_v45, 5  ;;  %v206_v21 = vld [vmem:[%s7576_s26 + $0x30] sm:$0xf] }
  0x62   : >> { %2307 = vmatpush.bf16.msra.mxu2 %v6961_v10  ;;  %2258 = vmatpush.bf16.msra.mxu1 %v6953_v23  ;;  %v591_v22 = vor.u32 %v590_v7, %v587_v6  ;;  %v601_v10 = vor.u32 %v600_v9, %v7815_v8  ;;  %v604_v23 = vshll.u32 %v5892_v12, 16  ;;  %v469_v43 = vsel %vm7694_vm5, %v5866_v26, %v468_v11  ;;  %v5893_v6 = vld [vmem:[%s7576_s26 + $0x38] sm:$0x1] }
  0x63   : >> { %v1169_v52 = vunpack.c.l.b16 %v296_v33  ;;  %v1200_v57 = vunpack.c.l.b16 %v469_v43  ;;  %v1201_v59 = vunpack.c.l.b16 %v472_v44  ;;  %v475_v12 = vrot.slane %v7824_v29, 5  ;;  %v5882_v43 = vld [vmem:[%s7576_s26 + $0x3c] sm:$0xf]  ;;  %v5883_v44 = vld [vmem:[%s7576_s26 + $0x40] sm:$0xf] }
  0x64   : >> { %2356 = vmatpush.bf16.msra.mxu3 %v6969_v30  ;;  %2405 = vmatpush.bf16.msra.mxu0 %v6977_v31  ;;  %v5880_v30 = vld [vmem:[%s7576_s26 + $0x30] sm:$0xf]  ;;  %v5881_v31 = vld [vmem:[%s7576_s26 + $0x34] sm:$0xf]  ;;  %v592_v34 = vrot.slane %v591_v22, 4  ;;  %v602_v38 = vrot.slane %v601_v10, 4 }
  0x65   : >> { %v612_v48 = vshll.u32 %v5880_v30, 16  ;;  %v618_v49 = vshll.u32 %v5881_v31, 16  ;;  %v622_v50 = vshrl.u32 %v5881_v31, 16  ;;  %v1182_v9 = vpack.c.b16 %v1169_v52, %v1168_v51  ;;  %v7904_v52 = vld [vmem:[%s7576_s26 + $0x38] sm:$0x1] }
  0x66   : >> { %2308 = vmatpush.bf16.msra.mxu2 %v6960_v39  ;;  %2259 = vmatpush.bf16.msra.mxu1 %v6952_v41  ;;  %v606_v39 = vrot.slane %v604_v23, 5  ;;  %v301_v41 = vshll.u32 %v204_v28, 16  ;;  %v597_v53 = vsel %vm7680_vm4, %v592_v34, %v7815_v8  ;;  %v317_v8 = vshll.u32 %v217_v60, 16  ;;  %v7869_v23 = vld [vmem:[%s7576_s26 + $0x34] sm:$0xf] }
  0x67   : >> { %v614_v63 = vrot.slane %v612_v48, 5  ;;  %v7859_v2 = vrot.slane %v618_v49, 5  ;;  %v624_v3 = vrot.slane %v622_v50, 4  ;;  %v1272_v4 = vunpack.c.l.b16 %v597_v53 }
  0x68   : >> { %2357 = vmatpush.bf16.msra.mxu3 %v6968_v46  ;;  %2406 = vmatpush.bf16.msra.mxu0 %v6976_v47  ;;  %v311_v46 = vshrl.u32 %v7824_v29, 16  ;;  %v609_v47 = vshrl.u32 %v5880_v30, 16  ;;  %v607_v54 = vsel %vm7680_vm4, %v602_v38, %v606_v39  ;;  %v303_v56 = vrot.slane %v301_v41, 5  ;;  %v6950_v38 = vld [vmem:[%s9356_s1 + $0x158] sm:$0xff] }
  0x69   : >> { %v1273_v5 = vunpack.c.l.b16 %v607_v54  ;;  %v625_v17 = vor.u32 %v624_v3, %v7859_v2  ;;  %v319_v10 = vrot.slane %v317_v8, 5  ;;  %v477_v25 = vrot.slane %v475_v12, 4  ;;  %v6974_v39 = vld [vmem:[%s9356_s1 + $0x218] sm:$0xff]  ;;  %v5894_v8 = vld [vmem:[%s7576_s26 + $0x44] sm:$0x1] }
  0x6a   : >> { %2309 = vmatpush.bf16.msra.mxu2 %v6959_v35  ;;  %2260 = vmatpush.bf16.msra.mxu1 %v6951_v37  ;;  %v313_v62 = vrot.slane %v311_v46, 4  ;;  %v611_v58 = vrot.slane %v609_v47, 4  ;;  %v304_v7 = vor.u32 %v303_v56, %v300_v55  ;;  %v478_v28 = vrot.slane %v217_v60, 5  ;;  %v6966_v37 = vld [vmem:[%s9356_s1 + $0x1d8] sm:$0xff] }
  0x6b   : >> { %v1286_v20 = vpack.c.b16 %v1273_v5, %v1272_v4  ;;  %v626_v30 = vrot.slane %v625_v17, 4  ;;  %v322_v32 = vshrl.u32 %v206_v21, 16  ;;  %v325_v33 = vshll.u32 %v206_v21, 16 }
  0x6c   : >> { %2358 = vmatpush.bf16.msra.mxu3 %v6967_v36  ;;  %2407 = vmatpush.bf16.msra.mxu0 %v6975_v42  ;;  %v314_v11 = vor.u32 %v313_v62, %v7857_v61  ;;  %v305_v22 = vrot.slane %v304_v7, 4  ;;  %v331_v34 = vshll.u32 %v7869_v23, 16  ;;  %v335_v35 = vshrl.u32 %v7869_v23, 16  ;;  %v6958_v36 = vld [vmem:[%s9356_s1 + $0x198] sm:$0xff] }
  0x6d   : >> { %2074 = vmatmul.bf16.gmra.mxu1 %v1181_v13  ;;  %2123 = vmatmul.bf16.gmra.mxu2 %v1213_v14  ;;  %v1214_v13 = vpack.c.b16 %v1201_v59, %v1200_v57  ;;  %v420_v14 = vld [vmem:[%s7576_s26 + $0x24] sm:$0xe]  ;;  %v479_v45 = vsel %vm7694_vm5, %v477_v25, %v478_v28  ;;  %v324_v48 = vrot.slane %v322_v32, 4  ;;  %v327_v49 = vrot.slane %v325_v33, 5  ;;  %v6949_v32 = vld [vmem:[%s9356_s1 + $0x150] sm:$0xff] }
  0x6e   : >> { %v315_v26 = vrot.slane %v314_v11, 4  ;;  %v5867_v27 = vrot.slane %v420_v14, 9  ;;  %v310_v40 = vsel %vm7680_vm4, %v305_v22, %v7857_v61  ;;  %2310 = vmatpush.bf16.msra.mxu2 %v6958_v36  ;;  %2261 = vmatpush.bf16.msra.mxu1 %v6950_v38  ;;  %v7901_v50 = vrot.slane %v331_v34, 5  ;;  %v6973_v38 = vld [vmem:[%s9356_s1 + $0x210] sm:$0xff] }
  0x6f   : >> { %2172 = vmatmul.bf16.gmra.mxu3 %v6892_v18  ;;  %2221 = vmatmul.bf16.gmra.mxu0 %v1285_v15  ;;  %v615_v15 = vor.u32 %v614_v63, %v611_v58  ;;  %v628_v18 = vshll.u32 %v5893_v6, 16  ;;  %v337_v51 = vrot.slane %v335_v35, 4  ;;  %v633_v53 = vshrl.u32 %v5882_v43, 16 }
  0x70   : >> { %v320_v41 = vsel %vm7680_vm4, %v315_v26, %v319_v10  ;;  %v476_v42 = vsel %vm7694_vm5, %v5867_v27, %v475_v12  ;;  %2359 = vmatpush.bf16.msra.mxu3 %v6966_v37  ;;  %2408 = vmatpush.bf16.msra.mxu0 %v6974_v39  ;;  %v636_v54 = vshll.u32 %v5882_v43, 16  ;;  %v642_v55 = vshll.u32 %v5883_v44, 16  ;;  %v6894_v12 = vld [vmem:[%s7576_s26 + $0x30] sm:$0xff]  ;;  %v208_v10 = vld [vmem:[%s7576_s26 + $0x3c] sm:$0xf] }
  0x71   : >> { %v616_v29 = vrot.slane %v615_v15, 4  ;;  %v630_v31 = vrot.slane %v628_v18, 5  ;;  %v646_v56 = vshrl.u32 %v5883_v44, 16  ;;  %v1170_v57 = vunpack.c.l.b16 %v310_v40  ;;  %v7914_v26 = vld [vmem:[%s7576_s26 + $0x40] sm:$0xf] }
  0x72   : >> { %v1171_v59 = vunpack.c.l.b16 %v320_v41  ;;  %v1202_v60 = vunpack.c.l.b16 %v476_v42  ;;  %v1203_v61 = vunpack.c.l.b16 %v479_v45  ;;  %v328_v63 = vor.u32 %v327_v49, %v324_v48  ;;  %v5884_v27 = vld [vmem:[%s7576_s26 + $0x48] sm:$0xf]  ;;  %v5885_v37 = vld [vmem:[%s7576_s26 + $0x4c] sm:$0xf]  ;;  %2262 = vmatpush.bf16.msra.mxu1 %v6949_v32 }
  0x73   : >> { %v621_v46 = vsel %vm7680_vm4, %v616_v29, %v7859_v2  ;;  %v631_v47 = vsel %vm7680_vm4, %v626_v30, %v630_v31  ;;  %v338_v2 = vor.u32 %v337_v51, %v7901_v50  ;;  %v341_v3 = vshll.u32 %v7904_v52, 16  ;;  %v6957_v30 = vld [vmem:[%s9356_s1 + $0x190] sm:$0xff]  ;;  %v6964_v32 = vld [vmem:[%s9356_s1 + $0x1c8] sm:$0xff] }
  0x74   : >> { %v1274_v62 = vunpack.c.l.b16 %v621_v46  ;;  %v1275_v58 = vunpack.c.l.b16 %v631_v47  ;;  %v635_v4 = vrot.slane %v633_v53, 4  ;;  %v638_v5 = vrot.slane %v636_v54, 5  ;;  %v6965_v31 = vld [vmem:[%s9356_s1 + $0x1d0] sm:$0xff]  ;;  %2311 = vmatpush.bf16.msra.mxu2 %v6957_v30  ;;  %2409 = vmatpush.bf16.msra.mxu0 %v6973_v38  ;;  %v219_v53 = vld [vmem:[%s7576_s26 + $0x44] sm:$0x1]  ;;  %v6956_v30 = vld [vmem:[%s9356_s1 + $0x188] sm:$0xff] }
  0x75   : >> { %v644_v6 = vrot.slane %v642_v55, 5  ;;  %v648_v7 = vrot.slane %v646_v56, 4  ;;  %v1215_v11 = vpack.c.b16 %v1203_v61, %v1202_v60  ;;  %v329_v14 = vrot.slane %v328_v63, 4  ;;  %2360 = vmatpush.bf16.msra.mxu3 %v6965_v31  ;;  %v5886_v31 = vld [vmem:[%s7576_s26 + $0x54] sm:$0xf] }
  0x76   : >> { %v343_v15 = vrot.slane %v341_v3, 5  ;;  %v482_v17 = vrot.slane %v7869_v23, 5  ;;  %v339_v18 = vrot.slane %v338_v2, 4  ;;  %v652_v22 = vshll.u32 %v5894_v8, 16 }
  0x77   : >> { %v649_v21 = vor.u32 %v648_v7, %v644_v6  ;;  %v334_v25 = vsel %vm7680_vm4, %v329_v14, %v7901_v50  ;;  %v485_v29 = vrot.slane %v7904_v52, 5  ;;  %v346_v39 = vshrl.u32 %v208_v10, 16 }
  0x78   : >> { %v484_v23 = vrot.slane %v482_v17, 4  ;;  %v344_v33 = vsel %vm7680_vm4, %v339_v18, %v343_v15  ;;  %v654_v36 = vrot.slane %v652_v22, 5  ;;  %v349_v40 = vshll.u32 %v208_v10, 16  ;;  %v422_v15 = vld [vmem:[%s7576_s26 + $0x3c] sm:$0xe]  ;;  %2312 = vmatpush.bf16.msra.mxu2 %v6956_v30  ;;  %v6963_v30 = vld [vmem:[%s9356_s1 + $0x1c0] sm:$0xff] }
  0x79   : >> { %v650_v35 = vrot.slane %v649_v21, 4  ;;  %v355_v41 = vshll.u32 %v7914_v26, 16  ;;  %v359_v42 = vshrl.u32 %v7914_v26, 16  ;;  %v657_v43 = vshrl.u32 %v5884_v27, 16  ;;  %v210_v22 = vld [vmem:[%s7576_s26 + $0x48] sm:$0xf]  ;;  %2361 = vmatpush.bf16.msra.mxu3 %v6964_v32 }
  0x7a   : >> { %v660_v44 = vshll.u32 %v5884_v27, 16  ;;  %v486_v46 = vsel %vm7694_vm5, %v484_v23, %v485_v29  ;;  %v666_v47 = vshll.u32 %v5885_v37, 16  ;;  %v670_v48 = vshrl.u32 %v5885_v37, 16  ;;  %v7959_v10 = vld [vmem:[%s7576_s26 + $0x4c] sm:$0xf] }
  0x7b   : >> { %v1172_v49 = vunpack.c.l.b16 %v334_v25  ;;  %v1173_v50 = vunpack.c.l.b16 %v344_v33  ;;  %v655_v52 = vsel %vm7680_vm4, %v650_v35, %v654_v36  ;;  %v348_v54 = vrot.slane %v346_v39, 4  ;;  %v5887_v37 = vld [vmem:[%s7576_s26 + $0x58] sm:$0xf] }
  0x7c   : >> { %v351_v55 = vrot.slane %v349_v40, 5  ;;  %v7947_v56 = vrot.slane %v355_v41, 5  ;;  %v1205_v60 = vunpack.c.l.b16 %v486_v46  ;;  %v659_v61 = vrot.slane %v657_v43, 4 }
  0x7d   : >> { %2079 = vmatmul.bf16.gmra.mxu1 %v1182_v9  ;;  %2128 = vmatmul.bf16.gmra.mxu2 %v1214_v13  ;;  %v1183_v9 = vpack.c.b16 %v1171_v59, %v1170_v57  ;;  %v1287_v13 = vpack.c.b16 %v1275_v58, %v1274_v62  ;;  %v361_v57 = vrot.slane %v359_v42, 4  ;;  %v662_v62 = vrot.slane %v660_v44, 5  ;;  %v6948_v44 = vld [vmem:[%s9356_s1 + $0x148] sm:$0xff] }
  0x7e   : >> { %v1277_v63 = vunpack.c.l.b16 %v655_v52  ;;  %v7949_v2 = vrot.slane %v666_v47, 5  ;;  %v672_v3 = vrot.slane %v670_v48, 4  ;;  %v1184_v8 = vpack.c.b16 %v1173_v50, %v1172_v49  ;;  %2263 = vmatpush.bf16.msra.mxu1 %v6948_v44  ;;  %2362 = vmatpush.bf16.msra.mxu3 %v6963_v30 }
  0x7f   : >> { %2177 = vmatmul.bf16.gmra.mxu3 %v6893_v19  ;;  %2226 = vmatmul.bf16.gmra.mxu0 %v1286_v20  ;;  %v421_v19 = vld [vmem:[%s7576_s26 + $0x30] sm:$0xe]  ;;  %v639_v20 = vor.u32 %v638_v5, %v635_v4  ;;  %v365_v4 = vshll.u32 %v219_v53, 16  ;;  %v5895_v5 = vld [vmem:[%s7576_s26 + $0x50] sm:$0x1]  ;;  %v362_v7 = vor.u32 %v361_v57, %v7947_v56  ;;  %v5869_v27 = vrot.slane %v422_v15, 9 }
  0x80   : >> { %v5868_v28 = vrot.slane %v421_v19, 9  ;;  %v676_v18 = vshll.u32 %v5895_v5, 16  ;;  %v370_v33 = vshrl.u32 %v210_v22, 16  ;;  %v379_v35 = vshll.u32 %v7959_v10, 16  ;;  %v7996_v5 = vld [vmem:[%s7576_s26 + $0x5c] sm:$0x1] }
  0x81   : >> { %v640_v34 = vrot.slane %v639_v20, 4  ;;  %v367_v19 = vrot.slane %v365_v4, 5  ;;  %v363_v21 = vrot.slane %v362_v7, 4  ;;  %v383_v36 = vshrl.u32 %v7959_v10, 16 }
  0x82   : >> { %v483_v45 = vsel %vm7694_vm5, %v5868_v28, %v482_v17  ;;  %v673_v17 = vor.u32 %v672_v3, %v7949_v2  ;;  %v678_v29 = vrot.slane %v676_v18, 5  ;;  %v681_v42 = vshrl.u32 %v5886_v31, 16 }
  0x83   : >> { %v645_v51 = vsel %vm7680_vm4, %v640_v34, %v644_v6  ;;  %v1204_v59 = vunpack.c.l.b16 %v483_v45  ;;  %v352_v6 = vor.u32 %v351_v55, %v348_v54  ;;  %v373_v34 = vshll.u32 %v210_v22, 16 }
  0x84   : >> { %v1276_v58 = vunpack.c.l.b16 %v645_v51  ;;  %v674_v23 = vrot.slane %v673_v17, 4  ;;  %v368_v39 = vsel %vm7680_vm4, %v363_v21, %v367_v19  ;;  %v684_v43 = vshll.u32 %v5886_v31, 16 }
  0x85   : >> { %v353_v20 = vrot.slane %v352_v6, 4  ;;  %v690_v47 = vshll.u32 %v5887_v37, 16  ;;  %v694_v48 = vshrl.u32 %v5887_v37, 16  ;;  %v372_v49 = vrot.slane %v370_v33, 4 }
  0x86   : >> { %v1288_v14 = vpack.c.b16 %v1277_v63, %v1276_v58  ;;  %v679_v46 = vsel %vm7680_vm4, %v674_v23, %v678_v29  ;;  %v375_v50 = vrot.slane %v373_v34, 5  ;;  %v7988_v51 = vrot.slane %v379_v35, 5  ;;  %v8004_v23 = vld [vmem:[%s7576_s26 + $0x58] sm:$0xf]  ;;  %v6955_v29 = vld [vmem:[%s9356_s1 + $0x180] sm:$0xff] }
  0x87   : >> { %v358_v38 = vsel %vm7680_vm4, %v353_v20, %v7947_v56  ;;  %v385_v52 = vrot.slane %v383_v36, 4  ;;  %v1175_v55 = vunpack.c.l.b16 %v368_v39  ;;  %v1279_v58 = vunpack.c.l.b16 %v679_v46  ;;  %2313 = vmatpush.bf16.msra.mxu2 %v6955_v29  ;;  %v5888_v35 = vld [vmem:[%s7576_s26 + $0x60] sm:$0xf]  ;;  %v5889_v36 = vld [vmem:[%s7576_s26 + $0x64] sm:$0xf] }
  0x88   : >> { %v1174_v54 = vunpack.c.l.b16 %v358_v38  ;;  %v692_v63 = vrot.slane %v690_v47, 5  ;;  %v376_v3 = vor.u32 %v375_v50, %v372_v49  ;;  %v496_v7 = vrot.slane %v7959_v10, 5 }
  0x89   : >> { %v386_v4 = vor.u32 %v385_v52, %v7988_v51  ;;  %v700_v17 = vshll.u32 %v7996_v5, 16  ;;  %v403_v39 = vshll.u32 %v8004_v23, 16  ;;  %v705_v44 = vshrl.u32 %v5888_v35, 16 }
  0x8a   : >> { %v377_v18 = vrot.slane %v376_v3, 4  ;;  %v498_v22 = vrot.slane %v496_v7, 4  ;;  %v714_v46 = vshll.u32 %v5889_v36, 16  ;;  %v718_v47 = vshrl.u32 %v5889_v36, 16 }
  0x8b   : >> { %v387_v19 = vrot.slane %v386_v4, 4 }
  0x8c   : >> { %v382_v31 = vsel %vm7680_vm4, %v377_v18, %v7988_v51 }
  0x8d   : >> { %2084 = vmatmul.bf16.gmra.mxu1 %v1183_v9  ;;  %2133 = vmatmul.bf16.gmra.mxu2 %v1215_v11  ;;  %v1216_v9 = vpack.c.b16 %v1205_v60, %v1204_v59  ;;  %v489_v11 = vrot.slane %v7914_v26, 5  ;;  %v492_v26 = vrot.slane %v219_v53, 5  ;;  %v6972_v53 = vld [vmem:[%s9356_s1 + $0x208] sm:$0xff]  ;;  %v220_v59 = vld [vmem:[%s7576_s26 + $0x50] sm:$0x1]  ;;  %v683_v60 = vrot.slane %v681_v42, 4 }
  0x8e   : >> { %2410 = vmatpush.bf16.msra.mxu0 %v6972_v53  ;;  %v389_v6 = vshll.u32 %v220_v59, 16  ;;  %v1176_v49 = vunpack.c.l.b16 %v382_v31 }
  0x8f   : >> { %2182 = vmatmul.bf16.gmra.mxu3 %v6894_v12  ;;  %2231 = vmatmul.bf16.gmra.mxu0 %v1287_v13  ;;  %v663_v12 = vor.u32 %v662_v62, %v659_v61  ;;  %v6895_v13 = vld [vmem:[%s7576_s26 + $0x3c] sm:$0xff]  ;;  %v491_v25 = vrot.slane %v489_v11, 4  ;;  %v490_v40 = vsel %vm7694_vm5, %v5869_v27, %v489_v11  ;;  %v686_v61 = vrot.slane %v684_v43, 5  ;;  %v423_v11 = vld [vmem:[%s7576_s26 + $0x48] sm:$0xe] }
  0x90   : >> { %v1206_v56 = vunpack.c.l.b16 %v490_v40  ;;  %v391_v20 = vrot.slane %v389_v6, 5  ;;  %v5870_v21 = vrot.slane %v423_v11, 9  ;;  %v499_v27 = vrot.slane %v220_v59, 5 }
  0x91   : >> { %v664_v28 = vrot.slane %v663_v12, 4  ;;  %v493_v41 = vsel %vm7694_vm5, %v491_v25, %v492_v26  ;;  %v687_v12 = vor.u32 %v686_v61, %v683_v60  ;;  %v212_v25 = vld [vmem:[%s7576_s26 + $0x54] sm:$0xf]  ;;  %v407_v40 = vshrl.u32 %v8004_v23, 16  ;;  %v221_v60 = vld [vmem:[%s7576_s26 + $0x5c] sm:$0x1] }
  0x92   : >> { %v1207_v57 = vunpack.c.l.b16 %v493_v41  ;;  %v392_v32 = vsel %vm7680_vm4, %v387_v19, %v391_v20  ;;  %v497_v33 = vsel %vm7694_vm5, %v5870_v21, %v496_v7  ;;  %v500_v34 = vsel %vm7694_vm5, %v498_v22, %v499_v27  ;;  %v6947_v41 = vld [vmem:[%s9356_s1 + $0x140] sm:$0xff]  ;;  %v5916_v22 = vld [vmem:[%s7576_s26 + $0x18] sm:$0xf]  ;;  %v8049_v27 = vld [vmem:[%s7576_s26 + $0x1c] sm:$0xf] }
  0x93   : >> { %v669_v45 = vsel %vm7680_vm4, %v664_v28, %v7949_v2  ;;  %v696_v2 = vrot.slane %v694_v48, 4  ;;  %v688_v10 = vrot.slane %v687_v12, 4  ;;  %v702_v28 = vrot.slane %v700_v17, 5  ;;  %2264 = vmatpush.bf16.msra.mxu1 %v6947_v41  ;;  %v6971_v48 = vld [vmem:[%s9356_s1 + $0x200] sm:$0xff] }
  0x94   : >> { %v1278_v62 = vunpack.c.l.b16 %v669_v45  ;;  %v394_v37 = vshrl.u32 %v212_v25, 16  ;;  %v397_v38 = vshll.u32 %v212_v25, 16  ;;  %v708_v45 = vshll.u32 %v5888_v35, 16  ;;  %2411 = vmatpush.bf16.msra.mxu0 %v6971_v48 }
  0x95   : >> { %v697_v15 = vor.u32 %v696_v2, %v692_v63  ;;  %v693_v42 = vsel %vm7680_vm4, %v688_v10, %v692_v63  ;;  %v1177_v50 = vunpack.c.l.b16 %v392_v32  ;;  %v1208_v51 = vunpack.c.l.b16 %v497_v33  ;;  %v8037_v2 = vld [vmem:[%s7576_s26 + $0x68] sm:$0x1] }
  0x96   : >> { %v1209_v52 = vunpack.c.l.b16 %v500_v34  ;;  %v396_v53 = vrot.slane %v394_v37, 4  ;;  %v707_v61 = vrot.slane %v705_v44, 4  ;;  %v720_v63 = vrot.slane %v718_v47, 4 }
  0x97   : >> { %v698_v26 = vrot.slane %v697_v15, 4  ;;  %v1186_v3 = vpack.c.b16 %v1177_v50, %v1176_v49  ;;  %v413_v12 = vshll.u32 %v221_v60, 16  ;;  %v424_v15 = vld [vmem:[%s7576_s26 + $0x54] sm:$0xe]  ;;  %v724_v19 = vshll.u32 %v8037_v2, 16 }
  0x98   : >> { %v1218_v4 = vpack.c.b16 %v1209_v52, %v1208_v51  ;;  %v5871_v25 = vrot.slane %v424_v15, 9  ;;  %v845_v32 = vshrl.u32 %v5916_v22, 16  ;;  %v848_v33 = vshll.u32 %v5916_v22, 16 }
  0x99   : >> { %v703_v43 = vsel %vm7680_vm4, %v698_v26, %v702_v28  ;;  %v415_v10 = vrot.slane %v413_v12, 5  ;;  %v506_v28 = vrot.slane %v221_v60, 5  ;;  %v726_v30 = vrot.slane %v724_v19, 5  ;;  %v5940_v12 = vld [vmem:[%s7576_s26 + $0x18] sm:$0xe] }
  0x9a   : >> { %v1281_v59 = vunpack.c.l.b16 %v703_v43  ;;  %v854_v34 = vshll.u32 %v8049_v27, 16  ;;  %v858_v35 = vshrl.u32 %v8049_v27, 16 }
  0x9c   : >> { %v856_v47 = vrot.slane %v854_v34, 5  ;;  %v860_v48 = vrot.slane %v858_v35, 4 }
  0x9d   : >> { %2089 = vmatmul.bf16.gmra.mxu1 %v1184_v8  ;;  %2138 = vmatmul.bf16.gmra.mxu2 %v1216_v9  ;;  %v1185_v8 = vpack.c.b16 %v1175_v55, %v1174_v54  ;;  %v1217_v9 = vpack.c.b16 %v1207_v57, %v1206_v56  ;;  %v399_v54 = vrot.slane %v397_v38, 5  ;;  %v405_v55 = vrot.slane %v403_v39, 5 }
  0x9e   : >> { %v409_v56 = vrot.slane %v407_v40, 4  ;;  %v1280_v57 = vunpack.c.l.b16 %v693_v42 }
  0x9f   : >> { %2187 = vmatmul.bf16.gmra.mxu3 %v6895_v13  ;;  %2236 = vmatmul.bf16.gmra.mxu0 %v1288_v14  ;;  %v6896_v13 = vld [vmem:[%s7576_s26 + $0x48] sm:$0xff]  ;;  %v1289_v14 = vpack.c.b16 %v1279_v58, %v1278_v62  ;;  %v710_v62 = vrot.slane %v708_v45, 5  ;;  %v716_v58 = vrot.slane %v714_v46, 5  ;;  %v400_v6 = vor.u32 %v399_v54, %v396_v53 }
  0xa0   : >> { %v410_v7 = vor.u32 %v409_v56, %v405_v55  ;;  %v1290_v11 = vpack.c.b16 %v1281_v59, %v1280_v57  ;;  %v847_v45 = vrot.slane %v845_v32, 4  ;;  %v850_v46 = vrot.slane %v848_v33, 5  ;;  %v7245_v57 = vld [vmem:[%s7576_s26 + $0x10] sm:$0xf] }
  0xa1   : >> { %v711_v17 = vor.u32 %v710_v62, %v707_v61  ;;  %v721_v18 = vor.u32 %v720_v63, %v716_v58  ;;  %v401_v20 = vrot.slane %v400_v6, 4  ;;  %v762_v59 = vrot.slane %v7245_v57, 5  ;;  %v5933_v57 = vld [vmem:[%s7576_s26 + $0x2c] sm:$0x1] }
  0xa2   : >> { %v411_v21 = vrot.slane %v410_v7, 4  ;;  %v851_v60 = vor.u32 %v850_v46, %v847_v45  ;;  %v861_v61 = vor.u32 %v860_v48, %v856_v47  ;;  %v1070_v6 = vrot.slane %v8049_v27, 5 }
  0xa3   : >> { %v722_v29 = vrot.slane %v721_v18, 4  ;;  %v406_v38 = vsel %vm7680_vm4, %v401_v20, %v405_v55  ;;  %v5932_v55 = vld [vmem:[%s7576_s26 + $0x20] sm:$0x1]  ;;  %v764_v19 = vrot.slane %v762_v59, 4 }
  0xa4   : >> { %v416_v39 = vsel %vm7680_vm4, %v411_v21, %v415_v10  ;;  %v1178_v49 = vunpack.c.l.b16 %v406_v38  ;;  %v852_v20 = vrot.slane %v851_v60, 4  ;;  %v862_v21 = vrot.slane %v861_v61, 4 }
  0xa5   : >> { %v727_v44 = vsel %vm7680_vm4, %v722_v29, %v726_v30  ;;  %v1179_v50 = vunpack.c.l.b16 %v416_v39  ;;  %v5948_v10 = vrot.slane %v5940_v12, 9  ;;  %v1072_v27 = vrot.slane %v1070_v6, 4 }
  0xa6   : >> { %v1283_v54 = vunpack.c.l.b16 %v727_v44  ;;  %v857_v33 = vsel %vm7680_vm4, %v852_v20, %v856_v47 }
  0xa7   : >> { %v1071_v35 = vsel %vm7694_vm5, %v5948_v10, %v1070_v6  ;;  %v1372_v48 = vunpack.c.l.b16 %v857_v33 }
  0xad   : >> { %2094 = vmatmul.bf16.gmra.mxu1 %v1185_v8  ;;  %2143 = vmatmul.bf16.gmra.mxu2 %v1217_v9  ;;  %v6897_v9 = vld [vmem:[%s7576_s26 + $0x54] sm:$0xff] }
  0xaf   : >> { %2192 = vmatmul.bf16.gmra.mxu3 %v6896_v13  ;;  %2241 = vmatmul.bf16.gmra.mxu0 %v1289_v14  ;;  %v503_v13 = vrot.slane %v8004_v23, 5  ;;  %v712_v23 = vrot.slane %v711_v17, 4 }
  0xb1   : >> { %v505_v26 = vrot.slane %v503_v13, 4  ;;  %v504_v40 = vsel %vm7694_vm5, %v5871_v25, %v503_v13  ;;  %v717_v43 = vsel %vm7680_vm4, %v712_v23, %v716_v58  ;;  %v1187_v58 = vpack.c.b16 %v1179_v50, %v1178_v49  ;;  %v7246_v13 = vld [vmem:[%s7576_s26 + $0x14] sm:$0x1] }
  0xb2   : >> { %v1210_v51 = vunpack.c.l.b16 %v504_v40  ;;  %v1282_v53 = vunpack.c.l.b16 %v717_v43  ;;  %v765_v15 = vrot.slane %v7246_v13, 5  ;;  %v1073_v25 = vrot.slane %v5932_v55, 5 }
  0xb3   : >> { %v507_v41 = vsel %vm7694_vm5, %v505_v26, %v506_v28  ;;  %v5918_v26 = vld [vmem:[%s7576_s26 + $0x24] sm:$0xf]  ;;  %v8090_v28 = vld [vmem:[%s7576_s26 + $0x28] sm:$0xf]  ;;  %v1404_v50 = vunpack.c.l.b16 %v1071_v35 }
  0xb4   : >> { %v1211_v52 = vunpack.c.l.b16 %v507_v41  ;;  %v766_v30 = vsel %vm7694_vm5, %v764_v19, %v765_v15  ;;  %v1074_v38 = vsel %vm7694_vm5, %v1072_v27, %v1073_v25  ;;  %v869_v40 = vshrl.u32 %v5918_v26, 16  ;;  %v5920_v27 = vld [vmem:[%s7576_s26 + $0x30] sm:$0xf]  ;;  %v8127_v25 = vld [vmem:[%s7576_s26 + $0x34] sm:$0xf] }
  0xb5   : >> { %v872_v41 = vshll.u32 %v5918_v26, 16  ;;  %v878_v43 = vshll.u32 %v8090_v28, 16  ;;  %v882_v44 = vshrl.u32 %v8090_v28, 16  ;;  %v1301_v47 = vunpack.c.l.b16 %v766_v30  ;;  %v7248_v26 = vld [vmem:[%s7576_s26 + $0x20] sm:$0x1] }
  0xb6   : >> { %v1219_v63 = vpack.c.b16 %v1211_v52, %v1210_v51  ;;  %v1405_v51 = vunpack.c.l.b16 %v1074_v38  ;;  %v871_v52 = vrot.slane %v869_v40, 4  ;;  %v888_v15 = vshll.u32 %v5933_v57, 16 }
  0xb7   : >> { %v1077_v20 = vrot.slane %v8090_v28, 5  ;;  %v1080_v38 = vrot.slane %v5933_v57, 5  ;;  %v893_v28 = vshrl.u32 %v5920_v27, 16 }
  0xba   : >> { %v8039_v8 = vpop.f32.mrf.mxu1 }
  0xbc   : >> { %v8043_v14 = vpop.f32.mrf.mxu0 }
  0xbd   : >> { %2099 = vmatmul.bf16.gmra.mxu1 %v1186_v3  ;;  %2148 = vmatmul.bf16.gmra.mxu2 %v1218_v4  ;;  %v5898_v3 = vld [vmem:[%s7576_s26 + $0xc] sm:$0xe]  ;;  %v864_v4 = vshll.u32 %v5932_v55, 16  ;;  %v884_v55 = vrot.slane %v882_v44, 4  ;;  %v906_v44 = vshrl.u32 %v8127_v25, 16 }
  0xbe   : >> { %v5906_v18 = vrot.slane %v5898_v3, 9  ;;  %v7247_v3 = vld [vmem:[%s7576_s26 + $0x1c] sm:$0xf] }
  0xbf   : >> { %2197 = vmatmul.bf16.gmra.mxu3 %v6897_v9  ;;  %2246 = vmatmul.bf16.gmra.mxu0 %v1290_v11  ;;  %v6898_v9 = vld [vmem:[%s7576_s26 + $0x60] sm:$0xff]  ;;  %v1291_v11 = vpack.c.b16 %v1283_v54, %v1282_v53  ;;  %v866_v22 = vrot.slane %v864_v4, 5  ;;  %v874_v53 = vrot.slane %v872_v41, 5  ;;  %v880_v54 = vrot.slane %v878_v43, 5 }
  0xc0   : >> { %v8051_v31 = vpop.f32.mrf.mxu2  ;;  %v763_v29 = vsel %vm7694_vm5, %v5906_v18, %v762_v59  ;;  %v769_v4 = vrot.slane %v7247_v3, 5  ;;  %v896_v41 = vshll.u32 %v5920_v27, 16  ;;  %v902_v43 = vshll.u32 %v8127_v25, 16 }
  0xc1   : >> { %v867_v34 = vsel %vm7680_vm4, %v862_v21, %v866_v22  ;;  %v1300_v46 = vunpack.c.l.b16 %v763_v29  ;;  %v875_v12 = vor.u32 %v874_v53, %v871_v52  ;;  %v885_v13 = vor.u32 %v884_v55, %v880_v54  ;;  %v5941_v21 = vld [vmem:[%s7576_s26 + $0x24] sm:$0xe] }
  0xc2   : >> { %v8055_v36 = vpop.f32.mrf.mxu3  ;;  %v8057_v37 = vpop.f32.mrf.mxu1  ;;  %v1373_v49 = vunpack.c.l.b16 %v867_v34  ;;  %v771_v10 = vrot.slane %v769_v4, 4  ;;  %v772_v29 = vrot.slane %v7248_v26, 5  ;;  %v890_v34 = vrot.slane %v888_v15, 5 }
  0xc3   : >> { %v1316_v61 = vpack.c.b16 %v1301_v47, %v1300_v46  ;;  %v876_v30 = vrot.slane %v875_v12, 4  ;;  %v886_v33 = vrot.slane %v885_v13, 4  ;;  %v5949_v35 = vrot.slane %v5941_v21, 9 }
  0xc4   : >> { %v8067_v42 = vpop.f32.mrf.mxu0  ;;  %v898_v3 = vrot.slane %v896_v41, 5 }
  0xc5   : >> { %v891_v52 = vsel %vm7680_vm4, %v886_v33, %v890_v34 }
  0xc6   : >> { %v1375_v13 = vunpack.c.l.b16 %v891_v52 }
  0xc8   : >> { %v8074_v56 = vpop.f32.mrf.mxu2 }
  0xca   : >> { %v8077_v62 = vpop.f32.mrf.mxu3  ;;  %v8081_v7 = vpop.f32.mrf.mxu1 }
  0xcc   : >> { %v8086_v17 = vpop.f32.mrf.mxu0 }
  0xcd   : >> { %2104 = vmatmul.bf16.gmra.mxu1 %v1187_v58  ;;  %2153 = vmatmul.bf16.gmra.mxu2 %v1219_v63  ;;  %v6899_v58 = vld [vmem:[%s7576_s26 + $0x18] sm:$0xff]  ;;  %v1388_v63 = vpack.c.b16 %v1373_v49, %v1372_v48 }
  0xcf   : >> { %2202 = vmatmul.bf16.gmra.mxu3 %v6898_v9  ;;  %2251 = vmatmul.bf16.gmra.mxu0 %v1291_v11  ;;  %v1420_v9 = vpack.c.b16 %v1405_v51, %v1404_v50  ;;  %v5899_v11 = vld [vmem:[%s7576_s26 + $0x18] sm:$0xe]  ;;  %v773_v50 = vsel %vm7694_vm5, %v771_v10, %v772_v29  ;;  %v881_v51 = vsel %vm7680_vm4, %v876_v30, %v880_v54  ;;  %v908_v54 = vrot.slane %v906_v44, 4  ;;  %v5900_v10 = vld [vmem:[%s7576_s26 + $0x24] sm:$0xe] }
  0xd0   : >> { %v8092_v23 = vpop.f32.mrf.mxu2  ;;  %v5907_v22 = vrot.slane %v5899_v11, 9  ;;  %v5934_v11 = vld [vmem:[%s7576_s26 + $0x38] sm:$0x1] }
  0xd1   : >> { %v912_v29 = vshll.u32 %v5934_v11, 16 }
  0xd2   : >> { %v8098_v32 = vpop.f32.mrf.mxu3  ;;  %v8108_v39 = vpop.f32.mrf.mxu1  ;;  %v770_v49 = vsel %vm7694_vm5, %v5907_v22, %v769_v4  ;;  %v8145_v4 = vrot.slane %v902_v43, 5 }
  0xd3   : >> { %v914_v52 = vrot.slane %v912_v29, 5 }
  0xd4   : >> { %v8112_v45 = vpop.f32.mrf.mxu0  ;;  %v909_v26 = vor.u32 %v908_v54, %v8145_v4 }
  0xd8   : >> { %v8115_v59 = vpop.f32.mrf.mxu2 }
  0xda   : >> { %v8117_v60 = vpop.f32.mrf.mxu3  ;;  %v2070_v6 = vpop.f32.mrf.mxu1 }
  0xdb   : >> { %v2071_v18 = vadd.f32 %v2070_v6, %v8043_v14  ;;  %v1079_v14 = vrot.slane %v1077_v20, 4  ;;  %v1302_v6 = vunpack.c.l.b16 %v770_v49 }
  0xdc   : >> { %v2217_v19 = vpop.f32.mrf.mxu0 }
  0xdd   : >> { %2265 = vmatmul.bf16.vlgmr.msra.gmra.mxu1 %v1316_v61  ;;  %2314 = vmatmul.bf16.vlgmr.msra.gmra.mxu2 %v6899_v58  ;;  %v1078_v61 = vsel %vm7694_vm5, %v5949_v35, %v1077_v20  ;;  %v1081_v58 = vsel %vm7694_vm5, %v1079_v14, %v1080_v38  ;;  %v7249_v20 = vld [vmem:[%s7576_s26 + $0x28] sm:$0xf] }
  0xde   : >> { %v1406_v15 = vunpack.c.l.b16 %v1078_v61  ;;  %v776_v21 = vrot.slane %v7249_v20, 5  ;;  %v6900_v35 = vld [vmem:[%s7576_s26 + $0x24] sm:$0xff] }
  0xdf   : >> { %2363 = vmatmul.bf16.vlgmr.msra.gmra.mxu3 %v1388_v63  ;;  %2412 = vmatmul.bf16.vlgmr.msra.gmra.mxu0 %v1420_v9  ;;  %v895_v63 = vrot.slane %v893_v28, 4  ;;  %v1303_v9 = vunpack.c.l.b16 %v773_v50  ;;  %v5942_v28 = vld [vmem:[%s7576_s26 + $0x30] sm:$0xe] }
  0xe0   : >> { %v2119_v40 = vpop.f32.mrf.mxu2 }
  0xe1   : >> { %v2120_v46 = vadd.f32 %v2119_v40, %v2071_v18  ;;  %v1407_v18 = vunpack.c.l.b16 %v1081_v58  ;;  %v899_v27 = vor.u32 %v898_v3, %v895_v63  ;;  %v1317_v34 = vpack.c.b16 %v1303_v9, %v1302_v6  ;;  %v8162_v58 = vld [vmem:[%s7576_s26 + $0x40] sm:$0xf] }
  0xe2   : >> { %v2168_v47 = vpop.f32.mrf.mxu3  ;;  %v2072_v48 = vpop.f32.mrf.mxu1 }
  0xe3   : >> { %v2169_v53 = vadd.f32 %v2168_v47, %v2120_v46  ;;  %v2073_v55 = vadd.f32 %v2072_v48, %v8067_v42  ;;  %v1374_v42 = vunpack.c.l.b16 %v881_v51  ;;  %v1421_v40 = vpack.c.b16 %v1407_v18, %v1406_v15  ;;  %v7250_v48 = vld [vmem:[%s7576_s26 + $0x2c] sm:$0x1] }
  0xe4   : >> { %v2219_v57 = vpop.f32.mrf.mxu0  ;;  %v5908_v46 = vrot.slane %v5900_v10, 9  ;;  %v778_v47 = vrot.slane %v776_v21, 4  ;;  %v779_v49 = vrot.slane %v7250_v48, 5  ;;  %v900_v50 = vrot.slane %v899_v27, 4  ;;  %v6901_v48 = vld [vmem:[%s7576_s26 + $0x30] sm:$0xff] }
  0xe5   : >> { %v8148_v12 = vadd.f32 %v2217_v19, %v2169_v53  ;;  %v1084_v19 = vrot.slane %v8127_v25, 5  ;;  %v1389_v38 = vpack.c.b16 %v1375_v13, %v1374_v42  ;;  %v910_v51 = vrot.slane %v909_v26, 4 }
  0xe6   : >> { %v5950_v25 = vrot.slane %v5942_v28, 9  ;;  %v777_v3 = vsel %vm7694_vm5, %v5908_v46, %v776_v21  ;;  %v780_v54 = vsel %vm7694_vm5, %v778_v47, %v779_v49  ;;  %v905_v6 = vsel %vm7680_vm4, %v900_v50, %v8145_v4  ;;  %v7251_v50 = vld [vmem:[%s7576_s26 + $0x34] sm:$0xf] }
  0xe7   : >> { %v1086_v53 = vrot.slane %v1084_v19, 4  ;;  %v926_v21 = vshll.u32 %v8162_v58, 16  ;;  %v1304_v26 = vunpack.c.l.b16 %v777_v3  ;;  %v1305_v29 = vunpack.c.l.b16 %v780_v54 }
  0xe8   : >> { %v2121_v22 = vpop.f32.mrf.mxu2  ;;  %v1085_v42 = vsel %vm7694_vm5, %v5950_v25, %v1084_v19  ;;  %v5901_v25 = vld [vmem:[%s7576_s26 + $0x30] sm:$0xe] }
  0xe9   : >> { %v2122_v30 = vadd.f32 %v2121_v22, %v2073_v55  ;;  %v1087_v55 = vrot.slane %v5934_v11, 5  ;;  %v930_v22 = vshrl.u32 %v8162_v58, 16  ;;  %v1318_v47 = vpack.c.b16 %v1305_v29, %v1304_v26 }
  0xea   : >> { %v2170_v33 = vpop.f32.mrf.mxu3  ;;  %v2075_v14 = vpop.f32.mrf.mxu1 }
  0xeb   : >> { %v2171_v41 = vadd.f32 %v2170_v33, %v2122_v30  ;;  %v2076_v43 = vadd.f32 %v2075_v14, %v8086_v17  ;;  %v5922_v17 = vld [vmem:[%s7576_s26 + $0x3c] sm:$0xf]  ;;  %v1088_v13 = vsel %vm7694_vm5, %v1086_v53, %v1087_v55  ;;  %v1376_v30 = vunpack.c.l.b16 %v905_v6 }
  0xec   : >> { %v2222_v44 = vpop.f32.mrf.mxu0  ;;  %v917_v18 = vshrl.u32 %v5922_v17, 16  ;;  %v920_v20 = vshll.u32 %v5922_v17, 16  ;;  %v932_v28 = vrot.slane %v930_v22, 4  ;;  %v1091_v6 = vrot.slane %v8162_v58, 5 }
  0xed   : >> { %2270 = vmatmul.bf16.gmra.mxu1 %v1317_v34  ;;  %2319 = vmatmul.bf16.gmra.mxu2 %v6900_v35  ;;  %v8158_v61 = vadd.f32 %v2219_v57, %v2171_v41  ;;  %v915_v57 = vsel %vm7680_vm4, %v910_v51, %v914_v52  ;;  %v1408_v34 = vunpack.c.l.b16 %v1085_v42  ;;  %v1409_v35 = vunpack.c.l.b16 %v1088_v13  ;;  %v5935_v41 = vld [vmem:[%s7576_s26 + $0x44] sm:$0x1]  ;;  %v5924_v42 = vld [vmem:[%s7576_s26 + $0x48] sm:$0xf]  ;;  %v8194_v13 = vld [vmem:[%s7576_s26 + $0x4c] sm:$0xf] }
  0xee   : >> { %v1377_v33 = vunpack.c.l.b16 %v915_v57  ;;  %v919_v14 = vrot.slane %v917_v18, 4  ;;  %v783_v51 = vrot.slane %v7251_v50, 5  ;;  %v936_v17 = vshll.u32 %v5935_v41, 16  ;;  %v7252_v18 = vld [vmem:[%s7576_s26 + $0x38] sm:$0x1] }
  0xef   : >> { %2368 = vmatmul.bf16.gmra.mxu3 %v1389_v38  ;;  %2417 = vmatmul.bf16.gmra.mxu0 %v1421_v40  ;;  %v922_v38 = vrot.slane %v920_v20, 5  ;;  %v8182_v40 = vrot.slane %v926_v21, 5  ;;  %v786_v20 = vrot.slane %v7252_v18, 5  ;;  %v1094_v58 = vrot.slane %v5935_v41, 5 }
  0xf0   : >> { %v2124_v63 = vpop.f32.mrf.mxu2  ;;  %v1390_v49 = vpack.c.b16 %v1377_v33, %v1376_v30  ;;  %v785_v57 = vrot.slane %v783_v51, 4  ;;  %v941_v29 = vshrl.u32 %v5924_v42, 16  ;;  %v944_v30 = vshll.u32 %v5924_v42, 16 }
  0xf1   : >> { %v2125_v9 = vadd.f32 %v2124_v63, %v2076_v43  ;;  %v923_v53 = vor.u32 %v922_v38, %v919_v14  ;;  %v933_v55 = vor.u32 %v932_v28, %v8182_v40  ;;  %v950_v33 = vshll.u32 %v8194_v13, 16 }
  0xf2   : >> { %v2173_v11 = vpop.f32.mrf.mxu3  ;;  %v2077_v15 = vpop.f32.mrf.mxu1  ;;  %v787_v28 = vsel %vm7694_vm5, %v785_v57, %v786_v20  ;;  %v943_v50 = vrot.slane %v941_v29, 4  ;;  %v5902_v57 = vld [vmem:[%s7576_s26 + $0x3c] sm:$0xe]  ;;  %v5944_v29 = vld [vmem:[%s7576_s26 + $0x48] sm:$0xe] }
  0xf3   : >> { %v2174_v4 = vadd.f32 %v2173_v11, %v2125_v9  ;;  %v2078_v10 = vadd.f32 %v2077_v15, %v8112_v45  ;;  %v5943_v9 = vld [vmem:[%s7576_s26 + $0x3c] sm:$0xe]  ;;  %v5909_v11 = vrot.slane %v5901_v25, 9  ;;  %v924_v21 = vrot.slane %v923_v53, 4  ;;  %v5936_v53 = vld [vmem:[%s7576_s26 + $0x50] sm:$0x1] }
  0xf4   : >> { %v2224_v27 = vpop.f32.mrf.mxu0  ;;  %v934_v22 = vrot.slane %v933_v55, 4  ;;  %v1307_v25 = vunpack.c.l.b16 %v787_v28  ;;  %v960_v20 = vshll.u32 %v5936_v53, 16 }
  0xf5   : >> { %v8180_v19 = vadd.f32 %v2222_v44, %v2174_v4  ;;  %v1422_v44 = vpack.c.b16 %v1409_v35, %v1408_v34  ;;  %v5951_v4 = vrot.slane %v5943_v9, 9  ;;  %v954_v34 = vshrl.u32 %v8194_v13, 16 }
  0xf6   : >> { %v784_v38 = vsel %vm7694_vm5, %v5909_v11, %v783_v51  ;;  %v929_v41 = vsel %vm7680_vm4, %v924_v21, %v8182_v40  ;;  %v946_v51 = vrot.slane %v944_v30, 5 }
  0xf7   : >> { %v956_v40 = vrot.slane %v954_v34, 4 }
  0xf8   : >> { %v2126_v43 = vpop.f32.mrf.mxu2  ;;  %v947_v42 = vor.u32 %v946_v51, %v943_v50 }
  0xf9   : >> { %v2127_v45 = vadd.f32 %v2126_v43, %v2078_v10  ;;  %v1093_v10 = vrot.slane %v1091_v6, 4 }
  0xfa   : >> { %v2175_v46 = vpop.f32.mrf.mxu3  ;;  %v2080_v52 = vpop.f32.mrf.mxu1  ;;  %v948_v28 = vrot.slane %v947_v42, 4 }
  0xfb   : >> { %v2176_v63 = vadd.f32 %v2175_v46, %v2127_v45  ;;  %v2081_v3 = vadd.f32 %v2080_v52, %v8039_v8  ;;  %v938_v8 = vrot.slane %v936_v17, 5  ;;  %v8215_v52 = vrot.slane %v950_v33, 5 }
  0xfc   : >> { %v2227_v54 = vpop.f32.mrf.mxu0 }
  0xfd   : >> { %2275 = vmatmul.bf16.gmra.mxu1 %v1318_v47  ;;  %2324 = vmatmul.bf16.gmra.mxu2 %v6901_v48  ;;  %v8196_v15 = vadd.f32 %v2224_v27, %v2176_v63  ;;  %v939_v43 = vsel %vm7680_vm4, %v934_v22, %v938_v8  ;;  %v1092_v48 = vsel %vm7694_vm5, %v5951_v4, %v1091_v6  ;;  %v7253_v6 = vld [vmem:[%s7576_s26 + $0x40] sm:$0xf] }
  0xfe   : >> { %v1379_v17 = vunpack.c.l.b16 %v939_v43  ;;  %v1410_v63 = vunpack.c.l.b16 %v1092_v48  ;;  %v790_v9 = vrot.slane %v7253_v6, 5  ;;  %v957_v18 = vor.u32 %v956_v40, %v8215_v52  ;;  %v6902_v4 = vld [vmem:[%s7576_s26 + $0x3c] sm:$0xff] }
  0xff   : >> { %2373 = vmatmul.bf16.gmra.mxu3 %v1390_v49  ;;  %2422 = vmatmul.bf16.gmra.mxu0 %v1422_v44  ;;  %v1095_v49 = vsel %vm7694_vm5, %v1093_v10, %v1094_v58  ;;  %v1306_v44 = vunpack.c.l.b16 %v784_v38  ;;  %v962_v43 = vrot.slane %v960_v20, 5 }
 0x100   : >> { %v2129_v26 = vpop.f32.mrf.mxu2 }
 0x101   : >> { %v2130_v35 = vadd.f32 %v2129_v26, %v2081_v3  ;;  %v1411_v3 = vunpack.c.l.b16 %v1095_v49  ;;  %v1319_v8 = vpack.c.b16 %v1307_v25, %v1306_v44  ;;  %v8232_v49 = vld [vmem:[%s7576_s26 + $0x58] sm:$0xf]  ;;  %v953_v44 = vsel %vm7680_vm4, %v948_v28, %v8215_v52  ;;  %v7255_v28 = vld [vmem:[%s7576_s26 + $0x4c] sm:$0xf] }
 0x102   : >> { %v2178_v27 = vpop.f32.mrf.mxu3  ;;  %v2082_v14 = vpop.f32.mrf.mxu1 }
 0x103   : >> { %v2179_v45 = vadd.f32 %v2178_v27, %v2130_v35  ;;  %v2083_v46 = vadd.f32 %v2082_v14, %v8057_v37  ;;  %v1378_v37 = vunpack.c.l.b16 %v929_v41  ;;  %v1423_v26 = vpack.c.b16 %v1411_v3, %v1410_v63  ;;  %v7254_v14 = vld [vmem:[%s7576_s26 + $0x44] sm:$0x1] }
 0x104   : >> { %v2229_v47 = vpop.f32.mrf.mxu0  ;;  %v5910_v35 = vrot.slane %v5902_v57, 9  ;;  %v792_v27 = vrot.slane %v790_v9, 4  ;;  %v793_v38 = vrot.slane %v7254_v14, 5  ;;  %v958_v41 = vrot.slane %v957_v18, 4  ;;  %v6903_v14 = vld [vmem:[%s7576_s26 + $0x48] sm:$0xff] }
 0x105   : >> { %v8218_v55 = vadd.f32 %v2227_v54, %v2179_v45  ;;  %v1098_v54 = vrot.slane %v8194_v13, 5  ;;  %v1391_v58 = vpack.c.b16 %v1379_v17, %v1378_v37  ;;  %v5952_v13 = vrot.slane %v5944_v29, 9 }
 0x106   : >> { %v791_v51 = vsel %vm7694_vm5, %v5910_v35, %v790_v9  ;;  %v794_v40 = vsel %vm7694_vm5, %v792_v27, %v793_v38  ;;  %v974_v9 = vshll.u32 %v8232_v49, 16 }
 0x107   : >> { %v1100_v45 = vrot.slane %v1098_v54, 4  ;;  %v1099_v37 = vsel %vm7694_vm5, %v5952_v13, %v1098_v54  ;;  %v1308_v18 = vunpack.c.l.b16 %v791_v51  ;;  %v1309_v20 = vunpack.c.l.b16 %v794_v40  ;;  %v5903_v13 = vld [vmem:[%s7576_s26 + $0x48] sm:$0xe] }
 0x108   : >> { %v2131_v11 = vpop.f32.mrf.mxu2  ;;  %v1105_v40 = vrot.slane %v8232_v49, 5 }
 0x109   : >> { %v2132_v21 = vadd.f32 %v2131_v11, %v2083_v46  ;;  %v1101_v46 = vrot.slane %v5936_v53, 5  ;;  %v978_v11 = vshrl.u32 %v8232_v49, 16  ;;  %v1320_v27 = vpack.c.b16 %v1309_v20, %v1308_v18 }
 0x10a   : >> { %v2180_v22 = vpop.f32.mrf.mxu3  ;;  %v2085_v10 = vpop.f32.mrf.mxu1 }
 0x10b   : >> { %v2181_v30 = vadd.f32 %v2180_v22, %v2132_v21  ;;  %v2086_v33 = vadd.f32 %v2085_v10, %v8081_v7  ;;  %v5926_v7 = vld [vmem:[%s7576_s26 + $0x54] sm:$0xf]  ;;  %v1102_v17 = vsel %vm7694_vm5, %v1100_v45, %v1101_v46  ;;  %v1380_v21 = vunpack.c.l.b16 %v953_v44 }
 0x10c   : >> { %v2232_v34 = vpop.f32.mrf.mxu0  ;;  %v965_v3 = vshrl.u32 %v5926_v7, 16  ;;  %v968_v6 = vshll.u32 %v5926_v7, 16  ;;  %v980_v29 = vrot.slane %v978_v11, 4  ;;  %v5945_v44 = vld [vmem:[%s7576_s26 + $0x54] sm:$0xe] }
 0x10d   : >> { %2280 = vmatmul.bf16.gmra.mxu1 %v1319_v8  ;;  %2329 = vmatmul.bf16.gmra.mxu2 %v6902_v4  ;;  %v8228_v48 = vadd.f32 %v2229_v47, %v2181_v30  ;;  %v963_v47 = vsel %vm7680_vm4, %v958_v41, %v962_v43  ;;  %v1412_v8 = vunpack.c.l.b16 %v1099_v37  ;;  %v1413_v4 = vunpack.c.l.b16 %v1102_v17  ;;  %v5937_v30 = vld [vmem:[%s7576_s26 + $0x5c] sm:$0x1]  ;;  %v8263_v37 = vld [vmem:[%s7576_s26 + $0x64] sm:$0xf] }
 0x10e   : >> { %v1381_v22 = vunpack.c.l.b16 %v963_v47  ;;  %v967_v10 = vrot.slane %v965_v3, 4  ;;  %v797_v41 = vrot.slane %v7255_v28, 5  ;;  %v984_v7 = vshll.u32 %v5937_v30, 16  ;;  %v5928_v47 = vld [vmem:[%s7576_s26 + $0x60] sm:$0xf] }
 0x10f   : >> { %2378 = vmatmul.bf16.gmra.mxu3 %v1391_v58  ;;  %2427 = vmatmul.bf16.gmra.mxu0 %v1423_v26  ;;  %v970_v58 = vrot.slane %v968_v6, 5  ;;  %v8252_v26 = vrot.slane %v974_v9, 5  ;;  %v1424_v43 = vpack.c.b16 %v1413_v4, %v1412_v8  ;;  %v5953_v49 = vrot.slane %v5945_v44, 9 }
 0x110   : >> { %v2134_v50 = vpop.f32.mrf.mxu2  ;;  %v1392_v38 = vpack.c.b16 %v1381_v22, %v1380_v21  ;;  %v986_v11 = vrot.slane %v984_v7, 5  ;;  %v1108_v18 = vrot.slane %v5937_v30, 5  ;;  %v989_v21 = vshrl.u32 %v5928_v47, 16 }
 0x111   : >> { %v2135_v25 = vadd.f32 %v2134_v50, %v2086_v33  ;;  %v971_v45 = vor.u32 %v970_v58, %v967_v10  ;;  %v981_v46 = vor.u32 %v980_v29, %v8252_v26  ;;  %v992_v22 = vshll.u32 %v5928_v47, 16 }
 0x112   : >> { %v2183_v53 = vpop.f32.mrf.mxu3  ;;  %v2087_v63 = vpop.f32.mrf.mxu1  ;;  %v998_v8 = vshll.u32 %v8263_v37, 16 }
 0x113   : >> { %v2184_v52 = vadd.f32 %v2183_v53, %v2135_v25  ;;  %v2088_v57 = vadd.f32 %v2087_v63, %v8108_v39  ;;  %v5911_v25 = vrot.slane %v5903_v13, 9  ;;  %v799_v53 = vrot.slane %v797_v41, 4  ;;  %v7256_v63 = vld [vmem:[%s7576_s26 + $0x50] sm:$0x1]  ;;  %v5938_v13 = vld [vmem:[%s7576_s26 + $0x68] sm:$0x1] }
 0x114   : >> { %v2234_v42 = vpop.f32.mrf.mxu0  ;;  %v800_v3 = vrot.slane %v7256_v63, 5  ;;  %v972_v6 = vrot.slane %v971_v45, 4  ;;  %v982_v9 = vrot.slane %v981_v46, 4  ;;  %v994_v28 = vrot.slane %v992_v22, 5  ;;  %v5904_v63 = vld [vmem:[%s7576_s26 + $0x54] sm:$0xe] }
 0x115   : >> { %v8250_v54 = vadd.f32 %v2232_v34, %v2184_v52  ;;  %v798_v29 = vsel %vm7694_vm5, %v5911_v25, %v797_v41  ;;  %v8284_v41 = vrot.slane %v998_v8, 5  ;;  %v7257_v25 = vld [vmem:[%s7576_s26 + $0x58] sm:$0xf]  ;;  %v5946_v22 = vld [vmem:[%s7576_s26 + $0x60] sm:$0xe] }
 0x116   : >> { %v977_v30 = vsel %vm7680_vm4, %v972_v6, %v8252_v26 }
 0x117   : >> { %v1382_v46 = vunpack.c.l.b16 %v977_v30  ;;  %v5954_v30 = vrot.slane %v5946_v22, 9 }
 0x118   : >> { %v2136_v33 = vpop.f32.mrf.mxu2 }
 0x119   : >> { %v2137_v39 = vadd.f32 %v2136_v33, %v2088_v57  ;;  %v1107_v57 = vrot.slane %v1105_v40, 4 }
 0x11a   : >> { %v2185_v35 = vpop.f32.mrf.mxu3  ;;  %v2090_v34 = vpop.f32.mrf.mxu1 }
 0x11b   : >> { %v2186_v50 = vadd.f32 %v2185_v35, %v2137_v39  ;;  %v2091_v52 = vadd.f32 %v2090_v34, %v8051_v31  ;;  %v801_v31 = vsel %vm7694_vm5, %v799_v53, %v800_v3  ;;  %v987_v35 = vsel %vm7680_vm4, %v982_v9, %v986_v11 }
 0x11c   : >> { %v2237_v51 = vpop.f32.mrf.mxu0  ;;  %v1311_v26 = vunpack.c.l.b16 %v801_v31  ;;  %v1383_v7 = vunpack.c.l.b16 %v987_v35  ;;  %v804_v53 = vrot.slane %v7257_v25, 5  ;;  %v1008_v9 = vshll.u32 %v5938_v13, 16 }
 0x11d   : >> { %2285 = vmatmul.bf16.gmra.mxu1 %v1320_v27  ;;  %2334 = vmatmul.bf16.gmra.mxu2 %v6903_v14  ;;  %v8265_v17 = vadd.f32 %v2234_v42, %v2186_v50  ;;  %v1002_v42 = vshrl.u32 %v8263_v37, 16  ;;  %v1106_v27 = vsel %vm7694_vm5, %v5953_v49, %v1105_v40  ;;  %v1109_v14 = vsel %vm7694_vm5, %v1107_v57, %v1108_v18  ;;  %v6904_v49 = vld [vmem:[%s7576_s26 + $0x54] sm:$0xff] }
 0x11e   : >> { %v1414_v50 = vunpack.c.l.b16 %v1106_v27  ;;  %v1415_v44 = vunpack.c.l.b16 %v1109_v14  ;;  %v1112_v57 = vrot.slane %v8263_v37, 5  ;;  %v1010_v31 = vrot.slane %v1008_v9, 5  ;;  %v5930_v14 = vld [vmem:[%s7576_s26 + $0x6c] sm:$0xf] }
 0x11f   : >> { %2383 = vmatmul.bf16.gmra.mxu3 %v1392_v38  ;;  %2432 = vmatmul.bf16.gmra.mxu0 %v1424_v43  ;;  %v991_v38 = vrot.slane %v989_v21, 4  ;;  %v1004_v34 = vrot.slane %v1002_v42, 4  ;;  %v1310_v43 = vunpack.c.l.b16 %v798_v29  ;;  %v5912_v42 = vrot.slane %v5904_v63, 9 }
 0x120   : >> { %v2139_v20 = vpop.f32.mrf.mxu2  ;;  %v1425_v21 = vpack.c.b16 %v1415_v44, %v1414_v50  ;;  %v1115_v37 = vrot.slane %v5938_v13, 5  ;;  %v1013_v50 = vshrl.u32 %v5930_v14, 16  ;;  %v1016_v44 = vshll.u32 %v5930_v14, 16 }
 0x121   : >> { %v2140_v4 = vadd.f32 %v2139_v20, %v2091_v52  ;;  %v995_v3 = vor.u32 %v994_v28, %v991_v38  ;;  %v1005_v6 = vor.u32 %v1004_v34, %v8284_v41  ;;  %v1393_v20 = vpack.c.b16 %v1383_v7, %v1382_v46  ;;  %v8302_v38 = vld [vmem:[%s7576_s26 + $0x70] sm:$0xf] }
 0x122   : >> { %v2188_v10 = vpop.f32.mrf.mxu3  ;;  %v2092_v58 = vpop.f32.mrf.mxu1  ;;  %v1026_v25 = vshrl.u32 %v8302_v38, 16 }
 0x123   : >> { %v2189_v33 = vadd.f32 %v2188_v10, %v2140_v4  ;;  %v2093_v40 = vadd.f32 %v2092_v58, %v8074_v56  ;;  %v806_v4 = vrot.slane %v804_v53, 4  ;;  %v807_v10 = vrot.slane %v7996_v5, 5 }
 0x124   : >> { %v2239_v39 = vpop.f32.mrf.mxu0  ;;  %v996_v58 = vrot.slane %v995_v3, 4  ;;  %v1006_v29 = vrot.slane %v1005_v6, 4  ;;  %v805_v5 = vsel %vm7694_vm5, %v5912_v42, %v804_v53 }
 0x125   : >> { %v8287_v45 = vadd.f32 %v2237_v51, %v2189_v33  ;;  %v1321_v51 = vpack.c.b16 %v1311_v26, %v1310_v43  ;;  %v1114_v33 = vrot.slane %v1112_v57, 4  ;;  %v808_v34 = vsel %vm7694_vm5, %v806_v4, %v807_v10  ;;  %v6905_v10 = vld [vmem:[%s7576_s26 + $0x60] sm:$0xff] }
 0x126   : >> { %v1001_v43 = vsel %vm7680_vm4, %v996_v58, %v8284_v41  ;;  %v1011_v13 = vsel %vm7680_vm4, %v1006_v29, %v1010_v31  ;;  %v1313_v63 = vunpack.c.l.b16 %v808_v34  ;;  %v7258_v29 = vld [vmem:[%s7576_s26 + $0x64] sm:$0xf]  ;;  %v5947_v34 = vld [vmem:[%s7576_s26 + $0x6c] sm:$0xe] }
 0x127   : >> { %v1116_v46 = vsel %vm7694_vm5, %v1114_v33, %v1115_v37  ;;  %v1384_v3 = vunpack.c.l.b16 %v1001_v43  ;;  %v1385_v6 = vunpack.c.l.b16 %v1011_v13  ;;  %v811_v31 = vrot.slane %v7258_v29, 5  ;;  %v5905_v33 = vld [vmem:[%s7576_s26 + $0x60] sm:$0xe] }
 0x128   : >> { %v2141_v47 = vpop.f32.mrf.mxu2  ;;  %v5913_v43 = vrot.slane %v5905_v33, 9  ;;  %v814_v13 = vrot.slane %v8037_v2, 5 }
 0x129   : >> { %v2142_v11 = vadd.f32 %v2141_v47, %v2093_v40  ;;  %v1022_v40 = vshll.u32 %v8302_v38, 16  ;;  %v1312_v47 = vunpack.c.l.b16 %v805_v5  ;;  %v1394_v58 = vpack.c.b16 %v1385_v6, %v1384_v3 }
 0x12a   : >> { %v2190_v52 = vpop.f32.mrf.mxu3  ;;  %v2095_v18 = vpop.f32.mrf.mxu1 }
 0x12b   : >> { %v2191_v56 = vadd.f32 %v2190_v52, %v2142_v11  ;;  %v2096_v27 = vadd.f32 %v2095_v18, %v8092_v23  ;;  %v1113_v23 = vsel %vm7694_vm5, %v5954_v30, %v1112_v57  ;;  %v1417_v11 = vunpack.c.l.b16 %v1116_v46 }
 0x12c   : >> { %v2242_v8 = vpop.f32.mrf.mxu0  ;;  %v1416_v9 = vunpack.c.l.b16 %v1113_v23  ;;  %v1024_v57 = vrot.slane %v1022_v40, 5  ;;  %v1028_v18 = vrot.slane %v1026_v25, 4  ;;  %v1322_v4 = vpack.c.b16 %v1313_v63, %v1312_v47 }
 0x12d   : >> { %2290 = vmatmul.bf16.gmra.mxu1 %v1321_v51  ;;  %2339 = vmatmul.bf16.gmra.mxu2 %v6904_v49  ;;  %v8297_v35 = vadd.f32 %v2239_v39, %v2191_v56  ;;  %v1015_v51 = vrot.slane %v1013_v50, 4  ;;  %v1018_v49 = vrot.slane %v1016_v44, 5  ;;  %v5955_v44 = vrot.slane %v5947_v34, 9 }
 0x12f   : >> { %2388 = vmatmul.bf16.gmra.mxu3 %v1393_v20  ;;  %2437 = vmatmul.bf16.gmra.mxu0 %v1425_v21  ;;  %v5939_v21 = vld [vmem:[%s7576_s26 + $0x74] sm:$0x1]  ;;  %v1019_v37 = vor.u32 %v1018_v49, %v1015_v51 }
 0x130   : >> { %v2144_v28 = vpop.f32.mrf.mxu2  ;;  %v1032_v14 = vshll.u32 %v5939_v21, 16  ;;  %v1122_v25 = vrot.slane %v5939_v21, 5 }
 0x131   : >> { %v2145_v39 = vadd.f32 %v2144_v28, %v2096_v27  ;;  %v1029_v27 = vor.u32 %v1028_v18, %v1024_v57  ;;  %v1020_v23 = vrot.slane %v1019_v37, 4 }
 0x132   : >> { %v2193_v26 = vpop.f32.mrf.mxu3  ;;  %v2097_v7 = vpop.f32.mrf.mxu1 }
 0x133   : >> { %v2194_v41 = vadd.f32 %v2193_v26, %v2145_v39  ;;  %v2098_v20 = vadd.f32 %v2097_v7, %v8115_v59  ;;  %v1119_v59 = vrot.slane %v8302_v38, 5  ;;  %v813_v39 = vrot.slane %v811_v31, 4 }
 0x134   : >> { %v2244_v53 = vpop.f32.mrf.mxu0  ;;  %v1030_v46 = vrot.slane %v1029_v27, 4  ;;  %v1034_v7 = vrot.slane %v1032_v14, 5  ;;  %v1025_v2 = vsel %vm7680_vm4, %v1020_v23, %v1024_v57 }
 0x135   : >> { %v8319_v52 = vadd.f32 %v2242_v8, %v2194_v41  ;;  %v1426_v8 = vpack.c.b16 %v1417_v11, %v1416_v9  ;;  %v1121_v40 = vrot.slane %v1119_v59, 4  ;;  %v815_v3 = vsel %vm7694_vm5, %v813_v39, %v814_v13 }
 0x136   : >> { %v1120_v11 = vsel %vm7694_vm5, %v5955_v44, %v1119_v59  ;;  %v1315_v18 = vunpack.c.l.b16 %v815_v3  ;;  %v1386_v21 = vunpack.c.l.b16 %v1025_v2 }
 0x137   : >> { %v1123_v51 = vsel %vm7694_vm5, %v1121_v40, %v1122_v25 }
 0x138   : >> { %v2146_v22 = vpop.f32.mrf.mxu2  ;;  %v1419_v57 = vunpack.c.l.b16 %v1123_v51 }
 0x139   : >> { %v2147_v56 = vadd.f32 %v2146_v22, %v2098_v20 }
 0x13a   : >> { %v2195_v42 = vpop.f32.mrf.mxu3  ;;  %v2100_v30 = vpop.f32.mrf.mxu1 }
 0x13b   : >> { %v2196_v28 = vadd.f32 %v2195_v42, %v2147_v56  ;;  %v2101_v50 = vadd.f32 %v2100_v30, %v8055_v36  ;;  %v1035_v36 = vsel %vm7680_vm4, %v1030_v46, %v1034_v7  ;;  %v1418_v56 = vunpack.c.l.b16 %v1120_v11 }
 0x13c   : >> { %v2247_v5 = vpop.f32.mrf.mxu0  ;;  %v1387_v22 = vunpack.c.l.b16 %v1035_v36 }
 0x13d   : >> { %2295 = vmatmul.bf16.gmra.mxu1 %v1322_v4  ;;  %2344 = vmatmul.bf16.gmra.mxu2 %v6905_v10  ;;  %v8328_v26 = vadd.f32 %v2244_v53, %v2196_v28  ;;  %v812_v53 = vsel %vm7694_vm5, %v5913_v43, %v811_v31  ;;  %v6906_v31 = vld [vmem:[%s7576_s26 + $0x6c] sm:$0xff]  ;;  %v1427_v33 = vpack.c.b16 %v1419_v57, %v1418_v56  ;;  %s6340_s26 = sshll.u32 %s7417_s17, 7  ;;  %s191_s17 = sadd.s32 1, %s7417_s17  }
 0x13e   : >> { %v1314_v49 = vunpack.c.l.b16 %v812_v53  ;;  %s8358_s19 = scalar_lea.vmem [#allocation3], %s6340_s26  ;;  %p188_p0 = scmp.ge.s32.totalorder %s191_s17, 2  }
 0x13f   : >> { %2393 = vmatmul.bf16.gmra.mxu3 %v1394_v58  ;;  %2442 = vmatmul.bf16.gmra.mxu0 %v1426_v8  ;;  %v1395_v8 = vpack.c.b16 %v1387_v22, %v1386_v21  ;;  %s8406_s17 = smov (%p188_p0), 0  }
 0x140   : >> { %v2149_v38 = vpop.f32.mrf.mxu2  ;;  %v1323_v29 = vpack.c.b16 %v1315_v18, %v1314_v49 }
 0x141   : >> { %v2150_v41 = vadd.f32 %v2149_v38, %v2101_v50 }
 0x142   : >> { %v2198_v47 = vpop.f32.mrf.mxu3  ;;  %v2102_v63 = vpop.f32.mrf.mxu1 }
 0x143   : >> { %v2199_v6 = vadd.f32 %v2198_v47, %v2150_v41  ;;  %v2103_v42 = vadd.f32 %v2102_v63, %v8077_v62 }
 0x144   : >> { %v2249_v9 = vpop.f32.mrf.mxu0 }
 0x145   : >> { %v8344_v20 = vadd.f32 %v2247_v5, %v2199_v6 }
 0x148   : >> { %v2151_v4 = vpop.f32.mrf.mxu2 }
 0x149   : >> { %v2152_v10 = vadd.f32 %v2151_v4, %v2103_v42 }
 0x14a   : >> { %v2200_v58 = vpop.f32.mrf.mxu3  ;;  %v2105_v30 = vpop.f32.mrf.mxu1 }
 0x14b   : >> { %v2201_v37 = vadd.f32 %v2200_v58, %v2152_v10  ;;  %v2106_v28 = vadd.f32 %v2105_v30, %v8098_v32 }
 0x14c   : >> { %v2252_v27 = vpop.f32.mrf.mxu0 }
 0x14d   : >> { %2300 = vmatmul.bf16.gmra.mxu1 %v1323_v29  ;;  %2349 = vmatmul.bf16.gmra.mxu2 %v6906_v31  ;;  %v8348_v14 = vadd.f32 %v2249_v9, %v2201_v37 }
 0x14f   : >> { %2398 = vmatmul.bf16.gmra.mxu3 %v1395_v8  ;;  %2447 = vmatmul.bf16.gmra.mxu0 %v1427_v33 }
 0x150   : >> { %v2154_v5 = vpop.f32.mrf.mxu2 }
 0x151   : >> { %v2155_v62 = vadd.f32 %v2154_v5, %v2106_v28 }
 0x152   : >> { %v2203_v59 = vpop.f32.mrf.mxu3  ;;  %v2107_v34 = vpop.f32.mrf.mxu1 }
 0x153   : >> { %v2204_v43 = vadd.f32 %v2203_v59, %v2155_v62  ;;  %v2108_v23 = vadd.f32 %v2107_v34, %v8117_v60 }
 0x154   : >> { %v2254_v39 = vpop.f32.mrf.mxu0 }
 0x155   : >> { %v8351_v13 = vadd.f32 %v2252_v27, %v2204_v43 }
 0x158   : >> { %v2156_v46 = vpop.f32.mrf.mxu2 }
 0x159   : >> { %v2157_v7 = vadd.f32 %v2156_v46, %v2108_v23 }
 0x15a   : >> { %v2205_v50 = vpop.f32.mrf.mxu3  ;;  %v2266_v44 = vpop.f32.mrf.mxu1 }
 0x15b   : >> { %v2206_v40 = vadd.f32 %v2205_v50, %v2157_v7  ;;  %v2267_v32 = vadd.f32 %v2266_v44, %v8148_v12 }
 0x15c   : >> { %v2413_v25 = vpop.f32.mrf.mxu0 }
 0x15d   : >> { %v8354_v38 = vadd.f32 %v2254_v39, %v2206_v40 }
 0x160   : >> { %v2315_v41 = vpop.f32.mrf.mxu2 }
 0x161   : >> { %v2316_v47 = vadd.f32 %v2315_v41, %v2267_v32 }
 0x162   : >> { %v2364_v63 = vpop.f32.mrf.mxu3  ;;  %v2268_v53 = vpop.f32.mrf.mxu1 }
 0x163   : >> { %v2365_v3 = vadd.f32 %v2364_v63, %v2316_v47  ;;  %v2269_v60 = vadd.f32 %v2268_v53, %v8158_v61 }
 0x164   : >> { %v2415_v2 = vpop.f32.mrf.mxu0 }
 0x165   : >> { %v2414_v6 = vadd.f32 %v2413_v25, %v2365_v3 }
 0x167   : >> { %2455 = vst [vmem:[%s8358_s19] sm:$0xff] %v2414_v6  ;;  %v2493_v21 = vmul.f32 %v2414_v6, %v2414_v6 }
 0x168   : >> { %v2317_v9 = vpop.f32.mrf.mxu2 }
 0x169   : >> { %v2318_v36 = vadd.f32 %v2317_v9, %v2269_v60 }
 0x16a   : >> { %v2366_v11 = vpop.f32.mrf.mxu3  ;;  %v2271_v51 = vpop.f32.mrf.mxu1 }
 0x16b   : >> { %v2367_v12 = vadd.f32 %v2366_v11, %v2318_v36  ;;  %v2272_v57 = vadd.f32 %v2271_v51, %v8180_v19 }
 0x16c   : >> { %v2418_v49 = vpop.f32.mrf.mxu0 }
 0x16d   : >> { %v2416_v18 = vadd.f32 %v2415_v2, %v2367_v12 }
 0x16f   : >> { %2456 = vst [vmem:[%s8358_s19 + $0x8] sm:$0xff] %v2416_v18  ;;  %v2471_v22 = vadd.f32 %v2416_v18, %v2414_v6  ;;  %v2494_v56 = vmul.f32 %v2416_v18, %v2416_v18 }
 0x170   : >> { %v2320_v42 = vpop.f32.mrf.mxu2 }
 0x171   : >> { %v2509_v4 = vadd.f32 %v2494_v56, %v2493_v21  ;;  %v2321_v10 = vadd.f32 %v2320_v42, %v2272_v57 }
 0x172   : >> { %v2369_v58 = vpop.f32.mrf.mxu3  ;;  %v2273_v29 = vpop.f32.mrf.mxu1 }
 0x173   : >> { %v2370_v61 = vadd.f32 %v2369_v58, %v2321_v10  ;;  %v2274_v37 = vadd.f32 %v2273_v29, %v8196_v15 }
 0x174   : >> { %v2420_v31 = vpop.f32.mrf.mxu0 }
 0x175   : >> { %v2419_v30 = vadd.f32 %v2418_v49, %v2370_v61 }
 0x177   : >> { %2457 = vst [vmem:[%s8358_s19 + $0x10] sm:$0xff] %v2419_v30  ;;  %v2472_v8 = vadd.f32 %v2471_v22, %v2419_v30  ;;  %v2495_v33 = vmul.f32 %v2419_v30, %v2419_v30 }
 0x178   : >> { %v2322_v27 = vpop.f32.mrf.mxu2 }
 0x179   : >> { %v2510_v28 = vadd.f32 %v2509_v4, %v2495_v33  ;;  %v2323_v5 = vadd.f32 %v2322_v27, %v2274_v37 }
 0x17a   : >> { %v2371_v62 = vpop.f32.mrf.mxu3  ;;  %v2276_v59 = vpop.f32.mrf.mxu1 }
 0x17b   : >> { %v2372_v19 = vadd.f32 %v2371_v62, %v2323_v5  ;;  %v2277_v46 = vadd.f32 %v2276_v59, %v8218_v55 }
 0x17c   : >> { %v2423_v34 = vpop.f32.mrf.mxu0 }
 0x17d   : >> { %v2421_v43 = vadd.f32 %v2420_v31, %v2372_v19 }
 0x17f   : >> { %2458 = vst [vmem:[%s8358_s19 + $0x18] sm:$0xff] %v2421_v43  ;;  %v2473_v39 = vadd.f32 %v2472_v8, %v2421_v43  ;;  %v2496_v23 = vmul.f32 %v2421_v43, %v2421_v43 }
 0x180   : >> { %v2325_v7 = vpop.f32.mrf.mxu2 }
 0x181   : >> { %v2511_v50 = vadd.f32 %v2510_v28, %v2496_v23  ;;  %v2326_v44 = vadd.f32 %v2325_v7, %v2277_v46 }
 0x182   : >> { %v2374_v40 = vpop.f32.mrf.mxu3  ;;  %v2278_v25 = vpop.f32.mrf.mxu1 }
 0x183   : >> { %v2375_v15 = vadd.f32 %v2374_v40, %v2326_v44  ;;  %v2279_v53 = vadd.f32 %v2278_v25, %v8228_v48 }
 0x184   : >> { %v2425_v32 = vpop.f32.mrf.mxu0 }
 0x185   : >> { %v2424_v41 = vadd.f32 %v2423_v34, %v2375_v15 }
 0x187   : >> { %2459 = vst [vmem:[%s8358_s19 + $0x20] sm:$0xff] %v2424_v41  ;;  %v2474_v47 = vadd.f32 %v2473_v39, %v2424_v41  ;;  %v2497_v63 = vmul.f32 %v2424_v41, %v2424_v41 }
 0x188   : >> { %v2327_v3 = vpop.f32.mrf.mxu2 }
 0x189   : >> { %v2512_v2 = vadd.f32 %v2511_v50, %v2497_v63  ;;  %v2328_v6 = vadd.f32 %v2327_v3, %v2279_v53 }
 0x18a   : >> { %v2376_v60 = vpop.f32.mrf.mxu3  ;;  %v2281_v9 = vpop.f32.mrf.mxu1 }
 0x18b   : >> { %v2377_v55 = vadd.f32 %v2376_v60, %v2328_v6  ;;  %v2282_v49 = vadd.f32 %v2281_v9, %v8250_v54 }
 0x18c   : >> { %v2428_v36 = vpop.f32.mrf.mxu0 }
 0x18d   : >> { %v2426_v11 = vadd.f32 %v2425_v32, %v2377_v55 }
 0x18f   : >> { %2460 = vst [vmem:[%s8358_s19 + $0x28] sm:$0xff] %v2426_v11  ;;  %v2475_v51 = vadd.f32 %v2474_v47, %v2426_v11  ;;  %v2498_v12 = vmul.f32 %v2426_v11, %v2426_v11 }
 0x190   : >> { %v2330_v18 = vpop.f32.mrf.mxu2 }
 0x191   : >> { %v2513_v21 = vadd.f32 %v2512_v2, %v2498_v12  ;;  %v2331_v22 = vadd.f32 %v2330_v18, %v2282_v49 }
 0x192   : >> { %v2379_v56 = vpop.f32.mrf.mxu3  ;;  %v2283_v57 = vpop.f32.mrf.mxu1 }
 0x193   : >> { %v2380_v48 = vadd.f32 %v2379_v56, %v2331_v22  ;;  %v2284_v29 = vadd.f32 %v2283_v57, %v8265_v17 }
 0x194   : >> { %v2430_v42 = vpop.f32.mrf.mxu0 }
 0x195   : >> { %v2429_v4 = vadd.f32 %v2428_v36, %v2380_v48 }
 0x197   : >> { %2461 = vst [vmem:[%s8358_s19 + $0x30] sm:$0xff] %v2429_v4  ;;  %v2476_v10 = vadd.f32 %v2475_v51, %v2429_v4  ;;  %v2499_v58 = vmul.f32 %v2429_v4, %v2429_v4 }
 0x198   : >> { %v2332_v61 = vpop.f32.mrf.mxu2 }
 0x199   : >> { %v2514_v31 = vadd.f32 %v2513_v21, %v2499_v58  ;;  %v2333_v30 = vadd.f32 %v2332_v61, %v2284_v29 }
 0x19a   : >> { %v2381_v8 = vpop.f32.mrf.mxu3  ;;  %v2286_v33 = vpop.f32.mrf.mxu1 }
 0x19b   : >> { %v2382_v54 = vadd.f32 %v2381_v8, %v2333_v30  ;;  %v2287_v62 = vadd.f32 %v2286_v33, %v8287_v45 }
 0x19c   : >> { %v2433_v37 = vpop.f32.mrf.mxu0 }
 0x19d   : >> { %v2431_v27 = vadd.f32 %v2430_v42, %v2382_v54 }
 0x19f   : >> { %2462 = vst [vmem:[%s8358_s19 + $0x38] sm:$0xff] %v2431_v27  ;;  %v2477_v28 = vadd.f32 %v2476_v10, %v2431_v27  ;;  %v2500_v5 = vmul.f32 %v2431_v27, %v2431_v27 }
 0x1a0   : >> { %v2335_v59 = vpop.f32.mrf.mxu2 }
 0x1a1   : >> { %v2515_v19 = vadd.f32 %v2514_v31, %v2500_v5  ;;  %v2336_v34 = vadd.f32 %v2335_v59, %v2287_v62 }
 0x1a2   : >> { %v2384_v43 = vpop.f32.mrf.mxu3  ;;  %v2288_v39 = vpop.f32.mrf.mxu1 }
 0x1a3   : >> { %v2385_v17 = vadd.f32 %v2384_v43, %v2336_v34  ;;  %v2289_v44 = vadd.f32 %v2288_v39, %v8297_v35 }
 0x1a4   : >> { %v2435_v23 = vpop.f32.mrf.mxu0 }
 0x1a5   : >> { %v2434_v46 = vadd.f32 %v2433_v37, %v2385_v17 }
 0x1a7   : >> { %2463 = vst [vmem:[%s8358_s19 + $0x40] sm:$0xff] %v2434_v46  ;;  %v2478_v7 = vadd.f32 %v2477_v28, %v2434_v46  ;;  %v2501_v50 = vmul.f32 %v2434_v46, %v2434_v46 }
 0x1a8   : >> { %v2337_v40 = vpop.f32.mrf.mxu2 }
 0x1a9   : >> { %v2516_v25 = vadd.f32 %v2515_v19, %v2501_v50  ;;  %v2338_v15 = vadd.f32 %v2337_v40, %v2289_v44 }
 0x1aa   : >> { %v2386_v32 = vpop.f32.mrf.mxu3  ;;  %v2291_v41 = vpop.f32.mrf.mxu1 }
 0x1ab   : >> { %v2387_v45 = vadd.f32 %v2386_v32, %v2338_v15  ;;  %v2292_v2 = vadd.f32 %v2291_v41, %v8319_v52 }
 0x1ac   : >> { %v2438_v47 = vpop.f32.mrf.mxu0 }
 0x1ad   : >> { %v2436_v63 = vadd.f32 %v2435_v23, %v2387_v45 }
 0x1af   : >> { %2464 = vst [vmem:[%s8358_s19 + $0x48] sm:$0xff] %v2436_v63  ;;  %v2479_v53 = vadd.f32 %v2478_v7, %v2436_v63  ;;  %v2502_v3 = vmul.f32 %v2436_v63, %v2436_v63 }
 0x1b0   : >> { %v2340_v6 = vpop.f32.mrf.mxu2 }
 0x1b1   : >> { %v2517_v60 = vadd.f32 %v2516_v25, %v2502_v3  ;;  %v2341_v9 = vadd.f32 %v2340_v6, %v2292_v2 }
 0x1b2   : >> { %v2389_v55 = vpop.f32.mrf.mxu3  ;;  %v2293_v36 = vpop.f32.mrf.mxu1 }
 0x1b3   : >> { %v2390_v35 = vadd.f32 %v2389_v55, %v2341_v9  ;;  %v2294_v18 = vadd.f32 %v2293_v36, %v8328_v26 }
 0x1b4   : >> { %v2440_v11 = vpop.f32.mrf.mxu0 }
 0x1b5   : >> { %v2439_v51 = vadd.f32 %v2438_v47, %v2390_v35 }
 0x1b7   : >> { %2465 = vst [vmem:[%s8358_s19 + $0x50] sm:$0xff] %v2439_v51  ;;  %v2480_v12 = vadd.f32 %v2479_v53, %v2439_v51  ;;  %v2503_v49 = vmul.f32 %v2439_v51, %v2439_v51 }
 0x1b8   : >> { %v2342_v21 = vpop.f32.mrf.mxu2 }
 0x1b9   : >> { %v2518_v22 = vadd.f32 %v2517_v60, %v2503_v49  ;;  %v2343_v56 = vadd.f32 %v2342_v21, %v2294_v18 }
 0x1ba   : >> { %v2391_v57 = vpop.f32.mrf.mxu3  ;;  %v2296_v52 = vpop.f32.mrf.mxu1 }
 0x1bb   : >> { %v2392_v48 = vadd.f32 %v2391_v57, %v2343_v56  ;;  %v2297_v29 = vadd.f32 %v2296_v52, %v8344_v20 }
 0x1bc   : >> { %v2443_v4 = vpop.f32.mrf.mxu0 }
 0x1bd   : >> { %v2441_v42 = vadd.f32 %v2440_v11, %v2392_v48 }
 0x1bf   : >> { %2466 = vst [vmem:[%s8358_s19 + $0x58] sm:$0xff] %v2441_v42  ;;  %v2481_v10 = vadd.f32 %v2480_v12, %v2441_v42  ;;  %v2504_v58 = vmul.f32 %v2441_v42, %v2441_v42 }
 0x1c0   : >> { %v2345_v61 = vpop.f32.mrf.mxu2 }
 0x1c1   : >> { %v2519_v31 = vadd.f32 %v2518_v22, %v2504_v58  ;;  %v2346_v30 = vadd.f32 %v2345_v61, %v2297_v29 }
 0x1c2   : >> { %v2394_v8 = vpop.f32.mrf.mxu3  ;;  %v2298_v26 = vpop.f32.mrf.mxu1 }
 0x1c3   : >> { %v2395_v33 = vadd.f32 %v2394_v8, %v2346_v30  ;;  %v2299_v28 = vadd.f32 %v2298_v26, %v8348_v14 }
 0x1c4   : >> { %v2445_v5 = vpop.f32.mrf.mxu0 }
 0x1c5   : >> { %v2444_v54 = vadd.f32 %v2443_v4, %v2395_v33 }
 0x1c7   : >> { %2467 = vst [vmem:[%s8358_s19 + $0x60] sm:$0xff] %v2444_v54  ;;  %v2482_v37 = vadd.f32 %v2481_v10, %v2444_v54  ;;  %v2505_v27 = vmul.f32 %v2444_v54, %v2444_v54 }
 0x1c8   : >> { %v2347_v62 = vpop.f32.mrf.mxu2 }
 0x1c9   : >> { %v2520_v59 = vadd.f32 %v2519_v31, %v2505_v27  ;;  %v2348_v19 = vadd.f32 %v2347_v62, %v2299_v28 }
 0x1ca   : >> { %v2396_v34 = vpop.f32.mrf.mxu3  ;;  %v2301_v20 = vpop.f32.mrf.mxu1 }
 0x1cb   : >> { %v2397_v43 = vadd.f32 %v2396_v34, %v2348_v19  ;;  %v2302_v46 = vadd.f32 %v2301_v20, %v8351_v13 }
 0x1cc   : >> { %v2448_v14 = vpop.f32.mrf.mxu0 }
 0x1cd   : >> { %v2446_v39 = vadd.f32 %v2445_v5, %v2397_v43 }
 0x1cf   : >> { %2468 = vst [vmem:[%s8358_s19 + $0x68] sm:$0xff] %v2446_v39  ;;  %v2483_v17 = vadd.f32 %v2482_v37, %v2446_v39  ;;  %v2506_v23 = vmul.f32 %v2446_v39, %v2446_v39 }
 0x1d0   : >> { %v2350_v7 = vpop.f32.mrf.mxu2 }
 0x1d1   : >> { %v2521_v50 = vadd.f32 %v2520_v59, %v2506_v23  ;;  %v2351_v44 = vadd.f32 %v2350_v7, %v2302_v46 }
 0x1d2   : >> { %v2399_v40 = vpop.f32.mrf.mxu3  ;;  %v2303_v15 = vpop.f32.mrf.mxu1 }
 0x1d3   : >> { %v2400_v25 = vadd.f32 %v2399_v40, %v2351_v44  ;;  %v2304_v47 = vadd.f32 %v2303_v15, %v8354_v38 }
 0x1d4   : >> { %v2450_v13 = vpop.f32.mrf.mxu0 }
 0x1d5   : >> { %v2449_v32 = vadd.f32 %v2448_v14, %v2400_v25 }
 0x1d7   : >> { %2469 = vst [vmem:[%s8358_s19 + $0x70] sm:$0xff] %v2449_v32  ;;  %v2484_v41 = vadd.f32 %v2483_v17, %v2449_v32  ;;  %v2507_v45 = vmul.f32 %v2449_v32, %v2449_v32 }
 0x1d8   : >> { %v2352_v63 = vpop.f32.mrf.mxu2 }
 0x1d9   : >> { %v2522_v53 = vadd.f32 %v2521_v50, %v2507_v45  ;;  %v2353_v3 = vadd.f32 %v2352_v63, %v2304_v47 }
 0x1da   : >> { %v2401_v2 = vpop.f32.mrf.mxu3 }
 0x1db   : >> { %v2402_v6 = vadd.f32 %v2401_v2, %v2353_v3 }
 0x1dd   : >> { %v2451_v60 = vadd.f32 %v2450_v13, %v2402_v6 }
 0x1df   : >> { %2470 = vst [vmem:[%s8358_s19 + $0x78] sm:$0xff] %v2451_v60  ;;  %v2485_v9 = vadd.f32 %v2484_v41, %v2451_v60  ;;  %v2508_v55 = vmul.f32 %v2451_v60, %v2451_v60 }
 0x1e1   : >> { %v2486_v36 = vrot.slane %v2485_v9, 4  ;;  %v2523_v35 = vadd.f32 %v2522_v53, %v2508_v55 }
 0x1e3   : >> { %v2487_v11 = vadd.f32 %v2486_v36, %v2485_v9  ;;  %v2524_v51 = vrot.slane %v2523_v35, 4 }
 0x1e5   : >> { %v2488_v12 = vrot.slane %v2487_v11, 2  ;;  %v2525_v49 = vadd.f32 %v2524_v51, %v2523_v35 }
 0x1e7   : >> { %v2489_v18 = vadd.f32 %v2488_v12, %v2487_v11  ;;  %v2526_v21 = vrot.slane %v2525_v49, 2 }
 0x1e9   : >> { %v2490_v22 = vrot.slane %v2489_v18, 1  ;;  %v2527_v38 = vadd.f32 %v2526_v21, %v2525_v49 }
 0x1eb   : >> { %v2491_v56 = vadd.f32 %v2490_v22, %v2489_v18  ;;  %v2528_v57 = vrot.slane %v2527_v38, 1 }
 0x1ed   : >> { %v2492_v52 = vadd.f32 %v7413_v1, %v2491_v56   ;;  %v2529_v48 = vadd.f32 %v2528_v57, %v2527_v38  ;;  %190 = sbr.rel (!%p188_p0) target bundleno = 29 (0x1d), region = 116 }
 0x1ef   : >> { %v2530_v42 = vadd.f32 %v7409_v0, %v2529_v48   ;;  %v9366_v1 = vmov %v2492_v52  ;;  %v8400_v4 = vmul.f32 (%p188_p0), 0.00390625, %v2492_v52 }
 0x1f1   : >> { %v9365_v0 = vmov %v2530_v42  ;;  %v2532_v10 = vmul.f32 (%p188_p0), 0.00390625, %v2530_v42  ;;  %v2533_v58 = vmul.f32 (%p188_p0), %v8400_v4, %v8400_v4 }
 0x1f3   : > { %v2534_v1 = vsub.f32 %v2532_v10, %v2533_v58 }
 0x1f5   : > { %v2535_v29 = vmax.f32 %v2534_v1, 0.0 }
 0x1f7   : > { %v2536_v61 = vadd.f32 1e-05, %v2535_v29 }
 0x1f9   : > { %7259 = vrsqrt.f32 %v2536_v61  ;;  %vm2543_vm6 = vweird.f32 %v2536_v61 }
 0x1ff   : > { %v7260_v31 = vpop.eup %7259 }
 0x200   : > { %v2538_v30 = vmul.f32 %v7260_v31, %v2536_v61  ;;  %vm2544_vm7 = vweird.f32 %v7260_v31 }
 0x201   : > { %vm2545_vm8 = vmor %vm2543_vm6, %vm2544_vm7 }
 0x202   : > { %v2539_v8 = vmul.f32 %v7260_v31, %v2538_v30 }
 0x204   : > { %v2540_v26 = vmul.f32 0.5, %v2539_v8 }
 0x206   : > { %v2541_v33 = vsub.f32 1.5, %v2540_v26 }
 0x208   : > { %v2542_v54 = vmul.f32 %v7260_v31, %v2541_v33 }
 0x20a   : > { %v8404_v37 = vsel %vm2545_vm8, %v7260_v31, %v2542_v54 }
 0x20b LB: >> { %s6341_s20 = sshll.u32 %s7421_s17, 7  ;;  %vm2835_vm9 = vcmask 1040384   ;;  %vm2836_vm10 = vsmask.f32 256  ;;  %s6343_s25 = smul.u32 96, %s7421_s17  ;;  %s7421_s17 = sphi %s8406_s17, %s2552_s17  }
 0x20c   : >> { %s8412_s24 = scalar_lea.vmem [#allocation3], %s6341_s20  ;;  %vm8442_vm11 = vmand %vm2835_vm9, %vm2836_vm10  ;;  %s2552_s17 = sadd.s32 1, %s7421_s17  }
 0x20d   : >> { %v2555_v0 = vld [vmem:[%s8412_s24] sm:$0xff]  ;;  %v2556_v27 = vld [vmem:[%s8412_s24 + $0x8] sm:$0xff]  ;;  %v2557_v28 = vld [vmem:[%s8412_s24 + $0x10] sm:$0xff]  ;;  %s8460_s27 = scalar_lea.vmem [#allocation2], %s6343_s25  ;;  %p2549_p1 = scmp.ge.s32.totalorder %s2552_s17, 2  }
 0x20e   : >> { %v2571_v5 = vsub.f32 %v2555_v0, %v8400_v4  ;;  %v2572_v62 = vsub.f32 %v2556_v27, %v8400_v4  ;;  %v2558_v59 = vld [vmem:[%s8412_s24 + $0x18] sm:$0xff]  ;;  %v2573_v19 = vsub.f32 %v2557_v28, %v8400_v4  ;;  %v2559_v34 = vld [vmem:[%s8412_s24 + $0x20] sm:$0xff]  ;;  %v2560_v20 = vld [vmem:[%s8412_s24 + $0x28] sm:$0xff]  ;;  %s8539_s28 = smov (%p2549_p1), 0  }
 0x20f   : >> { %v2574_v43 = vsub.f32 %v2558_v59, %v8400_v4  ;;  %v2575_v39 = vsub.f32 %v2559_v34, %v8400_v4  ;;  %v2576_v17 = vsub.f32 %v2560_v20, %v8400_v4  ;;  %v2561_v23 = vld [vmem:[%s8412_s24 + $0x30] sm:$0xff]  ;;  %v2562_v46 = vld [vmem:[%s8412_s24 + $0x38] sm:$0xff] }
 0x210   : >> { %v2587_v7 = vmul.f32 %v2571_v5, %v8404_v37  ;;  %v2588_v50 = vmul.f32 %v2572_v62, %v8404_v37  ;;  %v2589_v44 = vmul.f32 %v2573_v19, %v8404_v37  ;;  %v2577_v40 = vsub.f32 %v2561_v23, %v8400_v4 }
 0x211   : >> { %v2590_v14 = vmul.f32 %v2574_v43, %v8404_v37  ;;  %v2591_v25 = vmul.f32 %v2575_v39, %v8404_v37  ;;  %v2592_v15 = vmul.f32 %v2576_v17, %v8404_v37  ;;  %v2578_v32 = vsub.f32 %v2562_v46, %v8400_v4 }
 0x212   : >> { %v2603_v41 = vmax.f32 %v2587_v7, 0.0  ;;  %v2604_v45 = vmax.f32 %v2588_v50, 0.0  ;;  %v2605_v47 = vmax.f32 %v2589_v44, 0.0  ;;  %v2593_v63 = vmul.f32 %v2577_v40, %v8404_v37 }
 0x213   : >> { %v2606_v53 = vmax.f32 %v2590_v14, 0.0  ;;  %v2607_v3 = vmax.f32 %v2591_v25, 0.0  ;;  %v2608_v2 = vmax.f32 %v2592_v15, 0.0  ;;  %v2594_v6 = vmul.f32 %v2578_v32, %v8404_v37 }
 0x214   : >> { %v2619_v13 = vpack.c.bf16 %v2603_v41, %v2603_v41  ;;  %v2620_v60 = vpack.c.bf16 %v2604_v45, %v2604_v45  ;;  %v2621_v9 = vpack.c.bf16 %v2605_v47, %v2605_v47  ;;  %v2609_v55 = vmax.f32 %v2593_v63, 0.0 }
 0x215   : >> { %v2622_v36 = vpack.c.bf16 %v2606_v53, %v2606_v53  ;;  %v2623_v35 = vpack.c.bf16 %v2607_v3, %v2607_v3  ;;  %v2624_v11 = vpack.c.bf16 %v2608_v2, %v2608_v2  ;;  %v2610_v51 = vmax.f32 %v2594_v6, 0.0 }
 0x216   : >> { %v2643_v12 = vunpack.c.l.b16 %v2619_v13  ;;  %v2699_v49 = vunpack.c.l.b16 %v2620_v60  ;;  %v2644_v18 = vunpack.c.l.b16 %v2621_v9  ;;  %v2625_v21 = vpack.c.bf16 %v2609_v55, %v2609_v55  ;;  %v2563_v60 = vld [vmem:[%s8412_s24 + $0x40] sm:$0xff] }
 0x217   : >> { %v2700_v22 = vunpack.c.l.b16 %v2622_v36  ;;  %v2645_v38 = vunpack.c.l.b16 %v2623_v35  ;;  %v2701_v56 = vunpack.c.l.b16 %v2624_v11  ;;  %v8438_v57 = vpack.c.bf16 %v2610_v51, %v2610_v51  ;;  %v2564_v11 = vld [vmem:[%s8412_s24 + $0x48] sm:$0xff]  ;;  %v2565_v51 = vld [vmem:[%s8412_s24 + $0x50] sm:$0xff] }
 0x218   : >> { %v2651_v52 = vpack.c.b16 %v2643_v12, %v2643_v12  ;;  %v2707_v48 = vpack.c.b16 %v2699_v49, %v2643_v12  ;;  %v2787_v42 = vpack.c.b16 %v2699_v49, %v2699_v49  ;;  %v2652_v10 = vpack.c.b16 %v2644_v18, %v2644_v18  ;;  %v2566_v12 = vld [vmem:[%s8412_s24 + $0x58] sm:$0xff] }
 0x219   : >> { %v2708_v58 = vpack.c.b16 %v2700_v22, %v2644_v18  ;;  %v2788_v1 = vpack.c.b16 %v2700_v22, %v2700_v22  ;;  %v2653_v29 = vpack.c.b16 %v2645_v38, %v2645_v38  ;;  %v2709_v61 = vpack.c.b16 %v2701_v56, %v2645_v38 }
 0x21a   : >> { %v2660_v31 = vshrl.u32 %v2651_v52, 16  ;;  %v2716_v30 = vshrl.u32 %v2707_v48, 16  ;;  %v2719_v8 = vshll.u32 %v2707_v48, 16  ;;  %v2796_v26 = vshll.u32 %v2787_v42, 16  ;;  %v2567_v42 = vld [vmem:[%s8412_s24 + $0x60] sm:$0xff] }
 0x21b   : >> { %v2663_v54 = vshrl.u32 %v2652_v10, 16  ;;  %v2723_v0 = vshrl.u32 %v2708_v58, 16  ;;  %v2726_v27 = vshll.u32 %v2708_v58, 16  ;;  %v2800_v28 = vshll.u32 %v2788_v1, 16 }
 0x21c   : >> { %v2718_v5 = vrot.slane %v2716_v30, 7  ;;  %v2798_v62 = vrot.slane %v2796_v26, 3  ;;  %v2666_v59 = vshrl.u32 %v2653_v29, 16  ;;  %v2730_v19 = vshrl.u32 %v2709_v61, 16 }
 0x21d   : >> { %v2725_v34 = vrot.slane %v2723_v0, 7  ;;  %v2802_v20 = vrot.slane %v2800_v28, 3  ;;  %v2733_v43 = vshll.u32 %v2709_v61, 16  ;;  %v2789_v39 = vpack.c.b16 %v2701_v56, %v2701_v56  ;;  %v2568_v0 = vld [vmem:[%s8412_s24 + $0x68] sm:$0xff] }
 0x21e   : >> { %v2721_v17 = vor.u32 %v2719_v8, %v2718_v5  ;;  %v2846_v23 = vsel %vm8442_vm11, %v2718_v5, %v2798_v62  ;;  %v2732_v46 = vrot.slane %v2730_v19, 7  ;;  %v2646_v7 = vunpack.c.l.b16 %v2625_v21 }
 0x21f   : >> { %v2874_v50 = vunpack.c.l.b16 %v2846_v23  ;;  %v2728_v44 = vor.u32 %v2726_v27, %v2725_v34  ;;  %v2847_v40 = vsel %vm8442_vm11, %v2725_v34, %v2802_v20  ;;  %v2804_v14 = vshll.u32 %v2789_v39, 16 }
 0x220   : >> { %v2838_v25 = vsel %vm8442_vm11, %v2660_v31, %v2721_v17  ;;  %v2877_v15 = vunpack.c.l.b16 %v2847_v40  ;;  %v2735_v32 = vor.u32 %v2733_v43, %v2732_v46  ;;  %v2654_v41 = vpack.c.b16 %v2646_v7, %v2646_v7 }
 0x221   : >> { %v2872_v45 = vunpack.c.l.b16 %v2838_v25  ;;  %v2873_v47 = vunpack.c.h.b16 %v2838_v25  ;;  %v2898_v63 = vpack.c.b16 %v2874_v50, %v2874_v50  ;;  %v2839_v53 = vsel %vm8442_vm11, %v2663_v54, %v2728_v44 }
 0x222   : >> { %v2875_v3 = vunpack.c.l.b16 %v2839_v53  ;;  %v2876_v2 = vunpack.c.h.b16 %v2839_v53  ;;  %v2901_v6 = vpack.c.b16 %v2877_v15, %v2877_v15  ;;  %v2840_v13 = vsel %vm8442_vm11, %v2666_v59, %v2735_v32 }
 0x223   : >> { %v2896_v9 = vpack.c.b16 %v2872_v45, %v2872_v45  ;;  %v2897_v55 = vpack.c.b16 %v2873_v47, %v2873_v47  ;;  %6346 = vst [vmem:[%s8460_s27 + $0x14] sm:$0x1] %v2898_v63  ;;  %v2878_v36 = vunpack.c.l.b16 %v2840_v13  ;;  %v2879_v35 = vunpack.c.h.b16 %v2840_v13 }
 0x224   : >> { %v2899_v49 = vpack.c.b16 %v2875_v3, %v2875_v3  ;;  %v2900_v18 = vpack.c.b16 %v2876_v2, %v2876_v2  ;;  %6349 = vst [vmem:[%s8460_s27 + $0x20] sm:$0x1] %v2901_v6  ;;  %v2806_v21 = vrot.slane %v2804_v14, 3  ;;  %v2669_v22 = vshrl.u32 %v2654_v41, 16 }
 0x225   : >> { %6344 = vst [vmem:[%s8460_s27 + $0xc] sm:$0xf] %v2896_v9  ;;  %v2902_v38 = vpack.c.b16 %v2878_v36, %v2878_v36  ;;  %v2903_v56 = vpack.c.b16 %v2879_v35, %v2879_v35  ;;  %v2702_v52 = vunpack.c.l.b16 %v8438_v57  ;;  %v2579_v48 = vsub.f32 %v2563_v60, %v8400_v4 }
 0x226   : >> { %6345 = vst [vmem:[%s8460_s27 + $0x10] sm:$0xf] %v2897_v55  ;;  %v2848_v10 = vsel %vm8442_vm11, %v2732_v46, %v2806_v21  ;;  %v2580_v58 = vsub.f32 %v2564_v11, %v8400_v4  ;;  %v2581_v1 = vsub.f32 %v2565_v51, %v8400_v4  ;;  %v2582_v29 = vsub.f32 %v2566_v12, %v8400_v4 }
 0x227   : >> { %6347 = vst [vmem:[%s8460_s27 + $0x18] sm:$0xf] %v2899_v49  ;;  %v2880_v61 = vunpack.c.l.b16 %v2848_v10  ;;  %v2710_v31 = vpack.c.b16 %v2702_v52, %v2646_v7  ;;  %v2790_v57 = vpack.c.b16 %v2702_v52, %v2702_v52  ;;  %v2595_v30 = vmul.f32 %v2579_v48, %v8404_v37 }
 0x228   : >> { %6348 = vst [vmem:[%s8460_s27 + $0x1c] sm:$0xf] %v2900_v18  ;;  %v2596_v8 = vmul.f32 %v2580_v58, %v8404_v37  ;;  %v2597_v26 = vmul.f32 %v2581_v1, %v8404_v37  ;;  %v2598_v54 = vmul.f32 %v2582_v29, %v8404_v37  ;;  %v2583_v27 = vsub.f32 %v2567_v42, %v8400_v4  ;;  %v2570_v42 = vld [vmem:[%s8412_s24 + $0x78] sm:$0xff] }
 0x229   : >> { %6350 = vst [vmem:[%s8460_s27 + $0x24] sm:$0xf] %v2902_v38  ;;  %v2904_v28 = vpack.c.b16 %v2880_v61, %v2880_v61  ;;  %v2737_v5 = vshrl.u32 %v2710_v31, 16  ;;  %v2740_v62 = vshll.u32 %v2710_v31, 16  ;;  %v2808_v59 = vshll.u32 %v2790_v57, 16 }
 0x22a   : >> { %6351 = vst [vmem:[%s8460_s27 + $0x28] sm:$0xf] %v2903_v56  ;;  %v2611_v19 = vmax.f32 %v2595_v30, 0.0  ;;  %v2612_v34 = vmax.f32 %v2596_v8, 0.0  ;;  %v2613_v20 = vmax.f32 %v2597_v26, 0.0  ;;  %v2614_v43 = vmax.f32 %v2598_v54, 0.0 }
 0x22b   : >> { %6352 = vst [vmem:[%s8460_s27 + $0x2c] sm:$0x1] %v2904_v28  ;;  %v2739_v39 = vrot.slane %v2737_v5, 7  ;;  %v2810_v17 = vrot.slane %v2808_v59, 3  ;;  %v2584_v23 = vsub.f32 %v2568_v0, %v8400_v4  ;;  %v2599_v46 = vmul.f32 %v2583_v27, %v8404_v37 }
 0x22c   : >> { %v2627_v7 = vpack.c.bf16 %v2611_v19, %v2611_v19  ;;  %v2628_v50 = vpack.c.bf16 %v2612_v34, %v2612_v34  ;;  %v2629_v44 = vpack.c.bf16 %v2613_v20, %v2613_v20  ;;  %v2630_v40 = vpack.c.bf16 %v2614_v43, %v2614_v43 }
 0x22d   : >> { %v2742_v14 = vor.u32 %v2740_v62, %v2739_v39  ;;  %v2849_v25 = vsel %vm8442_vm11, %v2739_v39, %v2810_v17  ;;  %v2600_v15 = vmul.f32 %v2584_v23, %v8404_v37  ;;  %v2615_v32 = vmax.f32 %v2599_v46, 0.0 }
 0x22e   : >> { %v2883_v41 = vunpack.c.l.b16 %v2849_v25  ;;  %v2647_v45 = vunpack.c.l.b16 %v2627_v7  ;;  %v2703_v47 = vunpack.c.l.b16 %v2628_v50  ;;  %v2648_v63 = vunpack.c.l.b16 %v2629_v44 }
 0x22f   : >> { %v2841_v53 = vsel %vm8442_vm11, %v2669_v22, %v2742_v14  ;;  %v2704_v3 = vunpack.c.l.b16 %v2630_v40  ;;  %v2616_v2 = vmax.f32 %v2600_v15, 0.0  ;;  %v2631_v6 = vpack.c.bf16 %v2615_v32, %v2615_v32  ;;  %v2569_v22 = vld [vmem:[%s8412_s24 + $0x70] sm:$0xff] }
 0x230   : >> { %v2881_v13 = vunpack.c.l.b16 %v2841_v53  ;;  %v2882_v60 = vunpack.c.h.b16 %v2841_v53  ;;  %v2907_v9 = vpack.c.b16 %v2883_v41, %v2883_v41  ;;  %v2655_v55 = vpack.c.b16 %v2647_v45, %v2647_v45 }
 0x231   : >> { %v2711_v36 = vpack.c.b16 %v2703_v47, %v2647_v45  ;;  %v2791_v35 = vpack.c.b16 %v2703_v47, %v2703_v47  ;;  %v2656_v11 = vpack.c.b16 %v2648_v63, %v2648_v63  ;;  %v2712_v51 = vpack.c.b16 %v2704_v3, %v2648_v63 }
 0x232   : >> { %v2905_v12 = vpack.c.b16 %v2881_v13, %v2881_v13  ;;  %v2906_v49 = vpack.c.b16 %v2882_v60, %v2882_v60  ;;  %6355 = vst [vmem:[%s8460_s27 + $0x38] sm:$0x1] %v2907_v9  ;;  %v2672_v18 = vshrl.u32 %v2655_v55, 16  ;;  %v2792_v21 = vpack.c.b16 %v2704_v3, %v2704_v3 }
 0x233   : >> { %v2744_v38 = vshrl.u32 %v2711_v36, 16  ;;  %v2747_v56 = vshll.u32 %v2711_v36, 16  ;;  %v2812_v52 = vshll.u32 %v2791_v35, 16  ;;  %v2675_v48 = vshrl.u32 %v2656_v11, 16 }
 0x234   : >> { %6353 = vst [vmem:[%s8460_s27 + $0x30] sm:$0xf] %v2905_v12  ;;  %v2751_v10 = vshrl.u32 %v2712_v51, 16  ;;  %v2754_v58 = vshll.u32 %v2712_v51, 16  ;;  %v2816_v1 = vshll.u32 %v2792_v21, 16  ;;  %v2632_v29 = vpack.c.bf16 %v2616_v2, %v2616_v2 }
 0x235   : >> { %6354 = vst [vmem:[%s8460_s27 + $0x34] sm:$0xf] %v2906_v49  ;;  %v2746_v61 = vrot.slane %v2744_v38, 7  ;;  %v2814_v31 = vrot.slane %v2812_v52, 3  ;;  %v2649_v57 = vunpack.c.l.b16 %v2631_v6  ;;  %v2585_v30 = vsub.f32 %v2569_v22, %v8400_v4 }
 0x236   : >> { %v2753_v8 = vrot.slane %v2751_v10, 7  ;;  %v2818_v26 = vrot.slane %v2816_v1, 3  ;;  %v2705_v54 = vunpack.c.l.b16 %v2632_v29  ;;  %v2586_v0 = vsub.f32 %v2570_v42, %v8400_v4 }
 0x237   : >> { %v2749_v27 = vor.u32 %v2747_v56, %v2746_v61  ;;  %v2850_v28 = vsel %vm8442_vm11, %v2746_v61, %v2814_v31  ;;  %v2657_v5 = vpack.c.b16 %v2649_v57, %v2649_v57  ;;  %v2601_v62 = vmul.f32 %v2585_v30, %v8404_v37 }
 0x238   : >> { %v2886_v59 = vunpack.c.l.b16 %v2850_v28  ;;  %v2756_v19 = vor.u32 %v2754_v58, %v2753_v8  ;;  %v2851_v34 = vsel %vm8442_vm11, %v2753_v8, %v2818_v26  ;;  %v2713_v20 = vpack.c.b16 %v2705_v54, %v2649_v57 }
 0x239   : >> { %v2842_v43 = vsel %vm8442_vm11, %v2672_v18, %v2749_v27  ;;  %v2889_v39 = vunpack.c.l.b16 %v2851_v34  ;;  %v2678_v17 = vshrl.u32 %v2657_v5, 16  ;;  %v2793_v23 = vpack.c.b16 %v2705_v54, %v2705_v54 }
 0x23a   : >> { %v2884_v46 = vunpack.c.l.b16 %v2842_v43  ;;  %v2885_v7 = vunpack.c.h.b16 %v2842_v43  ;;  %v2910_v50 = vpack.c.b16 %v2886_v59, %v2886_v59  ;;  %v2843_v44 = vsel %vm8442_vm11, %v2675_v48, %v2756_v19 }
 0x23b   : >> { %v2887_v40 = vunpack.c.l.b16 %v2843_v44  ;;  %v2888_v14 = vunpack.c.h.b16 %v2843_v44  ;;  %v2913_v25 = vpack.c.b16 %v2889_v39, %v2889_v39  ;;  %v2758_v15 = vshrl.u32 %v2713_v20, 16 }
 0x23c   : >> { %v2908_v32 = vpack.c.b16 %v2884_v46, %v2884_v46  ;;  %v2909_v41 = vpack.c.b16 %v2885_v7, %v2885_v7  ;;  %6358 = vst [vmem:[%s8460_s27 + $0x44] sm:$0x1] %v2910_v50  ;;  %v2761_v45 = vshll.u32 %v2713_v20, 16  ;;  %v2820_v47 = vshll.u32 %v2793_v23, 16 }
 0x23d   : >> { %v2911_v63 = vpack.c.b16 %v2887_v40, %v2887_v40  ;;  %v2912_v53 = vpack.c.b16 %v2888_v14, %v2888_v14  ;;  %6361 = vst [vmem:[%s8460_s27 + $0x50] sm:$0x1] %v2913_v25  ;;  %v2760_v3 = vrot.slane %v2758_v15, 7  ;;  %v2602_v2 = vmul.f32 %v2586_v0, %v8404_v37 }
 0x23e   : >> { %6356 = vst [vmem:[%s8460_s27 + $0x3c] sm:$0xf] %v2908_v32  ;;  %v2822_v6 = vrot.slane %v2820_v47, 3  ;;  %v2617_v13 = vmax.f32 %v2601_v62, 0.0  ;;  %v8535_v34 = vmov (%p2549_p1), 0.0   ;;  %v8537_v20 = vmov (%p2549_p1), 0.0  }
 0x23f   : >> { %6357 = vst [vmem:[%s8460_s27 + $0x40] sm:$0xf] %v2909_v41  ;;  %v2763_v60 = vor.u32 %v2761_v45, %v2760_v3  ;;  %v2618_v9 = vmax.f32 %v2602_v2, 0.0 }
 0x240   : >> { %6359 = vst [vmem:[%s8460_s27 + $0x48] sm:$0xf] %v2911_v63  ;;  %v2852_v55 = vsel %vm8442_vm11, %v2760_v3, %v2822_v6  ;;  %v2633_v36 = vpack.c.bf16 %v2617_v13, %v2617_v13 }
 0x241   : >> { %6360 = vst [vmem:[%s8460_s27 + $0x4c] sm:$0xf] %v2912_v53  ;;  %v2844_v35 = vsel %vm8442_vm11, %v2678_v17, %v2763_v60  ;;  %v2892_v11 = vunpack.c.l.b16 %v2852_v55  ;;  %v2634_v51 = vpack.c.bf16 %v2618_v9, %v2618_v9 }
 0x242   : >> { %v2890_v12 = vunpack.c.l.b16 %v2844_v35  ;;  %v2891_v49 = vunpack.c.h.b16 %v2844_v35  ;;  %v2650_v18 = vunpack.c.l.b16 %v2633_v36 }
 0x243   : >> { %v2916_v21 = vpack.c.b16 %v2892_v11, %v2892_v11  ;;  %v2706_v22 = vunpack.c.l.b16 %v2634_v51 }
 0x244   : >> { %v2914_v38 = vpack.c.b16 %v2890_v12, %v2890_v12  ;;  %v2915_v56 = vpack.c.b16 %v2891_v49, %v2891_v49  ;;  %v2658_v52 = vpack.c.b16 %v2650_v18, %v2650_v18 }
 0x245   : >> { %6364 = vst [vmem:[%s8460_s27 + $0x5c] sm:$0x1] %v2916_v21  ;;  %v2714_v48 = vpack.c.b16 %v2706_v22, %v2650_v18  ;;  %v2794_v42 = vpack.c.b16 %v2706_v22, %v2706_v22 }
 0x246   : >> { %6362 = vst [vmem:[%s8460_s27 + $0x54] sm:$0xf] %v2914_v38  ;;  %v2681_v29 = vshrl.u32 %v2658_v52, 16 }
 0x247   : >> { %6363 = vst [vmem:[%s8460_s27 + $0x58] sm:$0xf] %v2915_v56  ;;  %v2765_v10 = vshrl.u32 %v2714_v48, 16  ;;  %v2768_v58 = vshll.u32 %v2714_v48, 16  ;;  %v2824_v1 = vshll.u32 %v2794_v42, 16 }
 0x249   : >> { %v2767_v61 = vrot.slane %v2765_v10, 7  ;;  %v2826_v31 = vrot.slane %v2824_v1, 3 }
 0x24b   : >> { %v2770_v57 = vor.u32 %v2768_v58, %v2767_v61  ;;  %v2853_v30 = vsel %vm8442_vm11, %v2767_v61, %v2826_v31 }
 0x24c   : >> { %v2895_v8 = vunpack.c.l.b16 %v2853_v30 }
 0x24d   : >> { %v2845_v26 = vsel %vm8442_vm11, %v2681_v29, %v2770_v57 }
 0x24e   : >> { %v2893_v54 = vunpack.c.l.b16 %v2845_v26  ;;  %v2894_v0 = vunpack.c.h.b16 %v2845_v26  ;;  %v2919_v27 = vpack.c.b16 %v2895_v8, %v2895_v8 }
 0x24f   : > { %2551 = sbr.rel (!%p2549_p1) target bundleno = 523 (0x20b), region = 127 }
 0x250   : >> { %v2917_v28 = vpack.c.b16 %v2893_v54, %v2893_v54  ;;  %v2918_v5 = vpack.c.b16 %v2894_v0, %v2894_v0  ;;  %6367 = vst [vmem:[%s8460_s27 + $0x68] sm:$0x1] %v2919_v27 }
 0x252   : >> { %6365 = vst [vmem:[%s8460_s27 + $0x60] sm:$0xf] %v2917_v28 }
 0x253   : >> { %6366 = vst [vmem:[%s8460_s27 + $0x64] sm:$0xf] %v2918_v5 }
 0x25a   : > { %v2972_v62 = vld [vmem:[#allocation2 + $0x18] sm:$0xff]   ;;  %v2974_v59 = vld [vmem:[#allocation2 + $0x20] sm:$0x1] }
 0x25b   : > { %v2979_v19 = vld [vmem:[#allocation2 + $0xb4] sm:$0xff]   ;;  %2975 = vst [vmem:[#allocation2] sm:$0xff] %v2972_v62   ;;  %v2981_v33 = vld [vmem:[#allocation2 + $0xbc] sm:$0x1] }
 0x25c   : > { %2977 = vst [vmem:[#allocation2 + $0x8] sm:$0x1] %v2974_v59 }
 0x25d   : > { %2983 = vst [vmem:[#allocation2 + $0xcc] sm:$0xff] %v2979_v19  }
 0x25e   : > { %2985 = vst [vmem:[#allocation2 + $0xd4] sm:$0x1] %v2981_v33 }
 0x25f LB: >> { %v7011_v4 = vld [vmem:[#allocation4 + $0x38] sm:$0xff]  ;;  %v7010_v37 = vld [vmem:[#allocation4 + $0x30] sm:$0xff]  ;;  %v7009_v43 = vld [vmem:[#allocation4 + $0x28] sm:$0xff]  ;;  %s6979_s29 = smul.u32 96, %s7433_s28  ;;  %s6847_s6 = sshll.u32 %s7433_s28, 7  ;;  %s7433_s28 = sphi %s8539_s28, %s2991_s28   ;;  %v7429_v20 = vphi %v8537_v20, %v9370_v20   ;;  %v7425_v34 = vphi %v8535_v34, %v9369_v34  }
 0x260   : >> { %7102 = vmatpush.bf16.msra.mxu1 %v7011_v4  ;;  %7103 = vmatpush.bf16.msra.mxu2 %v7011_v4  ;;  %v7008_v39 = vld [vmem:[#allocation4 + $0x20] sm:$0xff]  ;;  %v7007_v17 = vld [vmem:[#allocation4 + $0x18] sm:$0xff]  ;;  %v7006_v23 = vld [vmem:[#allocation4 + $0x10] sm:$0xff]  ;;  %s9129_s7 = scalar_lea.vmem [#allocation3], %s6847_s6  ;;  %s2991_s28 = sadd.s32 1, %s7433_s28  }
 0x261   : >> { %7104 = vmatpush.bf16.msra.mxu3 %v7011_v4  ;;  %4812 = vmatpush.bf16.msra.mxu0 %v7011_v4  ;;  %v7005_v46 = vld [vmem:[#allocation4 + $0x8] sm:$0xff]  ;;  %v7004_v7 = vld [vmem:[#allocation4] sm:$0xff]  ;;  %v7027_v50 = vld [vmem:[#allocation4 + $0xb8] sm:$0xff]  ;;  %s8551_s30 = scalar_lea.vmem [#allocation2], %s6979_s29  ;;  %p2988_p2 = scmp.ge.s32.totalorder %s2991_s28, 2  }
 0x262   : >> { %v7019_v44 = vld [vmem:[#allocation4 + $0x78] sm:$0xff]  ;;  %v7026_v45 = vld [vmem:[#allocation4 + $0xb0] sm:$0xff]  ;;  %v7025_v60 = vld [vmem:[#allocation4 + $0xa8] sm:$0xff]  ;;  %s9177_s8 = smov (%p2988_p2), 0  }
 0x263   : >> { %v7035_v32 = vld [vmem:[#allocation4 + $0xf8] sm:$0xff]  ;;  %v7018_v47 = vld [vmem:[#allocation4 + $0x70] sm:$0xff]  ;;  %v7017_v9 = vld [vmem:[#allocation4 + $0x68] sm:$0xff] }
 0x264   : >> { %7105 = vmatpush.bf16.msra.mxu1 %v7010_v37  ;;  %7106 = vmatpush.bf16.msra.mxu2 %v7010_v37  ;;  %v7043_v41 = vld [vmem:[#allocation4 + $0x138] sm:$0xff]  ;;  %v7034_v53 = vld [vmem:[#allocation4 + $0xf0] sm:$0xff]  ;;  %v7033_v21 = vld [vmem:[#allocation4 + $0xe8] sm:$0xff] }
 0x265   : >> { %7107 = vmatpush.bf16.msra.mxu3 %v7010_v37  ;;  %4813 = vmatpush.bf16.msra.mxu0 %v7010_v37  ;;  %v6982_v40 = vld [vmem:[%s8551_s30 + $0x18] sm:$0xff]  ;;  %v6984_v14 = vld [vmem:[%s8551_s30 + $0x30] sm:$0xff]  ;;  %v6986_v25 = vld [vmem:[%s8551_s30 + $0x48] sm:$0xff] }
 0x266   : >> { %v6980_v15 = vld [vmem:[%s8551_s30] sm:$0xff]  ;;  %v7042_v2 = vld [vmem:[#allocation4 + $0x130] sm:$0xff]  ;;  %v6382_v13 = vld [vmem:[%s8551_s30 + $0x10] sm:$0xf] }
 0x267   : >> { %v2998_v63 = vld [vmem:[%s8551_s30] sm:$0xf]  ;;  %v8559_v3 = vld [vmem:[%s8551_s30 + $0x4] sm:$0xf]  ;;  %v6381_v6 = vld [vmem:[%s8551_s30 + $0xc] sm:$0xf] }
 0x268   : >> { %7108 = vmatpush.bf16.msra.mxu1 %v7009_v43  ;;  %7109 = vmatpush.bf16.msra.mxu2 %v7009_v43  ;;  %v3026_v55 = vshrl.u32 %v2998_v63, 16  ;;  %v3029_v36 = vshll.u32 %v2998_v63, 16  ;;  %v3035_v35 = vshll.u32 %v8559_v3, 16  ;;  %v3039_v11 = vshrl.u32 %v8559_v3, 16  ;;  %v7041_v22 = vld [vmem:[#allocation4 + $0x128] sm:$0xff]  ;;  %v7024_v38 = vld [vmem:[#allocation4 + $0xa0] sm:$0xff] }
 0x269   : >> { %7110 = vmatpush.bf16.msra.mxu3 %v7009_v43  ;;  %4814 = vmatpush.bf16.msra.mxu0 %v7009_v43  ;;  %v3337_v51 = vshrl.u32 %v6381_v6, 16  ;;  %v3340_v12 = vshll.u32 %v6381_v6, 16  ;;  %v3346_v49 = vshll.u32 %v6382_v13, 16  ;;  %v3350_v18 = vshrl.u32 %v6382_v13, 16  ;;  %v7016_v56 = vld [vmem:[#allocation4 + $0x60] sm:$0xff]  ;;  %v7023_v26 = vld [vmem:[#allocation4 + $0x98] sm:$0xff] }
 0x26a   : >> { %v3028_v52 = vrot.slane %v3026_v55, 4  ;;  %v3031_v48 = vrot.slane %v3029_v36, 5  ;;  %v8565_v42 = vrot.slane %v3035_v35, 5  ;;  %v3041_v10 = vrot.slane %v3039_v11, 4  ;;  %v8568_v58 = vld [vmem:[%s8551_s30 + $0x8] sm:$0x1] }
 0x26b   : >> { %v3339_v1 = vrot.slane %v3337_v51, 4  ;;  %v3342_v29 = vrot.slane %v3340_v12, 5  ;;  %v8570_v61 = vrot.slane %v3346_v49, 5  ;;  %v3352_v31 = vrot.slane %v3350_v18, 4  ;;  %v7032_v57 = vld [vmem:[#allocation4 + $0xe0] sm:$0xff]  ;;  %v7015_v54 = vld [vmem:[#allocation4 + $0x58] sm:$0xff] }
 0x26c   : >> { %7111 = vmatpush.bf16.msra.mxu1 %v7008_v39  ;;  %7112 = vmatpush.bf16.msra.mxu2 %v7008_v39  ;;  %v7040_v30 = vld [vmem:[#allocation4 + $0x120] sm:$0xff]  ;;  %v6397_v8 = vld [vmem:[%s8551_s30 + $0x14] sm:$0x1]  ;;  %v3032_v0 = vor.u32 %v3031_v48, %v3028_v52  ;;  %v6983_v27 = vld [vmem:[%s8551_s30 + $0x24] sm:$0xff]  ;;  %v3042_v5 = vor.u32 %v3041_v10, %v8565_v42  ;;  %v3045_v62 = vshll.u32 %v8568_v58, 16  ;;  %v3254_v59 = vrot.slane %v8559_v3, 5 }
 0x26d   : >> { %7113 = vmatpush.bf16.msra.mxu3 %v7008_v39  ;;  %4815 = vmatpush.bf16.msra.mxu0 %v7008_v39  ;;  %v6985_v28 = vld [vmem:[%s8551_s30 + $0x3c] sm:$0xff]  ;;  %v6987_v19 = vld [vmem:[%s8551_s30 + $0x54] sm:$0xff]  ;;  %v6981_v33 = vld [vmem:[%s8551_s30 + $0xc] sm:$0xff]  ;;  %v3343_v37 = vor.u32 %v3342_v29, %v3339_v1  ;;  %v3353_v43 = vor.u32 %v3352_v31, %v8570_v61  ;;  %v3356_v39 = vshll.u32 %v6397_v8, 16 }
 0x26e   : >> { %v3217_v4 = vld [vmem:[%s8551_s30] sm:$0xe]  ;;  %v6384_v3 = vld [vmem:[%s8551_s30 + $0x1c] sm:$0xf]  ;;  %v7038_v6 = vld [vmem:[#allocation4 + $0x110] sm:$0xff] }
 0x26f   : >> { %v3354_v63 = vrot.slane %v3353_v43, 4  ;;  %v7021_v36 = vld [vmem:[#allocation4 + $0x88] sm:$0xff]  ;;  %v3370_v18 = vshll.u32 %v6384_v3, 16  ;;  %v8606_v10 = vld [vmem:[%s8551_s30 + $0x14] sm:$0x1]  ;;  %v7028_v43 = vld [vmem:[#allocation4 + $0xc0] sm:$0xff] }
 0x270   : >> { %7114 = vmatpush.bf16.msra.mxu1 %v7007_v17  ;;  %7115 = vmatpush.bf16.msra.mxu2 %v7007_v17  ;;  %v7013_v35 = vld [vmem:[#allocation4 + $0x48] sm:$0xff] }
 0x271   : >> { %7116 = vmatpush.bf16.msra.mxu3 %v7007_v17  ;;  %4816 = vmatpush.bf16.msra.mxu0 %v7007_v17  ;;  %v7031_v17 = vld [vmem:[#allocation4 + $0xd8] sm:$0xff] }
 0x274   : >> { %7117 = vmatpush.bf16.msra.mxu1 %v7006_v23  ;;  %7118 = vmatpush.bf16.msra.mxu2 %v7006_v23 }
 0x275   : >> { %7119 = vmatpush.bf16.msra.mxu3 %v7006_v23  ;;  %4817 = vmatpush.bf16.msra.mxu0 %v7006_v23  ;;  %v7039_v23 = vld [vmem:[#allocation4 + $0x118] sm:$0xff] }
 0x278   : >> { %7120 = vmatpush.bf16.msra.mxu1 %v7005_v46  ;;  %7121 = vmatpush.bf16.msra.mxu2 %v7005_v46 }
 0x279   : >> { %7122 = vmatpush.bf16.msra.mxu3 %v7005_v46  ;;  %4818 = vmatpush.bf16.msra.mxu0 %v7005_v46  ;;  %v7022_v46 = vld [vmem:[#allocation4 + $0x90] sm:$0xff] }
 0x27c   : >> { %7123 = vmatpush.bf16.msra.mxu1 %v7004_v7  ;;  %7124 = vmatpush.bf16.msra.mxu2 %v7004_v7 }
 0x27d   : >> { %7125 = vmatpush.bf16.msra.mxu3 %v7004_v7  ;;  %4819 = vmatpush.bf16.msra.mxu0 %v7004_v7  ;;  %v7014_v7 = vld [vmem:[#allocation4 + $0x50] sm:$0xff] }
 0x27f   : >> { %4830 = vmatmul.bf16.vlgmr.msra.gmra.mxu1 %v6982_v40  ;;  %4840 = vmatmul.bf16.vlgmr.msra.gmra.mxu2 %v6984_v14  ;;  %v8584_v40 = vld [vmem:[%s8551_s30 + $0x10] sm:$0xf]  ;;  %v3043_v14 = vrot.slane %v3042_v5, 4 }
 0x280   : >> { %4910 = vmatpush.bf16.msrb.mxu2 %v7027_v50  ;;  %4861 = vmatpush.bf16.msrb.mxu1 %v7019_v44  ;;  %v3033_v50 = vrot.slane %v3032_v0, 4  ;;  %v3000_v44 = vld [vmem:[%s8551_s30 + $0xc] sm:$0xf]  ;;  %v3063_v55 = vshrl.u32 %v8584_v40, 16  ;;  %v7051_v5 = vld [vmem:[#allocation4 + $0x178] sm:$0xff] }
 0x281   : >> { %4850 = vmatmul.bf16.vlgmr.msra.gmra.mxu3 %v6986_v25  ;;  %4820 = vmatmul.bf16.vlgmr.msra.gmra.mxu0 %v6980_v15  ;;  %v3047_v25 = vrot.slane %v3045_v62, 5  ;;  %v6371_v15 = vrot.slane %v3217_v4, 9  ;;  %v3050_v13 = vshrl.u32 %v3000_v44, 16  ;;  %v8610_v62 = vrot.slane %v3370_v18, 5 }
 0x282   : >> { %4959 = vmatpush.bf16.msrb.mxu3 %v7035_v32  ;;  %5008 = vmatpush.bf16.msrb.mxu0 %v7043_v41  ;;  %v3256_v32 = vrot.slane %v3254_v59, 4  ;;  %v6383_v41 = vld [vmem:[%s8551_s30 + $0x18] sm:$0xf]  ;;  %v3038_v12 = vsel %vm7680_vm4, %v3033_v50, %v8565_v42  ;;  %v3065_v31 = vrot.slane %v3063_v55, 4  ;;  %v3069_v4 = vshll.u32 %v8606_v10, 16 }
 0x283   : >> { %v3361_v11 = vshrl.u32 %v6383_v41, 16  ;;  %v3364_v51 = vshll.u32 %v6383_v41, 16  ;;  %v3255_v49 = vsel %vm7694_vm5, %v6371_v15, %v3254_v59  ;;  %v3964_v8 = vunpack.c.l.b16 %v3038_v12  ;;  %v3218_v15 = vld [vmem:[%s8551_s30 + $0xc] sm:$0xe] }
 0x284   : >> { %4911 = vmatpush.bf16.msrb.mxu2 %v7026_v45  ;;  %4862 = vmatpush.bf16.msrb.mxu1 %v7018_v47  ;;  %v3257_v45 = vrot.slane %v8568_v58, 5  ;;  %v3344_v47 = vrot.slane %v3343_v37, 4  ;;  %v3052_v58 = vrot.slane %v3050_v13, 4  ;;  %v6398_v37 = vld [vmem:[%s8551_s30 + $0x20] sm:$0x1]  ;;  %v3261_v50 = vrot.slane %v8584_v40, 5 }
 0x285   : >> { %v3380_v41 = vshll.u32 %v6398_v37, 16  ;;  %v8621_v13 = vld [vmem:[%s8551_s30 + $0x1c] sm:$0xf]  ;;  %v3264_v55 = vrot.slane %v8606_v10, 5 }
 0x286   : >> { %4960 = vmatpush.bf16.msrb.mxu3 %v7034_v53  ;;  %5009 = vmatpush.bf16.msrb.mxu0 %v7042_v2  ;;  %v3358_v53 = vrot.slane %v3356_v39, 5  ;;  %v7030_v2 = vld [vmem:[#allocation4 + $0xd0] sm:$0xff]  ;;  %v3258_v52 = vsel %vm7694_vm5, %v3256_v32, %v3257_v45  ;;  %v3349_v48 = vsel %vm7680_vm4, %v3344_v47, %v8570_v61  ;;  %v3363_v61 = vrot.slane %v3361_v11, 4  ;;  %v7036_v39 = vld [vmem:[#allocation4 + $0x100] sm:$0xff] }
 0x287   : >> { %v6988_v45 = vld [vmem:[%s8551_s30 + $0xc] sm:$0xff]  ;;  %v3382_v12 = vrot.slane %v3380_v41, 5 }
 0x288   : >> { %4912 = vmatpush.bf16.msrb.mxu2 %v7025_v60  ;;  %4863 = vmatpush.bf16.msrb.mxu1 %v7017_v9  ;;  %v3053_v60 = vshll.u32 %v3000_v44, 16  ;;  %v3059_v9 = vshll.u32 %v8584_v40, 16  ;;  %v3359_v42 = vsel %vm7680_vm4, %v3354_v63, %v3358_v53  ;;  %v3071_v63 = vrot.slane %v3069_v4, 5  ;;  %v3002_v53 = vld [vmem:[%s8551_s30 + $0x18] sm:$0xf]  ;;  %v7050_v40 = vld [vmem:[#allocation4 + $0x170] sm:$0xff] }
 0x289   : >> { %v7074_v11 = vld [vmem:[#allocation4 + $0x230] sm:$0xff]  ;;  %v3077_v18 = vshll.u32 %v3002_v53, 16 }
 0x28a   : >> { %4961 = vmatpush.bf16.msrb.mxu3 %v7033_v21  ;;  %5010 = vmatpush.bf16.msrb.mxu0 %v7041_v22  ;;  %v3374_v21 = vshrl.u32 %v6384_v3, 16  ;;  %v7029_v22 = vld [vmem:[#allocation4 + $0xc8] sm:$0xff]  ;;  %v3055_v1 = vrot.slane %v3053_v60, 5  ;;  %v8608_v29 = vrot.slane %v3059_v9, 5  ;;  %v6372_v60 = vrot.slane %v3218_v15, 9 }
 0x28b   : >> { %v3263_v9 = vrot.slane %v3261_v50, 4 }
 0x28c   : >> { %4913 = vmatpush.bf16.msrb.mxu2 %v7024_v38  ;;  %4864 = vmatpush.bf16.msrb.mxu1 %v7016_v56  ;;  %v7037_v38 = vld [vmem:[#allocation4 + $0x108] sm:$0xff]  ;;  %v3048_v56 = vsel %vm7680_vm4, %v3043_v14, %v3047_v25  ;;  %v3376_v59 = vrot.slane %v3374_v21, 4  ;;  %v3083_v21 = vshll.u32 %v8621_v13, 16  ;;  %v3262_v10 = vsel %vm7694_vm5, %v6372_v60, %v3261_v50 }
 0x28d   : >> { %v3965_v0 = vunpack.c.l.b16 %v3048_v56  ;;  %v7057_v56 = vld [vmem:[#allocation4 + $0x1a8] sm:$0xff]  ;;  %v3998_v4 = vunpack.c.l.b16 %v3262_v10 }
 0x28e   : >> { %4962 = vmatpush.bf16.msrb.mxu3 %v7032_v57  ;;  %5011 = vmatpush.bf16.msrb.mxu0 %v7040_v30  ;;  %v7020_v57 = vld [vmem:[#allocation4 + $0x80] sm:$0xff]  ;;  %v3377_v32 = vor.u32 %v3376_v59, %v8610_v62 }
 0x28f   : >> { %4835 = vmatmul.bf16.gmra.mxu1 %v6983_v27  ;;  %4845 = vmatmul.bf16.gmra.mxu2 %v6985_v28  ;;  %v7012_v30 = vld [vmem:[#allocation4 + $0x40] sm:$0xff]  ;;  %v3997_v27 = vunpack.c.l.b16 %v3258_v52  ;;  %v7059_v28 = vld [vmem:[#allocation4 + $0x1b8] sm:$0xff]  ;;  %v3980_v14 = vpack.c.b16 %v3965_v0, %v3964_v8  ;;  %v6385_v52 = vld [vmem:[%s8551_s30 + $0x24] sm:$0xf] }
 0x290   : >> { %4914 = vmatpush.bf16.msrb.mxu2 %v7023_v26  ;;  %4865 = vmatpush.bf16.msrb.mxu1 %v7015_v54  ;;  %v3996_v26 = vunpack.c.l.b16 %v3255_v49  ;;  %v3366_v54 = vrot.slane %v3364_v51, 5  ;;  %v3378_v51 = vrot.slane %v3377_v32, 4  ;;  %v3074_v49 = vshrl.u32 %v3002_v53, 16 }
 0x291   : >> { %4855 = vmatmul.bf16.gmra.mxu3 %v6987_v19  ;;  %4825 = vmatmul.bf16.gmra.mxu0 %v6981_v33  ;;  %v4068_v19 = vunpack.c.l.b16 %v3349_v48  ;;  %v4069_v33 = vunpack.c.l.b16 %v3359_v42  ;;  %v7049_v48 = vld [vmem:[#allocation4 + $0x168] sm:$0xff] }
 0x292   : >> { %4963 = vmatpush.bf16.msrb.mxu3 %v7031_v17  ;;  %5012 = vmatpush.bf16.msrb.mxu0 %v7039_v23  ;;  %v3056_v17 = vor.u32 %v3055_v1, %v3052_v58  ;;  %v3066_v23 = vor.u32 %v3065_v31, %v8608_v29  ;;  %v3367_v44 = vor.u32 %v3366_v54, %v3363_v61  ;;  %v6386_v1 = vld [vmem:[%s8551_s30 + $0x28] sm:$0xf]  ;;  %v7065_v31 = vld [vmem:[#allocation4 + $0x1e8] sm:$0xff]  ;;  %v3076_v8 = vrot.slane %v3074_v49, 4 }
 0x293   : >> { %v4012_v25 = vpack.c.b16 %v3997_v27, %v3996_v26  ;;  %v4084_v47 = vpack.c.b16 %v4069_v33, %v4068_v19  ;;  %v3265_v58 = vsel %vm7694_vm5, %v3263_v9, %v3264_v55  ;;  %v3079_v26 = vrot.slane %v3077_v18, 5  ;;  %v3016_v61 = vld [vmem:[%s8551_s30 + $0x20] sm:$0x1]  ;;  %v3004_v55 = vld [vmem:[%s8551_s30 + $0x24] sm:$0xf]  ;;  %v7056_v18 = vld [vmem:[#allocation4 + $0x1a0] sm:$0xff] }
 0x294   : >> { %4915 = vmatpush.bf16.msrb.mxu2 %v7022_v46  ;;  %4866 = vmatpush.bf16.msrb.mxu1 %v7014_v7  ;;  %v7067_v46 = vld [vmem:[#allocation4 + $0x1f8] sm:$0xff]  ;;  %v3057_v3 = vrot.slane %v3056_v17, 4  ;;  %v8643_v54 = vrot.slane %v3083_v21, 5  ;;  %v3385_v27 = vshrl.u32 %v6385_v52, 16  ;;  %v3398_v59 = vshrl.u32 %v6386_v1, 16  ;;  %v7064_v21 = vld [vmem:[#allocation4 + $0x1e0] sm:$0xff] }
 0x295   : >> { %v7075_v7 = vld [vmem:[#allocation4 + $0x238] sm:$0xff]  ;;  %v3080_v17 = vor.u32 %v3079_v26, %v3076_v8 }
 0x296   : >> { %4964 = vmatpush.bf16.msrb.mxu3 %v7030_v2  ;;  %5013 = vmatpush.bf16.msrb.mxu0 %v7038_v6  ;;  %v3067_v2 = vrot.slane %v3066_v23, 4  ;;  %v7058_v6 = vld [vmem:[#allocation4 + $0x1b0] sm:$0xff] }
 0x298   : >> { %4916 = vmatpush.bf16.msrb.mxu2 %v7021_v36  ;;  %4867 = vmatpush.bf16.msrb.mxu1 %v7013_v35  ;;  %v3368_v36 = vrot.slane %v3367_v44, 4  ;;  %v7066_v35 = vld [vmem:[#allocation4 + $0x1f0] sm:$0xff]  ;;  %v3072_v42 = vsel %vm7680_vm4, %v3067_v2, %v3071_v63  ;;  %v3400_v44 = vrot.slane %v3398_v59, 4  ;;  %v3081_v63 = vrot.slane %v3080_v17, 4 }
 0x299   : >> { %v3967_v33 = vunpack.c.l.b16 %v3072_v42  ;;  %v7072_v42 = vld [vmem:[#allocation4 + $0x220] sm:$0xff] }
 0x29a   : >> { %4965 = vmatpush.bf16.msrb.mxu3 %v7029_v22  ;;  %5014 = vmatpush.bf16.msrb.mxu0 %v7037_v38  ;;  %v3087_v22 = vshrl.u32 %v8621_v13, 16  ;;  %v3062_v38 = vsel %vm7680_vm4, %v3057_v3, %v8608_v29  ;;  %v7073_v29 = vld [vmem:[#allocation4 + $0x228] sm:$0xff] }
 0x29b   : >> { %v3966_v19 = vunpack.c.l.b16 %v3062_v38 }
 0x29c   : >> { %4917 = vmatpush.bf16.msrb.mxu2 %v7020_v57  ;;  %4868 = vmatpush.bf16.msrb.mxu1 %v7012_v30  ;;  %v3373_v57 = vsel %vm7680_vm4, %v3368_v36, %v8610_v62  ;;  %v3383_v30 = vsel %vm7680_vm4, %v3378_v51, %v3382_v12  ;;  %v3089_v0 = vrot.slane %v3087_v22, 4  ;;  %v3999_v62 = vunpack.c.l.b16 %v3265_v58  ;;  %v8655_v36 = vld [vmem:[%s8551_s30 + $0x28] sm:$0xf]  ;;  %v7048_v22 = vld [vmem:[#allocation4 + $0x160] sm:$0xff] }
 0x29d   : >> { %v4070_v37 = vunpack.c.l.b16 %v3373_v57  ;;  %v3981_v15 = vpack.c.b16 %v3967_v33, %v3966_v19  ;;  %v3086_v51 = vsel %vm7680_vm4, %v3081_v63, %v8643_v54  ;;  %v3017_v19 = vld [vmem:[%s8551_s30 + $0x2c] sm:$0x1]  ;;  %v6990_v63 = vld [vmem:[%s8551_s30 + $0x24] sm:$0xff] }
 0x29e   : >> { %4966 = vmatpush.bf16.msrb.mxu3 %v7028_v43  ;;  %5015 = vmatpush.bf16.msrb.mxu0 %v7036_v39  ;;  %v4071_v43 = vunpack.c.l.b16 %v3383_v30  ;;  %v3093_v39 = vshll.u32 %v3016_v61, 16  ;;  %v3090_v23 = vor.u32 %v3089_v0, %v8643_v54  ;;  %v4013_v32 = vpack.c.b16 %v3999_v62, %v3998_v4 }
 0x29f   : >> { %4869 = vmatmul.bf16.vlgmr.msrb.gmra.mxu1 %v3980_v14  ;;  %4918 = vmatmul.bf16.vlgmr.msrb.gmra.mxu2 %v4012_v25  ;;  %v3268_v14 = vrot.slane %v8621_v13, 5  ;;  %v6399_v25 = vld [vmem:[%s8551_s30 + $0x2c] sm:$0x1]  ;;  %v3271_v13 = vrot.slane %v3016_v61, 5  ;;  %v3968_v26 = vunpack.c.l.b16 %v3086_v51 }
 0x2a0   : >> { %5106 = vmatpush.bf16.msra.mxu2 %v7059_v28  ;;  %5057 = vmatpush.bf16.msra.mxu1 %v7051_v5  ;;  %v3388_v28 = vshll.u32 %v6385_v52, 16  ;;  %v3394_v5 = vshll.u32 %v6386_v1, 16  ;;  %v4085_v41 = vpack.c.b16 %v4071_v43, %v4070_v37  ;;  %v3091_v53 = vrot.slane %v3090_v23, 4 }
 0x2a1   : >> { %4967 = vmatmul.bf16.vlgmr.msrb.gmra.mxu3 %v6988_v45  ;;  %5016 = vmatmul.bf16.vlgmr.msrb.gmra.mxu0 %v4084_v47  ;;  %v3219_v45 = vld [vmem:[%s8551_s30 + $0x18] sm:$0xe]  ;;  %v3095_v3 = vrot.slane %v3093_v39, 5  ;;  %v3270_v9 = vrot.slane %v3268_v14, 4  ;;  %v3098_v52 = vshrl.u32 %v3004_v55, 16  ;;  %v3107_v1 = vshll.u32 %v8655_v36, 16 }
 0x2a2   : >> { %5155 = vmatpush.bf16.msra.mxu3 %v7067_v46  ;;  %5204 = vmatpush.bf16.msra.mxu0 %v7075_v7  ;;  %v3387_v46 = vrot.slane %v3385_v27, 4  ;;  %v3390_v7 = vrot.slane %v3388_v28, 5  ;;  %v8646_v50 = vrot.slane %v3394_v5, 5  ;;  %v6989_v47 = vld [vmem:[%s8551_s30 + $0x18] sm:$0xff]  ;;  %v6373_v60 = vrot.slane %v3219_v45, 9 }
 0x2a3   : >> { %v3096_v12 = vsel %vm7680_vm4, %v3091_v53, %v3095_v3  ;;  %v3272_v58 = vsel %vm7694_vm5, %v3270_v9, %v3271_v13  ;;  %v3100_v27 = vrot.slane %v3098_v52, 4  ;;  %v8676_v33 = vrot.slane %v3107_v1, 5  ;;  %v3006_v3 = vld [vmem:[%s8551_s30 + $0x30] sm:$0xf] }
 0x2a4   : >> { %5107 = vmatpush.bf16.msra.mxu2 %v7058_v6  ;;  %5058 = vmatpush.bf16.msra.mxu1 %v7050_v40  ;;  %v3391_v2 = vor.u32 %v3390_v7, %v3387_v46  ;;  %v3401_v6 = vor.u32 %v3400_v44, %v8646_v50  ;;  %v3404_v40 = vshll.u32 %v6399_v25, 16  ;;  %v3269_v10 = vsel %vm7694_vm5, %v6373_v60, %v3268_v14  ;;  %v6400_v46 = vld [vmem:[%s8551_s30 + $0x38] sm:$0x1] }
 0x2a5   : >> { %v3969_v61 = vunpack.c.l.b16 %v3096_v12  ;;  %v4000_v5 = vunpack.c.l.b16 %v3269_v10  ;;  %v4001_v59 = vunpack.c.l.b16 %v3272_v58  ;;  %v3275_v25 = vrot.slane %v8655_v36, 5  ;;  %v6389_v10 = vld [vmem:[%s8551_s30 + $0x3c] sm:$0xf]  ;;  %v6390_v58 = vld [vmem:[%s8551_s30 + $0x40] sm:$0xf] }
 0x2a6   : >> { %5156 = vmatpush.bf16.msra.mxu3 %v7066_v35  ;;  %5205 = vmatpush.bf16.msra.mxu0 %v7074_v11  ;;  %v6387_v35 = vld [vmem:[%s8551_s30 + $0x30] sm:$0xf]  ;;  %v6388_v11 = vld [vmem:[%s8551_s30 + $0x34] sm:$0xf]  ;;  %v3392_v49 = vrot.slane %v3391_v2, 4  ;;  %v3402_v38 = vrot.slane %v3401_v6, 4 }
 0x2a7   : >> { %v3412_v57 = vshll.u32 %v6387_v35, 16  ;;  %v3418_v30 = vshll.u32 %v6388_v11, 16  ;;  %v3422_v8 = vshrl.u32 %v6388_v11, 16  ;;  %v3982_v44 = vpack.c.b16 %v3969_v61, %v3968_v26  ;;  %v8711_v61 = vld [vmem:[%s8551_s30 + $0x38] sm:$0x1] }
 0x2a8   : >> { %5108 = vmatpush.bf16.msra.mxu2 %v7057_v56  ;;  %5059 = vmatpush.bf16.msra.mxu1 %v7049_v48  ;;  %v3406_v56 = vrot.slane %v3404_v40, 5  ;;  %v3101_v48 = vshll.u32 %v3004_v55, 16  ;;  %v3397_v54 = vsel %vm7680_vm4, %v3392_v49, %v8646_v50  ;;  %v3117_v50 = vshll.u32 %v3017_v19, 16  ;;  %v8688_v40 = vld [vmem:[%s8551_s30 + $0x34] sm:$0xf] }
 0x2a9   : >> { %v3414_v37 = vrot.slane %v3412_v57, 5  ;;  %v8678_v43 = vrot.slane %v3418_v30, 5  ;;  %v3424_v39 = vrot.slane %v3422_v8, 4  ;;  %v4072_v17 = vunpack.c.l.b16 %v3397_v54 }
 0x2aa   : >> { %5157 = vmatpush.bf16.msra.mxu3 %v7065_v31  ;;  %5206 = vmatpush.bf16.msra.mxu0 %v7073_v29  ;;  %v3111_v31 = vshrl.u32 %v8655_v36, 16  ;;  %v3409_v29 = vshrl.u32 %v6387_v35, 16  ;;  %v3407_v0 = vsel %vm7680_vm4, %v3402_v38, %v3406_v56  ;;  %v3103_v28 = vrot.slane %v3101_v48, 5  ;;  %v7047_v38 = vld [vmem:[#allocation4 + $0x158] sm:$0xff] }
 0x2ab   : >> { %v4073_v23 = vunpack.c.l.b16 %v3407_v0  ;;  %v3425_v45 = vor.u32 %v3424_v39, %v8678_v43  ;;  %v3119_v6 = vrot.slane %v3117_v50, 5  ;;  %v3277_v13 = vrot.slane %v3275_v25, 4  ;;  %v7071_v56 = vld [vmem:[#allocation4 + $0x218] sm:$0xff]  ;;  %v6401_v50 = vld [vmem:[%s8551_s30 + $0x44] sm:$0x1] }
 0x2ac   : >> { %5109 = vmatpush.bf16.msra.mxu2 %v7056_v18  ;;  %5060 = vmatpush.bf16.msra.mxu1 %v7048_v22  ;;  %v3113_v4 = vrot.slane %v3111_v31, 4  ;;  %v3411_v62 = vrot.slane %v3409_v29, 4  ;;  %v3104_v7 = vor.u32 %v3103_v28, %v3100_v27  ;;  %v3278_v55 = vrot.slane %v3017_v19, 5  ;;  %v7063_v22 = vld [vmem:[#allocation4 + $0x1d8] sm:$0xff] }
 0x2ad   : >> { %v4086_v53 = vpack.c.b16 %v4073_v23, %v4072_v17  ;;  %v3426_v35 = vrot.slane %v3425_v45, 4  ;;  %v3122_v51 = vshrl.u32 %v3006_v3, 16  ;;  %v3125_v12 = vshll.u32 %v3006_v3, 16 }
 0x2ae   : >> { %5158 = vmatpush.bf16.msra.mxu3 %v7064_v21  ;;  %5207 = vmatpush.bf16.msra.mxu0 %v7072_v42  ;;  %v3114_v14 = vor.u32 %v3113_v4, %v8676_v33  ;;  %v3105_v2 = vrot.slane %v3104_v7, 4  ;;  %v3131_v49 = vshll.u32 %v8688_v40, 16  ;;  %v3135_v18 = vshrl.u32 %v8688_v40, 16  ;;  %v7055_v21 = vld [vmem:[#allocation4 + $0x198] sm:$0xff] }
 0x2af   : >> { %4874 = vmatmul.bf16.gmra.mxu1 %v3981_v15  ;;  %4923 = vmatmul.bf16.gmra.mxu2 %v4013_v32  ;;  %v4014_v15 = vpack.c.b16 %v4001_v59, %v4000_v5  ;;  %v3220_v32 = vld [vmem:[%s8551_s30 + $0x24] sm:$0xe]  ;;  %v3279_v1 = vsel %vm7694_vm5, %v3277_v13, %v3278_v55  ;;  %v3124_v57 = vrot.slane %v3122_v51, 4  ;;  %v3127_v30 = vrot.slane %v3125_v12, 5  ;;  %v7046_v51 = vld [vmem:[#allocation4 + $0x150] sm:$0xff] }
 0x2b0   : >> { %v3115_v60 = vrot.slane %v3114_v14, 4  ;;  %v6374_v9 = vrot.slane %v3220_v32, 9  ;;  %v3110_v52 = vsel %vm7680_vm4, %v3105_v2, %v8676_v33  ;;  %5110 = vmatpush.bf16.msra.mxu2 %v7055_v21  ;;  %5061 = vmatpush.bf16.msra.mxu1 %v7047_v38  ;;  %v8708_v8 = vrot.slane %v3131_v49, 5  ;;  %v7070_v38 = vld [vmem:[#allocation4 + $0x210] sm:$0xff] }
 0x2b1   : >> { %4972 = vmatmul.bf16.gmra.mxu3 %v6989_v47  ;;  %5021 = vmatmul.bf16.gmra.mxu0 %v4085_v41  ;;  %v3415_v41 = vor.u32 %v3414_v37, %v3411_v62  ;;  %v3428_v47 = vshll.u32 %v6400_v46, 16  ;;  %v3137_v26 = vrot.slane %v3135_v18, 4  ;;  %v3433_v54 = vshrl.u32 %v6389_v10, 16 }
 0x2b2   : >> { %v3120_v48 = vsel %vm7680_vm4, %v3115_v60, %v3119_v6  ;;  %v3276_v42 = vsel %vm7694_vm5, %v6374_v9, %v3275_v25  ;;  %5159 = vmatpush.bf16.msra.mxu3 %v7063_v22  ;;  %5208 = vmatpush.bf16.msra.mxu0 %v7071_v56  ;;  %v3436_v0 = vshll.u32 %v6389_v10, 16  ;;  %v3442_v27 = vshll.u32 %v6390_v58, 16  ;;  %v6991_v25 = vld [vmem:[%s8551_s30 + $0x30] sm:$0xff]  ;;  %v3008_v6 = vld [vmem:[%s8551_s30 + $0x3c] sm:$0xf] }
 0x2b3   : >> { %v3416_v36 = vrot.slane %v3415_v41, 4  ;;  %v3430_v11 = vrot.slane %v3428_v47, 5  ;;  %v3446_v28 = vshrl.u32 %v6390_v58, 16  ;;  %v3970_v5 = vunpack.c.l.b16 %v3110_v52  ;;  %v8721_v60 = vld [vmem:[%s8551_s30 + $0x40] sm:$0xf] }
 0x2b4   : >> { %v3971_v59 = vunpack.c.l.b16 %v3120_v48  ;;  %v4002_v19 = vunpack.c.l.b16 %v3276_v42  ;;  %v4003_v33 = vunpack.c.l.b16 %v3279_v1  ;;  %v3128_v37 = vor.u32 %v3127_v30, %v3124_v57  ;;  %v6391_v9 = vld [vmem:[%s8551_s30 + $0x48] sm:$0xf]  ;;  %v6392_v22 = vld [vmem:[%s8551_s30 + $0x4c] sm:$0xf]  ;;  %5062 = vmatpush.bf16.msra.mxu1 %v7046_v51  ;;  %v7061_v51 = vld [vmem:[#allocation4 + $0x1c8] sm:$0xff] }
 0x2b5   : >> { %v3421_v31 = vsel %vm7680_vm4, %v3416_v36, %v8678_v43  ;;  %v3431_v29 = vsel %vm7680_vm4, %v3426_v35, %v3430_v11  ;;  %v3138_v43 = vor.u32 %v3137_v26, %v8708_v8  ;;  %v3141_v39 = vshll.u32 %v8711_v61, 16  ;;  %v7054_v35 = vld [vmem:[#allocation4 + $0x190] sm:$0xff] }
 0x2b6   : >> { %v4074_v4 = vunpack.c.l.b16 %v3421_v31  ;;  %v4075_v62 = vunpack.c.l.b16 %v3431_v29  ;;  %v3435_v17 = vrot.slane %v3433_v54, 4  ;;  %v3438_v23 = vrot.slane %v3436_v0, 5  ;;  %v7062_v11 = vld [vmem:[#allocation4 + $0x1d0] sm:$0xff]  ;;  %5111 = vmatpush.bf16.msra.mxu2 %v7054_v35  ;;  %5209 = vmatpush.bf16.msra.mxu0 %v7070_v38  ;;  %v3019_v54 = vld [vmem:[%s8551_s30 + $0x44] sm:$0x1] }
 0x2b7   : >> { %v3444_v46 = vrot.slane %v3442_v27, 5  ;;  %v3448_v7 = vrot.slane %v3446_v28, 4  ;;  %v4015_v14 = vpack.c.b16 %v4003_v33, %v4002_v19  ;;  %v3129_v32 = vrot.slane %v3128_v37, 4  ;;  %5160 = vmatpush.bf16.msra.mxu3 %v7062_v11  ;;  %v7053_v35 = vld [vmem:[#allocation4 + $0x188] sm:$0xff]  ;;  %v6393_v11 = vld [vmem:[%s8551_s30 + $0x54] sm:$0xf] }
 0x2b8   : >> { %v3143_v41 = vrot.slane %v3141_v39, 5  ;;  %v3282_v45 = vrot.slane %v8688_v40, 5  ;;  %v3139_v47 = vrot.slane %v3138_v43, 4  ;;  %v3452_v2 = vshll.u32 %v6401_v50, 16 }
 0x2b9   : >> { %v3449_v3 = vor.u32 %v3448_v7, %v3444_v46  ;;  %v3134_v13 = vsel %vm7680_vm4, %v3129_v32, %v8708_v8  ;;  %v3285_v36 = vrot.slane %v8711_v61, 5  ;;  %v3146_v56 = vshrl.u32 %v3008_v6, 16 }
 0x2ba   : >> { %v3284_v40 = vrot.slane %v3282_v45, 4  ;;  %v3144_v12 = vsel %vm7680_vm4, %v3139_v47, %v3143_v41  ;;  %v3454_v21 = vrot.slane %v3452_v2, 5  ;;  %v3149_v52 = vshll.u32 %v3008_v6, 16  ;;  %v3222_v41 = vld [vmem:[%s8551_s30 + $0x3c] sm:$0xe]  ;;  %5112 = vmatpush.bf16.msra.mxu2 %v7053_v35 }
 0x2bb   : >> { %v3450_v18 = vrot.slane %v3449_v3, 4  ;;  %v3155_v48 = vshll.u32 %v8721_v60, 16  ;;  %v3159_v42 = vshrl.u32 %v8721_v60, 16  ;;  %v3457_v10 = vshrl.u32 %v6391_v9, 16  ;;  %v3010_v2 = vld [vmem:[%s8551_s30 + $0x48] sm:$0xf]  ;;  %5161 = vmatpush.bf16.msra.mxu3 %v7061_v51 }
 0x2bc   : >> { %v3460_v58 = vshll.u32 %v6391_v9, 16  ;;  %v3286_v31 = vsel %vm7694_vm5, %v3284_v40, %v3285_v36  ;;  %v3466_v29 = vshll.u32 %v6392_v22, 16  ;;  %v3470_v57 = vshrl.u32 %v6392_v22, 16  ;;  %v8754_v6 = vld [vmem:[%s8551_s30 + $0x4c] sm:$0xf]  ;;  %v7060_v35 = vld [vmem:[#allocation4 + $0x1c0] sm:$0xff] }
 0x2bd   : >> { %v3972_v30 = vunpack.c.l.b16 %v3134_v13  ;;  %v3973_v8 = vunpack.c.l.b16 %v3144_v12  ;;  %v3455_v61 = vsel %vm7680_vm4, %v3450_v18, %v3454_v21  ;;  %v3148_v0 = vrot.slane %v3146_v56, 4  ;;  %v6394_v22 = vld [vmem:[%s8551_s30 + $0x58] sm:$0xf] }
 0x2be   : >> { %v3151_v27 = vrot.slane %v3149_v52, 5  ;;  %v8742_v28 = vrot.slane %v3155_v48, 5  ;;  %v4005_v19 = vunpack.c.l.b16 %v3286_v31  ;;  %v3459_v33 = vrot.slane %v3457_v10, 4 }
 0x2bf   : >> { %4879 = vmatmul.bf16.gmra.mxu1 %v3982_v44  ;;  %4928 = vmatmul.bf16.gmra.mxu2 %v4014_v15  ;;  %v3983_v44 = vpack.c.b16 %v3971_v59, %v3970_v5  ;;  %v4087_v15 = vpack.c.b16 %v4075_v62, %v4074_v4  ;;  %v3161_v5 = vrot.slane %v3159_v42, 4  ;;  %v3462_v4 = vrot.slane %v3460_v58, 5  ;;  %v7045_v58 = vld [vmem:[#allocation4 + $0x148] sm:$0xff] }
 0x2c0   : >> { %v4077_v37 = vunpack.c.l.b16 %v3455_v61  ;;  %v8744_v43 = vrot.slane %v3466_v29, 5  ;;  %v3472_v39 = vrot.slane %v3470_v57, 4  ;;  %v3984_v50 = vpack.c.b16 %v3973_v8, %v3972_v30  ;;  %5063 = vmatpush.bf16.msra.mxu1 %v7045_v58  ;;  %5162 = vmatpush.bf16.msra.mxu3 %v7060_v35 }
 0x2c1   : >> { %4977 = vmatmul.bf16.gmra.mxu3 %v6990_v63  ;;  %5026 = vmatmul.bf16.gmra.mxu0 %v4086_v53  ;;  %v3221_v63 = vld [vmem:[%s8551_s30 + $0x30] sm:$0xe]  ;;  %v3439_v53 = vor.u32 %v3438_v23, %v3435_v17  ;;  %v3165_v17 = vshll.u32 %v3019_v54, 16  ;;  %v6402_v23 = vld [vmem:[%s8551_s30 + $0x50] sm:$0x1]  ;;  %v3162_v7 = vor.u32 %v3161_v5, %v8742_v28  ;;  %v6376_v9 = vrot.slane %v3222_v41, 9 }
 0x2c2   : >> { %v6375_v55 = vrot.slane %v3221_v63, 9  ;;  %v3476_v47 = vshll.u32 %v6402_v23, 16  ;;  %v3170_v12 = vshrl.u32 %v3010_v2, 16  ;;  %v3179_v18 = vshll.u32 %v8754_v6, 16  ;;  %v8779_v23 = vld [vmem:[%s8551_s30 + $0x5c] sm:$0x1] }
 0x2c3   : >> { %v3440_v49 = vrot.slane %v3439_v53, 4  ;;  %v3167_v63 = vrot.slane %v3165_v17, 5  ;;  %v3163_v3 = vrot.slane %v3162_v7, 4  ;;  %v3183_v21 = vshrl.u32 %v8754_v6, 16 }
 0x2c4   : >> { %v3283_v1 = vsel %vm7694_vm5, %v6375_v55, %v3282_v45  ;;  %v3473_v45 = vor.u32 %v3472_v39, %v8744_v43  ;;  %v3478_v36 = vrot.slane %v3476_v47, 5  ;;  %v3481_v42 = vshrl.u32 %v6393_v11, 16 }
 0x2c5   : >> { %v3445_v26 = vsel %vm7680_vm4, %v3440_v49, %v3444_v46  ;;  %v4004_v59 = vunpack.c.l.b16 %v3283_v1  ;;  %v3152_v46 = vor.u32 %v3151_v27, %v3148_v0  ;;  %v3173_v49 = vshll.u32 %v3010_v2, 16 }
 0x2c6   : >> { %v4076_v62 = vunpack.c.l.b16 %v3445_v26  ;;  %v3474_v40 = vrot.slane %v3473_v45, 4  ;;  %v3168_v56 = vsel %vm7680_vm4, %v3163_v3, %v3167_v63  ;;  %v3484_v10 = vshll.u32 %v6393_v11, 16 }
 0x2c7   : >> { %v3153_v53 = vrot.slane %v3152_v46, 4  ;;  %v3490_v29 = vshll.u32 %v6394_v22, 16  ;;  %v3494_v57 = vshrl.u32 %v6394_v22, 16  ;;  %v3172_v30 = vrot.slane %v3170_v12, 4 }
 0x2c8   : >> { %v4088_v32 = vpack.c.b16 %v4077_v37, %v4076_v62  ;;  %v3479_v31 = vsel %vm7680_vm4, %v3474_v40, %v3478_v36  ;;  %v3175_v8 = vrot.slane %v3173_v49, 5  ;;  %v8774_v26 = vrot.slane %v3179_v18, 5  ;;  %v8787_v40 = vld [vmem:[%s8551_s30 + $0x58] sm:$0xf]  ;;  %v6395_v18 = vld [vmem:[%s8551_s30 + $0x60] sm:$0xf] }
 0x2c9   : >> { %v3158_v38 = vsel %vm7680_vm4, %v3153_v53, %v8742_v28  ;;  %v3185_v61 = vrot.slane %v3183_v21, 4  ;;  %v3975_v27 = vunpack.c.l.b16 %v3168_v56  ;;  %v4079_v62 = vunpack.c.l.b16 %v3479_v31  ;;  %v7052_v36 = vld [vmem:[#allocation4 + $0x180] sm:$0xff]  ;;  %v6396_v21 = vld [vmem:[%s8551_s30 + $0x64] sm:$0xf] }
 0x2ca   : >> { %v3974_v0 = vunpack.c.l.b16 %v3158_v38  ;;  %v3492_v37 = vrot.slane %v3490_v29, 5  ;;  %v3176_v39 = vor.u32 %v3175_v8, %v3172_v30  ;;  %v3296_v7 = vrot.slane %v8754_v6, 5  ;;  %5113 = vmatpush.bf16.msra.mxu2 %v7052_v36 }
 0x2cb   : >> { %v3186_v17 = vor.u32 %v3185_v61, %v8774_v26  ;;  %v3500_v45 = vshll.u32 %v8779_v23, 16  ;;  %v3203_v56 = vshll.u32 %v8787_v40, 16  ;;  %v3505_v58 = vshrl.u32 %v6395_v18, 16 }
 0x2cc   : >> { %v3177_v47 = vrot.slane %v3176_v39, 4  ;;  %v3298_v2 = vrot.slane %v3296_v7, 4  ;;  %v3514_v31 = vshll.u32 %v6396_v21, 16  ;;  %v3518_v29 = vshrl.u32 %v6396_v21, 16 }
 0x2cd   : >> { %v3187_v63 = vrot.slane %v3186_v17, 4 }
 0x2ce   : >> { %v3182_v11 = vsel %vm7680_vm4, %v3177_v47, %v8774_v26 }
 0x2cf   : >> { %4884 = vmatmul.bf16.gmra.mxu1 %v3983_v44  ;;  %4933 = vmatmul.bf16.gmra.mxu2 %v4015_v14  ;;  %v4016_v44 = vpack.c.b16 %v4005_v19, %v4004_v59  ;;  %v3289_v14 = vrot.slane %v8721_v60, 5  ;;  %v3292_v60 = vrot.slane %v3019_v54, 5  ;;  %v7069_v54 = vld [vmem:[#allocation4 + $0x208] sm:$0xff]  ;;  %v3020_v59 = vld [vmem:[%s8551_s30 + $0x50] sm:$0x1]  ;;  %v3483_v19 = vrot.slane %v3481_v42, 4 }
 0x2d0   : >> { %5210 = vmatpush.bf16.msra.mxu0 %v7069_v54  ;;  %v3189_v46 = vshll.u32 %v3020_v59, 16  ;;  %v3976_v30 = vunpack.c.l.b16 %v3182_v11 }
 0x2d1   : >> { %4982 = vmatmul.bf16.gmra.mxu3 %v6991_v25  ;;  %5031 = vmatmul.bf16.gmra.mxu0 %v4087_v15  ;;  %v3463_v25 = vor.u32 %v3462_v4, %v3459_v33  ;;  %v6992_v15 = vld [vmem:[%s8551_s30 + $0x3c] sm:$0xff]  ;;  %v3291_v13 = vrot.slane %v3289_v14, 4  ;;  %v3290_v52 = vsel %vm7694_vm5, %v6376_v9, %v3289_v14  ;;  %v3486_v33 = vrot.slane %v3484_v10, 5  ;;  %v3223_v14 = vld [vmem:[%s8551_s30 + $0x48] sm:$0xe] }
 0x2d2   : >> { %v4006_v28 = vunpack.c.l.b16 %v3290_v52  ;;  %v3191_v53 = vrot.slane %v3189_v46, 5  ;;  %v6377_v3 = vrot.slane %v3223_v14, 9  ;;  %v3299_v9 = vrot.slane %v3020_v59, 5 }
 0x2d3   : >> { %v3464_v55 = vrot.slane %v3463_v25, 4  ;;  %v3293_v48 = vsel %vm7694_vm5, %v3291_v13, %v3292_v60  ;;  %v3487_v25 = vor.u32 %v3486_v33, %v3483_v19  ;;  %v3012_v13 = vld [vmem:[%s8551_s30 + $0x54] sm:$0xf]  ;;  %v3207_v52 = vshrl.u32 %v8787_v40, 16  ;;  %v3021_v19 = vld [vmem:[%s8551_s30 + $0x5c] sm:$0x1] }
 0x2d4   : >> { %v4007_v5 = vunpack.c.l.b16 %v3293_v48  ;;  %v3192_v51 = vsel %vm7680_vm4, %v3187_v63, %v3191_v53  ;;  %v3297_v12 = vsel %vm7694_vm5, %v6377_v3, %v3296_v7  ;;  %v3300_v49 = vsel %vm7694_vm5, %v3298_v2, %v3299_v9  ;;  %v7044_v48 = vld [vmem:[#allocation4 + $0x140] sm:$0xff] }
 0x2d5   : >> { %v3469_v1 = vsel %vm7680_vm4, %v3464_v55, %v8744_v43  ;;  %v3496_v43 = vrot.slane %v3494_v57, 4  ;;  %v3488_v6 = vrot.slane %v3487_v25, 4  ;;  %v3502_v55 = vrot.slane %v3500_v45, 5  ;;  %5064 = vmatpush.bf16.msra.mxu1 %v7044_v48  ;;  %v7068_v57 = vld [vmem:[#allocation4 + $0x200] sm:$0xff] }
 0x2d6   : >> { %v4078_v4 = vunpack.c.l.b16 %v3469_v1  ;;  %v3194_v22 = vshrl.u32 %v3012_v13, 16  ;;  %v3197_v38 = vshll.u32 %v3012_v13, 16  ;;  %v3508_v1 = vshll.u32 %v6395_v18, 16  ;;  %5211 = vmatpush.bf16.msra.mxu0 %v7068_v57  ;;  %v6423_v2 = vld [vmem:[%s8551_s30 + $0x18] sm:$0xf] }
 0x2d7   : >> { %v3497_v41 = vor.u32 %v3496_v43, %v3492_v37  ;;  %v3493_v42 = vsel %vm7680_vm4, %v3488_v6, %v3492_v37  ;;  %v3977_v8 = vunpack.c.l.b16 %v3192_v51  ;;  %v4008_v26 = vunpack.c.l.b16 %v3297_v12  ;;  %v8808_v43 = vld [vmem:[%s8551_s30 + $0x68] sm:$0x1]  ;;  %v8820_v9 = vld [vmem:[%s8551_s30 + $0x1c] sm:$0xf] }
 0x2d8   : >> { %v4009_v61 = vunpack.c.l.b16 %v3300_v49  ;;  %v3196_v54 = vrot.slane %v3194_v22, 4  ;;  %v3507_v33 = vrot.slane %v3505_v58, 4  ;;  %v3520_v37 = vrot.slane %v3518_v29, 4 }
 0x2d9   : >> { %v3498_v60 = vrot.slane %v3497_v41, 4  ;;  %v3986_v39 = vpack.c.b16 %v3977_v8, %v3976_v30  ;;  %v3213_v25 = vshll.u32 %v3021_v19, 16  ;;  %v3224_v41 = vld [vmem:[%s8551_s30 + $0x54] sm:$0xe]  ;;  %v3524_v63 = vshll.u32 %v8808_v43, 16 }
 0x2da   : >> { %v4018_v17 = vpack.c.b16 %v4009_v61, %v4008_v26  ;;  %v6378_v13 = vrot.slane %v3224_v41, 9  ;;  %v3645_v51 = vshrl.u32 %v6423_v2, 16  ;;  %v3648_v12 = vshll.u32 %v6423_v2, 16 }
 0x2db   : >> { %v3503_v10 = vsel %vm7680_vm4, %v3498_v60, %v3502_v55  ;;  %v3215_v6 = vrot.slane %v3213_v25, 5  ;;  %v3306_v55 = vrot.slane %v3021_v19, 5  ;;  %v3526_v35 = vrot.slane %v3524_v63, 5  ;;  %v6447_v25 = vld [vmem:[%s8551_s30 + $0x18] sm:$0xe] }
 0x2dc   : >> { %v4081_v59 = vunpack.c.l.b16 %v3503_v10  ;;  %v3654_v49 = vshll.u32 %v8820_v9, 16  ;;  %v3658_v18 = vshrl.u32 %v8820_v9, 16 }
 0x2de   : >> { %v3656_v29 = vrot.slane %v3654_v49, 5  ;;  %v3660_v57 = vrot.slane %v3658_v18, 4 }
 0x2df   : >> { %4889 = vmatmul.bf16.gmra.mxu1 %v3984_v50  ;;  %4938 = vmatmul.bf16.gmra.mxu2 %v4016_v44  ;;  %v3985_v50 = vpack.c.b16 %v3975_v27, %v3974_v0  ;;  %v4017_v44 = vpack.c.b16 %v4007_v5, %v4006_v28  ;;  %v3199_v0 = vrot.slane %v3197_v38, 5  ;;  %v3205_v27 = vrot.slane %v3203_v56, 5 }
 0x2e0   : >> { %v3209_v28 = vrot.slane %v3207_v52, 4  ;;  %v4080_v5 = vunpack.c.l.b16 %v3493_v42 }
 0x2e1   : >> { %4987 = vmatmul.bf16.gmra.mxu3 %v6992_v15  ;;  %5036 = vmatmul.bf16.gmra.mxu0 %v4088_v32  ;;  %v6993_v15 = vld [vmem:[%s8551_s30 + $0x48] sm:$0xff]  ;;  %v4089_v32 = vpack.c.b16 %v4079_v62, %v4078_v4  ;;  %v3510_v4 = vrot.slane %v3508_v1, 5  ;;  %v3516_v62 = vrot.slane %v3514_v31, 5  ;;  %v3200_v46 = vor.u32 %v3199_v0, %v3196_v54 }
 0x2e2   : >> { %v3210_v7 = vor.u32 %v3209_v28, %v3205_v27  ;;  %v4090_v14 = vpack.c.b16 %v4081_v59, %v4080_v5  ;;  %v3647_v1 = vrot.slane %v3645_v51, 4  ;;  %v3650_v31 = vrot.slane %v3648_v12, 5  ;;  %v7261_v5 = vld [vmem:[%s8551_s30 + $0x10] sm:$0xf] }
 0x2e3   : >> { %v3511_v45 = vor.u32 %v3510_v4, %v3507_v33  ;;  %v3521_v47 = vor.u32 %v3520_v37, %v3516_v62  ;;  %v3201_v53 = vrot.slane %v3200_v46, 4  ;;  %v3562_v59 = vrot.slane %v7261_v5, 5  ;;  %v6440_v5 = vld [vmem:[%s8551_s30 + $0x2c] sm:$0x1] }
 0x2e4   : >> { %v3211_v3 = vrot.slane %v3210_v7, 4  ;;  %v3651_v19 = vor.u32 %v3650_v31, %v3647_v1  ;;  %v3661_v33 = vor.u32 %v3660_v57, %v3656_v29  ;;  %v3870_v46 = vrot.slane %v8820_v9, 5 }
 0x2e5   : >> { %v3522_v36 = vrot.slane %v3521_v47, 4  ;;  %v3206_v38 = vsel %vm7680_vm4, %v3201_v53, %v3205_v27  ;;  %v6439_v27 = vld [vmem:[%s8551_s30 + $0x20] sm:$0x1]  ;;  %v3564_v63 = vrot.slane %v3562_v59, 4 }
 0x2e6   : >> { %v3216_v56 = vsel %vm7680_vm4, %v3211_v3, %v3215_v6  ;;  %v3978_v30 = vunpack.c.l.b16 %v3206_v38  ;;  %v3652_v53 = vrot.slane %v3651_v19, 4  ;;  %v3662_v3 = vrot.slane %v3661_v33, 4 }
 0x2e7   : >> { %v3527_v58 = vsel %vm7680_vm4, %v3522_v36, %v3526_v35  ;;  %v3979_v8 = vunpack.c.l.b16 %v3216_v56  ;;  %v6455_v6 = vrot.slane %v6447_v25, 9  ;;  %v3872_v9 = vrot.slane %v3870_v46, 4 }
 0x2e8   : >> { %v4083_v0 = vunpack.c.l.b16 %v3527_v58  ;;  %v3657_v12 = vsel %vm7680_vm4, %v3652_v53, %v3656_v29 }
 0x2e9   : >> { %v3871_v18 = vsel %vm7694_vm5, %v6455_v6, %v3870_v46  ;;  %v4172_v57 = vunpack.c.l.b16 %v3657_v12 }
 0x2ef   : >> { %4894 = vmatmul.bf16.gmra.mxu1 %v3985_v50  ;;  %4943 = vmatmul.bf16.gmra.mxu2 %v4017_v44  ;;  %v6994_v44 = vld [vmem:[%s8551_s30 + $0x54] sm:$0xff] }
 0x2f1   : >> { %4992 = vmatmul.bf16.gmra.mxu3 %v6993_v15  ;;  %5041 = vmatmul.bf16.gmra.mxu0 %v4089_v32  ;;  %v3303_v15 = vrot.slane %v8787_v40, 5  ;;  %v3512_v40 = vrot.slane %v3511_v45, 4 }
 0x2f3   : >> { %v3305_v60 = vrot.slane %v3303_v15, 4  ;;  %v3304_v52 = vsel %vm7694_vm5, %v6378_v13, %v3303_v15  ;;  %v3517_v10 = vsel %vm7680_vm4, %v3512_v40, %v3516_v62  ;;  %v3987_v62 = vpack.c.b16 %v3979_v8, %v3978_v30  ;;  %v7262_v15 = vld [vmem:[%s8551_s30 + $0x14] sm:$0x1] }
 0x2f4   : >> { %v4010_v26 = vunpack.c.l.b16 %v3304_v52  ;;  %v4082_v54 = vunpack.c.l.b16 %v3517_v10  ;;  %v3565_v41 = vrot.slane %v7262_v15, 5  ;;  %v3873_v13 = vrot.slane %v6439_v27, 5 }
 0x2f5   : >> { %v3307_v48 = vsel %vm7694_vm5, %v3305_v60, %v3306_v55  ;;  %v6425_v60 = vld [vmem:[%s8551_s30 + $0x24] sm:$0xf]  ;;  %v8861_v55 = vld [vmem:[%s8551_s30 + $0x28] sm:$0xf]  ;;  %v4204_v8 = vunpack.c.l.b16 %v3871_v18 }
 0x2f6   : >> { %v4011_v61 = vunpack.c.l.b16 %v3307_v48  ;;  %v3566_v35 = vsel %vm7694_vm5, %v3564_v63, %v3565_v41  ;;  %v3874_v38 = vsel %vm7694_vm5, %v3872_v9, %v3873_v13  ;;  %v3669_v52 = vshrl.u32 %v6425_v60, 16  ;;  %v6427_v9 = vld [vmem:[%s8551_s30 + $0x30] sm:$0xf]  ;;  %v8898_v13 = vld [vmem:[%s8551_s30 + $0x34] sm:$0xf] }
 0x2f7   : >> { %v3672_v48 = vshll.u32 %v6425_v60, 16  ;;  %v3678_v10 = vshll.u32 %v8861_v55, 16  ;;  %v3682_v58 = vshrl.u32 %v8861_v55, 16  ;;  %v4101_v29 = vunpack.c.l.b16 %v3566_v35  ;;  %v7264_v60 = vld [vmem:[%s8551_s30 + $0x20] sm:$0x1] }
 0x2f8   : >> { %v4019_v37 = vpack.c.b16 %v4011_v61, %v4010_v26  ;;  %v4205_v26 = vunpack.c.l.b16 %v3874_v38  ;;  %v3671_v61 = vrot.slane %v3669_v52, 4  ;;  %v3688_v41 = vshll.u32 %v6440_v5, 16 }
 0x2f9   : >> { %v3877_v53 = vrot.slane %v8861_v55, 5  ;;  %v3880_v38 = vrot.slane %v6440_v5, 5  ;;  %v3693_v55 = vshrl.u32 %v6427_v9, 16 }
 0x2fc   : >> { %v8810_v50 = vpop.f32.mrf.mxu1 }
 0x2fe   : >> { %v8814_v32 = vpop.f32.mrf.mxu0 }
 0x2ff   : >> { %4899 = vmatmul.bf16.gmra.mxu1 %v3986_v39  ;;  %4948 = vmatmul.bf16.gmra.mxu2 %v4018_v17  ;;  %v6405_v39 = vld [vmem:[%s8551_s30 + $0xc] sm:$0xe]  ;;  %v3664_v17 = vshll.u32 %v6439_v27, 16  ;;  %v3684_v27 = vrot.slane %v3682_v58, 4  ;;  %v3706_v58 = vshrl.u32 %v8898_v13, 16 }
 0x300   : >> { %v6413_v47 = vrot.slane %v6405_v39, 9  ;;  %v7263_v39 = vld [vmem:[%s8551_s30 + $0x1c] sm:$0xf] }
 0x301   : >> { %4997 = vmatmul.bf16.gmra.mxu3 %v6994_v44  ;;  %5046 = vmatmul.bf16.gmra.mxu0 %v4090_v14  ;;  %v6995_v44 = vld [vmem:[%s8551_s30 + $0x60] sm:$0xff]  ;;  %v4091_v14 = vpack.c.b16 %v4083_v0, %v4082_v54  ;;  %v3666_v2 = vrot.slane %v3664_v17, 5  ;;  %v3674_v54 = vrot.slane %v3672_v48, 5  ;;  %v3680_v0 = vrot.slane %v3678_v10, 5 }
 0x302   : >> { %v8822_v11 = vpop.f32.mrf.mxu2  ;;  %v3563_v36 = vsel %vm7694_vm5, %v6413_v47, %v3562_v59  ;;  %v3569_v17 = vrot.slane %v7263_v39, 5  ;;  %v3696_v48 = vshll.u32 %v6427_v9, 16  ;;  %v3702_v10 = vshll.u32 %v8898_v13, 16 }
 0x303   : >> { %v3667_v49 = vsel %vm7680_vm4, %v3662_v3, %v3666_v2  ;;  %v4100_v31 = vunpack.c.l.b16 %v3563_v36  ;;  %v3675_v25 = vor.u32 %v3674_v54, %v3671_v61  ;;  %v3685_v15 = vor.u32 %v3684_v27, %v3680_v0  ;;  %v6448_v3 = vld [vmem:[%s8551_s30 + $0x24] sm:$0xe] }
 0x304   : >> { %v8826_v21 = vpop.f32.mrf.mxu3  ;;  %v8828_v22 = vpop.f32.mrf.mxu1  ;;  %v4173_v30 = vunpack.c.l.b16 %v3667_v49  ;;  %v3571_v6 = vrot.slane %v3569_v17, 4  ;;  %v3572_v36 = vrot.slane %v7264_v60, 5  ;;  %v3690_v49 = vrot.slane %v3688_v41, 5 }
 0x305   : >> { %v4116_v33 = vpack.c.b16 %v4101_v29, %v4100_v31  ;;  %v3676_v35 = vrot.slane %v3675_v25, 4  ;;  %v3686_v12 = vrot.slane %v3685_v15, 4  ;;  %v6456_v18 = vrot.slane %v6448_v3, 9 }
 0x306   : >> { %v8838_v42 = vpop.f32.mrf.mxu0  ;;  %v3698_v39 = vrot.slane %v3696_v48, 5 }
 0x307   : >> { %v3691_v61 = vsel %vm7680_vm4, %v3686_v12, %v3690_v49 }
 0x308   : >> { %v4175_v15 = vunpack.c.l.b16 %v3691_v61 }
 0x30a   : >> { %v8845_v28 = vpop.f32.mrf.mxu2 }
 0x30c   : >> { %v8848_v4 = vpop.f32.mrf.mxu3  ;;  %v8852_v7 = vpop.f32.mrf.mxu1 }
 0x30e   : >> { %v8857_v45 = vpop.f32.mrf.mxu0 }
 0x30f   : >> { %4904 = vmatmul.bf16.gmra.mxu1 %v3987_v62  ;;  %4953 = vmatmul.bf16.gmra.mxu2 %v4019_v37  ;;  %v6996_v62 = vld [vmem:[%s8551_s30 + $0x18] sm:$0xff]  ;;  %v4188_v37 = vpack.c.b16 %v4173_v30, %v4172_v57 }
 0x311   : >> { %5002 = vmatmul.bf16.gmra.mxu3 %v6995_v44  ;;  %5051 = vmatmul.bf16.gmra.mxu0 %v4091_v14  ;;  %v4220_v44 = vpack.c.b16 %v4205_v26, %v4204_v8  ;;  %v6406_v14 = vld [vmem:[%s8551_s30 + $0x18] sm:$0xe]  ;;  %v3573_v8 = vsel %vm7694_vm5, %v3571_v6, %v3572_v36  ;;  %v3681_v26 = vsel %vm7680_vm4, %v3676_v35, %v3680_v0  ;;  %v3708_v0 = vrot.slane %v3706_v58, 4  ;;  %v6407_v6 = vld [vmem:[%s8551_s30 + $0x24] sm:$0xe] }
 0x312   : >> { %v8863_v40 = vpop.f32.mrf.mxu2  ;;  %v6414_v2 = vrot.slane %v6406_v14, 9  ;;  %v6441_v14 = vld [vmem:[%s8551_s30 + $0x38] sm:$0x1] }
 0x313   : >> { %v3712_v36 = vshll.u32 %v6441_v14, 16 }
 0x314   : >> { %v8869_v51 = vpop.f32.mrf.mxu3  ;;  %v8879_v56 = vpop.f32.mrf.mxu1  ;;  %v3570_v30 = vsel %vm7694_vm5, %v6414_v2, %v3569_v17  ;;  %v8916_v17 = vrot.slane %v3702_v10, 5 }
 0x315   : >> { %v3714_v61 = vrot.slane %v3712_v36, 5 }
 0x316   : >> { %v8883_v1 = vpop.f32.mrf.mxu0  ;;  %v3709_v60 = vor.u32 %v3708_v0, %v8916_v17 }
 0x31a   : >> { %v8886_v59 = vpop.f32.mrf.mxu2 }
 0x31c   : >> { %v8888_v19 = vpop.f32.mrf.mxu3  ;;  %v4870_v46 = vpop.f32.mrf.mxu1 }
 0x31d   : >> { %v4871_v47 = vadd.f32 %v4870_v46, %v8814_v32  ;;  %v3879_v32 = vrot.slane %v3877_v53, 4  ;;  %v4102_v46 = vunpack.c.l.b16 %v3570_v30 }
 0x31e   : >> { %v5017_v63 = vpop.f32.mrf.mxu0 }
 0x31f   : >> { %5065 = vmatmul.bf16.vlgmr.msra.gmra.mxu1 %v4116_v33  ;;  %5114 = vmatmul.bf16.vlgmr.msra.gmra.mxu2 %v6996_v62  ;;  %v3878_v33 = vsel %vm7694_vm5, %v6456_v18, %v3877_v53  ;;  %v3881_v62 = vsel %vm7694_vm5, %v3879_v32, %v3880_v38  ;;  %v7265_v53 = vld [vmem:[%s8551_s30 + $0x28] sm:$0xf] }
 0x320   : >> { %v4206_v41 = vunpack.c.l.b16 %v3878_v33  ;;  %v3576_v3 = vrot.slane %v7265_v53, 5  ;;  %v6997_v18 = vld [vmem:[%s8551_s30 + $0x24] sm:$0xff] }
 0x321   : >> { %5163 = vmatmul.bf16.vlgmr.msra.gmra.mxu3 %v4188_v37  ;;  %5212 = vmatmul.bf16.vlgmr.msra.gmra.mxu0 %v4220_v44  ;;  %v3695_v37 = vrot.slane %v3693_v55, 4  ;;  %v4103_v44 = vunpack.c.l.b16 %v3573_v8  ;;  %v6449_v55 = vld [vmem:[%s8551_s30 + $0x30] sm:$0xe] }
 0x322   : >> { %v4919_v52 = vpop.f32.mrf.mxu2 }
 0x323   : >> { %v4920_v31 = vadd.f32 %v4919_v52, %v4871_v47  ;;  %v4207_v47 = vunpack.c.l.b16 %v3881_v62  ;;  %v3699_v9 = vor.u32 %v3698_v39, %v3695_v37  ;;  %v4117_v49 = vpack.c.b16 %v4103_v44, %v4102_v46  ;;  %v8933_v62 = vld [vmem:[%s8551_s30 + $0x40] sm:$0xf] }
 0x324   : >> { %v4968_v29 = vpop.f32.mrf.mxu3  ;;  %v4872_v57 = vpop.f32.mrf.mxu1 }
 0x325   : >> { %v4969_v54 = vadd.f32 %v4968_v29, %v4920_v31  ;;  %v4873_v27 = vadd.f32 %v4872_v57, %v8838_v42  ;;  %v4174_v42 = vunpack.c.l.b16 %v3681_v26  ;;  %v4221_v52 = vpack.c.b16 %v4207_v47, %v4206_v41  ;;  %v7266_v57 = vld [vmem:[%s8551_s30 + $0x2c] sm:$0x1] }
 0x326   : >> { %v5019_v5 = vpop.f32.mrf.mxu0  ;;  %v6415_v31 = vrot.slane %v6407_v6, 9  ;;  %v3578_v29 = vrot.slane %v3576_v3, 4  ;;  %v3579_v30 = vrot.slane %v7266_v57, 5  ;;  %v3700_v8 = vrot.slane %v3699_v9, 4  ;;  %v6998_v57 = vld [vmem:[%s8551_s30 + $0x30] sm:$0xff] }
 0x327   : >> { %v8919_v25 = vadd.f32 %v5017_v63, %v4969_v54  ;;  %v3884_v63 = vrot.slane %v8898_v13, 5  ;;  %v4189_v38 = vpack.c.b16 %v4175_v15, %v4174_v42  ;;  %v3710_v26 = vrot.slane %v3709_v60, 4 }
 0x328   : >> { %v6457_v13 = vrot.slane %v6449_v55, 9  ;;  %v3577_v39 = vsel %vm7694_vm5, %v6415_v31, %v3576_v3  ;;  %v3580_v0 = vsel %vm7694_vm5, %v3578_v29, %v3579_v30  ;;  %v3705_v46 = vsel %vm7680_vm4, %v3700_v8, %v8916_v17  ;;  %v7267_v8 = vld [vmem:[%s8551_s30 + $0x34] sm:$0xf] }
 0x329   : >> { %v3886_v54 = vrot.slane %v3884_v63, 4  ;;  %v3726_v3 = vshll.u32 %v8933_v62, 16  ;;  %v4104_v60 = vunpack.c.l.b16 %v3577_v39  ;;  %v4105_v36 = vunpack.c.l.b16 %v3580_v0 }
 0x32a   : >> { %v4921_v2 = vpop.f32.mrf.mxu2  ;;  %v3885_v42 = vsel %vm7694_vm5, %v6457_v13, %v3884_v63  ;;  %v6408_v13 = vld [vmem:[%s8551_s30 + $0x30] sm:$0xe] }
 0x32b   : >> { %v4922_v35 = vadd.f32 %v4921_v2, %v4873_v27  ;;  %v3887_v27 = vrot.slane %v6441_v14, 5  ;;  %v3730_v2 = vshrl.u32 %v8933_v62, 16  ;;  %v4118_v29 = vpack.c.b16 %v4105_v36, %v4104_v60 }
 0x32c   : >> { %v4970_v12 = vpop.f32.mrf.mxu3  ;;  %v4875_v32 = vpop.f32.mrf.mxu1 }
 0x32d   : >> { %v4971_v48 = vadd.f32 %v4970_v12, %v4922_v35  ;;  %v4876_v10 = vadd.f32 %v4875_v32, %v8857_v45  ;;  %v6429_v45 = vld [vmem:[%s8551_s30 + $0x3c] sm:$0xf]  ;;  %v3888_v15 = vsel %vm7694_vm5, %v3886_v54, %v3887_v27  ;;  %v4176_v35 = vunpack.c.l.b16 %v3705_v46 }
 0x32e   : >> { %v5022_v58 = vpop.f32.mrf.mxu0  ;;  %v3717_v47 = vshrl.u32 %v6429_v45, 16  ;;  %v3720_v53 = vshll.u32 %v6429_v45, 16  ;;  %v3732_v55 = vrot.slane %v3730_v2, 4  ;;  %v3891_v46 = vrot.slane %v8933_v62, 5 }
 0x32f   : >> { %5070 = vmatmul.bf16.gmra.mxu1 %v4117_v49  ;;  %5119 = vmatmul.bf16.gmra.mxu2 %v6997_v18  ;;  %v8929_v33 = vadd.f32 %v5019_v5, %v4971_v48  ;;  %v3715_v5 = vsel %vm7680_vm4, %v3710_v26, %v3714_v61  ;;  %v4208_v49 = vunpack.c.l.b16 %v3885_v42  ;;  %v4209_v18 = vunpack.c.l.b16 %v3888_v15  ;;  %v6442_v48 = vld [vmem:[%s8551_s30 + $0x44] sm:$0x1]  ;;  %v6431_v42 = vld [vmem:[%s8551_s30 + $0x48] sm:$0xf]  ;;  %v8965_v15 = vld [vmem:[%s8551_s30 + $0x4c] sm:$0xf] }
 0x330   : >> { %v4177_v12 = vunpack.c.l.b16 %v3715_v5  ;;  %v3719_v32 = vrot.slane %v3717_v47, 4  ;;  %v3583_v26 = vrot.slane %v7267_v8, 5  ;;  %v3736_v45 = vshll.u32 %v6442_v48, 16  ;;  %v7268_v47 = vld [vmem:[%s8551_s30 + $0x38] sm:$0x1] }
 0x331   : >> { %5168 = vmatmul.bf16.gmra.mxu3 %v4189_v38  ;;  %5217 = vmatmul.bf16.gmra.mxu0 %v4221_v52  ;;  %v3722_v38 = vrot.slane %v3720_v53, 5  ;;  %v8953_v52 = vrot.slane %v3726_v3, 5  ;;  %v3586_v53 = vrot.slane %v7268_v47, 5  ;;  %v3894_v62 = vrot.slane %v6442_v48, 5 }
 0x332   : >> { %v4924_v37 = vpop.f32.mrf.mxu2  ;;  %v4190_v30 = vpack.c.b16 %v4177_v12, %v4176_v35  ;;  %v3585_v5 = vrot.slane %v3583_v26, 4  ;;  %v3741_v36 = vshrl.u32 %v6431_v42, 16  ;;  %v3744_v35 = vshll.u32 %v6431_v42, 16 }
 0x333   : >> { %v4925_v44 = vadd.f32 %v4924_v37, %v4876_v10  ;;  %v3723_v54 = vor.u32 %v3722_v38, %v3719_v32  ;;  %v3733_v27 = vor.u32 %v3732_v55, %v8953_v52  ;;  %v3750_v12 = vshll.u32 %v8965_v15, 16 }
 0x334   : >> { %v4973_v14 = vpop.f32.mrf.mxu3  ;;  %v4877_v41 = vpop.f32.mrf.mxu1  ;;  %v3587_v55 = vsel %vm7694_vm5, %v3585_v5, %v3586_v53  ;;  %v3743_v8 = vrot.slane %v3741_v36, 4  ;;  %v6409_v5 = vld [vmem:[%s8551_s30 + $0x3c] sm:$0xe]  ;;  %v6451_v36 = vld [vmem:[%s8551_s30 + $0x48] sm:$0xe] }
 0x335   : >> { %v4974_v17 = vadd.f32 %v4973_v14, %v4925_v44  ;;  %v4878_v6 = vadd.f32 %v4877_v41, %v8883_v1  ;;  %v6450_v44 = vld [vmem:[%s8551_s30 + $0x3c] sm:$0xe]  ;;  %v6416_v14 = vrot.slane %v6408_v13, 9  ;;  %v3724_v3 = vrot.slane %v3723_v54, 4  ;;  %v6443_v54 = vld [vmem:[%s8551_s30 + $0x50] sm:$0x1] }
 0x336   : >> { %v5024_v9 = vpop.f32.mrf.mxu0  ;;  %v3734_v2 = vrot.slane %v3733_v27, 4  ;;  %v4107_v13 = vunpack.c.l.b16 %v3587_v55  ;;  %v3760_v53 = vshll.u32 %v6443_v54, 16 }
 0x337   : >> { %v8951_v63 = vadd.f32 %v5022_v58, %v4974_v17  ;;  %v4222_v58 = vpack.c.b16 %v4209_v18, %v4208_v49  ;;  %v6458_v17 = vrot.slane %v6450_v44, 9  ;;  %v3754_v49 = vshrl.u32 %v8965_v15, 16 }
 0x338   : >> { %v3584_v38 = vsel %vm7694_vm5, %v6416_v14, %v3583_v26  ;;  %v3729_v48 = vsel %vm7680_vm4, %v3724_v3, %v8953_v52  ;;  %v3746_v26 = vrot.slane %v3744_v35, 5 }
 0x339   : >> { %v3756_v52 = vrot.slane %v3754_v49, 4 }
 0x33a   : >> { %v4926_v10 = vpop.f32.mrf.mxu2  ;;  %v3747_v42 = vor.u32 %v3746_v26, %v3743_v8 }
 0x33b   : >> { %v4927_v1 = vadd.f32 %v4926_v10, %v4878_v6  ;;  %v3893_v6 = vrot.slane %v3891_v46, 4 }
 0x33c   : >> { %v4975_v31 = vpop.f32.mrf.mxu3  ;;  %v4880_v61 = vpop.f32.mrf.mxu1  ;;  %v3748_v55 = vrot.slane %v3747_v42, 4 }
 0x33d   : >> { %v4976_v37 = vadd.f32 %v4975_v31, %v4927_v1  ;;  %v4881_v39 = vadd.f32 %v4880_v61, %v8810_v50  ;;  %v3738_v50 = vrot.slane %v3736_v45, 5  ;;  %v8986_v61 = vrot.slane %v3750_v12, 5 }
 0x33e   : >> { %v5027_v0 = vpop.f32.mrf.mxu0 }
 0x33f   : >> { %5075 = vmatmul.bf16.gmra.mxu1 %v4118_v29  ;;  %5124 = vmatmul.bf16.gmra.mxu2 %v6998_v57  ;;  %v8967_v41 = vadd.f32 %v5024_v9, %v4976_v37  ;;  %v3739_v10 = vsel %vm7680_vm4, %v3734_v2, %v3738_v50  ;;  %v3892_v57 = vsel %vm7694_vm5, %v6458_v17, %v3891_v46  ;;  %v7269_v46 = vld [vmem:[%s8551_s30 + $0x40] sm:$0xf] }
 0x340   : >> { %v4179_v45 = vunpack.c.l.b16 %v3739_v10  ;;  %v4210_v37 = vunpack.c.l.b16 %v3892_v57  ;;  %v3590_v44 = vrot.slane %v7269_v46, 5  ;;  %v3757_v47 = vor.u32 %v3756_v52, %v8986_v61  ;;  %v6999_v17 = vld [vmem:[%s8551_s30 + $0x3c] sm:$0xff] }
 0x341   : >> { %5173 = vmatmul.bf16.gmra.mxu3 %v4190_v30  ;;  %5222 = vmatmul.bf16.gmra.mxu0 %v4222_v58  ;;  %v3895_v30 = vsel %vm7694_vm5, %v3893_v6, %v3894_v62  ;;  %v4106_v58 = vunpack.c.l.b16 %v3584_v38  ;;  %v3762_v10 = vrot.slane %v3760_v53, 5 }
 0x342   : >> { %v4929_v60 = vpop.f32.mrf.mxu2 }
 0x343   : >> { %v4930_v18 = vadd.f32 %v4929_v60, %v4881_v39  ;;  %v4211_v39 = vunpack.c.l.b16 %v3895_v30  ;;  %v4119_v50 = vpack.c.b16 %v4107_v13, %v4106_v58  ;;  %v9003_v30 = vld [vmem:[%s8551_s30 + $0x58] sm:$0xf]  ;;  %v3753_v58 = vsel %vm7680_vm4, %v3748_v55, %v8986_v61  ;;  %v7271_v55 = vld [vmem:[%s8551_s30 + $0x4c] sm:$0xf] }
 0x344   : >> { %v4978_v9 = vpop.f32.mrf.mxu3  ;;  %v4882_v32 = vpop.f32.mrf.mxu1 }
 0x345   : >> { %v4979_v1 = vadd.f32 %v4978_v9, %v4930_v18  ;;  %v4883_v31 = vadd.f32 %v4882_v32, %v8828_v22  ;;  %v4178_v22 = vunpack.c.l.b16 %v3729_v48  ;;  %v4223_v60 = vpack.c.b16 %v4211_v39, %v4210_v37  ;;  %v7270_v32 = vld [vmem:[%s8551_s30 + $0x44] sm:$0x1] }
 0x346   : >> { %v5029_v29 = vpop.f32.mrf.mxu0  ;;  %v6417_v18 = vrot.slane %v6409_v5, 9  ;;  %v3592_v9 = vrot.slane %v3590_v44, 4  ;;  %v3593_v38 = vrot.slane %v7270_v32, 5  ;;  %v3758_v48 = vrot.slane %v3757_v47, 4  ;;  %v7000_v32 = vld [vmem:[%s8551_s30 + $0x48] sm:$0xff] }
 0x347   : >> { %v8989_v27 = vadd.f32 %v5027_v0, %v4979_v1  ;;  %v3898_v0 = vrot.slane %v8965_v15, 5  ;;  %v4191_v62 = vpack.c.b16 %v4179_v45, %v4178_v22  ;;  %v6459_v15 = vrot.slane %v6451_v36, 9 }
 0x348   : >> { %v3591_v26 = vsel %vm7694_vm5, %v6417_v18, %v3590_v44  ;;  %v3594_v52 = vsel %vm7694_vm5, %v3592_v9, %v3593_v38  ;;  %v3774_v44 = vshll.u32 %v9003_v30, 16 }
 0x349   : >> { %v3900_v1 = vrot.slane %v3898_v0, 4  ;;  %v3899_v22 = vsel %vm7694_vm5, %v6459_v15, %v3898_v0  ;;  %v4108_v47 = vunpack.c.l.b16 %v3591_v26  ;;  %v4109_v53 = vunpack.c.l.b16 %v3594_v52  ;;  %v6410_v15 = vld [vmem:[%s8551_s30 + $0x48] sm:$0xe] }
 0x34a   : >> { %v4931_v14 = vpop.f32.mrf.mxu2  ;;  %v3905_v52 = vrot.slane %v9003_v30, 5 }
 0x34b   : >> { %v4932_v3 = vadd.f32 %v4931_v14, %v4883_v31  ;;  %v3901_v31 = vrot.slane %v6443_v54, 5  ;;  %v3778_v14 = vshrl.u32 %v9003_v30, 16  ;;  %v4120_v9 = vpack.c.b16 %v4109_v53, %v4108_v47 }
 0x34c   : >> { %v4980_v2 = vpop.f32.mrf.mxu3  ;;  %v4885_v6 = vpop.f32.mrf.mxu1 }
 0x34d   : >> { %v4981_v35 = vadd.f32 %v4980_v2, %v4932_v3  ;;  %v4886_v12 = vadd.f32 %v4885_v6, %v8852_v7  ;;  %v6433_v7 = vld [vmem:[%s8551_s30 + $0x54] sm:$0xf]  ;;  %v3902_v45 = vsel %vm7694_vm5, %v3900_v1, %v3901_v31  ;;  %v4180_v3 = vunpack.c.l.b16 %v3753_v58 }
 0x34e   : >> { %v5032_v49 = vpop.f32.mrf.mxu0  ;;  %v3765_v39 = vshrl.u32 %v6433_v7, 16  ;;  %v3768_v46 = vshll.u32 %v6433_v7, 16  ;;  %v3780_v36 = vrot.slane %v3778_v14, 4  ;;  %v6452_v58 = vld [vmem:[%s8551_s30 + $0x54] sm:$0xe] }
 0x34f   : >> { %5080 = vmatmul.bf16.gmra.mxu1 %v4119_v50  ;;  %5129 = vmatmul.bf16.gmra.mxu2 %v6999_v17  ;;  %v8999_v57 = vadd.f32 %v5029_v29, %v4981_v35  ;;  %v3763_v29 = vsel %vm7680_vm4, %v3758_v48, %v3762_v10  ;;  %v4212_v50 = vunpack.c.l.b16 %v3899_v22  ;;  %v4213_v17 = vunpack.c.l.b16 %v3902_v45  ;;  %v6444_v35 = vld [vmem:[%s8551_s30 + $0x5c] sm:$0x1]  ;;  %v9034_v22 = vld [vmem:[%s8551_s30 + $0x64] sm:$0xf] }
 0x350   : >> { %v4181_v2 = vunpack.c.l.b16 %v3763_v29  ;;  %v3767_v6 = vrot.slane %v3765_v39, 4  ;;  %v3597_v48 = vrot.slane %v7271_v55, 5  ;;  %v3784_v7 = vshll.u32 %v6444_v35, 16  ;;  %v6435_v29 = vld [vmem:[%s8551_s30 + $0x60] sm:$0xf] }
 0x351   : >> { %5178 = vmatmul.bf16.gmra.mxu3 %v4191_v62  ;;  %5227 = vmatmul.bf16.gmra.mxu0 %v4223_v60  ;;  %v3770_v62 = vrot.slane %v3768_v46, 5  ;;  %v9023_v60 = vrot.slane %v3774_v44, 5  ;;  %v4224_v10 = vpack.c.b16 %v4213_v17, %v4212_v50  ;;  %v6460_v30 = vrot.slane %v6452_v58, 9 }
 0x352   : >> { %v4934_v8 = vpop.f32.mrf.mxu2  ;;  %v4192_v38 = vpack.c.b16 %v4181_v2, %v4180_v3  ;;  %v3786_v14 = vrot.slane %v3784_v7, 5  ;;  %v3908_v47 = vrot.slane %v6444_v35, 5  ;;  %v3789_v3 = vshrl.u32 %v6435_v29, 16 }
 0x353   : >> { %v4935_v13 = vadd.f32 %v4934_v8, %v4886_v12  ;;  %v3771_v1 = vor.u32 %v3770_v62, %v3767_v6  ;;  %v3781_v31 = vor.u32 %v3780_v36, %v9023_v60  ;;  %v3792_v2 = vshll.u32 %v6435_v29, 16 }
 0x354   : >> { %v4983_v54 = vpop.f32.mrf.mxu3  ;;  %v4887_v37 = vpop.f32.mrf.mxu1  ;;  %v3798_v50 = vshll.u32 %v9034_v22, 16 }
 0x355   : >> { %v4984_v61 = vadd.f32 %v4983_v54, %v4935_v13  ;;  %v4888_v5 = vadd.f32 %v4887_v37, %v8879_v56  ;;  %v6418_v13 = vrot.slane %v6410_v15, 9  ;;  %v3599_v54 = vrot.slane %v3597_v48, 4  ;;  %v7272_v37 = vld [vmem:[%s8551_s30 + $0x50] sm:$0x1]  ;;  %v6445_v15 = vld [vmem:[%s8551_s30 + $0x68] sm:$0x1] }
 0x356   : >> { %v5034_v42 = vpop.f32.mrf.mxu0  ;;  %v3600_v39 = vrot.slane %v7272_v37, 5  ;;  %v3772_v46 = vrot.slane %v3771_v1, 4  ;;  %v3782_v44 = vrot.slane %v3781_v31, 4  ;;  %v3794_v55 = vrot.slane %v3792_v2, 5  ;;  %v6411_v37 = vld [vmem:[%s8551_s30 + $0x54] sm:$0xe] }
 0x357   : >> { %v9021_v0 = vadd.f32 %v5032_v49, %v4984_v61  ;;  %v3598_v36 = vsel %vm7694_vm5, %v6418_v13, %v3597_v48  ;;  %v9055_v48 = vrot.slane %v3798_v50, 5  ;;  %v7273_v13 = vld [vmem:[%s8551_s30 + $0x58] sm:$0xf]  ;;  %v6453_v2 = vld [vmem:[%s8551_s30 + $0x60] sm:$0xe] }
 0x358   : >> { %v3777_v35 = vsel %vm7680_vm4, %v3772_v46, %v9023_v60 }
 0x359   : >> { %v4182_v31 = vunpack.c.l.b16 %v3777_v35  ;;  %v6461_v35 = vrot.slane %v6453_v2, 9 }
 0x35a   : >> { %v4936_v12 = vpop.f32.mrf.mxu2 }
 0x35b   : >> { %v4937_v56 = vadd.f32 %v4936_v12, %v4888_v5  ;;  %v3907_v5 = vrot.slane %v3905_v52, 4 }
 0x35c   : >> { %v4985_v18 = vpop.f32.mrf.mxu3  ;;  %v4890_v49 = vpop.f32.mrf.mxu1 }
 0x35d   : >> { %v4986_v8 = vadd.f32 %v4985_v18, %v4937_v56  ;;  %v4891_v61 = vadd.f32 %v4890_v49, %v8822_v11  ;;  %v3601_v11 = vsel %vm7694_vm5, %v3599_v54, %v3600_v39  ;;  %v3787_v18 = vsel %vm7680_vm4, %v3782_v44, %v3786_v14 }
 0x35e   : >> { %v5037_v26 = vpop.f32.mrf.mxu0  ;;  %v4111_v60 = vunpack.c.l.b16 %v3601_v11  ;;  %v4183_v7 = vunpack.c.l.b16 %v3787_v18  ;;  %v3604_v54 = vrot.slane %v7273_v13, 5  ;;  %v3808_v44 = vshll.u32 %v6445_v15, 16 }
 0x35f   : >> { %5085 = vmatmul.bf16.gmra.mxu1 %v4120_v9  ;;  %5134 = vmatmul.bf16.gmra.mxu2 %v7000_v32  ;;  %v9036_v45 = vadd.f32 %v5034_v42, %v4986_v8  ;;  %v3802_v42 = vshrl.u32 %v9034_v22, 16  ;;  %v3906_v9 = vsel %vm7694_vm5, %v6460_v30, %v3905_v52  ;;  %v3909_v32 = vsel %vm7694_vm5, %v3907_v5, %v3908_v47  ;;  %v7001_v30 = vld [vmem:[%s8551_s30 + $0x54] sm:$0xff] }
 0x360   : >> { %v4214_v8 = vunpack.c.l.b16 %v3906_v9  ;;  %v4215_v58 = vunpack.c.l.b16 %v3909_v32  ;;  %v3912_v5 = vrot.slane %v9034_v22, 5  ;;  %v3810_v11 = vrot.slane %v3808_v44, 5  ;;  %v6437_v32 = vld [vmem:[%s8551_s30 + $0x6c] sm:$0xf] }
 0x361   : >> { %5183 = vmatmul.bf16.gmra.mxu3 %v4192_v38  ;;  %5232 = vmatmul.bf16.gmra.mxu0 %v4224_v10  ;;  %v3791_v38 = vrot.slane %v3789_v3, 4  ;;  %v3804_v49 = vrot.slane %v3802_v42, 4  ;;  %v4110_v10 = vunpack.c.l.b16 %v3598_v36  ;;  %v6419_v42 = vrot.slane %v6411_v37, 9 }
 0x362   : >> { %v4939_v53 = vpop.f32.mrf.mxu2  ;;  %v4225_v3 = vpack.c.b16 %v4215_v58, %v4214_v8  ;;  %v3915_v22 = vrot.slane %v6445_v15, 5  ;;  %v3813_v8 = vshrl.u32 %v6437_v32, 16  ;;  %v3816_v58 = vshll.u32 %v6437_v32, 16 }
 0x363   : >> { %v4940_v17 = vadd.f32 %v4939_v53, %v4891_v61  ;;  %v3795_v39 = vor.u32 %v3794_v55, %v3791_v38  ;;  %v3805_v46 = vor.u32 %v3804_v49, %v9055_v48  ;;  %v4193_v53 = vpack.c.b16 %v4183_v7, %v4182_v31  ;;  %v9073_v38 = vld [vmem:[%s8551_s30 + $0x70] sm:$0xf] }
 0x364   : >> { %v4988_v6 = vpop.f32.mrf.mxu3  ;;  %v4892_v62 = vpop.f32.mrf.mxu1  ;;  %v3826_v13 = vshrl.u32 %v9073_v38, 16 }
 0x365   : >> { %v4989_v12 = vadd.f32 %v4988_v6, %v4940_v17  ;;  %v4893_v52 = vadd.f32 %v4892_v62, %v8845_v28  ;;  %v3606_v17 = vrot.slane %v3604_v54, 4  ;;  %v3607_v6 = vrot.slane %v8779_v23, 5 }
 0x366   : >> { %v5039_v56 = vpop.f32.mrf.mxu0  ;;  %v3796_v62 = vrot.slane %v3795_v39, 4  ;;  %v3806_v36 = vrot.slane %v3805_v46, 4  ;;  %v3605_v23 = vsel %vm7694_vm5, %v6419_v42, %v3604_v54 }
 0x367   : >> { %v9058_v1 = vadd.f32 %v5037_v26, %v4989_v12  ;;  %v4121_v26 = vpack.c.b16 %v4111_v60, %v4110_v10  ;;  %v3914_v12 = vrot.slane %v3912_v5, 4  ;;  %v3608_v49 = vsel %vm7694_vm5, %v3606_v17, %v3607_v6  ;;  %v7002_v6 = vld [vmem:[%s8551_s30 + $0x60] sm:$0xff] }
 0x368   : >> { %v3801_v10 = vsel %vm7680_vm4, %v3796_v62, %v9055_v48  ;;  %v3811_v15 = vsel %vm7680_vm4, %v3806_v36, %v3810_v11  ;;  %v4113_v37 = vunpack.c.l.b16 %v3608_v49  ;;  %v7274_v36 = vld [vmem:[%s8551_s30 + $0x64] sm:$0xf]  ;;  %v6454_v49 = vld [vmem:[%s8551_s30 + $0x6c] sm:$0xe] }
 0x369   : >> { %v3916_v31 = vsel %vm7694_vm5, %v3914_v12, %v3915_v22  ;;  %v4184_v39 = vunpack.c.l.b16 %v3801_v10  ;;  %v4185_v46 = vunpack.c.l.b16 %v3811_v15  ;;  %v3611_v11 = vrot.slane %v7274_v36, 5  ;;  %v6412_v12 = vld [vmem:[%s8551_s30 + $0x60] sm:$0xe] }
 0x36a   : >> { %v4941_v29 = vpop.f32.mrf.mxu2  ;;  %v6420_v10 = vrot.slane %v6412_v12, 9  ;;  %v3614_v15 = vrot.slane %v8808_v43, 5 }
 0x36b   : >> { %v4942_v14 = vadd.f32 %v4941_v29, %v4893_v52  ;;  %v3822_v52 = vshll.u32 %v9073_v38, 16  ;;  %v4112_v29 = vunpack.c.l.b16 %v3605_v23  ;;  %v4194_v62 = vpack.c.b16 %v4185_v46, %v4184_v39 }
 0x36c   : >> { %v4990_v61 = vpop.f32.mrf.mxu3  ;;  %v4895_v47 = vpop.f32.mrf.mxu1 }
 0x36d   : >> { %v4991_v28 = vadd.f32 %v4990_v61, %v4942_v14  ;;  %v4896_v9 = vadd.f32 %v4895_v47, %v8863_v40  ;;  %v3913_v40 = vsel %vm7694_vm5, %v6461_v35, %v3912_v5  ;;  %v4217_v14 = vunpack.c.l.b16 %v3916_v31 }
 0x36e   : >> { %v5042_v50 = vpop.f32.mrf.mxu0  ;;  %v4216_v44 = vunpack.c.l.b16 %v3913_v40  ;;  %v3824_v5 = vrot.slane %v3822_v52, 5  ;;  %v3828_v47 = vrot.slane %v3826_v13, 4  ;;  %v4122_v17 = vpack.c.b16 %v4113_v37, %v4112_v29 }
 0x36f   : >> { %5090 = vmatmul.bf16.gmra.mxu1 %v4121_v26  ;;  %5139 = vmatmul.bf16.gmra.mxu2 %v7001_v30  ;;  %v9068_v18 = vadd.f32 %v5039_v56, %v4991_v28  ;;  %v3815_v26 = vrot.slane %v3813_v8, 4  ;;  %v3818_v30 = vrot.slane %v3816_v58, 5  ;;  %v6462_v58 = vrot.slane %v6454_v49, 9 }
 0x371   : >> { %5188 = vmatmul.bf16.gmra.mxu3 %v4193_v53  ;;  %5237 = vmatmul.bf16.gmra.mxu0 %v4225_v3  ;;  %v6446_v3 = vld [vmem:[%s8551_s30 + $0x74] sm:$0x1]  ;;  %v3819_v22 = vor.u32 %v3818_v30, %v3815_v26 }
 0x372   : >> { %v4944_v55 = vpop.f32.mrf.mxu2  ;;  %v3832_v32 = vshll.u32 %v6446_v3, 16  ;;  %v3922_v13 = vrot.slane %v6446_v3, 5 }
 0x373   : >> { %v4945_v56 = vadd.f32 %v4944_v55, %v4896_v9  ;;  %v3829_v9 = vor.u32 %v3828_v47, %v3824_v5  ;;  %v3820_v40 = vrot.slane %v3819_v22, 4 }
 0x374   : >> { %v4993_v60 = vpop.f32.mrf.mxu3  ;;  %v4897_v7 = vpop.f32.mrf.mxu1 }
 0x375   : >> { %v4994_v48 = vadd.f32 %v4993_v60, %v4945_v56  ;;  %v4898_v53 = vadd.f32 %v4897_v7, %v8886_v59  ;;  %v3919_v59 = vrot.slane %v9073_v38, 5  ;;  %v3613_v56 = vrot.slane %v3611_v11, 4 }
 0x376   : >> { %v5044_v54 = vpop.f32.mrf.mxu0  ;;  %v3830_v31 = vrot.slane %v3829_v9, 4  ;;  %v3834_v7 = vrot.slane %v3832_v32, 5  ;;  %v3825_v43 = vsel %vm7680_vm4, %v3820_v40, %v3824_v5 }
 0x377   : >> { %v9090_v61 = vadd.f32 %v5042_v50, %v4994_v48  ;;  %v4226_v50 = vpack.c.b16 %v4217_v14, %v4216_v44  ;;  %v3921_v52 = vrot.slane %v3919_v59, 4  ;;  %v3615_v39 = vsel %vm7694_vm5, %v3613_v56, %v3614_v15 }
 0x378   : >> { %v3920_v14 = vsel %vm7694_vm5, %v6462_v58, %v3919_v59  ;;  %v4115_v47 = vunpack.c.l.b16 %v3615_v39  ;;  %v4186_v3 = vunpack.c.l.b16 %v3825_v43 }
 0x379   : >> { %v3923_v26 = vsel %vm7694_vm5, %v3921_v52, %v3922_v13 }
 0x37a   : >> { %v4946_v2 = vpop.f32.mrf.mxu2  ;;  %v4219_v5 = vunpack.c.l.b16 %v3923_v26 }
 0x37b   : >> { %v4947_v28 = vadd.f32 %v4946_v2, %v4898_v53 }
 0x37c   : >> { %v4995_v42 = vpop.f32.mrf.mxu3  ;;  %v4900_v35 = vpop.f32.mrf.mxu1 }
 0x37d   : >> { %v4996_v55 = vadd.f32 %v4995_v42, %v4947_v28  ;;  %v4901_v8 = vadd.f32 %v4900_v35, %v8826_v21  ;;  %v3835_v21 = vsel %vm7680_vm4, %v3830_v31, %v3834_v7  ;;  %v4218_v28 = vunpack.c.l.b16 %v3920_v14 }
 0x37e   : >> { %v5047_v23 = vpop.f32.mrf.mxu0  ;;  %v4187_v2 = vunpack.c.l.b16 %v3835_v21 }
 0x37f   : >> { %5095 = vmatmul.bf16.gmra.mxu1 %v4122_v17  ;;  %5144 = vmatmul.bf16.gmra.mxu2 %v7002_v6  ;;  %v9099_v60 = vadd.f32 %v5044_v54, %v4996_v55  ;;  %v3612_v54 = vsel %vm7694_vm5, %v6420_v10, %v3611_v11  ;;  %v7003_v11 = vld [vmem:[%s8551_s30 + $0x6c] sm:$0xff]  ;;  %v4227_v12 = vpack.c.b16 %v4219_v5, %v4218_v28 }
 0x380   : >> { %v4114_v30 = vunpack.c.l.b16 %v3612_v54 }
 0x381   : >> { %5193 = vmatmul.bf16.gmra.mxu3 %v4194_v62  ;;  %5242 = vmatmul.bf16.gmra.mxu0 %v4226_v50  ;;  %v4195_v50 = vpack.c.b16 %v4187_v2, %v4186_v3 }
 0x382   : >> { %v4949_v38 = vpop.f32.mrf.mxu2  ;;  %v4123_v36 = vpack.c.b16 %v4115_v47, %v4114_v30 }
 0x383   : >> { %v4950_v48 = vadd.f32 %v4949_v38, %v4901_v8 }
 0x384   : >> { %v4998_v29 = vpop.f32.mrf.mxu3  ;;  %v4902_v37 = vpop.f32.mrf.mxu1 }
 0x385   : >> { %v4999_v46 = vadd.f32 %v4998_v29, %v4950_v48  ;;  %v4903_v42 = vadd.f32 %v4902_v37, %v8848_v4 }
 0x386   : >> { %v5049_v44 = vpop.f32.mrf.mxu0 }
 0x387   : >> { %v9115_v53 = vadd.f32 %v5047_v23, %v4999_v46 }
 0x38a   : >> { %v4951_v17 = vpop.f32.mrf.mxu2 }
 0x38b   : >> { %v4952_v6 = vadd.f32 %v4951_v17, %v4903_v42 }
 0x38c   : >> { %v5000_v62 = vpop.f32.mrf.mxu3  ;;  %v4905_v35 = vpop.f32.mrf.mxu1 }
 0x38d   : >> { %v5001_v22 = vadd.f32 %v5000_v62, %v4952_v6  ;;  %v4906_v55 = vadd.f32 %v4905_v35, %v8869_v51 }
 0x38e   : >> { %v5052_v9 = vpop.f32.mrf.mxu0 }
 0x38f   : >> { %5100 = vmatmul.bf16.gmra.mxu1 %v4123_v36  ;;  %5149 = vmatmul.bf16.gmra.mxu2 %v7003_v11  ;;  %v9119_v32 = vadd.f32 %v5049_v44, %v5001_v22 }
 0x391   : >> { %5198 = vmatmul.bf16.gmra.mxu3 %v4195_v50  ;;  %5247 = vmatmul.bf16.gmra.mxu0 %v4227_v12 }
 0x392   : >> { %v4954_v23 = vpop.f32.mrf.mxu2 }
 0x393   : >> { %v4955_v4 = vadd.f32 %v4954_v23, %v4906_v55 }
 0x394   : >> { %v5003_v59 = vpop.f32.mrf.mxu3  ;;  %v4907_v49 = vpop.f32.mrf.mxu1 }
 0x395   : >> { %v5004_v10 = vadd.f32 %v5003_v59, %v4955_v4  ;;  %v4908_v40 = vadd.f32 %v4907_v49, %v8888_v19 }
 0x396   : >> { %v5054_v56 = vpop.f32.mrf.mxu0 }
 0x397   : >> { %v9122_v15 = vadd.f32 %v5052_v9, %v5004_v10 }
 0x39a   : >> { %v4956_v31 = vpop.f32.mrf.mxu2 }
 0x39b   : >> { %v4957_v7 = vadd.f32 %v4956_v31, %v4908_v40 }
 0x39c   : >> { %v5005_v8 = vpop.f32.mrf.mxu3  ;;  %v5066_v58 = vpop.f32.mrf.mxu1 }
 0x39d   : >> { %v5006_v52 = vadd.f32 %v5005_v8, %v4957_v7  ;;  %v5067_v51 = vadd.f32 %v5066_v58, %v8919_v25 }
 0x39e   : >> { %v5213_v13 = vpop.f32.mrf.mxu0 }
 0x39f   : >> { %v9125_v38 = vadd.f32 %v5054_v56, %v5006_v52 }
 0x3a2   : >> { %v5115_v48 = vpop.f32.mrf.mxu2 }
 0x3a3   : >> { %v5116_v29 = vadd.f32 %v5115_v48, %v5067_v51 }
 0x3a4   : >> { %v5164_v37 = vpop.f32.mrf.mxu3  ;;  %v5068_v54 = vpop.f32.mrf.mxu1 }
 0x3a5   : >> { %v5165_v39 = vadd.f32 %v5164_v37, %v5116_v29  ;;  %v5069_v19 = vadd.f32 %v5068_v54, %v8929_v33 }
 0x3a6   : >> { %v5215_v43 = vpop.f32.mrf.mxu0 }
 0x3a7   : >> { %v5214_v46 = vadd.f32 %v5213_v13, %v5165_v39 }
 0x3a9   : >> { %5255 = vst [vmem:[%s9129_s7] sm:$0xff] %v5214_v46  ;;  %v5293_v3 = vmul.f32 %v5214_v46, %v5214_v46 }
 0x3aa   : >> { %v5117_v44 = vpop.f32.mrf.mxu2 }
 0x3ab   : >> { %v5118_v21 = vadd.f32 %v5117_v44, %v5069_v19 }
 0x3ac   : >> { %v5166_v14 = vpop.f32.mrf.mxu3  ;;  %v5071_v26 = vpop.f32.mrf.mxu1 }
 0x3ad   : >> { %v5167_v25 = vadd.f32 %v5166_v14, %v5118_v21  ;;  %v5072_v5 = vadd.f32 %v5071_v26, %v8951_v63 }
 0x3ae   : >> { %v5218_v30 = vpop.f32.mrf.mxu0 }
 0x3af   : >> { %v5216_v47 = vadd.f32 %v5215_v43, %v5167_v25 }
 0x3b1   : >> { %5256 = vst [vmem:[%s9129_s7 + $0x8] sm:$0xff] %v5216_v47  ;;  %v5271_v2 = vadd.f32 %v5216_v47, %v5214_v46  ;;  %v5294_v28 = vmul.f32 %v5216_v47, %v5216_v47 }
 0x3b2   : >> { %v5120_v42 = vpop.f32.mrf.mxu2 }
 0x3b3   : >> { %v5309_v17 = vadd.f32 %v5294_v28, %v5293_v3  ;;  %v5121_v6 = vadd.f32 %v5120_v42, %v5072_v5 }
 0x3b4   : >> { %v5169_v62 = vpop.f32.mrf.mxu3  ;;  %v5073_v36 = vpop.f32.mrf.mxu1 }
 0x3b5   : >> { %v5170_v33 = vadd.f32 %v5169_v62, %v5121_v6  ;;  %v5074_v22 = vadd.f32 %v5073_v36, %v8967_v41 }
 0x3b6   : >> { %v5220_v11 = vpop.f32.mrf.mxu0 }
 0x3b7   : >> { %v5219_v35 = vadd.f32 %v5218_v30, %v5170_v33 }
 0x3b9   : >> { %5257 = vst [vmem:[%s9129_s7 + $0x10] sm:$0xff] %v5219_v35  ;;  %v5272_v50 = vadd.f32 %v5271_v2, %v5219_v35  ;;  %v5295_v12 = vmul.f32 %v5219_v35, %v5219_v35 }
 0x3ba   : >> { %v5122_v9 = vpop.f32.mrf.mxu2 }
 0x3bb   : >> { %v5310_v55 = vadd.f32 %v5309_v17, %v5295_v12  ;;  %v5123_v23 = vadd.f32 %v5122_v9, %v5074_v22 }
 0x3bc   : >> { %v5171_v4 = vpop.f32.mrf.mxu3  ;;  %v5076_v59 = vpop.f32.mrf.mxu1 }
 0x3bd   : >> { %v5172_v63 = vadd.f32 %v5171_v4, %v5123_v23  ;;  %v5077_v31 = vadd.f32 %v5076_v59, %v8989_v27 }
 0x3be   : >> { %v5223_v49 = vpop.f32.mrf.mxu0 }
 0x3bf   : >> { %v5221_v10 = vadd.f32 %v5220_v11, %v5172_v63 }
 0x3c1   : >> { %5258 = vst [vmem:[%s9129_s7 + $0x18] sm:$0xff] %v5221_v10  ;;  %v5273_v56 = vadd.f32 %v5272_v50, %v5221_v10  ;;  %v5296_v40 = vmul.f32 %v5221_v10, %v5221_v10 }
 0x3c2   : >> { %v5125_v7 = vpop.f32.mrf.mxu2 }
 0x3c3   : >> { %v5311_v8 = vadd.f32 %v5310_v55, %v5296_v40  ;;  %v5126_v58 = vadd.f32 %v5125_v7, %v5077_v31 }
 0x3c4   : >> { %v5174_v52 = vpop.f32.mrf.mxu3  ;;  %v5078_v13 = vpop.f32.mrf.mxu1 }
 0x3c5   : >> { %v5175_v41 = vadd.f32 %v5174_v52, %v5126_v58  ;;  %v5079_v54 = vadd.f32 %v5078_v13, %v8999_v57 }
 0x3c6   : >> { %v5225_v51 = vpop.f32.mrf.mxu0 }
 0x3c7   : >> { %v5224_v48 = vadd.f32 %v5223_v49, %v5175_v41 }
 0x3c9   : >> { %5259 = vst [vmem:[%s9129_s7 + $0x20] sm:$0xff] %v5224_v48  ;;  %v5274_v29 = vadd.f32 %v5273_v56, %v5224_v48  ;;  %v5297_v37 = vmul.f32 %v5224_v48, %v5224_v48 }
 0x3ca   : >> { %v5127_v39 = vpop.f32.mrf.mxu2 }
 0x3cb   : >> { %v5312_v43 = vadd.f32 %v5311_v8, %v5297_v37  ;;  %v5128_v46 = vadd.f32 %v5127_v39, %v5079_v54 }
 0x3cc   : >> { %v5176_v19 = vpop.f32.mrf.mxu3  ;;  %v5081_v44 = vpop.f32.mrf.mxu1 }
 0x3cd   : >> { %v5177_v27 = vadd.f32 %v5176_v19, %v5128_v46  ;;  %v5082_v30 = vadd.f32 %v5081_v44, %v9021_v0 }
 0x3ce   : >> { %v5228_v21 = vpop.f32.mrf.mxu0 }
 0x3cf   : >> { %v5226_v14 = vadd.f32 %v5225_v51, %v5177_v27 }
 0x3d1   : >> { %5260 = vst [vmem:[%s9129_s7 + $0x28] sm:$0xff] %v5226_v14  ;;  %v5275_v26 = vadd.f32 %v5274_v29, %v5226_v14  ;;  %v5298_v25 = vmul.f32 %v5226_v14, %v5226_v14 }
 0x3d2   : >> { %v5130_v47 = vpop.f32.mrf.mxu2 }
 0x3d3   : >> { %v5313_v3 = vadd.f32 %v5312_v43, %v5298_v25  ;;  %v5131_v2 = vadd.f32 %v5130_v47, %v5082_v30 }
 0x3d4   : >> { %v5179_v28 = vpop.f32.mrf.mxu3  ;;  %v5083_v5 = vpop.f32.mrf.mxu1 }
 0x3d5   : >> { %v5180_v57 = vadd.f32 %v5179_v28, %v5131_v2  ;;  %v5084_v36 = vadd.f32 %v5083_v5, %v9036_v45 }
 0x3d6   : >> { %v5230_v42 = vpop.f32.mrf.mxu0 }
 0x3d7   : >> { %v5229_v17 = vadd.f32 %v5228_v21, %v5180_v57 }
 0x3d9   : >> { %5261 = vst [vmem:[%s9129_s7 + $0x30] sm:$0xff] %v5229_v17  ;;  %v5276_v6 = vadd.f32 %v5275_v26, %v5229_v17  ;;  %v5299_v62 = vmul.f32 %v5229_v17, %v5229_v17 }
 0x3da   : >> { %v5132_v33 = vpop.f32.mrf.mxu2 }
 0x3db   : >> { %v5314_v11 = vadd.f32 %v5313_v3, %v5299_v62  ;;  %v5133_v35 = vadd.f32 %v5132_v33, %v5084_v36 }
 0x3dc   : >> { %v5181_v50 = vpop.f32.mrf.mxu3  ;;  %v5086_v12 = vpop.f32.mrf.mxu1 }
 0x3dd   : >> { %v5182_v0 = vadd.f32 %v5181_v50, %v5133_v35  ;;  %v5087_v4 = vadd.f32 %v5086_v12, %v9058_v1 }
 0x3de   : >> { %v5233_v22 = vpop.f32.mrf.mxu0 }
 0x3df   : >> { %v5231_v9 = vadd.f32 %v5230_v42, %v5182_v0 }
 0x3e1   : >> { %5262 = vst [vmem:[%s9129_s7 + $0x38] sm:$0xff] %v5231_v9  ;;  %v5277_v55 = vadd.f32 %v5276_v6, %v5231_v9  ;;  %v5300_v23 = vmul.f32 %v5231_v9, %v5231_v9 }
 0x3e2   : >> { %v5135_v59 = vpop.f32.mrf.mxu2 }
 0x3e3   : >> { %v5315_v63 = vadd.f32 %v5314_v11, %v5300_v23  ;;  %v5136_v49 = vadd.f32 %v5135_v59, %v5087_v4 }
 0x3e4   : >> { %v5184_v10 = vpop.f32.mrf.mxu3  ;;  %v5088_v56 = vpop.f32.mrf.mxu1 }
 0x3e5   : >> { %v5185_v45 = vadd.f32 %v5184_v10, %v5136_v49  ;;  %v5089_v58 = vadd.f32 %v5088_v56, %v9068_v18 }
 0x3e6   : >> { %v5235_v40 = vpop.f32.mrf.mxu0 }
 0x3e7   : >> { %v5234_v31 = vadd.f32 %v5233_v22, %v5185_v45 }
 0x3e9   : >> { %5263 = vst [vmem:[%s9129_s7 + $0x40] sm:$0xff] %v5234_v31  ;;  %v5278_v7 = vadd.f32 %v5277_v55, %v5234_v31  ;;  %v5301_v8 = vmul.f32 %v5234_v31, %v5234_v31 }
 0x3ea   : >> { %v5137_v52 = vpop.f32.mrf.mxu2 }
 0x3eb   : >> { %v5316_v13 = vadd.f32 %v5315_v63, %v5301_v8  ;;  %v5138_v41 = vadd.f32 %v5137_v52, %v5089_v58 }
 0x3ec   : >> { %v5186_v51 = vpop.f32.mrf.mxu3  ;;  %v5091_v48 = vpop.f32.mrf.mxu1 }
 0x3ed   : >> { %v5187_v1 = vadd.f32 %v5186_v51, %v5138_v41  ;;  %v5092_v43 = vadd.f32 %v5091_v48, %v9090_v61 }
 0x3ee   : >> { %v5238_v29 = vpop.f32.mrf.mxu0 }
 0x3ef   : >> { %v5236_v37 = vadd.f32 %v5235_v40, %v5187_v1 }
 0x3f1   : >> { %5264 = vst [vmem:[%s9129_s7 + $0x48] sm:$0xff] %v5236_v37  ;;  %v5279_v54 = vadd.f32 %v5278_v7, %v5236_v37  ;;  %v5302_v39 = vmul.f32 %v5236_v37, %v5236_v37 }
 0x3f2   : >> { %v5140_v46 = vpop.f32.mrf.mxu2 }
 0x3f3   : >> { %v5317_v19 = vadd.f32 %v5316_v13, %v5302_v39  ;;  %v5141_v44 = vadd.f32 %v5140_v46, %v5092_v43 }
 0x3f4   : >> { %v5189_v27 = vpop.f32.mrf.mxu3  ;;  %v5093_v21 = vpop.f32.mrf.mxu1 }
 0x3f5   : >> { %v5190_v18 = vadd.f32 %v5189_v27, %v5141_v44  ;;  %v5094_v47 = vadd.f32 %v5093_v21, %v9099_v60 }
 0x3f6   : >> { %v5240_v14 = vpop.f32.mrf.mxu0 }
 0x3f7   : >> { %v5239_v26 = vadd.f32 %v5238_v29, %v5190_v18 }
 0x3f9   : >> { %5265 = vst [vmem:[%s9129_s7 + $0x50] sm:$0xff] %v5239_v26  ;;  %v5280_v25 = vadd.f32 %v5279_v54, %v5239_v26  ;;  %v5303_v30 = vmul.f32 %v5239_v26, %v5239_v26 }
 0x3fa   : >> { %v5142_v3 = vpop.f32.mrf.mxu2 }
 0x3fb   : >> { %v5318_v2 = vadd.f32 %v5317_v19, %v5303_v30  ;;  %v5143_v28 = vadd.f32 %v5142_v3, %v5094_v47 }
 0x3fc   : >> { %v5191_v5 = vpop.f32.mrf.mxu3  ;;  %v5096_v61 = vpop.f32.mrf.mxu1 }
 0x3fd   : >> { %v5192_v57 = vadd.f32 %v5191_v5, %v5143_v28  ;;  %v5097_v36 = vadd.f32 %v5096_v61, %v9115_v53 }
 0x3fe   : >> { %v5243_v17 = vpop.f32.mrf.mxu0 }
 0x3ff   : >> { %v5241_v42 = vadd.f32 %v5240_v14, %v5192_v57 }
 0x401   : >> { %5266 = vst [vmem:[%s9129_s7 + $0x58] sm:$0xff] %v5241_v42  ;;  %v5281_v6 = vadd.f32 %v5280_v25, %v5241_v42  ;;  %v5304_v62 = vmul.f32 %v5241_v42, %v5241_v42 }
 0x402   : >> { %v5145_v33 = vpop.f32.mrf.mxu2 }
 0x403   : >> { %v5319_v11 = vadd.f32 %v5318_v2, %v5304_v62  ;;  %v5146_v35 = vadd.f32 %v5145_v33, %v5097_v36 }
 0x404   : >> { %v5194_v50 = vpop.f32.mrf.mxu3  ;;  %v5098_v60 = vpop.f32.mrf.mxu1 }
 0x405   : >> { %v5195_v12 = vadd.f32 %v5194_v50, %v5146_v35  ;;  %v5099_v55 = vadd.f32 %v5098_v60, %v9119_v32 }
 0x406   : >> { %v5245_v23 = vpop.f32.mrf.mxu0 }
 0x407   : >> { %v5244_v0 = vadd.f32 %v5243_v17, %v5195_v12 }
 0x409   : >> { %5267 = vst [vmem:[%s9129_s7 + $0x60] sm:$0xff] %v5244_v0  ;;  %v5282_v22 = vadd.f32 %v5281_v6, %v5244_v0  ;;  %v5305_v9 = vmul.f32 %v5244_v0, %v5244_v0 }
 0x40a   : >> { %v5147_v4 = vpop.f32.mrf.mxu2 }
 0x40b   : >> { %v5320_v59 = vadd.f32 %v5319_v11, %v5305_v9  ;;  %v5148_v63 = vadd.f32 %v5147_v4, %v5099_v55 }
 0x40c   : >> { %v5196_v49 = vpop.f32.mrf.mxu3  ;;  %v5101_v53 = vpop.f32.mrf.mxu1 }
 0x40d   : >> { %v5197_v10 = vadd.f32 %v5196_v49, %v5148_v63  ;;  %v5102_v31 = vadd.f32 %v5101_v53, %v9122_v15 }
 0x40e   : >> { %v5248_v32 = vpop.f32.mrf.mxu0 }
 0x40f   : >> { %v5246_v56 = vadd.f32 %v5245_v23, %v5197_v10 }
 0x411   : >> { %5268 = vst [vmem:[%s9129_s7 + $0x68] sm:$0xff] %v5246_v56  ;;  %v5283_v45 = vadd.f32 %v5282_v22, %v5246_v56  ;;  %v5306_v40 = vmul.f32 %v5246_v56, %v5246_v56 }
 0x412   : >> { %v5150_v7 = vpop.f32.mrf.mxu2 }
 0x413   : >> { %v5321_v8 = vadd.f32 %v5320_v59, %v5306_v40  ;;  %v5151_v58 = vadd.f32 %v5150_v7, %v5102_v31 }
 0x414   : >> { %v5199_v52 = vpop.f32.mrf.mxu3  ;;  %v5103_v41 = vpop.f32.mrf.mxu1 }
 0x415   : >> { %v5200_v13 = vadd.f32 %v5199_v52, %v5151_v58  ;;  %v5104_v29 = vadd.f32 %v5103_v41, %v9125_v38 }
 0x416   : >> { %v5250_v15 = vpop.f32.mrf.mxu0 }
 0x417   : >> { %v5249_v51 = vadd.f32 %v5248_v32, %v5200_v13 }
 0x419   : >> { %5269 = vst [vmem:[%s9129_s7 + $0x70] sm:$0xff] %v5249_v51  ;;  %v5284_v48 = vadd.f32 %v5283_v45, %v5249_v51  ;;  %v5307_v1 = vmul.f32 %v5249_v51, %v5249_v51 }
 0x41a   : >> { %v5152_v37 = vpop.f32.mrf.mxu2 }
 0x41b   : >> { %v5322_v54 = vadd.f32 %v5321_v8, %v5307_v1  ;;  %v5153_v39 = vadd.f32 %v5152_v37, %v5104_v29 }
 0x41c   : >> { %v5201_v43 = vpop.f32.mrf.mxu3 }
 0x41d   : >> { %v5202_v46 = vadd.f32 %v5201_v43, %v5153_v39 }
 0x41f   : >> { %v5251_v19 = vadd.f32 %v5250_v15, %v5202_v46 }
 0x421   : >> { %5270 = vst [vmem:[%s9129_s7 + $0x78] sm:$0xff] %v5251_v19  ;;  %v5285_v44 = vadd.f32 %v5284_v48, %v5251_v19  ;;  %v5308_v27 = vmul.f32 %v5251_v19, %v5251_v19 }
 0x423   : >> { %v5286_v21 = vrot.slane %v5285_v44, 4  ;;  %v5323_v18 = vadd.f32 %v5322_v54, %v5308_v27 }
 0x425   : >> { %v5287_v14 = vadd.f32 %v5286_v21, %v5285_v44  ;;  %v5324_v26 = vrot.slane %v5323_v18, 4 }
 0x427   : >> { %v5288_v25 = vrot.slane %v5287_v14, 2  ;;  %v5325_v30 = vadd.f32 %v5324_v26, %v5323_v18 }
 0x429   : >> { %v5289_v47 = vadd.f32 %v5288_v25, %v5287_v14  ;;  %v5326_v3 = vrot.slane %v5325_v30, 2 }
 0x42b   : >> { %v5290_v2 = vrot.slane %v5289_v47, 1  ;;  %v5327_v38 = vadd.f32 %v5326_v3, %v5325_v30 }
 0x42d   : >> { %v5291_v28 = vadd.f32 %v5290_v2, %v5289_v47  ;;  %v5328_v5 = vrot.slane %v5327_v38, 1 }
 0x42f   : >> { %v5292_v61 = vadd.f32 %v7429_v20, %v5291_v28   ;;  %v5329_v57 = vadd.f32 %v5328_v5, %v5327_v38  ;;  %2990 = sbr.rel (!%p2988_p2) target bundleno = 607 (0x25f), region = 138 }
 0x431   : >> { %v5330_v42 = vadd.f32 %v7425_v34, %v5329_v57   ;;  %v9370_v20 = vmov %v5292_v61  ;;  %v9171_v17 = vmul.f32 (%p2988_p2), 0.00390625, %v5292_v61 }
 0x433   : >> { %v9369_v34 = vmov %v5330_v42  ;;  %v5332_v6 = vmul.f32 (%p2988_p2), 0.00390625, %v5330_v42  ;;  %v5333_v62 = vmul.f32 (%p2988_p2), %v9171_v17, %v9171_v17 }
 0x435   : > { %v5334_v20 = vsub.f32 %v5332_v6, %v5333_v62 }
 0x437   : > { %v5335_v36 = vmax.f32 %v5334_v20, 0.0 }
 0x439   : > { %v5336_v33 = vadd.f32 1e-05, %v5335_v36 }
 0x43b   : > { %7275 = vrsqrt.f32 %v5336_v33  ;;  %vm5343_vm12 = vweird.f32 %v5336_v33 }
 0x441   : > { %v7276_v11 = vpop.eup %7275 }
 0x442   : > { %v5338_v35 = vmul.f32 %v7276_v11, %v5336_v33  ;;  %vm5344_vm13 = vweird.f32 %v7276_v11 }
 0x443   : > { %vm5345_vm14 = vmor %vm5343_vm12, %vm5344_vm13 }
 0x444   : > { %v5339_v50 = vmul.f32 %v7276_v11, %v5338_v35 }
 0x446   : > { %v5340_v60 = vmul.f32 0.5, %v5339_v50 }
 0x448   : > { %v5341_v12 = vsub.f32 1.5, %v5340_v60 }
 0x44a   : > { %v5342_v0 = vmul.f32 %v7276_v11, %v5341_v12 }
 0x44c   : > { %v9175_v22 = vsel %vm5345_vm14, %v7276_v11, %v5342_v0 }
 0x44d LB: >> { %s6848_s9 = sshll.u32 %s7437_s8, 7  ;;  %s6851_s26 = smul.u32 96, %s7437_s8  ;;  %s7437_s8 = sphi %s9177_s8, %s5352_s8  }
 0x44e   : >> { %s9186_s19 = scalar_lea.vmem [#allocation3], %s6848_s9  ;;  %s9222_s20 = scalar_lea.vmem %s180_s11, %s6848_s9 [#allocation7] }
 0x44f   : >> { %v5355_v24 = vld [vmem:[%s9186_s19] sm:$0xff]  ;;  %s9190_s17 = scalar_lea.vmem %s7532_s10, %s6851_s26  ;;  %v5356_v34 = vld [vmem:[%s9186_s19 + $0x8] sm:$0xff]  ;;  %v5357_v9 = vld [vmem:[%s9186_s19 + $0x10] sm:$0xff]  ;;  %s5352_s8 = sadd.s32 1, %s7437_s8  }
 0x450   : >> { %v5371_v55 = vsub.f32 %v5355_v24, %v9171_v17  ;;  %v6852_v23 = vld [vmem:[%s9190_s17 + $0xc] sm:$0xf]  ;;  %v6853_v4 = vld [vmem:[%s9190_s17 + $0x10] sm:$0xf]  ;;  %v5372_v59 = vsub.f32 %v5356_v34, %v9171_v17  ;;  %v6854_v63 = vld [vmem:[%s9190_s17 + $0x14] sm:$0x1]  ;;  %v5373_v8 = vsub.f32 %v5357_v9, %v9171_v17 }
 0x451   : >> { %v5436_v49 = vshrl.u32 %v6852_v23, 16  ;;  %v5439_v53 = vshll.u32 %v6852_v23, 16  ;;  %v5445_v10 = vshll.u32 %v6853_v4, 16  ;;  %v5449_v56 = vshrl.u32 %v6853_v4, 16  ;;  %v6855_v45 = vld [vmem:[%s9190_s17 + $0x18] sm:$0xf] }
 0x452   : >> { %v5387_v40 = vmul.f32 %v5371_v55, %v9175_v22  ;;  %v5388_v31 = vmul.f32 %v5372_v59, %v9175_v22  ;;  %v5455_v7 = vshll.u32 %v6854_v63, 16  ;;  %v6856_v58 = vld [vmem:[%s9190_s17 + $0x1c] sm:$0xf]  ;;  %v6857_v48 = vld [vmem:[%s9190_s17 + $0x20] sm:$0x1]  ;;  %v5460_v29 = vshrl.u32 %v6855_v45, 16 }
 0x453   : >> { %v5358_v52 = vld [vmem:[%s9186_s19 + $0x18] sm:$0xff]  ;;  %v5438_v32 = vrot.slane %v5436_v49, 4  ;;  %v5441_v13 = vrot.slane %v5439_v53, 5  ;;  %v5447_v41 = vrot.slane %v5445_v10, 5  ;;  %v5451_v51 = vrot.slane %v5449_v56, 4  ;;  %v5359_v47 = vld [vmem:[%s9186_s19 + $0x20] sm:$0xff] }
 0x454   : >> { %v5457_v1 = vrot.slane %v5455_v7, 5  ;;  %v5463_v37 = vshll.u32 %v6855_v45, 16  ;;  %v5469_v54 = vshll.u32 %v6856_v58, 16  ;;  %v5473_v46 = vshrl.u32 %v6856_v58, 16  ;;  %v6858_v19 = vld [vmem:[%s9190_s17 + $0x24] sm:$0xf] }
 0x455   : >> { %v5442_v39 = vor.u32 %v5441_v13, %v5438_v32  ;;  %v5452_v43 = vor.u32 %v5451_v51, %v5447_v41  ;;  %v5374_v15 = vsub.f32 %v5358_v52, %v9171_v17  ;;  %v5462_v44 = vrot.slane %v5460_v29, 4  ;;  %v6859_v28 = vld [vmem:[%s9190_s17 + $0x28] sm:$0xf]  ;;  %v6860_v0 = vld [vmem:[%s9190_s17 + $0x2c] sm:$0x1]  ;;  %v5361_v23 = vld [vmem:[%s9186_s19 + $0x30] sm:$0xff] }
 0x456   : >> { %v5465_v27 = vrot.slane %v5463_v37, 5  ;;  %v5471_v21 = vrot.slane %v5469_v54, 5  ;;  %v5479_v18 = vshll.u32 %v6857_v48, 16  ;;  %v5389_v25 = vmul.f32 %v5373_v8, %v9175_v22  ;;  %v5360_v11 = vld [vmem:[%s9186_s19 + $0x28] sm:$0xff]  ;;  %v6861_v4 = vld [vmem:[%s9190_s17 + $0x30] sm:$0xf] }
 0x457   : >> { %v5443_v14 = vrot.slane %v5442_v39, 4  ;;  %v5453_v26 = vrot.slane %v5452_v43, 4  ;;  %v5475_v30 = vrot.slane %v5473_v46, 4  ;;  %v5390_v2 = vmul.f32 %v5374_v15, %v9175_v22  ;;  %v6862_v58 = vld [vmem:[%s9190_s17 + $0x34] sm:$0xf]  ;;  %v5362_v48 = vld [vmem:[%s9186_s19 + $0x38] sm:$0xff] }
 0x458   : >> { %v5466_v3 = vor.u32 %v5465_v27, %v5462_v44  ;;  %v5481_v38 = vrot.slane %v5479_v18, 5  ;;  %v5484_v5 = vshrl.u32 %v6858_v19, 16  ;;  %v5487_v6 = vshll.u32 %v6858_v19, 16  ;;  %v5363_v44 = vld [vmem:[%s9186_s19 + $0x40] sm:$0xff]  ;;  %p5349_p3 = scmp.ge.s32.totalorder %s5352_s8, 2  }
 0x459   : >> { %v5448_v61 = vsel %vm7680_vm4, %v5443_v14, %v5447_v41  ;;  %v5458_v57 = vsel %vm7680_vm4, %v5453_v26, %v5457_v1  ;;  %v5476_v42 = vor.u32 %v5475_v30, %v5471_v21  ;;  %v5375_v33 = vsub.f32 %v5359_v47, %v9171_v17  ;;  %v6863_v1 = vld [vmem:[%s9190_s17 + $0x38] sm:$0x1]  ;;  %v6864_v26 = vld [vmem:[%s9190_s17 + $0x3c] sm:$0xf]  ;;  %s7077_s24 = sshll.u32 (%p5349_p3), %s7485_s16, 8  ;;  %s5706_s29 = sshll.u32 (%p5349_p3), %s180_s11, 4  ;;  %s5707_s29 = int_to_ptr.vmem [resolvable:$true] %s5706_s29 }
 0x45a   : >> { %v5643_v62 = vunpack.c.l.bf16 %v5448_v61  ;;  %v5644_v20 = vunpack.c.l.bf16 %v5458_v57  ;;  %v5467_v36 = vrot.slane %v5466_v3, 4  ;;  %v5486_v50 = vrot.slane %v5484_v5, 4  ;;  %v5364_v57 = vld [vmem:[%s9186_s19 + $0x48] sm:$0xff]  ;;  %s5705_s28 = scalar_lea.hbm (%p5349_p3), %s9358_s3, %s7077_s24  ;;  %s5694_s6 = scalar_lea.sflag (%p5349_p3), [#allocation6], %s178_s4 }
 0x45b   : >> { %v5477_v35 = vrot.slane %v5476_v42, 4  ;;  %v5489_v60 = vrot.slane %v5487_v6, 5  ;;  %v5493_v12 = vshll.u32 %v6859_v28, 16  ;;  %v5497_v55 = vshrl.u32 %v6859_v28, 16  ;;  %s5708_s30 = sshll.u32 (%p5349_p3), %s5705_s28, 4  ;;  %s7327_s9 = scalar_lea.hbm (%p5349_p3), %s9358_s3, 512  ;;  %s5709_s30 = int_to_ptr.hbm [resolvable:$true] %s5708_s30 }
 0x45c   : >> { %v5659_v24 = vadd.f32 %v5643_v62, %v5387_v40  ;;  %v5660_v34 = vadd.f32 %v5644_v20, %v5388_v31  ;;  %v5472_v9 = vsel %vm7680_vm4, %v5467_v36, %v5471_v21  ;;  %v5376_v56 = vsub.f32 %v5360_v11, %v9171_v17  ;;  %v6866_v36 = vld [vmem:[%s9190_s17 + $0x44] sm:$0x1]  ;;  %s7321_s7 = sshra.s32 (%p5349_p3), %s5709_s30, 4  ;;  %s7322_s7 = int_to_ptr.hbm [resolvable:$true] %s7321_s7 }
 0x45d   : >> { %v5645_v59 = vunpack.c.l.bf16 %v5472_v9  ;;  %v5482_v63 = vsel %vm7680_vm4, %v5477_v35, %v5481_v38  ;;  %v5490_v49 = vor.u32 %v5489_v60, %v5486_v50  ;;  %v5495_v53 = vrot.slane %v5493_v12, 5  ;;  %s7323_s8 = scalar_lea.hbm (%p5349_p3), %s7322_s7, 256  ;;  %p7328_p9 = scmp.lt.s32.totalorder (%p5349_p3), %s7322_s7, %s9358_s3 }
 0x45e   : >> { %5677 = vst [vmem:[%s9222_s20] sm:$0xff] %v5659_v24  ;;  %v5646_v10 = vunpack.c.l.bf16 %v5482_v63  ;;  %v5499_v45 = vrot.slane %v5497_v55, 4  ;;  %v5503_v40 = vshll.u32 %v6860_v0, 16  ;;  %v5377_v8 = vsub.f32 %v5361_v23, %v9171_v17  ;;  %p7324_p4 = scmp.ne.s32.totalorder (%p5349_p3), %s7322_s7, %s7323_s8  ;;  %p7329_p10 = scmp.lt.s32.totalorder (%p5349_p3), %s7327_s9, %s7323_s8 }
 0x45f   : >> { %5678 = vst [vmem:[%s9222_s20 + $0x8] sm:$0xff] %v5660_v34  ;;  %v5661_v31 = vadd.f32 %v5645_v59, %v5389_v25  ;;  %v5491_v7 = vrot.slane %v5490_v49, 4  ;;  %v5508_v52 = vshrl.u32 %v6861_v4, 16  ;;  %v5391_v13 = vmul.f32 %v5375_v33, %v9175_v22 }
 0x460   : >> { %v5662_v32 = vadd.f32 %v5646_v10, %v5390_v2  ;;  %v5500_v41 = vor.u32 %v5499_v45, %v5495_v53  ;;  %v5505_v51 = vrot.slane %v5503_v40, 5  ;;  %v5392_v37 = vmul.f32 %v5376_v56, %v9175_v22  ;;  %v6865_v2 = vld [vmem:[%s9190_s17 + $0x40] sm:$0xf]  ;;  %v5365_v10 = vld [vmem:[%s9186_s19 + $0x50] sm:$0xff]  ;;  %v6868_v56 = vld [vmem:[%s9190_s17 + $0x4c] sm:$0xf]  ;;  %p7325_p7 = pnand (%p5349_p3), %p7324_p4, %p7502_p5  ;;  %p7330_p11 = por (%p5349_p3), %p7329_p10, %p7328_p9 }
 0x461   : >> { %5679 = vst [vmem:[%s9222_s20 + $0x10] sm:$0xff] %v5661_v31  ;;  %v5496_v29 = vsel %vm7680_vm4, %v5491_v7, %v5495_v53  ;;  %v5510_v54 = vrot.slane %v5508_v52, 4  ;;  %v5511_v39 = vshll.u32 %v6861_v4, 16  ;;  %v5517_v15 = vshll.u32 %v6862_v58, 16  ;;  %v6867_v4 = vld [vmem:[%s9190_s17 + $0x48] sm:$0xf] }
 0x462   : >> { %5680 = vst [vmem:[%s9222_s20 + $0x18] sm:$0xff] %v5662_v32  ;;  %v5647_v43 = vunpack.c.l.bf16 %v5496_v29  ;;  %v5501_v46 = vrot.slane %v5500_v41, 4  ;;  %v5521_v19 = vshrl.u32 %v6862_v58, 16  ;;  %v5393_v27 = vmul.f32 %v5377_v8, %v9175_v22  ;;  %v6869_v29 = vld [vmem:[%s9190_s17 + $0x50] sm:$0x1]  ;;  %p7326_p8 = pneg (%p5349_p3), %p7325_p7 }
 0x463   : >> { %v5513_v21 = vrot.slane %v5511_v39, 5  ;;  %v5378_v18 = vsub.f32 %v5362_v48, %v9171_v17  ;;  %v5527_v14 = vshll.u32 %v6863_v1, 16  ;;  %v5519_v47 = vrot.slane %v5517_v15, 5  ;;  %v6870_v15 = vld [vmem:[%s9190_s17 + $0x54] sm:$0xf] }
 0x464   : >> { %v5663_v25 = vadd.f32 %v5647_v43, %v5391_v13  ;;  %v5506_v30 = vsel %vm7680_vm4, %v5501_v46, %v5505_v51  ;;  %v5523_v3 = vrot.slane %v5521_v19, 4  ;;  %v5379_v61 = vsub.f32 %v5363_v44, %v9171_v17  ;;  %v5366_v13 = vld [vmem:[%s9186_s19 + $0x58] sm:$0xff]  ;;  %p7331_p12 = pnand (%p5349_p3), %p7330_p11, %p7326_p8 }
 0x465   : >> { %v5648_v38 = vunpack.c.l.bf16 %v5506_v30  ;;  %v5514_v28 = vor.u32 %v5513_v21, %v5510_v54  ;;  %v5394_v5 = vmul.f32 %v5378_v18, %v9175_v22  ;;  %v5529_v6 = vrot.slane %v5527_v14, 5  ;;  %v6871_v30 = vld [vmem:[%s9190_s17 + $0x58] sm:$0xf] }
 0x466   : >> { %5681 = vst [vmem:[%s9222_s20 + $0x20] sm:$0xff] %v5663_v25  ;;  %v5524_v42 = vor.u32 %v5523_v3, %v5519_v47  ;;  %v5532_v62 = vshrl.u32 %v6864_v26, 16  ;;  %v5535_v20 = vshll.u32 %v6864_v26, 16  ;;  %v5541_v35 = vshll.u32 %v6865_v2, 16 }
 0x467   : >> { %v5664_v33 = vadd.f32 %v5648_v38, %v5392_v37  ;;  %v5515_v11 = vrot.slane %v5514_v28, 4  ;;  %v5545_v50 = vshrl.u32 %v6865_v2, 16  ;;  %v5380_v24 = vsub.f32 %v5364_v57, %v9171_v17  ;;  %v5367_v37 = vld [vmem:[%s9186_s19 + $0x60] sm:$0xff]  ;;  %v5368_v28 = vld [vmem:[%s9186_s19 + $0x68] sm:$0xff] }
 0x468   : >> { %v5525_v60 = vrot.slane %v5524_v42, 4  ;;  %v5534_v12 = vrot.slane %v5532_v62, 4  ;;  %v5537_v0 = vrot.slane %v5535_v20, 5  ;;  %v5543_v9 = vrot.slane %v5541_v35, 5 }
 0x469   : >> { %5682 = vst [vmem:[%s9222_s20 + $0x28] sm:$0xff] %v5664_v33  ;;  %v5520_v34 = vsel %vm7680_vm4, %v5515_v11, %v5519_v47  ;;  %v5547_v55 = vrot.slane %v5545_v50, 4  ;;  %v5551_v23 = vshll.u32 %v6866_v36, 16  ;;  %v5395_v49 = vmul.f32 %v5379_v61, %v9175_v22 }
 0x46a   : >> { %v5649_v59 = vunpack.c.l.bf16 %v5520_v34  ;;  %v5530_v63 = vsel %vm7680_vm4, %v5525_v60, %v5529_v6  ;;  %v5538_v53 = vor.u32 %v5537_v0, %v5534_v12  ;;  %v5396_v40 = vmul.f32 %v5380_v24, %v9175_v22  ;;  %v6872_v6 = vld [vmem:[%s9190_s17 + $0x5c] sm:$0x1] }
 0x46b   : >> { %v5650_v45 = vunpack.c.l.bf16 %v5530_v63  ;;  %v5548_v31 = vor.u32 %v5547_v55, %v5543_v9  ;;  %v5553_v7 = vrot.slane %v5551_v23, 5  ;;  %v5556_v52 = vshrl.u32 %v6867_v4, 16 }
 0x46c   : >> { %v5665_v8 = vadd.f32 %v5649_v59, %v5393_v27  ;;  %v5539_v58 = vrot.slane %v5538_v53, 4  ;;  %v5559_v32 = vshll.u32 %v6867_v4, 16  ;;  %v5381_v48 = vsub.f32 %v5365_v10, %v9171_v17  ;;  %v6874_v59 = vld [vmem:[%s9190_s17 + $0x64] sm:$0xf] }
 0x46d   : >> { %v5666_v41 = vadd.f32 %v5650_v45, %v5394_v5  ;;  %v5549_v51 = vrot.slane %v5548_v31, 4  ;;  %v5565_v1 = vshll.u32 %v6868_v56, 16  ;;  %v5558_v39 = vrot.slane %v5556_v52, 4 }
 0x46e   : >> { %5683 = vst [vmem:[%s9222_s20 + $0x30] sm:$0xff] %v5665_v8  ;;  %v5544_v54 = vsel %vm7680_vm4, %v5539_v58, %v5543_v9  ;;  %v5561_v43 = vrot.slane %v5559_v32, 5  ;;  %v5569_v46 = vshrl.u32 %v6868_v56, 16  ;;  %v5382_v21 = vsub.f32 %v5366_v13, %v9171_v17  ;;  %v6873_v9 = vld [vmem:[%s9190_s17 + $0x60] sm:$0xf]  ;;  %v5369_v56 = vld [vmem:[%s9186_s19 + $0x70] sm:$0xff] }
 0x46f   : >> { %5684 = vst [vmem:[%s9222_s20 + $0x38] sm:$0xff] %v5666_v41  ;;  %v5651_v19 = vunpack.c.l.bf16 %v5544_v54  ;;  %v5554_v44 = vsel %vm7680_vm4, %v5549_v51, %v5553_v7  ;;  %v5567_v27 = vrot.slane %v5565_v1, 5  ;;  %v5575_v25 = vshll.u32 %v6869_v29, 16  ;;  %v6875_v8 = vld [vmem:[%s9190_s17 + $0x68] sm:$0x1]  ;;  %v5370_v41 = vld [vmem:[%s9186_s19 + $0x78] sm:$0xff] }
 0x470   : >> { %v5652_v18 = vunpack.c.l.bf16 %v5554_v44  ;;  %v5562_v14 = vor.u32 %v5561_v43, %v5558_v39  ;;  %v5571_v26 = vrot.slane %v5569_v46, 4  ;;  %v5397_v3 = vmul.f32 %v5381_v48, %v9175_v22 }
 0x471   : >> { %v5667_v47 = vadd.f32 %v5651_v19, %v5395_v49  ;;  %v5383_v2 = vsub.f32 %v5367_v37, %v9171_v17  ;;  %v5580_v38 = vshrl.u32 %v6870_v15, 16  ;;  %v5577_v42 = vrot.slane %v5575_v25, 5 }
 0x472   : >> { %v5668_v5 = vadd.f32 %v5652_v18, %v5396_v40  ;;  %v5563_v61 = vrot.slane %v5562_v14, 4  ;;  %v5572_v57 = vor.u32 %v5571_v26, %v5567_v27  ;;  %v5398_v62 = vmul.f32 %v5382_v21, %v9175_v22 }
 0x473   : >> { %5685 = vst [vmem:[%s9222_s20 + $0x40] sm:$0xff] %v5667_v47  ;;  %v5582_v20 = vrot.slane %v5580_v38, 4  ;;  %v5583_v36 = vshll.u32 %v6870_v15, 16  ;;  %v5589_v33 = vshll.u32 %v6871_v30, 16  ;;  %v5593_v50 = vshrl.u32 %v6871_v30, 16 }
 0x474   : >> { %5686 = vst [vmem:[%s9222_s20 + $0x48] sm:$0xff] %v5668_v5  ;;  %v5568_v11 = vsel %vm7680_vm4, %v5563_v61, %v5567_v27  ;;  %v5573_v35 = vrot.slane %v5572_v57, 4  ;;  %v5384_v60 = vsub.f32 %v5368_v28, %v9171_v17  ;;  %v5599_v34 = vshll.u32 %v6872_v6, 16 }
 0x475   : >> { %v5653_v12 = vunpack.c.l.bf16 %v5568_v11  ;;  %v5585_v0 = vrot.slane %v5583_v36, 5  ;;  %v5591_v24 = vrot.slane %v5589_v33, 5  ;;  %v5399_v23 = vmul.f32 %v5383_v2, %v9175_v22 }
 0x476   : >> { %v5578_v55 = vsel %vm7680_vm4, %v5573_v35, %v5577_v42  ;;  %v5595_v4 = vrot.slane %v5593_v50, 4  ;;  %v5400_v10 = vmul.f32 %v5384_v60, %v9175_v22  ;;  %v5601_v40 = vrot.slane %v5599_v34, 5 }
 0x477   : >> { %v5669_v63 = vadd.f32 %v5653_v12, %v5397_v3  ;;  %v5654_v49 = vunpack.c.l.bf16 %v5578_v55  ;;  %v5586_v53 = vor.u32 %v5585_v0, %v5582_v20  ;;  %v5604_v31 = vshrl.u32 %v6873_v9, 16 }
 0x478   : >> { %v5596_v45 = vor.u32 %v5595_v4, %v5591_v24  ;;  %v5607_v7 = vshll.u32 %v6873_v9, 16  ;;  %v5613_v32 = vshll.u32 %v6874_v59, 16  ;;  %v5617_v13 = vshrl.u32 %v6874_v59, 16 }
 0x479   : >> { %5687 = vst [vmem:[%s9222_s20 + $0x50] sm:$0xff] %v5669_v63  ;;  %v5670_v58 = vadd.f32 %v5654_v49, %v5398_v62  ;;  %v5587_v52 = vrot.slane %v5586_v53, 4  ;;  %v5385_v48 = vsub.f32 %v5369_v56, %v9171_v17  ;;  %v5606_v1 = vrot.slane %v5604_v31, 4 }
 0x47a   : >> { %v5597_v51 = vrot.slane %v5596_v45, 4  ;;  %v5609_v29 = vrot.slane %v5607_v7, 5  ;;  %v5615_v54 = vrot.slane %v5613_v32, 5  ;;  %v5619_v39 = vrot.slane %v5617_v13, 4 }
 0x47b   : >> { %5688 = vst [vmem:[%s9222_s20 + $0x58] sm:$0xff] %v5670_v58  ;;  %v5592_v37 = vsel %vm7680_vm4, %v5587_v52, %v5591_v24  ;;  %v5623_v43 = vshll.u32 %v6875_v8, 16  ;;  %v5386_v44 = vsub.f32 %v5370_v41, %v9171_v17  ;;  %v5401_v30 = vmul.f32 %v5385_v48, %v9175_v22 }
 0x47c   : >> { %v5655_v46 = vunpack.c.l.bf16 %v5592_v37  ;;  %v5602_v15 = vsel %vm7680_vm4, %v5597_v51, %v5601_v40  ;;  %v5610_v19 = vor.u32 %v5609_v29, %v5606_v1  ;;  %v5620_v21 = vor.u32 %v5619_v39, %v5615_v54 }
 0x47d   : >> { %v5656_v27 = vunpack.c.l.bf16 %v5602_v15  ;;  %v5625_v18 = vrot.slane %v5623_v43, 5  ;;  %v5402_v2 = vmul.f32 %v5386_v44, %v9175_v22 }
 0x47e   : >> { %v5671_v14 = vadd.f32 %v5655_v46, %v5399_v23  ;;  %v5611_v26 = vrot.slane %v5610_v19, 4  ;;  %v5621_v47 = vrot.slane %v5620_v21, 4 }
 0x47f   : >> { %v5672_v25 = vadd.f32 %v5656_v27, %v5400_v10 }
 0x480   : >> { %5689 = vst [vmem:[%s9222_s20 + $0x60] sm:$0xff] %v5671_v14  ;;  %v5616_v3 = vsel %vm7680_vm4, %v5611_v26, %v5615_v54  ;;  %v5626_v28 = vsel %vm7680_vm4, %v5621_v47, %v5625_v18 }
 0x481   : >> { %5690 = vst [vmem:[%s9222_s20 + $0x68] sm:$0xff] %v5672_v25  ;;  %v5657_v38 = vunpack.c.l.bf16 %v5616_v3  ;;  %v5658_v5 = vunpack.c.l.bf16 %v5626_v28 }
 0x482   : > { %5351 = sbr.rel (!%p5349_p3) target bundleno = 1101 (0x44d), region = 149 }
 0x483   : >> { %v5673_v61 = vadd.f32 %v5657_v38, %v5401_v30  ;;  %v5674_v57 = vadd.f32 %v5658_v5, %v5402_v2 }
 0x485   : >> { %5691 = vst [vmem:[%s9222_s20 + $0x70] sm:$0xff] %v5673_v61 }
 0x486   : >> { %5692 = vst [vmem:[%s9222_s20 + $0x78] sm:$0xff] %v5674_v57 }
 0x487   : > { %7334 = shalt.err (!%p7331_p12)
}
 0x488   : > { %s7442_s4 = smov 128   ;;  %s7443_s5 = smov 8  }
 0x489   : > { %7131 = dma.vmem_to_hbm [thread:$0]  (%p7502_p5), %s5707_s29, 4096, %s5709_s30, %s5694_s6, %s7442_s4, %s7442_s4, %s7443_s5  }
 0x48a PF: > { %p7143_p13 = scmp.ge.s32.totalorder %s7405_s15, 2  ;;  %s5723_s11 = sand.u32 1, %s7393_s12  }
 0x48b   : > { %s5724_s17 = scalar_lea.sflag [#allocation6], %s5723_s11 }
 0x48c   : > { %p7138_p0 = pnand %p7143_p13, %p7506_p6 }
 0x48e   : > { %p7139_p1 = pneg %p7138_p0 }
 0x490   : > { %7388 = dma.done.wait (%p7139_p1), %s5724_s17, 4096  }
 0x491   : > { %7390 = vsyncadd (%p7139_p1), %s5724_s17, 4294963200  ;;  %p14_p2 = scmp.ge.s32.totalorder %s7489_s18, 4   ;;  %s9371_s12 = smov %s7397_s13 }
 0x492   : > { %s9372_s13 = smov %s7401_s14  ;;  %s9373_s14 = smov %s7500_s21 }
 0x493   : > { %s9374_s15 = smov %s7489_s18  ;;  %16 = sbr.rel (!%p14_p2) target bundleno = 4 (0x4), region = 160 }
 0x498   :  { %5730 = vsyncpa [#allocation5], 1 }
 0x499   :  { %5732 = vsyncpa [#allocation5 + $0x1], 1 }
 0x49a   :  { %5733 = vsyncpa [#allocation6], 1 }
 0x49b   :  { %5735 = vsyncpa [#allocation6 + $0x1], 1 }

</bundles_post_ra>
